<compile_context>
chip_gen: v7x
topology: tpu7x:2x2x1
jax: 0.10.0
libtpu: 0.0.40
codegen_flags: <defaults>
</compile_context>

<pallas_src>
import jax
import jax.numpy as jnp
import numpy as np
from jax.experimental import pallas as pl
from jax.experimental.pallas import tpu as pltpu

_L = 16  # scratch column where the intermediate's interior starts (bf16-tile aligned)


def _shake_block_kernel(x_ref, w1_ref, w2_ref, b1_ref, b2_ref, o_ref, pad_ref):
    # x_ref  : (1, H+2, W+2, Cp)  bf16  spatially pre-padded input, one image
    # w1_ref : (9, Cp, 2*Cp)      bf16  conv1 taps, both branches along Cout, BN1 scale folded
    # w2_ref : (9, 2*Cp, Cp)      bf16  conv2 taps, both branches along Cin, 0.5*BN2 scale folded
    # b1_ref : (1, 2*Cp)          f32   BN1 bias, both branches
    # b2_ref : (1, Cp)            f32   0.5*(BN2 bias br1 + BN2 bias br2)
    # o_ref  : (1, H, W, Cp)      f32
    # pad_ref: (H+2, WS, 2*Cp)    bf16  scratch for the padded intermediate
    _, H, W, Cp = o_ref.shape
    C2 = 2 * Cp
    WS = pad_ref.shape[1]

    # ---- conv1 (both branches fused along Cout): 9 accumulating tap matmuls ----
    acc1 = None
    shortcut = None
    for dy in range(3):
        for dx in range(3):
            tap = x_ref[0, dy:dy + H, dx:dx + W, :].reshape(H * W, Cp)
            if dy == 1 and dx == 1:
                shortcut = tap                       # centre tap == x (identity shortcut)
            d = jnp.dot(tap, w1_ref[dy * 3 + dx],
                        preferred_element_type=jnp.float32)
            acc1 = d if acc1 is None else acc1 + d
    # BN1 (scale already folded into w1) bias + ReLU, both branches at once.
    h = jnp.maximum(acc1 + b1_ref[...], 0.0)

    # ---- padded intermediate in VMEM scratch (interior at column _L) -----------
    # Thin zero borders re-written every step (megacore-safe); all stores have
    # even sublane offsets/widths so bf16 packing never splits a pair.
    zrow = jnp.zeros((WS, C2), jnp.bfloat16)
    pad_ref[0] = zrow                                            # top border row
    pad_ref[H + 1] = zrow                                        # bottom border row
    zcol = jnp.zeros((H, 8, C2), jnp.bfloat16)
    pad_ref[1:H + 1, _L - 8:_L, :] = zcol                        # covers left zero col (_L-1)
    pad_ref[1:H + 1, _L + W:_L + W + 8, :] = zcol                # covers right zero col (_L+W)
    pad_ref[1:H + 1, _L:_L + W, :] = h.reshape(H, W, C2).astype(jnp.bfloat16)

    # ---- conv2 (both branches fused along K = 2*Cp): 9 accumulating tap matmuls
    # Epilogue folded into the accumulator init: shortcut + combined BN2 bias.
    acc2 = shortcut.astype(jnp.float32) + b2_ref[...]
    for dy in range(3):
        for dx in range(3):
            c0 = _L - 1 + dx
            tap = pad_ref[dy:dy + H, c0:c0 + W, :].reshape(H * W, C2)
            acc2 = acc2 + jnp.dot(tap, w2_ref[dy * 3 + dx],
                                  preferred_element_type=jnp.float32)
    o_ref[0] = jnp.maximum(acc2, 0.0).reshape(H, W, Cp)


def _round_up(x, m):
    return (x + m - 1) // m * m


def shake_shake_block(x_nchw, wA, wB, sA, bA, sB, bB):
    """Eval-mode ShakeShakeBlock. x_nchw: (N, C, H, W) f32 -> (N, P, H, W) f32."""
    N, Cin, H, W = x_nchw.shape
    P = wA.shape[-1]
    assert Cin == P, "identity shortcut requires in_planes == planes"
    assert W % 8 == 0, "W must be a multiple of 8 (sublane-aligned stores)"
    # TODO(synk): stride != 1 / channel-changing conv1x1+BN shortcut not implemented.

    Cp = _round_up(P, 128)            # lane-dense channel padding
    C2 = 2 * Cp
    WS = W + 24                       # scratch width: interior at cols _L.._L+W-1

    # NCHW -> NHWC, spatial pad 1 (3x3 'same'), channel pad to Cp, cast to bf16.
    # TODO(synk): the spatial pad could be moved in-kernel to shave one host pass.
    x = jnp.transpose(x_nchw, (0, 2, 3, 1)).astype(jnp.float32)
    x_pad = jnp.pad(x, ((0, 0), (1, 1), (1, 1), (0, Cp - Cin))).astype(jnp.bfloat16)

    # conv1 weights (BN1 scale folded), branches concatenated along Cout:
    # (9, Cp, 2*Cp), tap index t = 3*dy + dx, columns = [branch0 | branch1].
    wA_f = wA.astype(jnp.float32) * sA[:, None, None, :, :]
    wA_p = jnp.pad(wA_f, ((0, 0), (0, 0), (0, 0), (0, Cp - Cin), (0, Cp - P)))
    w1 = jnp.transpose(wA_p, (1, 2, 3, 0, 4)).reshape(9, Cp, C2).astype(jnp.bfloat16)

    # conv2 weights (0.5 * BN2 scale folded), branches concatenated along Cin:
    # (9, 2*Cp, Cp), rows = [branch0 | branch1], shared Cout.
    wB_f = wB.astype(jnp.float32) * (0.5 * sB)[:, None, None, :, :]
    wB_p = jnp.pad(wB_f, ((0, 0), (0, 0), (0, 0), (0, Cp - P), (0, Cp - P)))
    w2 = jnp.transpose(wB_p, (1, 2, 0, 3, 4)).reshape(9, C2, Cp).astype(jnp.bfloat16)

    # Biases stay f32; BN2 bias carries the eval-mode shake factor (0.5).
    b1 = jnp.transpose(jnp.pad(bA, ((0, 0), (0, 0), (0, Cp - P))),
                       (1, 0, 2)).reshape(1, C2)
    b2 = jnp.pad(0.5 * (bB[0] + bB[1]), ((0, 0), (0, Cp - P)))

    flops = N * (2 * (H * W) * (9 * Cp) * C2      # conv1, both branches fused
                 + 2 * (H * W) * (9 * C2) * Cp)   # conv2, both branches fused
    bytes_accessed = (2 * (x_pad.size + w1.size + w2.size)
                      + 4 * (b1.size + b2.size + N * H * W * Cp))

    full = lambda shape: pl.BlockSpec(shape, lambda n: (0,) * len(shape))

    out = pl.pallas_call(
        _shake_block_kernel,
        out_shape=jax.ShapeDtypeStruct((N, H, W, Cp), jnp.float32),
        grid_spec=pltpu.PrefetchScalarGridSpec(
            num_scalar_prefetch=0,
            grid=(N,),
            in_specs=[
                pl.BlockSpec((1, H + 2, W + 2, Cp), lambda n: (n, 0, 0, 0)),
                full((9, Cp, C2)),
                full((9, C2, Cp)),
                full((1, C2)),
                full((1, Cp)),
            ],
            out_specs=pl.BlockSpec((1, H, W, Cp), lambda n: (n, 0, 0, 0)),
            scratch_shapes=[pltpu.VMEM((H + 2, WS, C2), jnp.bfloat16)],
        ),
        compiler_params=pltpu.CompilerParams(
            dimension_semantics=("parallel",),
            vmem_limit_bytes=48 * 1024 * 1024,
        ),
        cost_estimate=pl.CostEstimate(
            flops=flops, transcendentals=0, bytes_accessed=bytes_accessed),
    )(x_pad, w1, w2, b1, b2)

    out = out[:, :, :, :P]                      # drop lane padding
    return jnp.transpose(out, (0, 3, 1, 2))     # back to NCHW


# ------------------------- pure-JAX reference --------------------------------
def _conv3x3_nhwc(x, w):
    return jax.lax.conv_general_dilated(
        x, w, window_strides=(1, 1), padding="SAME",
        dimension_numbers=("NHWC", "HWIO", "NHWC"),
        precision=jax.lax.Precision.HIGHEST)


def reference(x_nchw, wA, wB, sA, bA, sB, bB, *, mirror_bf16=True):
    """Eval-mode reference. With mirror_bf16=True it rounds x / folded weights /
    the intermediate activation to bf16 at the same points as the kernel
    (with f32 accumulation), so a tight tolerance applies."""
    f32 = jnp.float32

    def rnd(v):
        return v.astype(jnp.bfloat16).astype(f32) if mirror_bf16 else v.astype(f32)

    x = rnd(jnp.transpose(x_nchw, (0, 2, 3, 1)).astype(f32))
    wA_f = rnd(wA.astype(f32) * sA[:, None, None, :, :])
    wB_f = rnd(wB.astype(f32) * (0.5 * sB)[:, None, None, :, :])
    mix = 0.0
    for br in range(2):
        h = jnp.maximum(_conv3x3_nhwc(x, wA_f[br]) + bA[br][0], 0.0)
        h = rnd(h)
        mix = mix + _conv3x3_nhwc(h, wB_f[br])
    out = jnp.maximum(mix + 0.5 * (bB[0][0] + bB[1][0]) + x, 0.0)
    return jnp.transpose(out, (0, 3, 1, 2))


# ------------------------------- main -----------------------------------------
if __name__ == "__main__":
    # Small shapes: batch=2, in_planes=planes=4, spatial=16x16, stride=1.
    N, C, H, W = 2, 4, 16, 16
    P = C  # planes == in_planes -> identity shortcut
    eps = 1e-5

    key = jax.random.PRNGKey(0)
    ks = jax.random.split(key, 11)

    x = jax.random.normal(ks[0], (N, C, H, W), jnp.float32)

    # Conv weights, layout (branch, ky, kx, Cin, Cout).
    wA = 0.3 * jax.random.normal(ks[1], (2, 3, 3, C, P), jnp.float32)
    wB = 0.3 * jax.random.normal(ks[2], (2, 3, 3, P, P), jnp.float32)

    # BatchNorm (inference / running stats) folded into per-channel scale & bias.
    def fold_bn(kg, kb, km, kv):
        gamma = 1.0 + 0.1 * jax.random.normal(kg, (2, 1, P), jnp.float32)
        beta = 0.1 * jax.random.normal(kb, (2, 1, P), jnp.float32)
        mean = 0.1 * jax.random.normal(km, (2, 1, P), jnp.float32)
        var = jax.random.uniform(kv, (2, 1, P), jnp.float32, 0.5, 1.5)
        scale = gamma / jnp.sqrt(var + eps)
        bias = beta - mean * scale
        return scale, bias

    sA, bA = fold_bn(ks[3], ks[4], ks[5], ks[6])
    sB, bB = fold_bn(ks[7], ks[8], ks[9], ks[10])

    out = jax.block_until_ready(shake_shake_block(x, wA, wB, sA, bA, sB, bB))
    assert out.shape == (N, P, H, W), out.shape

    # Tight check against a reference that mirrors the kernel's bf16 rounding points.
    ref_bf16 = jax.block_until_ready(
        reference(x, wA, wB, sA, bA, sB, bB, mirror_bf16=True))
    np.testing.assert_allclose(np.asarray(out), np.asarray(ref_bf16),
                               rtol=5e-3, atol=5e-3)

    # Loose semantic check against the pure-f32 eval-mode module math.
    ref_f32 = jax.block_until_ready(
        reference(x, wA, wB, sA, bA, sB, bB, mirror_bf16=False))
    np.testing.assert_allclose(np.asarray(out), np.asarray(ref_f32),
                               rtol=1e-1, atol=1e-1)

    print("KERNEL_OK")
</pallas_src>

<mosaic_0001>
module attributes {stable_mosaic.version = 11 : i64} {
  func.func @_shake_block_kernel(%arg0: i32, %arg1: memref<1x18x18x128xbf16, #tpu.memory_space<vmem>>, %arg2: memref<9x128x256xbf16, #tpu.memory_space<vmem>>, %arg3: memref<9x256x128xbf16, #tpu.memory_space<vmem>>, %arg4: memref<1x256xf32, #tpu.memory_space<vmem>>, %arg5: memref<1x128xf32, #tpu.memory_space<vmem>>, %arg6: memref<1x16x16x128xf32, #tpu.memory_space<vmem>>, %arg7: memref<18x40x256xbf16, #tpu.memory_space<vmem>>) attributes {dimension_semantics = [#tpu.dimension_semantics<parallel>], iteration_bounds = array<i64: 2>, scalar_prefetch = 0 : i64, scratch_operands = 1 : i64, tpu.core_type = #tpu.core_type<tc>, window_params = [{transform_indices = @transform_0, window_bounds = array<i64: 1, 18, 18, 128>}, {pipeline_mode = #tpu.pipeline_mode<synchronous>, transform_indices = @transform_1, window_bounds = array<i64: 9, 128, 256>}, {pipeline_mode = #tpu.pipeline_mode<synchronous>, transform_indices = @transform_2, window_bounds = array<i64: 9, 256, 128>}, {pipeline_mode = #tpu.pipeline_mode<synchronous>, transform_indices = @transform_3, window_bounds = array<i64: 1, 256>}, {pipeline_mode = #tpu.pipeline_mode<synchronous>, transform_indices = @transform_4, window_bounds = array<i64: 1, 128>}, {transform_indices = @transform_5, window_bounds = array<i64: 1, 16, 16, 128>}]} {
    %c0 = arith.constant 0 : index
    %c0_0 = arith.constant 0 : index
    %c0_1 = arith.constant 0 : index
    %c0_2 = arith.constant 0 : index
    %0 = vector.load %arg1[%c0, %c0_0, %c0_1, %c0_2] : memref<1x18x18x128xbf16, #tpu.memory_space<vmem>>, vector<1x16x16x128xbf16>
    %1 = vector.shape_cast %0 : vector<1x16x16x128xbf16> to vector<16x16x128xbf16>
    %2 = vector.shape_cast %1 : vector<16x16x128xbf16> to vector<256x128xbf16>
    %c0_3 = arith.constant 0 : index
    %c0_4 = arith.constant 0 : index
    %c0_5 = arith.constant 0 : index
    %3 = vector.load %arg2[%c0_3, %c0_4, %c0_5] : memref<9x128x256xbf16, #tpu.memory_space<vmem>>, vector<1x128x256xbf16>
    %4 = vector.shape_cast %3 : vector<1x128x256xbf16> to vector<128x256xbf16>
    %cst = arith.constant dense<0.000000e+00> : vector<256x256xf32>
    %5 = tpu.matmul %2, %4, %cst {dimension_numbers = #tpu.dot_dimension_numbers<[1], [0], [0], [1], [0, 0, 1, 1], [], []>} : vector<256x128xbf16>, vector<128x256xbf16>, vector<256x256xf32> -> vector<256x256xf32>
    %c0_6 = arith.constant 0 : index
    %c0_7 = arith.constant 0 : index
    %c1 = arith.constant 1 : index
    %c0_8 = arith.constant 0 : index
    %6 = vector.load %arg1[%c0_6, %c0_7, %c1, %c0_8] : memref<1x18x18x128xbf16, #tpu.memory_space<vmem>>, vector<1x16x16x128xbf16>
    %7 = vector.shape_cast %6 : vector<1x16x16x128xbf16> to vector<16x16x128xbf16>
    %8 = vector.shape_cast %7 : vector<16x16x128xbf16> to vector<256x128xbf16>
    %c1_9 = arith.constant 1 : index
    %c0_10 = arith.constant 0 : index
    %c0_11 = arith.constant 0 : index
    %9 = vector.load %arg2[%c1_9, %c0_10, %c0_11] : memref<9x128x256xbf16, #tpu.memory_space<vmem>>, vector<1x128x256xbf16>
    %10 = vector.shape_cast %9 : vector<1x128x256xbf16> to vector<128x256xbf16>
    %cst_12 = arith.constant dense<0.000000e+00> : vector<256x256xf32>
    %11 = tpu.matmul %8, %10, %cst_12 {dimension_numbers = #tpu.dot_dimension_numbers<[1], [0], [0], [1], [0, 0, 1, 1], [], []>} : vector<256x128xbf16>, vector<128x256xbf16>, vector<256x256xf32> -> vector<256x256xf32>
    %12 = arith.addf %5, %11 : vector<256x256xf32>
    %c0_13 = arith.constant 0 : index
    %c0_14 = arith.constant 0 : index
    %c2 = arith.constant 2 : index
    %c0_15 = arith.constant 0 : index
    %13 = vector.load %arg1[%c0_13, %c0_14, %c2, %c0_15] : memref<1x18x18x128xbf16, #tpu.memory_space<vmem>>, vector<1x16x16x128xbf16>
    %14 = vector.shape_cast %13 : vector<1x16x16x128xbf16> to vector<16x16x128xbf16>
    %15 = vector.shape_cast %14 : vector<16x16x128xbf16> to vector<256x128xbf16>
    %c2_16 = arith.constant 2 : index
    %c0_17 = arith.constant 0 : index
    %c0_18 = arith.constant 0 : index
    %16 = vector.load %arg2[%c2_16, %c0_17, %c0_18] : memref<9x128x256xbf16, #tpu.memory_space<vmem>>, vector<1x128x256xbf16>
    %17 = vector.shape_cast %16 : vector<1x128x256xbf16> to vector<128x256xbf16>
    %cst_19 = arith.constant dense<0.000000e+00> : vector<256x256xf32>
    %18 = tpu.matmul %15, %17, %cst_19 {dimension_numbers = #tpu.dot_dimension_numbers<[1], [0], [0], [1], [0, 0, 1, 1], [], []>} : vector<256x128xbf16>, vector<128x256xbf16>, vector<256x256xf32> -> vector<256x256xf32>
    %19 = arith.addf %12, %18 : vector<256x256xf32>
    %c0_20 = arith.constant 0 : index
    %c1_21 = arith.constant 1 : index
    %c0_22 = arith.constant 0 : index
    %c0_23 = arith.constant 0 : index
    %20 = vector.load %arg1[%c0_20, %c1_21, %c0_22, %c0_23] : memref<1x18x18x128xbf16, #tpu.memory_space<vmem>>, vector<1x16x16x128xbf16>
    %21 = vector.shape_cast %20 : vector<1x16x16x128xbf16> to vector<16x16x128xbf16>
    %22 = vector.shape_cast %21 : vector<16x16x128xbf16> to vector<256x128xbf16>
    %c3 = arith.constant 3 : index
    %c0_24 = arith.constant 0 : index
    %c0_25 = arith.constant 0 : index
    %23 = vector.load %arg2[%c3, %c0_24, %c0_25] : memref<9x128x256xbf16, #tpu.memory_space<vmem>>, vector<1x128x256xbf16>
    %24 = vector.shape_cast %23 : vector<1x128x256xbf16> to vector<128x256xbf16>
    %cst_26 = arith.constant dense<0.000000e+00> : vector<256x256xf32>
    %25 = tpu.matmul %22, %24, %cst_26 {dimension_numbers = #tpu.dot_dimension_numbers<[1], [0], [0], [1], [0, 0, 1, 1], [], []>} : vector<256x128xbf16>, vector<128x256xbf16>, vector<256x256xf32> -> vector<256x256xf32>
    %26 = arith.addf %19, %25 : vector<256x256xf32>
    %c0_27 = arith.constant 0 : index
    %c1_28 = arith.constant 1 : index
    %c1_29 = arith.constant 1 : index
    %c0_30 = arith.constant 0 : index
    %27 = vector.load %arg1[%c0_27, %c1_28, %c1_29, %c0_30] : memref<1x18x18x128xbf16, #tpu.memory_space<vmem>>, vector<1x16x16x128xbf16>
    %28 = vector.shape_cast %27 : vector<1x16x16x128xbf16> to vector<16x16x128xbf16>
    %29 = vector.shape_cast %28 : vector<16x16x128xbf16> to vector<256x128xbf16>
    %c4 = arith.constant 4 : index
    %c0_31 = arith.constant 0 : index
    %c0_32 = arith.constant 0 : index
    %30 = vector.load %arg2[%c4, %c0_31, %c0_32] : memref<9x128x256xbf16, #tpu.memory_space<vmem>>, vector<1x128x256xbf16>
    %31 = vector.shape_cast %30 : vector<1x128x256xbf16> to vector<128x256xbf16>
    %cst_33 = arith.constant dense<0.000000e+00> : vector<256x256xf32>
    %32 = tpu.matmul %29, %31, %cst_33 {dimension_numbers = #tpu.dot_dimension_numbers<[1], [0], [0], [1], [0, 0, 1, 1], [], []>} : vector<256x128xbf16>, vector<128x256xbf16>, vector<256x256xf32> -> vector<256x256xf32>
    %33 = arith.addf %26, %32 : vector<256x256xf32>
    %c0_34 = arith.constant 0 : index
    %c1_35 = arith.constant 1 : index
    %c2_36 = arith.constant 2 : index
    %c0_37 = arith.constant 0 : index
    %34 = vector.load %arg1[%c0_34, %c1_35, %c2_36, %c0_37] : memref<1x18x18x128xbf16, #tpu.memory_space<vmem>>, vector<1x16x16x128xbf16>
    %35 = vector.shape_cast %34 : vector<1x16x16x128xbf16> to vector<16x16x128xbf16>
    %36 = vector.shape_cast %35 : vector<16x16x128xbf16> to vector<256x128xbf16>
    %c5 = arith.constant 5 : index
    %c0_38 = arith.constant 0 : index
    %c0_39 = arith.constant 0 : index
    %37 = vector.load %arg2[%c5, %c0_38, %c0_39] : memref<9x128x256xbf16, #tpu.memory_space<vmem>>, vector<1x128x256xbf16>
    %38 = vector.shape_cast %37 : vector<1x128x256xbf16> to vector<128x256xbf16>
    %cst_40 = arith.constant dense<0.000000e+00> : vector<256x256xf32>
    %39 = tpu.matmul %36, %38, %cst_40 {dimension_numbers = #tpu.dot_dimension_numbers<[1], [0], [0], [1], [0, 0, 1, 1], [], []>} : vector<256x128xbf16>, vector<128x256xbf16>, vector<256x256xf32> -> vector<256x256xf32>
    %40 = arith.addf %33, %39 : vector<256x256xf32>
    %c0_41 = arith.constant 0 : index
    %c2_42 = arith.constant 2 : index
    %c0_43 = arith.constant 0 : index
    %c0_44 = arith.constant 0 : index
    %41 = vector.load %arg1[%c0_41, %c2_42, %c0_43, %c0_44] : memref<1x18x18x128xbf16, #tpu.memory_space<vmem>>, vector<1x16x16x128xbf16>
    %42 = vector.shape_cast %41 : vector<1x16x16x128xbf16> to vector<16x16x128xbf16>
    %43 = vector.shape_cast %42 : vector<16x16x128xbf16> to vector<256x128xbf16>
    %c6 = arith.constant 6 : index
    %c0_45 = arith.constant 0 : index
    %c0_46 = arith.constant 0 : index
    %44 = vector.load %arg2[%c6, %c0_45, %c0_46] : memref<9x128x256xbf16, #tpu.memory_space<vmem>>, vector<1x128x256xbf16>
    %45 = vector.shape_cast %44 : vector<1x128x256xbf16> to vector<128x256xbf16>
    %cst_47 = arith.constant dense<0.000000e+00> : vector<256x256xf32>
    %46 = tpu.matmul %43, %45, %cst_47 {dimension_numbers = #tpu.dot_dimension_numbers<[1], [0], [0], [1], [0, 0, 1, 1], [], []>} : vector<256x128xbf16>, vector<128x256xbf16>, vector<256x256xf32> -> vector<256x256xf32>
    %47 = arith.addf %40, %46 : vector<256x256xf32>
    %c0_48 = arith.constant 0 : index
    %c2_49 = arith.constant 2 : index
    %c1_50 = arith.constant 1 : index
    %c0_51 = arith.constant 0 : index
    %48 = vector.load %arg1[%c0_48, %c2_49, %c1_50, %c0_51] : memref<1x18x18x128xbf16, #tpu.memory_space<vmem>>, vector<1x16x16x128xbf16>
    %49 = vector.shape_cast %48 : vector<1x16x16x128xbf16> to vector<16x16x128xbf16>
    %50 = vector.shape_cast %49 : vector<16x16x128xbf16> to vector<256x128xbf16>
    %c7 = arith.constant 7 : index
    %c0_52 = arith.constant 0 : index
    %c0_53 = arith.constant 0 : index
    %51 = vector.load %arg2[%c7, %c0_52, %c0_53] : memref<9x128x256xbf16, #tpu.memory_space<vmem>>, vector<1x128x256xbf16>
    %52 = vector.shape_cast %51 : vector<1x128x256xbf16> to vector<128x256xbf16>
    %cst_54 = arith.constant dense<0.000000e+00> : vector<256x256xf32>
    %53 = tpu.matmul %50, %52, %cst_54 {dimension_numbers = #tpu.dot_dimension_numbers<[1], [0], [0], [1], [0, 0, 1, 1], [], []>} : vector<256x128xbf16>, vector<128x256xbf16>, vector<256x256xf32> -> vector<256x256xf32>
    %54 = arith.addf %47, %53 : vector<256x256xf32>
    %c0_55 = arith.constant 0 : index
    %c2_56 = arith.constant 2 : index
    %c2_57 = arith.constant 2 : index
    %c0_58 = arith.constant 0 : index
    %55 = vector.load %arg1[%c0_55, %c2_56, %c2_57, %c0_58] : memref<1x18x18x128xbf16, #tpu.memory_space<vmem>>, vector<1x16x16x128xbf16>
    %56 = vector.shape_cast %55 : vector<1x16x16x128xbf16> to vector<16x16x128xbf16>
    %57 = vector.shape_cast %56 : vector<16x16x128xbf16> to vector<256x128xbf16>
    %c8 = arith.constant 8 : index
    %c0_59 = arith.constant 0 : index
    %c0_60 = arith.constant 0 : index
    %58 = vector.load %arg2[%c8, %c0_59, %c0_60] : memref<9x128x256xbf16, #tpu.memory_space<vmem>>, vector<1x128x256xbf16>
    %59 = vector.shape_cast %58 : vector<1x128x256xbf16> to vector<128x256xbf16>
    %cst_61 = arith.constant dense<0.000000e+00> : vector<256x256xf32>
    %60 = tpu.matmul %57, %59, %cst_61 {dimension_numbers = #tpu.dot_dimension_numbers<[1], [0], [0], [1], [0, 0, 1, 1], [], []>} : vector<256x128xbf16>, vector<128x256xbf16>, vector<256x256xf32> -> vector<256x256xf32>
    %61 = arith.addf %54, %60 : vector<256x256xf32>
    %c0_62 = arith.constant 0 : index
    %c0_63 = arith.constant 0 : index
    %62 = vector.load %arg4[%c0_62, %c0_63] : memref<1x256xf32, #tpu.memory_space<vmem>>, vector<1x256xf32>
    %63 = vector.broadcast %62 : vector<1x256xf32> to vector<256x256xf32>
    %64 = arith.addf %61, %63 : vector<256x256xf32>
    %cst_64 = arith.constant 0.000000e+00 : f32
    %65 = vector.broadcast %cst_64 : f32 to vector<256x256xf32>
    %66 = arith.maximumf %64, %65 : vector<256x256xf32>
    %cst_65 = arith.constant 0.000000e+00 : bf16
    %67 = vector.broadcast %cst_65 : bf16 to vector<40x256xbf16>
    %c0_66 = arith.constant 0 : index
    %c0_67 = arith.constant 0 : index
    %c0_68 = arith.constant 0 : index
    %68 = vector.load %arg7[%c0_66, %c0_67, %c0_68] : memref<18x40x256xbf16, #tpu.memory_space<vmem>>, vector<1x40x256xbf16>
    %69 = vector.shape_cast %68 : vector<1x40x256xbf16> to vector<40x256xbf16>
    %70 = vector.shape_cast %67 : vector<40x256xbf16> to vector<1x40x256xbf16>
    tpu.vector_store %arg7[%c0_66, %c0_67, %c0_68], %70 {strides = array<i32>} : memref<18x40x256xbf16, #tpu.memory_space<vmem>>, vector<1x40x256xbf16>,
    %c17 = arith.constant 17 : index
    %c0_69 = arith.constant 0 : index
    %c0_70 = arith.constant 0 : index
    %71 = vector.load %arg7[%c17, %c0_69, %c0_70] : memref<18x40x256xbf16, #tpu.memory_space<vmem>>, vector<1x40x256xbf16>
    %72 = vector.shape_cast %71 : vector<1x40x256xbf16> to vector<40x256xbf16>
    %73 = vector.shape_cast %67 : vector<40x256xbf16> to vector<1x40x256xbf16>
    tpu.vector_store %arg7[%c17, %c0_69, %c0_70], %73 {strides = array<i32>} : memref<18x40x256xbf16, #tpu.memory_space<vmem>>, vector<1x40x256xbf16>,
    %cst_71 = arith.constant 0.000000e+00 : bf16
    %74 = vector.broadcast %cst_71 : bf16 to vector<16x8x256xbf16>
    %c1_72 = arith.constant 1 : index
    %c8_73 = arith.constant 8 : index
    %c0_74 = arith.constant 0 : index
    %75 = vector.load %arg7[%c1_72, %c8_73, %c0_74] : memref<18x40x256xbf16, #tpu.memory_space<vmem>>, vector<16x8x256xbf16>
    tpu.vector_store %arg7[%c1_72, %c8_73, %c0_74], %74 {strides = array<i32>} : memref<18x40x256xbf16, #tpu.memory_space<vmem>>, vector<16x8x256xbf16>,
    %c1_75 = arith.constant 1 : index
    %c32 = arith.constant 32 : index
    %c0_76 = arith.constant 0 : index
    %76 = vector.load %arg7[%c1_75, %c32, %c0_76] : memref<18x40x256xbf16, #tpu.memory_space<vmem>>, vector<16x8x256xbf16>
    tpu.vector_store %arg7[%c1_75, %c32, %c0_76], %74 {strides = array<i32>} : memref<18x40x256xbf16, #tpu.memory_space<vmem>>, vector<16x8x256xbf16>,
    %77 = vector.shape_cast %66 : vector<256x256xf32> to vector<16x16x256xf32>
    %78 = arith.truncf %77 : vector<16x16x256xf32> to vector<16x16x256xbf16>
    %c1_77 = arith.constant 1 : index
    %c16 = arith.constant 16 : index
    %c0_78 = arith.constant 0 : index
    %79 = vector.load %arg7[%c1_77, %c16, %c0_78] : memref<18x40x256xbf16, #tpu.memory_space<vmem>>, vector<16x16x256xbf16>
    tpu.vector_store %arg7[%c1_77, %c16, %c0_78], %78 {strides = array<i32>} : memref<18x40x256xbf16, #tpu.memory_space<vmem>>, vector<16x16x256xbf16>,
    %80 = arith.extf %29 : vector<256x128xbf16> to vector<256x128xf32>
    %c0_79 = arith.constant 0 : index
    %c0_80 = arith.constant 0 : index
    %81 = vector.load %arg5[%c0_79, %c0_80] : memref<1x128xf32, #tpu.memory_space<vmem>>, vector<1x128xf32>
    %82 = vector.broadcast %81 : vector<1x128xf32> to vector<256x128xf32>
    %83 = arith.addf %80, %82 : vector<256x128xf32>
    %c0_81 = arith.constant 0 : index
    %c15 = arith.constant 15 : index
    %c0_82 = arith.constant 0 : index
    %84 = vector.load %arg7[%c0_81, %c15, %c0_82] : memref<18x40x256xbf16, #tpu.memory_space<vmem>>, vector<16x16x256xbf16>
    %85 = vector.shape_cast %84 : vector<16x16x256xbf16> to vector<256x256xbf16>
    %c0_83 = arith.constant 0 : index
    %c0_84 = arith.constant 0 : index
    %c0_85 = arith.constant 0 : index
    %86 = vector.load %arg3[%c0_83, %c0_84, %c0_85] : memref<9x256x128xbf16, #tpu.memory_space<vmem>>, vector<1x256x128xbf16>
    %87 = vector.shape_cast %86 : vector<1x256x128xbf16> to vector<256x128xbf16>
    %cst_86 = arith.constant dense<0.000000e+00> : vector<256x128xf32>
    %88 = tpu.matmul %85, %87, %cst_86 {dimension_numbers = #tpu.dot_dimension_numbers<[1], [0], [0], [1], [0, 0, 1, 1], [], []>} : vector<256x256xbf16>, vector<256x128xbf16>, vector<256x128xf32> -> vector<256x128xf32>
    %89 = arith.addf %83, %88 : vector<256x128xf32>
    %c0_87 = arith.constant 0 : index
    %c16_88 = arith.constant 16 : index
    %c0_89 = arith.constant 0 : index
    %90 = vector.load %arg7[%c0_87, %c16_88, %c0_89] : memref<18x40x256xbf16, #tpu.memory_space<vmem>>, vector<16x16x256xbf16>
    %91 = vector.shape_cast %90 : vector<16x16x256xbf16> to vector<256x256xbf16>
    %c1_90 = arith.constant 1 : index
    %c0_91 = arith.constant 0 : index
    %c0_92 = arith.constant 0 : index
    %92 = vector.load %arg3[%c1_90, %c0_91, %c0_92] : memref<9x256x128xbf16, #tpu.memory_space<vmem>>, vector<1x256x128xbf16>
    %93 = vector.shape_cast %92 : vector<1x256x128xbf16> to vector<256x128xbf16>
    %cst_93 = arith.constant dense<0.000000e+00> : vector<256x128xf32>
    %94 = tpu.matmul %91, %93, %cst_93 {dimension_numbers = #tpu.dot_dimension_numbers<[1], [0], [0], [1], [0, 0, 1, 1], [], []>} : vector<256x256xbf16>, vector<256x128xbf16>, vector<256x128xf32> -> vector<256x128xf32>
    %95 = arith.addf %89, %94 : vector<256x128xf32>
    %c0_94 = arith.constant 0 : index
    %c17_95 = arith.constant 17 : index
    %c0_96 = arith.constant 0 : index
    %96 = vector.load %arg7[%c0_94, %c17_95, %c0_96] : memref<18x40x256xbf16, #tpu.memory_space<vmem>>, vector<16x16x256xbf16>
    %97 = vector.shape_cast %96 : vector<16x16x256xbf16> to vector<256x256xbf16>
    %c2_97 = arith.constant 2 : index
    %c0_98 = arith.constant 0 : index
    %c0_99 = arith.constant 0 : index
    %98 = vector.load %arg3[%c2_97, %c0_98, %c0_99] : memref<9x256x128xbf16, #tpu.memory_space<vmem>>, vector<1x256x128xbf16>
    %99 = vector.shape_cast %98 : vector<1x256x128xbf16> to vector<256x128xbf16>
    %cst_100 = arith.constant dense<0.000000e+00> : vector<256x128xf32>
    %100 = tpu.matmul %97, %99, %cst_100 {dimension_numbers = #tpu.dot_dimension_numbers<[1], [0], [0], [1], [0, 0, 1, 1], [], []>} : vector<256x256xbf16>, vector<256x128xbf16>, vector<256x128xf32> -> vector<256x128xf32>
    %101 = arith.addf %95, %100 : vector<256x128xf32>
    %c1_101 = arith.constant 1 : index
    %c15_102 = arith.constant 15 : index
    %c0_103 = arith.constant 0 : index
    %102 = vector.load %arg7[%c1_101, %c15_102, %c0_103] : memref<18x40x256xbf16, #tpu.memory_space<vmem>>, vector<16x16x256xbf16>
    %103 = vector.shape_cast %102 : vector<16x16x256xbf16> to vector<256x256xbf16>
    %c3_104 = arith.constant 3 : index
    %c0_105 = arith.constant 0 : index
    %c0_106 = arith.constant 0 : index
    %104 = vector.load %arg3[%c3_104, %c0_105, %c0_106] : memref<9x256x128xbf16, #tpu.memory_space<vmem>>, vector<1x256x128xbf16>
    %105 = vector.shape_cast %104 : vector<1x256x128xbf16> to vector<256x128xbf16>
    %cst_107 = arith.constant dense<0.000000e+00> : vector<256x128xf32>
    %106 = tpu.matmul %103, %105, %cst_107 {dimension_numbers = #tpu.dot_dimension_numbers<[1], [0], [0], [1], [0, 0, 1, 1], [], []>} : vector<256x256xbf16>, vector<256x128xbf16>, vector<256x128xf32> -> vector<256x128xf32>
    %107 = arith.addf %101, %106 : vector<256x128xf32>
    %c1_108 = arith.constant 1 : index
    %c16_109 = arith.constant 16 : index
    %c0_110 = arith.constant 0 : index
    %108 = vector.load %arg7[%c1_108, %c16_109, %c0_110] : memref<18x40x256xbf16, #tpu.memory_space<vmem>>, vector<16x16x256xbf16>
    %109 = vector.shape_cast %108 : vector<16x16x256xbf16> to vector<256x256xbf16>
    %c4_111 = arith.constant 4 : index
    %c0_112 = arith.constant 0 : index
    %c0_113 = arith.constant 0 : index
    %110 = vector.load %arg3[%c4_111, %c0_112, %c0_113] : memref<9x256x128xbf16, #tpu.memory_space<vmem>>, vector<1x256x128xbf16>
    %111 = vector.shape_cast %110 : vector<1x256x128xbf16> to vector<256x128xbf16>
    %cst_114 = arith.constant dense<0.000000e+00> : vector<256x128xf32>
    %112 = tpu.matmul %109, %111, %cst_114 {dimension_numbers = #tpu.dot_dimension_numbers<[1], [0], [0], [1], [0, 0, 1, 1], [], []>} : vector<256x256xbf16>, vector<256x128xbf16>, vector<256x128xf32> -> vector<256x128xf32>
    %113 = arith.addf %107, %112 : vector<256x128xf32>
    %c1_115 = arith.constant 1 : index
    %c17_116 = arith.constant 17 : index
    %c0_117 = arith.constant 0 : index
    %114 = vector.load %arg7[%c1_115, %c17_116, %c0_117] : memref<18x40x256xbf16, #tpu.memory_space<vmem>>, vector<16x16x256xbf16>
    %115 = vector.shape_cast %114 : vector<16x16x256xbf16> to vector<256x256xbf16>
    %c5_118 = arith.constant 5 : index
    %c0_119 = arith.constant 0 : index
    %c0_120 = arith.constant 0 : index
    %116 = vector.load %arg3[%c5_118, %c0_119, %c0_120] : memref<9x256x128xbf16, #tpu.memory_space<vmem>>, vector<1x256x128xbf16>
    %117 = vector.shape_cast %116 : vector<1x256x128xbf16> to vector<256x128xbf16>
    %cst_121 = arith.constant dense<0.000000e+00> : vector<256x128xf32>
    %118 = tpu.matmul %115, %117, %cst_121 {dimension_numbers = #tpu.dot_dimension_numbers<[1], [0], [0], [1], [0, 0, 1, 1], [], []>} : vector<256x256xbf16>, vector<256x128xbf16>, vector<256x128xf32> -> vector<256x128xf32>
    %119 = arith.addf %113, %118 : vector<256x128xf32>
    %c2_122 = arith.constant 2 : index
    %c15_123 = arith.constant 15 : index
    %c0_124 = arith.constant 0 : index
    %120 = vector.load %arg7[%c2_122, %c15_123, %c0_124] : memref<18x40x256xbf16, #tpu.memory_space<vmem>>, vector<16x16x256xbf16>
    %121 = vector.shape_cast %120 : vector<16x16x256xbf16> to vector<256x256xbf16>
    %c6_125 = arith.constant 6 : index
    %c0_126 = arith.constant 0 : index
    %c0_127 = arith.constant 0 : index
    %122 = vector.load %arg3[%c6_125, %c0_126, %c0_127] : memref<9x256x128xbf16, #tpu.memory_space<vmem>>, vector<1x256x128xbf16>
    %123 = vector.shape_cast %122 : vector<1x256x128xbf16> to vector<256x128xbf16>
    %cst_128 = arith.constant dense<0.000000e+00> : vector<256x128xf32>
    %124 = tpu.matmul %121, %123, %cst_128 {dimension_numbers = #tpu.dot_dimension_numbers<[1], [0], [0], [1], [0, 0, 1, 1], [], []>} : vector<256x256xbf16>, vector<256x128xbf16>, vector<256x128xf32> -> vector<256x128xf32>
    %125 = arith.addf %119, %124 : vector<256x128xf32>
    %c2_129 = arith.constant 2 : index
    %c16_130 = arith.constant 16 : index
    %c0_131 = arith.constant 0 : index
    %126 = vector.load %arg7[%c2_129, %c16_130, %c0_131] : memref<18x40x256xbf16, #tpu.memory_space<vmem>>, vector<16x16x256xbf16>
    %127 = vector.shape_cast %126 : vector<16x16x256xbf16> to vector<256x256xbf16>
    %c7_132 = arith.constant 7 : index
    %c0_133 = arith.constant 0 : index
    %c0_134 = arith.constant 0 : index
    %128 = vector.load %arg3[%c7_132, %c0_133, %c0_134] : memref<9x256x128xbf16, #tpu.memory_space<vmem>>, vector<1x256x128xbf16>
    %129 = vector.shape_cast %128 : vector<1x256x128xbf16> to vector<256x128xbf16>
    %cst_135 = arith.constant dense<0.000000e+00> : vector<256x128xf32>
    %130 = tpu.matmul %127, %129, %cst_135 {dimension_numbers = #tpu.dot_dimension_numbers<[1], [0], [0], [1], [0, 0, 1, 1], [], []>} : vector<256x256xbf16>, vector<256x128xbf16>, vector<256x128xf32> -> vector<256x128xf32>
    %131 = arith.addf %125, %130 : vector<256x128xf32>
    %c2_136 = arith.constant 2 : index
    %c17_137 = arith.constant 17 : index
    %c0_138 = arith.constant 0 : index
    %132 = vector.load %arg7[%c2_136, %c17_137, %c0_138] : memref<18x40x256xbf16, #tpu.memory_space<vmem>>, vector<16x16x256xbf16>
    %133 = vector.shape_cast %132 : vector<16x16x256xbf16> to vector<256x256xbf16>
    %c8_139 = arith.constant 8 : index
    %c0_140 = arith.constant 0 : index
    %c0_141 = arith.constant 0 : index
    %134 = vector.load %arg3[%c8_139, %c0_140, %c0_141] : memref<9x256x128xbf16, #tpu.memory_space<vmem>>, vector<1x256x128xbf16>
    %135 = vector.shape_cast %134 : vector<1x256x128xbf16> to vector<256x128xbf16>
    %cst_142 = arith.constant dense<0.000000e+00> : vector<256x128xf32>
    %136 = tpu.matmul %133, %135, %cst_142 {dimension_numbers = #tpu.dot_dimension_numbers<[1], [0], [0], [1], [0, 0, 1, 1], [], []>} : vector<256x256xbf16>, vector<256x128xbf16>, vector<256x128xf32> -> vector<256x128xf32>
    %137 = arith.addf %131, %136 : vector<256x128xf32>
    %cst_143 = arith.constant 0.000000e+00 : f32
    %138 = vector.broadcast %cst_143 : f32 to vector<256x128xf32>
    %139 = arith.maximumf %137, %138 : vector<256x128xf32>
    %140 = vector.shape_cast %139 : vector<256x128xf32> to vector<16x16x128xf32>
    %c0_144 = arith.constant 0 : index
    %c0_145 = arith.constant 0 : index
    %c0_146 = arith.constant 0 : index
    %c0_147 = arith.constant 0 : index
    %141 = vector.load %arg6[%c0_144, %c0_145, %c0_146, %c0_147] : memref<1x16x16x128xf32, #tpu.memory_space<vmem>>, vector<1x16x16x128xf32>
    %142 = vector.shape_cast %141 : vector<1x16x16x128xf32> to vector<16x16x128xf32>
    %143 = vector.shape_cast %140 : vector<16x16x128xf32> to vector<1x16x16x128xf32>
    tpu.vector_store %arg6[%c0_144, %c0_145, %c0_146, %c0_147], %143 {strides = array<i32>} : memref<1x16x16x128xf32, #tpu.memory_space<vmem>>, vector<1x16x16x128xf32>,
    return
  }
  func.func @transform_0(%arg0: i32) -> (i32, i32, i32, i32) {
    %c0_i32 = arith.constant 0 : i32
    %c0_i32_0 = arith.constant 0 : i32
    %c0_i32_1 = arith.constant 0 : i32
    %c0_i32_2 = arith.constant 0 : i32
    return %arg0, %c0_i32, %c0_i32_0, %c0_i32_1 : i32, i32, i32, i32
  }
  func.func @transform_1(%arg0: i32) -> (i32, i32, i32) {
    %c0_i32 = arith.constant 0 : i32
    %c0_i32_0 = arith.constant 0 : i32
    %c0_i32_1 = arith.constant 0 : i32
    %c0_i32_2 = arith.constant 0 : i32
    return %c0_i32, %c0_i32_0, %c0_i32_1 : i32, i32, i32
  }
  func.func @transform_2(%arg0: i32) -> (i32, i32, i32) {
    %c0_i32 = arith.constant 0 : i32
    %c0_i32_0 = arith.constant 0 : i32
    %c0_i32_1 = arith.constant 0 : i32
    %c0_i32_2 = arith.constant 0 : i32
    return %c0_i32, %c0_i32_0, %c0_i32_1 : i32, i32, i32
  }
  func.func @transform_3(%arg0: i32) -> (i32, i32) {
    %c0_i32 = arith.constant 0 : i32
    %c0_i32_0 = arith.constant 0 : i32
    %c0_i32_1 = arith.constant 0 : i32
    return %c0_i32, %c0_i32_0 : i32, i32
  }
  func.func @transform_4(%arg0: i32) -> (i32, i32) {
    %c0_i32 = arith.constant 0 : i32
    %c0_i32_0 = arith.constant 0 : i32
    %c0_i32_1 = arith.constant 0 : i32
    return %c0_i32, %c0_i32_0 : i32, i32
  }
  func.func @transform_5(%arg0: i32) -> (i32, i32, i32, i32) {
    %c0_i32 = arith.constant 0 : i32
    %c0_i32_0 = arith.constant 0 : i32
    %c0_i32_1 = arith.constant 0 : i32
    %c0_i32_2 = arith.constant 0 : i32
    return %arg0, %c0_i32, %c0_i32_0, %c0_i32_1 : i32, i32, i32, i32
  }
}

</mosaic_0001>

<bundles_post_ra>
// kernel: tpu_custom_call.1
= control target key start
LH: loop header
LB: loop body
LE: loop exit
PB: predicated region body
PF: predicated region fallthrough
CT: control target
= control target key end

     0   :  { %10 = vsyncpa [#allocation4], 0  ;;  %s20581_s0 = inlined_call_operand.vmem [shape: bf16[2,18,18,128], index: 0, kind: input, shape index: {}]   ;;  %s20582_s1 = inlined_call_operand.hbm [shape: bf16[9,128,256], index: 1, kind: input, shape index: {}]   ;;  %s20583_s2 = inlined_call_operand.hbm [shape: bf16[9,256,128], index: 2, kind: input, shape index: {}]   ;;  %s20584_s3 = inlined_call_operand.vmem [shape: f32[1,256], index: 3, kind: input, shape index: {}]   ;;  %s20585_s4 = inlined_call_operand.vmem [shape: f32[1,128], index: 4, kind: input, shape index: {}]   ;;  %s20586_s5 = inlined_call_operand.hbm [shape: f32[2,16,16,128], index: 5, kind: output, shape index: {}]  }
   0x1   :  { %11 = vsyncpa [#allocation7], 0 }
   0x2   :  { %12 = vsyncpa [#allocation5], 0 }
   0x3   :  { %14 = vsyncpa [#allocation5 + $0x1], 0  ;;  %s16642_s18 = smov 0   ;;  %s16644_s19 = smov 0  }
   0x4   :  { %s16646_s20 = smov 0   ;;  %s16648_s21 = smov 0  }
   0x5 LB: > { %s16663_s22 = sadd.s32 4294967295, %s16600_s21   ;;  %s13181_s23 = sadd.s32 4294967294, %s16600_s21   ;;  %s16600_s21 = sphi %s16648_s21, %s21193_s21   ;;  %s16596_s20 = sphi %s16646_s20, %s21192_s20   ;;  %s16592_s19 = sphi %s16644_s19, %s21191_s19   ;;  %s16588_s18 = sphi %s16642_s18, %s21190_s18  }
   0x6   : > { %s16667_s24 = sadd.s32 1, %s16600_s21   ;;  %s137_s25 = sadd.s32 1, %s16596_s20 }
   0x7   : > { %s134_s26 = ssub.s32 %s16600_s21, %s16667_s24  ;;  %p147_p0 = scmp.ne.s32.totalorder %s16596_s20, %s16592_s19 }
   0x8   : > { %p135_p1 = scmp.eq.s32.totalorder %s134_s26, 0  ;;  %p148_p2 = scmp.eq.s32.totalorder %s16663_s22, 1 }
   0x9   : > { %p153_p3 = scmp.ne.s32.totalorder %s16592_s19, %s16588_s18  ;;  %p154_p4 = scmp.eq.s32.totalorder %s13181_s23, 1 }
   0xa   : > { %s16678_s27 = scalar_select %p135_p1, %s16596_s20, %s137_s25  }
   0xb   : > { %p16680_p5 = por %p148_p2, %p147_p0  ;;  %p16684_p6 = por %p154_p4, %p153_p3 }
   0xc   : > { %p13182_p7 = scmp.ge.s32.totalorder %s16600_s21, 1  ;;  %p161_p8 = scmp.lt.s32.totalorder %s16600_s21, 3 }
   0xd   : > { %s20774_s28 = scalar_select %p16680_p5, 1, 0 }
   0xe   : > { %s20775_s29 = scalar_select %p16684_p6, 1, 0 }
   0xf   : > { %p20587_p9 = scmp.eq.s32.totalorder %s16663_s22, 0  ;;  %p16691_p10 = pnand %p13182_p7, %p161_p8 }
  0x10   : > { %s16602_s6 = smov [#allocation3]   ;;  %s16603_s9 = smov [#allocation6]  }
  0x11   : > { %s20776_s30 = scalar_select %p16691_p10, 1, 0 }
  0x12   : > { %s173_s7 = sshll.u32 %s16602_s6, 4  ;;  %p15801_p11 = pneg %p16691_p10  ;;  %s174_s7 = int_to_ptr.vmem [resolvable:$true] %s173_s7 }
  0x13   : > { %s186_s10 = sshll.u32 %s16603_s9, 4  ;;  %s16474_s13 = scalar_lea.hbm %s20582_s1, 18432  ;;  %s16703_s10 = int_to_ptr.vmem [resolvable:$true] %s186_s10 }
  0x14   : > { %p16699_p12 = pnand %p20587_p9, %p15801_p11  ;;  %p16475_p13 = scmp.ne.s32.totalorder %s20582_s1, %s16474_s13 }
  0x15   : > { %p16481_p3 = scmp.lt.u32.totalorder %s16474_s13, %s20582_s1 }
  0x16   : > { %p16476_p0 = pneg %p16699_p12 }
  0x18   : > { %p16477_p1 = pnand %p16476_p0, %p16475_p13 }
  0x1a   : > { %p16478_p2 = pneg %p16477_p1 }
  0x1c   : > { %p16483_p4 = pnand %p16481_p3, %p16478_p2 }
  0x1e   : > { %16486 = shalt.err (!%p16483_p4)
}
  0x1f   : > { %s16487_s23 = scalar_lea.vmem %s174_s7, 18432  ;;  %p16495_p9 = scmp.lt.s32.totalorder %s174_s7, %s174_s7 }
  0x20   : > { %p16488_p7 = scmp.ne.s32.totalorder %s174_s7, %s16487_s23  ;;  %p16496_p6 = scmp.lt.s32.totalorder %s16487_s23, %s16487_s23 }
  0x22   : > { %p16490_p8 = pnand %p16488_p7, %p16476_p0  ;;  %p16497_p5 = por %p16496_p6, %p16495_p9 }
  0x24   : > { %p16491_p11 = pneg %p16490_p8 }
  0x26   : > { %p16498_p10 = pnand %p16497_p5, %p16491_p11 }
  0x28   : > { %16501 = shalt.err (!%p16498_p10)
}
  0x29   : > { %s16604_s25 = smov 128   ;;  %s16605_s26 = smov 8  }
  0x2a   : > { %15804 = dma.hbm_to_vmem [thread:$0]  (!%p16699_p12), %s20582_s1, 18432, %s174_s7, [#allocation4], %s16604_s25, %s16604_s25, %s16605_s26  }
  0x2b   : > { %s16502_s13 = scalar_lea.hbm %s20583_s2, 18432 }
  0x2c   : > { %p16503_p13 = scmp.ne.s32.totalorder %s20583_s2, %s16502_s13  ;;  %p16509_p9 = scmp.lt.u32.totalorder %s16502_s13, %s20583_s2 }
  0x2e   : > { %p16505_p5 = pnand %p16503_p13, %p16476_p0 }
  0x30   : > { %p16506_p6 = pneg %p16505_p5 }
  0x32   : > { %p16511_p10 = pnand %p16509_p9, %p16506_p6 }
  0x34   : > { %16514 = shalt.err (!%p16511_p10)
}
  0x35   : > { %s16515_s7 = scalar_lea.vmem %s16703_s10, 18432  ;;  %p16523_p4 = scmp.lt.s32.totalorder %s16703_s10, %s16703_s10 }
  0x36   : > { %p16516_p1 = scmp.ne.s32.totalorder %s16703_s10, %s16515_s7  ;;  %p16524_p7 = scmp.lt.s32.totalorder %s16515_s7, %s16515_s7 }
  0x38   : > { %p16518_p2 = pnand %p16516_p1, %p16476_p0  ;;  %p16525_p8 = por %p16524_p7, %p16523_p4 }
  0x3a   : > { %p16519_p3 = pneg %p16518_p2 }
  0x3c   : > { %p16526_p11 = pnand %p16525_p8, %p16519_p3 }
  0x3e   : > { %16529 = shalt.err (!%p16526_p11)
}
  0x3f   : > { %s16606_s23 = smov 64   ;;  %s16607_s25 = smov 4  }
  0x40   : > { %15807 = dma.hbm_to_vmem [thread:$0]  (!%p16699_p12), %s20583_s2, 18432, %s16703_s10, [#allocation7], %s16606_s23, %s16606_s23, %s16607_s25  }
  0x41   : > { %p20778_p13 = scmp.ne.s32.totalorder %s20776_s30, 0 }
  0x43   : > { %216 = sbr.rel (%p20778_p13) target bundleno = 2741 (0xab5), region = 40 }
  0x4a   : > { %p20779_p0 = scmp.eq.s32.totalorder %s16663_s22, 0 }
  0x4c   : > { %16575 = dma.done.wait (%p20779_p0), [#allocation4], 18432   ;;  %p20780_p5 = pmov %p20779_p0 }
  0x4d   : > { %p20781_p6 = pmov %p20779_p0 }
  0x4e   : > { %16577 = vsyncadd (%p20780_p5), [#allocation4], 4294948864 }
  0x4f   : > { %16579 = dma.done.wait (%p20781_p6), [#allocation7], 18432   ;;  %p20782_p9 = pmov %p20779_p0 }
  0x50   : > { %v16608_v0 = vmov 0   ;;  %p248_p12 = scmp.lt.s32.totalorder %s16663_s22, 1  ;;  %v15858_v1 = vld [vmem:[#allocation3 + $0x84] ss:$8 sps:$4 sm:$0xff]   ;;  %v15860_v2 = vld [vmem:[#allocation3 + $0x80] ss:$8 sps:$4 sm:$0xff]  }
  0x51   : > { %16581 = vsyncadd (%p20782_p9), [#allocation7], 4294948864  ;;  %6035 = vst [vmem:[#allocation2] sm:$0xff] %v16608_v0  ;;  %898 = vmatprep.mubr.bf16.mxu0 %v16608_v0  ;;  %866 = vmatprep.subr.bf16.mxu0 %v15858_v1  ;;  %v15861_v3 = vld [vmem:[#allocation3 + $0x94] ss:$8 sps:$4 sm:$0xff]   ;;  %v20783_v40 = vmov 0 }
  0x52   : > { %6036 = vst [vmem:[#allocation2 + $0x8] sm:$0xff] %v16608_v0  ;;  %6039 = vst [vmem:[#allocation2 + $0x20] sm:$0xff] %v16608_v0  ;;  %s249_s30 = scalar_select %p248_p12, %s16663_s22, 1  ;;  %867 = vmatpush1.bf16.msra.mxu0 %v15860_v2  ;;  %v15863_v4 = vld [vmem:[#allocation3 + $0x90] ss:$8 sps:$4 sm:$0xff]   ;;  %vm1476_vm3 = vcmask 1042432  }
  0x53   : > { %6042 = vst [vmem:[#allocation2 + $0x2b0] sm:$0xff] %v16608_v0  ;;  %6045 = vst [vmem:[#allocation2 + $0x2c8] sm:$0xff] %v16608_v0  ;;  %868 = vmatprep.subr.bf16.mxu0 %v15861_v3  ;;  %v15864_v5 = vld [vmem:[#allocation3 + $0xa4] ss:$8 sps:$4 sm:$0xff]   ;;  %v15866_v6 = vld [vmem:[#allocation3 + $0xa0] ss:$8 sps:$4 sm:$0xff]  }
  0x54   : > { %6047 = vst [vmem:[#allocation2 + $0x30] sm:$0xff] %v16608_v0  ;;  %6048 = vst [vmem:[#allocation2 + $0x58] sm:$0xff] %v16608_v0  ;;  %s15790_s8 = smul.u32 216, %s249_s30  ;;  %v15867_v7 = vld [vmem:[#allocation3 + $0xb4] ss:$8 sps:$4 sm:$0xff]   ;;  %vm1477_vm4 = vcmask 1046532  }
  0x55   : > { %6049 = vst [vmem:[#allocation2 + $0x80] sm:$0xff] %v16608_v0  ;;  %6050 = vst [vmem:[#allocation2 + $0xa8] sm:$0xff] %v16608_v0  ;;  %v15869_v9 = vld [vmem:[#allocation3 + $0xb0] ss:$8 sps:$4 sm:$0xff]   ;;  %v15870_v13 = vld [vmem:[#allocation3 + $0xc4] ss:$8 sps:$4 sm:$0xff]  }
  0x56   : > { %6051 = vst [vmem:[#allocation2 + $0xd0] sm:$0xff] %v16608_v0  ;;  %6052 = vst [vmem:[#allocation2 + $0xf8] sm:$0xff] %v16608_v0  ;;  %869 = vmatpush1.bf16.msra.mxu0 %v15863_v4  ;;  %s16805_s11 = scalar_lea.vmem %s20581_s0, %s15790_s8  ;;  %v15872_v16 = vld [vmem:[#allocation3 + $0xc0] ss:$8 sps:$4 sm:$0xff]   ;;  %v15873_v19 = vld [vmem:[#allocation3 + $0xd4] ss:$8 sps:$4 sm:$0xff]  }
  0x57   : > { %6053 = vst [vmem:[#allocation2 + $0x120] sm:$0xff] %v16608_v0  ;;  %6054 = vst [vmem:[#allocation2 + $0x148] sm:$0xff] %v16608_v0  ;;  %870 = vmatprep.subr.bf16.mxu0 %v15864_v5  ;;  %v254_v8 = vld [vmem:[%s16805_s11] sm:$0xf]  ;;  %v255_v10 = vld [vmem:[%s16805_s11 + $0x4] sm:$0xf] }
  0x58   : > { %6055 = vst [vmem:[#allocation2 + $0x170] sm:$0xff] %v16608_v0  ;;  %6056 = vst [vmem:[#allocation2 + $0x198] sm:$0xff] %v16608_v0  ;;  %v322_v11 = vshrl.u32 %v254_v8, 16  ;;  %v325_v12 = vshll.u32 %v254_v8, 16  ;;  %v331_v14 = vshll.u32 %v255_v10, 16  ;;  %v335_v15 = vshrl.u32 %v255_v10, 16 }
  0x59   : > { %6057 = vst [vmem:[#allocation2 + $0x1c0] sm:$0xff] %v16608_v0  ;;  %6058 = vst [vmem:[#allocation2 + $0x1e8] sm:$0xff] %v16608_v0  ;;  %v256_v22 = vld [vmem:[%s16805_s11 + $0xc] sm:$0xf]  ;;  %v302_v23 = vld [vmem:[%s16805_s11 + $0x8] sm:$0x1] }
  0x5a   : > { %6059 = vst [vmem:[#allocation2 + $0x210] sm:$0xff] %v16608_v0  ;;  %6060 = vst [vmem:[#allocation2 + $0x238] sm:$0xff] %v16608_v0  ;;  %871 = vmatpush1.bf16.msra.mxu0 %v15866_v6  ;;  %v324_v17 = vrot.slane %v322_v11, 4  ;;  %v327_v18 = vrot.slane %v325_v12, 5  ;;  %v333_v20 = vrot.slane %v331_v14, 5  ;;  %v337_v21 = vrot.slane %v335_v15, 4 }
  0x5b   : > { %6061 = vst [vmem:[#allocation2 + $0x260] sm:$0xff] %v16608_v0  ;;  %6062 = vst [vmem:[#allocation2 + $0x288] sm:$0xff] %v16608_v0  ;;  %872 = vmatprep.subr.bf16.mxu0 %v15867_v7  ;;  %v257_v24 = vld [vmem:[%s16805_s11 + $0x10] sm:$0xf]  ;;  %v346_v26 = vshrl.u32 %v256_v22, 16  ;;  %v349_v27 = vshll.u32 %v256_v22, 16 }
  0x5c   : > { %6063 = vst [vmem:[#allocation2 + $0x48] sm:$0xff] %v16608_v0  ;;  %6064 = vst [vmem:[#allocation2 + $0x70] sm:$0xff] %v16608_v0  ;;  %v328_v25 = vor.u32 %v327_v18, %v324_v17  ;;  %v15875_v28 = vld [vmem:[#allocation3 + $0xd0] ss:$8 sps:$4 sm:$0xff]   ;;  %v338_v29 = vor.u32 %v337_v21, %v333_v20  ;;  %v341_v30 = vshll.u32 %v302_v23, 16  ;;  %v355_v31 = vshll.u32 %v257_v24, 16 }
  0x5d   : > { %6065 = vst [vmem:[#allocation2 + $0x98] sm:$0xff] %v16608_v0  ;;  %6066 = vst [vmem:[#allocation2 + $0xc0] sm:$0xff] %v16608_v0  ;;  %v359_v32 = vshrl.u32 %v257_v24, 16  ;;  %v15876_v33 = vld [vmem:[#allocation3 + $0xe4] ss:$8 sps:$4 sm:$0xff]   ;;  %v348_v38 = vrot.slane %v346_v26, 4 }
  0x5e   : > { %6067 = vst [vmem:[#allocation2 + $0xe8] sm:$0xff] %v16608_v0  ;;  %6068 = vst [vmem:[#allocation2 + $0x110] sm:$0xff] %v16608_v0  ;;  %873 = vmatpush1.bf16.msra.mxu0 %v15869_v9  ;;  %vm318_vm0 = vsmask.f32 3328  ;;  %vm319_vm1 = vsmask.f32 7440 }
  0x5f   : > { %6069 = vst [vmem:[#allocation2 + $0x138] sm:$0xff] %v16608_v0  ;;  %6070 = vst [vmem:[#allocation2 + $0x160] sm:$0xff] %v16608_v0  ;;  %874 = vmatprep.subr.bf16.mxu0 %v15870_v13  ;;  %v15878_v34 = vld [vmem:[#allocation3 + $0xe0] ss:$8 sps:$4 sm:$0xff]   ;;  %v15879_v35 = vld [vmem:[#allocation3 + $0xf4] ss:$8 sps:$4 sm:$0xff]  }
  0x60   : > { %6071 = vst [vmem:[#allocation2 + $0x188] sm:$0xff] %v16608_v0  ;;  %6072 = vst [vmem:[#allocation2 + $0x1b0] sm:$0xff] %v16608_v0  ;;  %v329_v36 = vrot.slane %v328_v25, 4  ;;  %v303_v37 = vld [vmem:[%s16805_s11 + $0x14] sm:$0x1]  ;;  %v351_v39 = vrot.slane %v349_v27, 5 }
  0x61   : > { %6073 = vst [vmem:[#allocation2 + $0x1d8] sm:$0xff] %v16608_v0  ;;  %6074 = vst [vmem:[#allocation2 + $0x200] sm:$0xff] %v16608_v0  ;;  %v339_v41 = vrot.slane %v338_v29, 4  ;;  %v343_v42 = vrot.slane %v341_v30, 5  ;;  %v357_v43 = vrot.slane %v355_v31, 5  ;;  %v361_v44 = vrot.slane %v359_v32, 4 }
  0x62   : > { %6075 = vst [vmem:[#allocation2 + $0x228] sm:$0xff] %v16608_v0  ;;  %6076 = vst [vmem:[#allocation2 + $0x250] sm:$0xff] %v16608_v0  ;;  %875 = vmatpush1.bf16.msra.mxu0 %v15872_v16  ;;  %v258_v45 = vld [vmem:[%s16805_s11 + $0x18] sm:$0xf]  ;;  %v259_v46 = vld [vmem:[%s16805_s11 + $0x1c] sm:$0xf]  ;;  %v352_v49 = vor.u32 %v351_v39, %v348_v38 }
  0x63   : > { %6077 = vst [vmem:[#allocation2 + $0x278] sm:$0xff] %v16608_v0  ;;  %6078 = vst [vmem:[#allocation2 + $0x2a0] sm:$0xff] %v16608_v0  ;;  %876 = vmatprep.subr.bf16.mxu0 %v15873_v19  ;;  %v365_v47 = vshll.u32 %v303_v37, 16  ;;  %v370_v50 = vshrl.u32 %v258_v45, 16  ;;  %v373_v51 = vshll.u32 %v258_v45, 16  ;;  %v362_v54 = vor.u32 %v361_v44, %v357_v43  ;;  %s245_s7 = sand.u32 1, %s16592_s19  }
  0x64   : > { %vm16813_vm2 = vmor %vm318_vm0, %vm319_vm1  ;;  %v15881_v52 = vld [vmem:[#allocation3 + $0xf0] ss:$8 sps:$4 sm:$0xff]   ;;  %v379_v55 = vshll.u32 %v259_v46, 16  ;;  %v383_v56 = vshrl.u32 %v259_v46, 16  ;;  %v15884_v57 = vld [vmem:[#allocation3 + $0x4] ss:$8 sps:$4 sm:$0xff]  }
  0x65   : > { %v20784_v40 = vsel %vm16813_vm2, 4294967295, %v20783_v40  ;;  %v334_v48 = vsel %vm16813_vm2, %v329_v36, %v333_v20  ;;  %v344_v53 = vsel %vm16813_vm2, %v339_v41, %v343_v42  ;;  %v15882_v58 = vld [vmem:[#allocation3] ss:$8 sps:$4 sm:$0xff]   ;;  %v353_v60 = vrot.slane %v352_v49, 4  ;;  %v304_v61 = vld [vmem:[%s16805_s11 + $0x20] sm:$0x1]  ;;  %vm17071_vm5 = vmor %vm1476_vm3, %vm1477_vm4 }
  0x66   : > { %877 = vmatpush1.bf16.msra.mxu0 %v15875_v28  ;;  %20785 = vst [vmem:[#allocation12_spill] sm:$0xff] %v20784_v40  ;;  %v13191_v59 = vcombine.low %v334_v48, %v344_v53  ;;  %v372_v62 = vrot.slane %v370_v50, 4  ;;  %v375_v63 = vrot.slane %v373_v51, 5  ;;  %v363_v1 = vrot.slane %v362_v54, 4  ;;  %v260_v5 = vld [vmem:[%s16805_s11 + $0x24] sm:$0xf] }
  0x67   : > { %878 = vmatprep.subr.bf16.mxu0 %v15876_v33  ;;  %v367_v2 = vrot.slane %v365_v47, 5  ;;  %v381_v3 = vrot.slane %v379_v55, 5  ;;  %v385_v4 = vrot.slane %v383_v56, 4  ;;  %v15887_v6 = vld [vmem:[#allocation3 + $0x14] ss:$8 sps:$4 sm:$0xff]   ;;  %v389_v8 = vshll.u32 %v304_v61, 16 }
  0x68   : > { %v261_v7 = vld [vmem:[%s16805_s11 + $0x28] sm:$0xf]  ;;  %v358_v9 = vsel %vm16813_vm2, %v353_v60, %v357_v43  ;;  %v376_v10 = vor.u32 %v375_v63, %v372_v62  ;;  %v394_v11 = vshrl.u32 %v260_v5, 16  ;;  %v397_v12 = vshll.u32 %v260_v5, 16  ;;  %v15890_v18 = vld [vmem:[#allocation3 + $0x24] ss:$8 sps:$4 sm:$0xff]  }
  0x69   : > { %v368_v13 = vsel %vm16813_vm2, %v363_v1, %v367_v2  ;;  %v386_v14 = vor.u32 %v385_v4, %v381_v3  ;;  %v15885_v15 = vld [vmem:[#allocation3 + $0x10] ss:$8 sps:$4 sm:$0xff]   ;;  %v403_v16 = vshll.u32 %v261_v7, 16  ;;  %v407_v17 = vshrl.u32 %v261_v7, 16  ;;  %v305_v19 = vld [vmem:[%s16805_s11 + $0x2c] sm:$0x1] }
  0x6a   : > { %879 = vmatpush1.bf16.msra.mxu0 %v15878_v34  ;;  %v13192_v20 = vcombine.low %v358_v9, %v368_v13  ;;  %v377_v21 = vrot.slane %v376_v10, 4  ;;  %v396_v22 = vrot.slane %v394_v11, 4  ;;  %v399_v23 = vrot.slane %v397_v12, 5  ;;  %v262_v24 = vld [vmem:[%s16805_s11 + $0x30] sm:$0xf]  ;;  %s13189_s23 = sshll.u32 %s245_s7, 8 }
  0x6b   : > { %880 = vmatprep.subr.bf16.mxu0 %v15879_v35  ;;  %v387_v25 = vrot.slane %v386_v14, 4  ;;  %v391_v26 = vrot.slane %v389_v8, 5  ;;  %v405_v27 = vrot.slane %v403_v16, 5  ;;  %v409_v28 = vrot.slane %v407_v17, 4  ;;  %v15888_v29 = vld [vmem:[#allocation3 + $0x20] ss:$8 sps:$4 sm:$0xff]  }
  0x6c   : > { %v263_v30 = vld [vmem:[%s16805_s11 + $0x34] sm:$0xf]  ;;  %v15893_v31 = vld [vmem:[#allocation3 + $0x34] ss:$8 sps:$4 sm:$0xff]   ;;  %v413_v32 = vshll.u32 %v305_v19, 16  ;;  %v382_v33 = vsel %vm16813_vm2, %v377_v21, %v381_v3  ;;  %v400_v34 = vor.u32 %v399_v23, %v396_v22  ;;  %v418_v35 = vshrl.u32 %v262_v24, 16 }
  0x6d   : > { %v421_v36 = vshll.u32 %v262_v24, 16  ;;  %v392_v37 = vsel %vm16813_vm2, %v387_v25, %v391_v26  ;;  %v410_v38 = vor.u32 %v409_v28, %v405_v27  ;;  %v427_v39 = vshll.u32 %v263_v30, 16  ;;  %v15891_v42 = vld [vmem:[#allocation3 + $0x30] ss:$8 sps:$4 sm:$0xff]   ;;  %v15896_v43 = vld [vmem:[#allocation3 + $0x44] ss:$8 sps:$4 sm:$0xff]  }
  0x6e   : > { %881 = vmatpush1.bf16.msra.mxu0 %v15881_v52  ;;  %v431_v41 = vshrl.u32 %v263_v30, 16  ;;  %v264_v44 = vld [vmem:[%s16805_s11 + $0x3c] sm:$0xf]  ;;  %v13193_v45 = vcombine.low %v382_v33, %v392_v37  ;;  %v401_v46 = vrot.slane %v400_v34, 4  ;;  %v415_v47 = vrot.slane %v413_v32, 5  ;;  %s20465_s25 = scalar_lea.vmem [#allocation8], %s13189_s23 }
  0x6f   : > { %1235 = vmatprep.subr.bf16.mxu0 %v15884_v57  ;;  %v420_v48 = vrot.slane %v418_v35, 4  ;;  %v265_v49 = vld [vmem:[%s16805_s11 + $0x40] sm:$0xf]  ;;  %v411_v50 = vrot.slane %v410_v38, 4  ;;  %v423_v51 = vrot.slane %v421_v36, 5  ;;  %v429_v52 = vrot.slane %v427_v39, 5 }
  0x70   : > { %v433_v53 = vrot.slane %v431_v41, 4  ;;  %v15894_v54 = vld [vmem:[#allocation3 + $0x40] ss:$8 sps:$4 sm:$0xff]   ;;  %v442_v56 = vshrl.u32 %v264_v44, 16  ;;  %v445_v57 = vshll.u32 %v264_v44, 16  ;;  %v451_v60 = vshll.u32 %v265_v49, 16 }
  0x71   : > { %899 = vmatmul.mubr.bf16.vlgmr.msra.gmra.mrb[0].mxu0 %v13191_v59  ;;  %v306_v55 = vld [vmem:[%s16805_s11 + $0x38] sm:$0x1]  ;;  %v406_v59 = vsel %vm16813_vm2, %v401_v46, %v405_v27  ;;  %v455_v61 = vshrl.u32 %v265_v49, 16  ;;  %v416_v62 = vsel %vm16813_vm2, %v411_v50, %v415_v47  ;;  %v424_v63 = vor.u32 %v423_v51, %v420_v48  ;;  %v15897_v3 = vld [vmem:[#allocation3 + $0x50] ss:$8 sps:$4 sm:$0xff]   ;;  %s14269_s26 = sshll.u32 %s16663_s22, 12 }
  0x72   : > { %1236 = vmatpush1.bf16.msra.mxu0 %v15882_v58  ;;  %908 = vmatprep.mubr.bf16.mxu0 %v16608_v0  ;;  %v15899_v58 = vld [vmem:[#allocation3 + $0x54] ss:$8 sps:$4 sm:$0xff]   ;;  %v434_v1 = vor.u32 %v433_v53, %v429_v52  ;;  %v437_v2 = vshll.u32 %v306_v55, 16  ;;  %v444_v4 = vrot.slane %v442_v56, 4  ;;  %v447_v5 = vrot.slane %v445_v57, 5  ;;  %s13097_s6 = sshll.u32 %s20465_s25, 4  ;;  %s20532_s10 = scalar_lea.hbm %s20586_s5, %s14269_s26  ;;  %s20534_s6 = int_to_ptr.vmem [resolvable:$true] %s13097_s6 }
  0x73   : > { %1237 = vmatprep.subr.bf16.mxu0 %v15887_v6  ;;  %v15902_v6 = vld [vmem:[#allocation3 + $0x64] ss:$8 sps:$4 sm:$0xff]   ;;  %v307_v7 = vld [vmem:[%s16805_s11 + $0x44] sm:$0x1]  ;;  %v13194_v8 = vcombine.low %v406_v59, %v416_v62  ;;  %v16848_v9 = vrot.slane %v451_v60, 5  ;;  %v457_v10 = vrot.slane %v455_v61, 4 }
  0x74   : > { %v266_v11 = vld [vmem:[%s16805_s11 + $0x48] sm:$0xf]  ;;  %v267_v12 = vld [vmem:[%s16805_s11 + $0x4c] sm:$0xf]  ;;  %v425_v13 = vrot.slane %v424_v63, 4  ;;  %v435_v14 = vrot.slane %v434_v1, 4  ;;  %v448_v17 = vor.u32 %v447_v5, %v444_v4 }
  0x75   : > { %v15900_v16 = vld [vmem:[#allocation3 + $0x60] ss:$8 sps:$4 sm:$0xff]   ;;  %v15905_v19 = vld [vmem:[#allocation3 + $0x74] ss:$8 sps:$4 sm:$0xff]   ;;  %v469_v21 = vshll.u32 %v266_v11, 16  ;;  %v475_v22 = vshll.u32 %v267_v12, 16  ;;  %v458_v23 = vor.u32 %v457_v10, %v16848_v9 }
  0x76   : > { %1238 = vmatpush1.bf16.msra.mxu0 %v15885_v15  ;;  %v439_v15 = vrot.slane %v437_v2, 5  ;;  %v479_v24 = vshrl.u32 %v267_v12, 16  ;;  %v268_v25 = vld [vmem:[%s16805_s11 + $0x54] sm:$0xf]  ;;  %v269_v26 = vld [vmem:[%s16805_s11 + $0x58] sm:$0xf]  ;;  %v430_v27 = vsel %vm16813_vm2, %v425_v13, %v429_v52 }
  0x77   : > { %1239 = vmatprep.subr.bf16.mxu0 %v15890_v18  ;;  %v461_v18 = vshll.u32 %v307_v7, 16  ;;  %v15903_v30 = vld [vmem:[#allocation3 + $0x70] ss:$8 sps:$4 sm:$0xff]   ;;  %v449_v32 = vrot.slane %v448_v17, 4  ;;  %v308_v34 = vld [vmem:[%s16805_s11 + $0x50] sm:$0x1] }
  0x78   : > { %v440_v28 = vsel %vm16813_vm2, %v435_v14, %v439_v15  ;;  %v471_v36 = vrot.slane %v469_v21, 5  ;;  %v477_v37 = vrot.slane %v475_v22, 5  ;;  %v459_v39 = vrot.slane %v458_v23, 4  ;;  %v309_v52 = vld [vmem:[%s16805_s11 + $0x5c] sm:$0x1]  ;;  %s20540_s9 = scalar_lea.sflag [#allocation5], %s245_s7 }
  0x79   : > { %909 = vmatmul.mubr.bf16.gmra.mrb[4].mxu0 %v13192_v20  ;;  %v466_v20 = vshrl.u32 %v266_v11, 16  ;;  %v463_v33 = vrot.slane %v461_v18, 5  ;;  %v13195_v38 = vcombine.low %v430_v27, %v440_v28  ;;  %v481_v41 = vrot.slane %v479_v24, 4  ;;  %v310_v59 = vld [vmem:[%s16805_s11 + $0x68] sm:$0x1]  ;;  %s16530_s22 = scalar_lea.vmem %s20534_s6, 4096 }
  0x7a   : > { %918 = vmatprep.mubr.bf16.mxu0 %v16608_v0  ;;  %1240 = vmatpush1.bf16.msra.mxu0 %v15888_v29  ;;  %v270_v29 = vld [vmem:[%s16805_s11 + $0x60] sm:$0xf]  ;;  %v499_v44 = vshll.u32 %v269_v26, 16  ;;  %v454_v49 = vsel %vm16813_vm2, %v449_v32, %v16848_v9  ;;  %v485_v51 = vshll.u32 %v308_v34, 16  ;;  %v272_v62 = vld [vmem:[%s16805_s11 + $0x6c] sm:$0xf]  ;;  %p16531_p10 = scmp.ne.s32.totalorder %s20534_s6, %s16530_s22 }
  0x7b   : > { %1241 = vmatprep.subr.bf16.mxu0 %v15893_v31  ;;  %v15909_v31 = vld [vmem:[#allocation3 + $0x104] ss:$8 sps:$4 sm:$0xff]   ;;  %v468_v35 = vrot.slane %v466_v20, 4  ;;  %v514_v46 = vshrl.u32 %v270_v29, 16  ;;  %v517_v47 = vshll.u32 %v270_v29, 16  ;;  %v464_v50 = vsel %vm16813_vm2, %v459_v39, %v463_v33  ;;  %p21188_p1 = scmp.ne.s32.totalorder %s20774_s28, 0 }
  0x7c   : > { %v482_v55 = vor.u32 %v481_v41, %v477_v37  ;;  %v501_v57 = vrot.slane %v499_v44, 5  ;;  %v509_v1 = vshll.u32 %v309_v52, 16  ;;  %v13196_v2 = vcombine.low %v454_v49, %v464_v50  ;;  %v273_v11 = vld [vmem:[%s16805_s11 + $0x70] sm:$0xf]  ;;  %v274_v14 = vld [vmem:[%s16805_s11 + $0x78] sm:$0xf] }
  0x7d   : > { %v472_v48 = vor.u32 %v471_v36, %v468_v35  ;;  %v516_v60 = vrot.slane %v514_v46, 4  ;;  %v519_v61 = vrot.slane %v517_v47, 5  ;;  %v533_v10 = vshll.u32 %v310_v59, 16  ;;  %v311_v22 = vld [vmem:[%s16805_s11 + $0x74] sm:$0x1]  ;;  %p16532_p2 = pnand %p16531_p10, %p21188_p1 }
  0x7e   : > { %1242 = vmatpush1.bf16.msra.mxu0 %v15891_v42  ;;  %v490_v42 = vshrl.u32 %v268_v25, 16  ;;  %v483_v5 = vrot.slane %v482_v55, 4  ;;  %v538_v12 = vshrl.u32 %v272_v62, 16  ;;  %v541_v13 = vshll.u32 %v272_v62, 16  ;;  %v275_v29 = vld [vmem:[%s16805_s11 + $0x7c] sm:$0xf] }
  0x7f   : > { %1243 = vmatprep.subr.bf16.mxu0 %v15896_v43  ;;  %v493_v43 = vshll.u32 %v268_v25, 16  ;;  %v473_v63 = vrot.slane %v472_v48, 4  ;;  %v520_v9 = vor.u32 %v519_v61, %v516_v60  ;;  %v547_v23 = vshll.u32 %v273_v11, 16  ;;  %v276_v36 = vld [vmem:[%s16805_s11 + $0x84] sm:$0xf]  ;;  %p16533_p3 = pneg %p16532_p2 }
  0x80   : > { %v492_v53 = vrot.slane %v490_v42, 4  ;;  %v535_v25 = vrot.slane %v533_v10, 5  ;;  %v543_v27 = vrot.slane %v541_v13, 5  ;;  %v551_v28 = vshrl.u32 %v273_v11, 16  ;;  %v277_v44 = vld [vmem:[%s16805_s11 + $0x88] sm:$0xf] }
  0x81   : > { %919 = vmatmul.mubr.bf16.gmra.mrb[8].mxu0 %v13193_v45  ;;  %v503_v45 = vshrl.u32 %v269_v26, 16  ;;  %v495_v56 = vrot.slane %v493_v43, 5  ;;  %v478_v15 = vsel %vm16813_vm2, %v473_v63, %v477_v37  ;;  %v521_v24 = vrot.slane %v520_v9, 4  ;;  %v312_v49 = vld [vmem:[%s16805_s11 + $0x80] sm:$0x1] }
  0x82   : > { %928 = vmatprep.mubr.bf16.mxu0 %v16608_v0  ;;  %1244 = vmatpush1.bf16.msra.mxu0 %v15894_v54  ;;  %v271_v54 = vld [vmem:[%s16805_s11 + $0x64] sm:$0xf]  ;;  %v540_v26 = vrot.slane %v538_v12, 4  ;;  %v562_v32 = vshrl.u32 %v274_v14, 16  ;;  %v16881_v33 = vrot.slane %v547_v23, 5  ;;  %v557_v34 = vshll.u32 %v311_v22, 16 }
  0x83   : > { %1245 = vmatprep.subr.bf16.mxu0 %v15899_v58  ;;  %v505_v58 = vrot.slane %v503_v45, 4  ;;  %v527_v4 = vshrl.u32 %v271_v54, 16  ;;  %v496_v7 = vor.u32 %v495_v56, %v492_v53  ;;  %v565_v35 = vshll.u32 %v274_v14, 16  ;;  %v313_v56 = vld [vmem:[%s16805_s11 + $0x8c] sm:$0x1] }
  0x84   : > { %v564_v39 = vrot.slane %v562_v32, 4  ;;  %v571_v41 = vshll.u32 %v275_v29, 16  ;;  %v575_v45 = vshrl.u32 %v275_v29, 16  ;;  %v586_v47 = vshrl.u32 %v276_v36, 16  ;;  %v279_v62 = vld [vmem:[%s16805_s11 + $0x94] sm:$0xf] }
  0x85   : > { %v529_v18 = vrot.slane %v527_v4, 4  ;;  %v497_v20 = vrot.slane %v496_v7, 4  ;;  %v589_v48 = vshll.u32 %v276_v36, 16  ;;  %v595_v50 = vshll.u32 %v277_v44, 16  ;;  %v314_v11 = vld [vmem:[%s16805_s11 + $0x98] sm:$0x1] }
  0x86   : > { %1246 = vmatpush1.bf16.msra.mxu0 %v15897_v3  ;;  %v523_v3 = vshll.u32 %v271_v54, 16  ;;  %v544_v53 = vor.u32 %v543_v27, %v540_v26  ;;  %v567_v54 = vrot.slane %v565_v35, 5  ;;  %v16893_v55 = vrot.slane %v571_v41, 5  ;;  %v16912_v26 = vld [vmem:[#allocation2] sm:$0xff]  ;;  %v6416_v40 = vld [vmem:[#allocation2 + $0x238] sm:$0x88] }
  0x87   : > { %1247 = vmatprep.subr.bf16.mxu0 %v15902_v6  ;;  %v487_v6 = vrot.slane %v485_v51, 5  ;;  %v502_v42 = vsel %vm16813_vm2, %v497_v20, %v501_v57  ;;  %v599_v51 = vshrl.u32 %v277_v44, 16  ;;  %v577_v59 = vrot.slane %v575_v45, 4 }
  0x88   : > { %v525_v17 = vrot.slane %v523_v3, 5  ;;  %v588_v60 = vrot.slane %v586_v47, 4  ;;  %v591_v61 = vrot.slane %v589_v48, 5  ;;  %v581_v7 = vshll.u32 %v312_v49, 16  ;;  %v315_v47 = vld [vmem:[%s16805_s11 + $0xa4] sm:$0x1] }
  0x89   : > { %929 = vmatmul.mubr.bf16.gmra.mrb[12].mxu0 %v13194_v8  ;;  %v506_v8 = vor.u32 %v505_v58, %v501_v57  ;;  %v278_v57 = vld [vmem:[%s16805_s11 + $0x90] sm:$0xf]  ;;  %v601_v3 = vrot.slane %v599_v51, 4  ;;  %v605_v10 = vshll.u32 %v313_v56, 16  ;;  %v619_v14 = vshll.u32 %v279_v62, 16 }
  0x8a   : > { %938 = vmatprep.mubr.bf16.mxu0 %v16608_v0  ;;  %1248 = vmatpush1.bf16.msra.mxu0 %v15900_v16  ;;  %v511_v16 = vrot.slane %v509_v1, 5  ;;  %v526_v52 = vsel %vm16813_vm2, %v521_v24, %v525_v17  ;;  %v559_v1 = vrot.slane %v557_v34, 5  ;;  %v592_v9 = vor.u32 %v591_v61, %v588_v60  ;;  %v16930_v48 = vld [vmem:[%s16805_s11 + $0xac] sm:$0xf]  ;;  %v16936_v56 = vld [vmem:[%s16805_s11 + $0xb4] sm:$0xf] }
  0x8b   : > { %1249 = vmatprep.subr.bf16.mxu0 %v15905_v19  ;;  %v488_v19 = vsel %vm16813_vm2, %v483_v5, %v487_v6  ;;  %v507_v21 = vrot.slane %v506_v8, 4  ;;  %v545_v5 = vrot.slane %v544_v53, 4  ;;  %v568_v6 = vor.u32 %v567_v54, %v564_v39  ;;  %v16920_v39 = vld [vmem:[%s16805_s11 + $0xa8] sm:$0xf]  ;;  %v316_v54 = vld [vmem:[%s16805_s11 + $0xb0] sm:$0x1] }
  0x8c   : > { %v578_v8 = vor.u32 %v577_v59, %v16893_v55  ;;  %v610_v12 = vshrl.u32 %v278_v57, 16  ;;  %v583_v20 = vrot.slane %v581_v7, 5  ;;  %v593_v22 = vrot.slane %v592_v9, 4 }
  0x8d   : > { %v512_v43 = vsel %vm16813_vm2, %v507_v21, %v511_v16  ;;  %v623_v16 = vshrl.u32 %v279_v62, 16  ;;  %v607_v23 = vrot.slane %v605_v10, 5  ;;  %v16917_v29 = vrot.slane %v619_v14, 5 }
  0x8e   : > { %1250 = vmatpush1.bf16.msra.mxu0 %v15903_v30  ;;  %v13197_v30 = vcombine.low %v478_v15, %v488_v19  ;;  %v13198_v46 = vcombine.low %v502_v42, %v512_v43  ;;  %v569_v19 = vrot.slane %v568_v6, 4  ;;  %v579_v21 = vrot.slane %v578_v8, 4  ;;  %v317_v8 = vld [vmem:[%s16805_s11 + $0xbc] sm:$0x1] }
  0x8f   : > { %1752 = vmatprep.subr.bf16.mxu0 %v15909_v31  ;;  %v530_v31 = vor.u32 %v529_v18, %v525_v17  ;;  %v280_v17 = vld [vmem:[%s16805_s11 + $0x9c] sm:$0xf]  ;;  %v550_v18 = vsel %vm16813_vm2, %v545_v5, %v16881_v33  ;;  %v612_v24 = vrot.slane %v610_v12, 4  ;;  %v625_v32 = vrot.slane %v623_v16, 4 }
  0x90   : > { %v637_v34 = vshll.u32 %v280_v17, 16  ;;  %v574_v43 = vsel %vm16813_vm2, %v569_v19, %v16893_v55  ;;  %v584_v44 = vsel %vm16813_vm2, %v579_v21, %v583_v20  ;;  %v658_v49 = vshrl.u32 %v16920_v39, 16 }
  0x91   : > { %939 = vmatmul.mubr.bf16.gmra.mrb[16].mxu0 %v13195_v38  ;;  %v531_v37 = vrot.slane %v530_v31, 4  ;;  %v553_v38 = vrot.slane %v551_v28, 4  ;;  %v13201_v51 = vcombine.low %v574_v43, %v584_v44  ;;  %v626_v55 = vor.u32 %v625_v32, %v16917_v29 }
  0x92   : > { %948 = vmatprep.mubr.bf16.mxu0 %v16608_v0  ;;  %v639_v42 = vrot.slane %v637_v34, 5  ;;  %v653_v61 = vshll.u32 %v315_v47, 16  ;;  %v667_v62 = vshll.u32 %v16930_v48, 16  ;;  %v677_v5 = vshll.u32 %v316_v54, 16  ;;  %v16329_v47 = vld [vmem:[%s16805_s11] sm:$0xf] }
  0x93   : > { %v536_v58 = vsel %vm16813_vm2, %v531_v37, %v535_v25  ;;  %v554_v63 = vor.u32 %v553_v38, %v16881_v33  ;;  %v281_v25 = vld [vmem:[%s16805_s11 + $0xa0] sm:$0xf]  ;;  %v634_v33 = vshrl.u32 %v280_v17, 16  ;;  %v682_v6 = vshrl.u32 %v16936_v56, 16  ;;  %v15917_v54 = vld [vmem:[#allocation3 + $0x120] ss:$8 sps:$4 sm:$0xff]  }
  0x94   : > { %v13199_v4 = vcombine.low %v526_v52, %v536_v58  ;;  %v643_v38 = vshll.u32 %v281_v25, 16  ;;  %v660_v58 = vrot.slane %v658_v49, 4  ;;  %v685_v9 = vshll.u32 %v16936_v56, 16  ;;  %v16979_v49 = vld [vmem:[%s16805_s11 + $0x4] sm:$0xf] }
  0x95   : > { %v555_v13 = vrot.slane %v554_v63, 4  ;;  %v636_v41 = vrot.slane %v634_v33, 4  ;;  %v671_v63 = vshrl.u32 %v16930_v48, 16  ;;  %v627_v12 = vrot.slane %v626_v55, 4  ;;  %v16331_v55 = vld [vmem:[%s16805_s11 + $0xc] sm:$0xf] }
  0x96   : > { %v645_v52 = vrot.slane %v643_v38, 5  ;;  %v679_v17 = vrot.slane %v677_v5, 5  ;;  %v687_v20 = vrot.slane %v685_v9, 5  ;;  %v15934_v5 = vld [vmem:[#allocation3 + $0x154] ss:$8 sps:$4 sm:$0xff]  }
  0x97   : > { %v560_v27 = vsel %vm16813_vm2, %v555_v13, %v559_v1  ;;  %v640_v60 = vor.u32 %v639_v42, %v636_v41  ;;  %v673_v16 = vrot.slane %v671_v63, 4  ;;  %v15927_v63 = vld [vmem:[#allocation3 + $0x140] ss:$8 sps:$4 sm:$0xff]   ;;  %v16335_v9 = vld [vmem:[%s16805_s11 + $0x24] sm:$0xf] }
  0x98   : > { %v13200_v35 = vcombine.low %v550_v18, %v560_v27  ;;  %v684_v18 = vrot.slane %v682_v6, 4  ;;  %v15932_v6 = vld [vmem:[#allocation3 + $0x150] ss:$8 sps:$4 sm:$0xff]   ;;  %vm6422_vm6 = vsmask.f32 256 }
  0x99   : > { %949 = vmatmul.mubr.bf16.gmra.mrb[20].mxu0 %v13196_v2  ;;  %v16902_v2 = vrot.slane %v595_v50, 5  ;;  %v661_v50 = vshll.u32 %v16920_v39, 16  ;;  %v641_v13 = vrot.slane %v640_v60, 4  ;;  %v15924_v60 = vld [vmem:[#allocation3 + $0x134] ss:$8 sps:$4 sm:$0xff]  }
  0x9a   : > { %958 = vmatprep.mubr.bf16.mxu0 %v16608_v0  ;;  %vm6423_vm7 = vsmask.f32 4368 }
  0x9b   : > { %v602_v15 = vor.u32 %v601_v3, %v16902_v2  ;;  %v663_v59 = vrot.slane %v661_v50, 5  ;;  %v598_v1 = vsel %vm16813_vm2, %v593_v22, %v16902_v2  ;;  %v655_v2 = vrot.slane %v653_v61, 5  ;;  %v15922_v61 = vld [vmem:[#allocation3 + $0x130] ss:$8 sps:$4 sm:$0xff]   ;;  %vm18073_vm8 = vmor %vm6422_vm6, %vm6423_vm7 }
  0x9c   : > { %v13223_v50 = vcombine.low %v16329_v47, %v16979_v49  ;;  %v1481_v47 = vrot.slane %v16979_v49, 5 }
  0x9d   : > { %v603_v31 = vrot.slane %v602_v15, 4  ;;  %v664_v7 = vor.u32 %v663_v59, %v660_v58  ;;  %v669_v15 = vrot.slane %v667_v62, 5  ;;  %v16985_v58 = vld [vmem:[%s16805_s11 + $0x10] sm:$0xf]  ;;  %v15929_v62 = vld [vmem:[#allocation3 + $0x144] ss:$8 sps:$4 sm:$0xff]  }
  0x9e   : > { %v13224_v59 = vcombine.low %v16331_v55, %v16985_v58  ;;  %v1483_v55 = vrot.slane %v1481_v47, 4 }
  0x9f   : > { %v608_v3 = vsel %vm16813_vm2, %v603_v31, %v607_v23  ;;  %v665_v19 = vrot.slane %v664_v7, 4  ;;  %v701_v23 = vshll.u32 %v317_v8, 16  ;;  %v15939_v7 = vld [vmem:[#allocation3 + $0x164] ss:$8 sps:$4 sm:$0xff]   ;;  %v15937_v8 = vld [vmem:[#allocation3 + $0x160] ss:$8 sps:$4 sm:$0xff]  }
  0xa1   : > { %959 = vmatmul.mubr.bf16.gmra.mrb[24].mxu0 %v13197_v30  ;;  %v629_v30 = vshll.u32 %v314_v11, 16  ;;  %v13202_v11 = vcombine.low %v598_v1, %v608_v3  ;;  %v670_v38 = vsel %vm16813_vm2, %v665_v19, %v669_v15  ;;  %v16333_v1 = vld [vmem:[%s16805_s11 + $0x18] sm:$0xf]  ;;  %v16991_v3 = vld [vmem:[%s16805_s11 + $0x1c] sm:$0xf] }
  0xa2   : > { %968 = vmatprep.mubr.bf16.mxu0 %v16608_v0  ;;  %v16341_v19 = vld [vmem:[%s16805_s11 + $0x48] sm:$0xf] }
  0xa3   : > { %v631_v37 = vrot.slane %v629_v30, 5  ;;  %v688_v30 = vor.u32 %v687_v20, %v684_v18  ;;  %v17015_v20 = vld [vmem:[%s16805_s11 + $0x4c] sm:$0xf] }
  0xa5   : > { %v689_v33 = vrot.slane %v688_v30, 4  ;;  %v16347_v30 = vld [vmem:[%s16805_s11 + $0x6c] sm:$0xf] }
  0xa9   : > { %969 = vmatmul.mubr.bf16.gmra.mrb[28].mxu0 %v13198_v46  ;;  %v647_v46 = vshrl.u32 %v281_v25, 16  ;;  %v632_v25 = vsel %vm16813_vm2, %v627_v12, %v631_v37  ;;  %v15944_v12 = vld [vmem:[#allocation3 + $0x174] ss:$8 sps:$4 sm:$0xff]  }
  0xaa   : > { %978 = vmatprep.mubr.bf16.mxu0 %v16608_v0  ;;  %v613_v0 = vshll.u32 %v278_v57, 16  ;;  %v16939_v57 = vld [vmem:[%s16805_s11 + $0xb8] sm:$0xf] }
  0xab   : > { %v649_v53 = vrot.slane %v647_v46, 4  ;;  %v691_v10 = vshll.u32 %v16939_v57, 16  ;;  %v15907_v46 = vld [vmem:[#allocation3 + $0x100] ss:$8 sps:$4 sm:$0xff]  }
  0xac   : > { %v615_v28 = vrot.slane %v613_v0, 5  ;;  %v695_v0 = vshrl.u32 %v16939_v57, 16 }
  0xad   : > { %v693_v21 = vrot.slane %v691_v10, 5  ;;  %v16997_v10 = vld [vmem:[%s16805_s11 + $0x28] sm:$0xf] }
  0xae   : > { %v616_v36 = vor.u32 %v615_v28, %v612_v24  ;;  %v697_v22 = vrot.slane %v695_v0, 4  ;;  %v674_v28 = vor.u32 %v673_v16, %v669_v15  ;;  %v15948_v0 = vld [vmem:[#allocation3 + $0x184] ss:$8 sps:$4 sm:$0xff]  }
  0xaf   : > { %v694_v43 = vsel %vm16813_vm2, %v689_v33, %v693_v21  ;;  %v16339_v16 = vld [vmem:[%s16805_s11 + $0x3c] sm:$0xf]  ;;  %v16349_v33 = vld [vmem:[%s16805_s11 + $0x78] sm:$0xf] }
  0xb0   : > { %v617_v45 = vrot.slane %v616_v36, 4  ;;  %v698_v31 = vor.u32 %v697_v22, %v693_v21  ;;  %v675_v32 = vrot.slane %v674_v28, 4  ;;  %v646_v36 = vsel %vm16813_vm2, %v641_v13, %v645_v52  ;;  %v15942_v13 = vld [vmem:[#allocation3 + $0x170] ss:$8 sps:$4 sm:$0xff]   ;;  %v16343_v22 = vld [vmem:[%s16805_s11 + $0x54] sm:$0xf] }
  0xb1   : > { %979 = vmatmul.mubr.bf16.gmra.mrb[32].mxu0 %v13199_v4  ;;  %v650_v4 = vor.u32 %v649_v53, %v645_v52  ;;  %v15912_v52 = vld [vmem:[#allocation3 + $0x110] ss:$8 sps:$4 sm:$0xff]   ;;  %v15919_v53 = vld [vmem:[#allocation3 + $0x124] ss:$8 sps:$4 sm:$0xff]   ;;  %v13229_v21 = vcombine.low %v16341_v19, %v17015_v20  ;;  %v1502_v19 = vrot.slane %v16997_v10, 5 }
  0xb2   : > { %988 = vmatprep.mubr.bf16.mxu0 %v16912_v26  ;;  %v622_v24 = vsel %vm16813_vm2, %v617_v45, %v16917_v29  ;;  %v699_v34 = vrot.slane %v698_v31, 4  ;;  %v680_v41 = vsel %vm16813_vm2, %v675_v32, %v679_v17  ;;  %v17009_v17 = vld [vmem:[%s16805_s11 + $0x40] sm:$0xf]  ;;  %v17033_v31 = vld [vmem:[%s16805_s11 + $0x70] sm:$0xf] }
  0xb3   : > { %v651_v14 = vrot.slane %v650_v4, 4  ;;  %v13203_v27 = vcombine.low %v622_v24, %v632_v25  ;;  %v13205_v42 = vcombine.low %v670_v38, %v680_v41  ;;  %v13225_v4 = vcombine.low %v16333_v1, %v16991_v3  ;;  %v16345_v25 = vld [vmem:[%s16805_s11 + $0x60] sm:$0xf]  ;;  %v17053_v41 = vld [vmem:[%s16805_s11 + $0x94] sm:$0xf] }
  0xb4   : > { %v13228_v18 = vcombine.low %v16339_v16, %v17009_v17  ;;  %v13232_v32 = vcombine.low %v16347_v30, %v17033_v31  ;;  %v15957_v16 = vld [vmem:[#allocation3 + $0x1b4] ss:$8 sps:$4 sm:$0xff]   ;;  %v1504_v30 = vrot.slane %v1502_v19, 4 }
  0xb5   : > { %v656_v29 = vsel %vm16813_vm2, %v651_v14, %v655_v2  ;;  %v16337_v14 = vld [vmem:[%s16805_s11 + $0x30] sm:$0xf]  ;;  %v17003_v2 = vld [vmem:[%s16805_s11 + $0x34] sm:$0xf] }
  0xb6   : > { %v13204_v37 = vcombine.low %v646_v36, %v656_v29  ;;  %v13227_v15 = vcombine.low %v16337_v14, %v17003_v2  ;;  %v17042_v36 = vld [vmem:[#allocation2] sm:$0xff] }
  0xb7   : > { %v16352_v29 = vld [vmem:[%s16805_s11 + $0x84] sm:$0xf] }
  0xb9   : > { %989 = vmatmul.mubr.bf16.gmra.mrb[36].mxu0 %v13200_v35  ;;  %v703_v35 = vrot.slane %v701_v23, 5  ;;  %v17021_v23 = vld [vmem:[%s16805_s11 + $0x58] sm:$0xf] }
  0xba   : > { %998 = vmatprep.mubr.bf16.mxu0 %v16912_v26  ;;  %v13230_v24 = vcombine.low %v16343_v22, %v17021_v23  ;;  %v1431_v22 = vld [vmem:[%s16805_s11 + $0x24] sm:$0xe] }
  0xbb   : > { %v704_v44 = vsel %vm16813_vm2, %v699_v34, %v703_v35  ;;  %v17039_v34 = vld [vmem:[%s16805_s11 + $0x7c] sm:$0xf] }
  0xbc   : > { %v13206_v45 = vcombine.low %v694_v43, %v704_v44  ;;  %v13233_v35 = vcombine.low %v16349_v33, %v17039_v34  ;;  %v16356_v43 = vld [vmem:[%s16805_s11 + $0x9c] sm:$0xf]  ;;  %v17059_v44 = vld [vmem:[%s16805_s11 + $0xa0] sm:$0xf] }
  0xc1   : > { %999 = vmatmul.mubr.bf16.gmra.mrb[40].mxu0 %v13201_v51  ;;  %v15914_v51 = vld [vmem:[#allocation3 + $0x114] ss:$8 sps:$4 sm:$0xff]  }
  0xc2   : > { %1008 = vmatprep.mubr.bf16.mxu0 %v16912_v26 }
  0xc9   : > { %1009 = vmatmul.mubr.bf16.gmra.mrb[44].mxu0 %v13202_v11  ;;  %v13226_v11 = vcombine.low %v16335_v9, %v16997_v10  ;;  %v15954_v9 = vld [vmem:[#allocation3 + $0x1a4] ss:$8 sps:$4 sm:$0xff]  }
  0xca   : > { %1018 = vmatprep.mubr.bf16.mxu0 %v16912_v26 }
  0xd1   : > { %1019 = vmatmul.mubr.bf16.gmra.mrb[48].mxu0 %v13203_v27  ;;  %v17027_v27 = vld [vmem:[%s16805_s11 + $0x64] sm:$0xf] }
  0xd2   : > { %1028 = vmatprep.mubr.bf16.mxu0 %v16912_v26  ;;  %v13231_v28 = vcombine.low %v16345_v25, %v17027_v27 }
  0xd9   : > { %1029 = vmatmul.mubr.bf16.gmra.mrb[52].mxu0 %v13204_v37  ;;  %v17047_v37 = vld [vmem:[%s16805_s11 + $0x88] sm:$0xf] }
  0xda   : > { %1038 = vmatprep.mubr.bf16.mxu0 %v16912_v26  ;;  %v13234_v38 = vcombine.low %v16352_v29, %v17047_v37  ;;  %v15963_v29 = vld [vmem:[#allocation3 + $0x1d4] ss:$8 sps:$4 sm:$0xff]  }
  0xe1   : > { %1039 = vmatmul.mubr.bf16.gmra.mrb[56].mxu0 %v13205_v42 }
  0xe2   : > { %1048 = vmatprep.mubr.bf16.mxu0 %v16912_v26 }
  0xe9   : > { %1049 = vmatmul.mubr.bf16.gmra.mrb[60].mxu0 %v13206_v45  ;;  %v13236_v45 = vcombine.low %v16356_v43, %v17059_v44  ;;  %v1432_v43 = vld [vmem:[%s16805_s11 + $0x30] sm:$0xe] }
  0xea   : > { %1267 = vmatprep.mubr.bf16.mxu0 %v16912_v26 }
  0xf1   : > { %1268 = vmatmul.mubr.bf16.vlgmr.msra.gmra.mrb[0].mxu0 %v13223_v50  ;;  %v1428_v50 = vld [vmem:[%s16805_s11] sm:$0xe] }
  0xf2   : > { %1753 = vmatpush1.bf16.msra.mxu0 %v15907_v46  ;;  %1277 = vmatprep.mubr.bf16.mxu0 %v16912_v26  ;;  %v13237_v46 = vcombine.low %v16920_v39, %v16930_v48 }
  0xf3   : > { %1754 = vmatprep.subr.bf16.mxu0 %v15914_v51  ;;  %v13238_v51 = vcombine.low %v16936_v56, %v16939_v57  ;;  %v1488_v56 = vrot.slane %v16985_v58, 5  ;;  %v1429_v57 = vld [vmem:[%s16805_s11 + $0xc] sm:$0xe] }
  0xf6   : > { %1755 = vmatpush1.bf16.msra.mxu0 %v15912_v52  ;;  %v16358_v52 = vld [vmem:[%s16805_s11 + $0x8] sm:$0x1] }
  0xf7   : > { %1756 = vmatprep.subr.bf16.mxu0 %v15919_v53  ;;  %v1484_v53 = vrot.slane %v16358_v52, 5 }
  0xf9   : > { %1278 = vmatmul.mubr.bf16.gmra.mrb[4].mxu0 %v13224_v59  ;;  %v1485_v48 = vsel %vm17071_vm5, %v1483_v55, %v1484_v53  ;;  %v15964_v53 = vld [vmem:[#allocation3 + $0x1e0] ss:$8 sps:$4 sm:$0xff]  }
  0xfa   : > { %1287 = vmatprep.mubr.bf16.mxu0 %v16912_v26  ;;  %1757 = vmatpush1.bf16.msra.mxu0 %v15917_v54  ;;  %v13255_v54 = vrot.slane %v1428_v50, 9  ;;  %v16148_v59 = vld [vmem:[#allocation6 + $0xe8] sm:$0xff]  }
  0xfb   : > { %1758 = vmatprep.subr.bf16.mxu0 %v15924_v60  ;;  %v15946_v60 = vld [vmem:[#allocation3 + $0x180] ss:$8 sps:$4 sm:$0xff]  }
  0xfc   : > { %v1482_v39 = vsel %vm17071_vm5, %v13255_v54, %v1481_v47  ;;  %v13259_v47 = vrot.slane %v1432_v43, 9  ;;  %v15969_v54 = vld [vmem:[#allocation3 + $0x1f4] ss:$8 sps:$4 sm:$0xff]  }
  0xfd   : > { %v13271_v49 = vcombine.low %v1482_v39, %v1485_v48  ;;  %v1516_v39 = vrot.slane %v17009_v17, 5  ;;  %v15967_v48 = vld [vmem:[#allocation3 + $0x1f0] ss:$8 sps:$4 sm:$0xff]  }
  0xfe   : > { %1759 = vmatpush1.bf16.msra.mxu0 %v15922_v61  ;;  %v13256_v61 = vrot.slane %v1429_v57, 9  ;;  %v15973_v57 = vld [vmem:[#allocation3 + $0x204] ss:$8 sps:$4 sm:$0xff]  }
  0xff   : > { %1760 = vmatprep.subr.bf16.mxu0 %v15929_v62  ;;  %v1490_v62 = vrot.slane %v1488_v56, 4 }
 0x101   : > { %1288 = vmatmul.mubr.bf16.gmra.mrb[8].mxu0 %v13225_v4  ;;  %v15951_v4 = vld [vmem:[#allocation3 + $0x194] ss:$8 sps:$4 sm:$0xff]  }
 0x102   : > { %1297 = vmatprep.mubr.bf16.mxu0 %v16912_v26  ;;  %1761 = vmatpush1.bf16.msra.mxu0 %v15927_v63  ;;  %v16359_v63 = vld [vmem:[%s16805_s11 + $0x14] sm:$0x1] }
 0x103   : > { %1762 = vmatprep.subr.bf16.mxu0 %v15934_v5  ;;  %v1491_v1 = vrot.slane %v16359_v63, 5  ;;  %v1489_v5 = vsel %vm17071_vm5, %v13256_v61, %v1488_v56  ;;  %v1433_v56 = vld [vmem:[%s16805_s11 + $0x3c] sm:$0xe]  ;;  %v1518_v61 = vrot.slane %v1516_v39, 4 }
 0x105   : > { %v1492_v58 = vsel %vm17071_vm5, %v1490_v62, %v1491_v1  ;;  %v16363_v62 = vld [vmem:[%s16805_s11 + $0x44] sm:$0x1] }
 0x106   : > { %1763 = vmatpush1.bf16.msra.mxu0 %v15932_v6  ;;  %v1495_v6 = vrot.slane %v16991_v3, 5  ;;  %v1519_v63 = vrot.slane %v16363_v62, 5  ;;  %v1565_v62 = vrot.slane %v17053_v41, 5 }
 0x107   : > { %1764 = vmatprep.subr.bf16.mxu0 %v15939_v7  ;;  %v15949_v7 = vld [vmem:[#allocation3 + $0x190] ss:$8 sps:$4 sm:$0xff]  }
 0x108   : > { %v1520_v1 = vsel %vm17071_vm5, %v1518_v61, %v1519_v63 }
 0x109   : > { %1298 = vmatmul.mubr.bf16.gmra.mrb[12].mxu0 %v13226_v11  ;;  %v13272_v11 = vcombine.low %v1489_v5, %v1492_v58  ;;  %v1434_v5 = vld [vmem:[%s16805_s11 + $0x48] sm:$0xe] }
 0x10a   : > { %1307 = vmatprep.mubr.bf16.mxu0 %v16912_v26  ;;  %1765 = vmatpush1.bf16.msra.mxu0 %v15937_v8  ;;  %v1430_v8 = vld [vmem:[%s16805_s11 + $0x18] sm:$0xe] }
 0x10b   : > { %1766 = vmatprep.subr.bf16.mxu0 %v15944_v12  ;;  %v13257_v12 = vrot.slane %v1430_v8, 9  ;;  %v16364_v8 = vld [vmem:[%s16805_s11 + $0x50] sm:$0x1] }
 0x10d   : > { %v1496_v3 = vsel %vm17071_vm5, %v13257_v12, %v1495_v6 }
 0x10e   : > { %1767 = vmatpush1.bf16.msra.mxu0 %v15942_v13  ;;  %v1497_v13 = vrot.slane %v1495_v6, 4  ;;  %v13261_v6 = vrot.slane %v1434_v5, 9 }
 0x10f   : > { %2235 = vmatprep.subr.bf16.mxu0 %v15948_v0  ;;  %v16360_v0 = vld [vmem:[%s16805_s11 + $0x20] sm:$0x1] }
 0x110   : > { %v1498_v14 = vrot.slane %v16360_v0, 5 }
 0x111   : > { %1308 = vmatmul.mubr.bf16.gmra.mrb[16].mxu0 %v13227_v15  ;;  %v15952_v15 = vld [vmem:[#allocation3 + $0x1a0] ss:$8 sps:$4 sm:$0xff]  }
 0x112   : > { %1317 = vmatprep.mubr.bf16.mxu0 %v16912_v26 }
 0x119   : > { %1318 = vmatmul.mubr.bf16.gmra.mrb[20].mxu0 %v13228_v18  ;;  %v1499_v18 = vsel %vm17071_vm5, %v1497_v13, %v1498_v14  ;;  %v1530_v13 = vrot.slane %v17021_v23, 5  ;;  %v1436_v23 = vld [vmem:[%s16805_s11 + $0x60] sm:$0xe] }
 0x11a   : > { %1327 = vmatprep.mubr.bf16.mxu0 %v16912_v26  ;;  %v13273_v25 = vcombine.low %v1496_v3, %v1499_v18 }
 0x121   : > { %1328 = vmatmul.mubr.bf16.gmra.mrb[24].mxu0 %v13229_v21  ;;  %v15955_v21 = vld [vmem:[#allocation3 + $0x1b0] ss:$8 sps:$4 sm:$0xff]  }
 0x122   : > { %1337 = vmatprep.mubr.bf16.mxu0 %v16912_v26 }
 0x129   : > { %1338 = vmatmul.mubr.bf16.gmra.mrb[28].mxu0 %v13230_v24  ;;  %v15960_v24 = vld [vmem:[#allocation3 + $0x1c4] ss:$8 sps:$4 sm:$0xff]  }
 0x12a   : > { %1347 = vmatprep.mubr.bf16.mxu0 %v16912_v26 }
 0x131   : > { %1348 = vmatmul.mubr.bf16.gmra.mrb[32].mxu0 %v13231_v28  ;;  %v13258_v28 = vrot.slane %v1431_v22, 9 }
 0x132   : > { %1357 = vmatprep.mubr.bf16.mxu0 %v16912_v26 }
 0x133   : > { %v1503_v10 = vsel %vm17071_vm5, %v13258_v28, %v1502_v19  ;;  %v16366_v28 = vld [vmem:[%s16805_s11 + $0x68] sm:$0x1] }
 0x139   : > { %1358 = vmatmul.mubr.bf16.gmra.mrb[36].mxu0 %v13232_v32  ;;  %v16361_v32 = vld [vmem:[%s16805_s11 + $0x2c] sm:$0x1] }
 0x13a   : > { %1367 = vmatprep.mubr.bf16.mxu0 %v16912_v26  ;;  %v16354_v26 = vld [vmem:[%s16805_s11 + $0x90] sm:$0xf]  ;;  %v1505_v33 = vrot.slane %v16361_v32, 5 }
 0x13b   : > { %v13235_v42 = vcombine.low %v16354_v26, %v17053_v41  ;;  %v1509_v26 = vrot.slane %v17003_v2, 5  ;;  %v1572_v41 = vrot.slane %v17059_v44, 5 }
 0x13d   : > { %v1511_v50 = vrot.slane %v1509_v26, 4  ;;  %v1510_v2 = vsel %vm17071_vm5, %v13259_v47, %v1509_v26  ;;  %v16367_v26 = vld [vmem:[%s16805_s11 + $0x74] sm:$0x1] }
 0x141   : > { %1368 = vmatmul.mubr.bf16.gmra.mrb[40].mxu0 %v13233_v35  ;;  %v15958_v35 = vld [vmem:[#allocation3 + $0x1c0] ss:$8 sps:$4 sm:$0xff]  }
 0x142   : > { %1377 = vmatprep.mubr.bf16.mxu0 %v17042_v36 }
 0x149   : > { %1378 = vmatmul.mubr.bf16.gmra.mrb[44].mxu0 %v13234_v38  ;;  %v1506_v38 = vsel %vm17071_vm5, %v1504_v30, %v1505_v33  ;;  %v1540_v30 = vrot.slane %v16366_v28, 5  ;;  %v1443_v28 = vld [vmem:[%s16805_s11 + $0xb4] sm:$0xe] }
 0x14a   : > { %1387 = vmatprep.mubr.bf16.mxu0 %v17042_v36 }
 0x151   : > { %1388 = vmatmul.mubr.bf16.gmra.mrb[48].mxu0 %v13235_v42  ;;  %v15961_v42 = vld [vmem:[#allocation3 + $0x1d0] ss:$8 sps:$4 sm:$0xff]  }
 0x152   : > { %1397 = vmatprep.mubr.bf16.mxu0 %v17042_v36 }
 0x159   : > { %1398 = vmatmul.mubr.bf16.gmra.mrb[52].mxu0 %v13236_v45  ;;  %v15966_v45 = vld [vmem:[#allocation3 + $0x1e4] ss:$8 sps:$4 sm:$0xff]  }
 0x15a   : > { %1407 = vmatprep.mubr.bf16.mxu0 %v17042_v36 }
 0x161   : > { %1408 = vmatmul.mubr.bf16.gmra.mrb[56].mxu0 %v13237_v46  ;;  %v13274_v46 = vcombine.low %v1503_v10, %v1506_v38 }
 0x162   : > { %1417 = vmatprep.mubr.bf16.mxu0 %v17042_v36 }
 0x169   : > { %1418 = vmatmul.mubr.bf16.gmra.mrb[60].mxu0 %v13238_v51  ;;  %v16362_v51 = vld [vmem:[%s16805_s11 + $0x38] sm:$0x1] }
 0x16a   : > { %1784 = vmatprep.mubr.bf16.mxu0 %v17042_v36  ;;  %v1512_v52 = vrot.slane %v16362_v51, 5 }
 0x16c   : > { %v1513_v55 = vsel %vm17071_vm5, %v1511_v50, %v1512_v52  ;;  %v16368_v52 = vld [vmem:[%s16805_s11 + $0x80] sm:$0x1] }
 0x171   : > { %1785 = vmatmul.mubr.bf16.vlgmr.msra.gmra.mrb[0].mxu0 %v13271_v49  ;;  %v13275_v49 = vcombine.low %v1510_v2, %v1513_v55  ;;  %v1558_v55 = vrot.slane %v17047_v37, 5  ;;  %v1440_v37 = vld [vmem:[%s16805_s11 + $0x90] sm:$0xe] }
 0x172   : > { %2236 = vmatpush1.bf16.msra.mxu0 %v15946_v60  ;;  %1794 = vmatprep.mubr.bf16.mxu0 %v17042_v36  ;;  %v13260_v60 = vrot.slane %v1433_v56, 9 }
 0x173   : > { %2237 = vmatprep.subr.bf16.mxu0 %v15951_v4  ;;  %v1523_v4 = vrot.slane %v17015_v20, 5  ;;  %v1435_v20 = vld [vmem:[%s16805_s11 + $0x54] sm:$0xe]  ;;  %v1560_v56 = vrot.slane %v1558_v55, 4 }
 0x174   : > { %v1517_v17 = vsel %vm17071_vm5, %v13260_v60, %v1516_v39  ;;  %v13262_v14 = vrot.slane %v1435_v20, 9 }
 0x175   : > { %v13276_v58 = vcombine.low %v1517_v17, %v1520_v1  ;;  %v13267_v17 = vrot.slane %v1440_v37, 9  ;;  %v1567_v1 = vrot.slane %v1565_v62, 4  ;;  %v15989_v37 = vld [vmem:[%s16805_s11 + $0x60] sm:$0xff]  }
 0x176   : > { %2238 = vmatpush1.bf16.msra.mxu0 %v15949_v7  ;;  %v1525_v7 = vrot.slane %v1523_v4, 4  ;;  %v1531_v18 = vsel %vm17071_vm5, %v13262_v14, %v1530_v13  ;;  %v16372_v14 = vld [vmem:[%s16805_s11 + $0xac] sm:$0xf] }
 0x177   : > { %2239 = vmatprep.subr.bf16.mxu0 %v15954_v9  ;;  %v1526_v9 = vrot.slane %v16364_v8, 5  ;;  %v1579_v44 = vrot.slane %v16372_v14, 5 }
 0x179   : > { %1795 = vmatmul.mubr.bf16.gmra.mrb[4].mxu0 %v13272_v11  ;;  %v1524_v11 = vsel %vm17071_vm5, %v13261_v6, %v1523_v4  ;;  %v1527_v12 = vsel %vm17071_vm5, %v1525_v7, %v1526_v9  ;;  %v16370_v4 = vld [vmem:[%s16805_s11 + $0x98] sm:$0x1]  ;;  %v1441_v7 = vld [vmem:[%s16805_s11 + $0x9c] sm:$0xe] }
 0x17a   : > { %1804 = vmatprep.mubr.bf16.mxu0 %v17042_v36  ;;  %2240 = vmatpush1.bf16.msra.mxu0 %v15952_v15  ;;  %v13277_v0 = vcombine.low %v1524_v11, %v1527_v12  ;;  %v1532_v15 = vrot.slane %v1530_v13, 4  ;;  %v1568_v5 = vrot.slane %v16370_v4, 5  ;;  %v13268_v9 = vrot.slane %v1441_v7, 9  ;;  %v16371_v12 = vld [vmem:[%s16805_s11 + $0xa4] sm:$0x1]  ;;  %v15999_v4 = vld [vmem:[%s16805_s11 + $0x90] sm:$0xff]  }
 0x17b   : > { %2241 = vmatprep.subr.bf16.mxu0 %v15957_v16  ;;  %v16365_v16 = vld [vmem:[%s16805_s11 + $0x5c] sm:$0x1]  ;;  %v1574_v11 = vrot.slane %v1572_v41, 4  ;;  %v1575_v13 = vrot.slane %v16371_v12, 5  ;;  %v13370_v12 = vld [vmem:[%s16805_s11 + $0x18] sm:$0xf] }
 0x17c   : > { %v1533_v3 = vrot.slane %v16365_v16, 5  ;;  %v1569_v6 = vsel %vm17071_vm5, %v1567_v1, %v1568_v5  ;;  %v1573_v20 = vsel %vm17071_vm5, %v13268_v9, %v1572_v41  ;;  %v15995_v1 = vld [vmem:[%s16805_s11 + $0x84] sm:$0xff]   ;;  %v16000_v5 = vld [vmem:[%s16805_s11 + $0x9c] sm:$0xff]   ;;  %v17230_v41 = vld [vmem:[%s16805_s11 + $0x10] sm:$0xf] }
 0x17d   : > { %v2550_v9 = vshll.u32 %v17230_v41, 16 }
 0x17e   : > { %2242 = vmatpush1.bf16.msra.mxu0 %v15955_v21  ;;  %v1534_v19 = vsel %vm17071_vm5, %v1532_v15, %v1533_v3  ;;  %v1537_v21 = vrot.slane %v17027_v27, 5  ;;  %v1437_v27 = vld [vmem:[%s16805_s11 + $0x6c] sm:$0xe]  ;;  %v1442_v15 = vld [vmem:[%s16805_s11 + $0xa8] sm:$0xe] }
 0x17f   : > { %2243 = vmatprep.subr.bf16.mxu0 %v15960_v24  ;;  %v13278_v22 = vcombine.low %v1531_v18, %v1534_v19  ;;  %v13263_v24 = vrot.slane %v1436_v23, 9  ;;  %v13264_v10 = vrot.slane %v1437_v27, 9  ;;  %v13269_v3 = vrot.slane %v1442_v15, 9  ;;  %v16373_v19 = vld [vmem:[%s16805_s11 + $0xb0] sm:$0x1] }
 0x180   : > { %v1581_v18 = vrot.slane %v1579_v44, 4 }
 0x181   : > { %1805 = vmatmul.mubr.bf16.gmra.mrb[8].mxu0 %v13273_v25  ;;  %v1539_v25 = vrot.slane %v1537_v21, 4  ;;  %v1538_v32 = vsel %vm17071_vm5, %v13263_v24, %v1537_v21  ;;  %v1582_v21 = vrot.slane %v16373_v19, 5  ;;  %v1580_v23 = vsel %vm17071_vm5, %v13269_v3, %v1579_v44  ;;  %v16374_v24 = vld [vmem:[%s16805_s11 + $0xb8] sm:$0xf] }
 0x182   : > { %1814 = vmatprep.mubr.bf16.mxu0 %v17042_v36  ;;  %2244 = vmatpush1.bf16.msra.mxu0 %v15958_v35  ;;  %v1544_v35 = vrot.slane %v17033_v31, 5  ;;  %v1438_v31 = vld [vmem:[%s16805_s11 + $0x78] sm:$0xe]  ;;  %v2552_v44 = vrot.slane %v2550_v9, 5  ;;  %v2565_v3 = vshrl.u32 %v13370_v12, 16 }
 0x183   : > { %2245 = vmatprep.subr.bf16.mxu0 %v15963_v29  ;;  %v1541_v33 = vsel %vm17071_vm5, %v1539_v25, %v1540_v30  ;;  %v13265_v50 = vrot.slane %v1438_v31, 9  ;;  %v1586_v25 = vrot.slane %v16374_v24, 5  ;;  %v15974_v31 = vld [vmem:[%s16805_s11 + $0x18] sm:$0xff]  }
 0x184   : > { %v13279_v29 = vcombine.low %v1538_v32, %v1541_v33  ;;  %v1546_v38 = vrot.slane %v1544_v35, 4  ;;  %v1545_v43 = vsel %vm17071_vm5, %v13264_v10, %v1544_v35  ;;  %v13270_v32 = vrot.slane %v1443_v28, 9  ;;  %v16375_v35 = vld [vmem:[%s16805_s11 + $0xbc] sm:$0x1] }
 0x185   : > { %v1588_v33 = vrot.slane %v1586_v25, 4  ;;  %v1589_v27 = vrot.slane %v16375_v35, 5  ;;  %v17249_v35 = vld [vmem:[%s16805_s11 + $0x20] sm:$0x1]  ;;  %v16018_v9 = vld [vmem:[#allocation3 + $0x2a4] ss:$8 sps:$4 sm:$0xff]  }
 0x186   : > { %2246 = vmatpush1.bf16.msra.mxu0 %v15961_v42  ;;  %v1547_v42 = vrot.slane %v16367_v26, 5  ;;  %v15970_v26 = vld [vmem:[%s16805_s11 + $0xc] sm:$0xff]  }
 0x187   : > { %2247 = vmatprep.subr.bf16.mxu0 %v15966_v45  ;;  %v1590_v10 = vsel %vm17071_vm5, %v1588_v33, %v1589_v27  ;;  %v16009_v33 = vld [vmem:[%s16805_s11 + $0xc0] sm:$0xff]  }
 0x188   : > { %v1548_v45 = vsel %vm17071_vm5, %v1546_v38, %v1547_v42  ;;  %v15971_v42 = vld [vmem:[#allocation3 + $0x200] ss:$8 sps:$4 sm:$0xff]   ;;  %v13373_v27 = vld [vmem:[%s16805_s11 + $0x24] sm:$0xf] }
 0x189   : > { %1815 = vmatmul.mubr.bf16.gmra.mrb[12].mxu0 %v13274_v46  ;;  %v1551_v46 = vrot.slane %v17039_v34, 5  ;;  %v13280_v47 = vcombine.low %v1545_v43, %v1548_v45  ;;  %v1439_v34 = vld [vmem:[%s16805_s11 + $0x84] sm:$0xe]  ;;  %v15976_v45 = vld [vmem:[#allocation3 + $0x210] ss:$8 sps:$4 sm:$0xff]  }
 0x18a   : > { %1824 = vmatprep.mubr.bf16.mxu0 %v17042_v36  ;;  %2248 = vmatpush1.bf16.msra.mxu0 %v15964_v53  ;;  %v1554_v53 = vrot.slane %v16368_v52, 5  ;;  %v15978_v43 = vld [vmem:[#allocation3 + $0x214] ss:$8 sps:$4 sm:$0xff]   ;;  %v15993_v52 = vld [vmem:[#allocation3 + $0x244] ss:$8 sps:$4 sm:$0xff]  }
 0x18b   : > { %2249 = vmatprep.subr.bf16.mxu0 %v15969_v54  ;;  %v1553_v51 = vrot.slane %v1551_v46, 4  ;;  %v1552_v54 = vsel %vm17071_vm5, %v13265_v50, %v1551_v46  ;;  %v15983_v46 = vld [vmem:[#allocation3 + $0x224] ss:$8 sps:$4 sm:$0xff]   ;;  %v15988_v50 = vld [vmem:[#allocation3 + $0x234] ss:$8 sps:$4 sm:$0xff]  }
 0x18d   : > { %v1555_v2 = vsel %vm17071_vm5, %v1553_v51, %v1554_v53  ;;  %v15986_v51 = vld [vmem:[#allocation3 + $0x230] ss:$8 sps:$4 sm:$0xff]  }
 0x18e   : > { %2250 = vmatpush1.bf16.msra.mxu0 %v15967_v48  ;;  %v13281_v39 = vcombine.low %v1552_v54, %v1555_v2  ;;  %v13266_v48 = vrot.slane %v1439_v34, 9  ;;  %v15975_v53 = vld [vmem:[%s16805_s11 + $0x24] sm:$0xff]   ;;  %v15991_v54 = vld [vmem:[#allocation3 + $0x240] ss:$8 sps:$4 sm:$0xff]   ;;  %v16003_v34 = vld [vmem:[#allocation3 + $0x264] ss:$8 sps:$4 sm:$0xff]  }
 0x18f   : > { %3117 = vmatprep.subr.bf16.mxu0 %v15973_v57  ;;  %v16369_v57 = vld [vmem:[%s16805_s11 + $0x8c] sm:$0x1] }
 0x190   : > { %v1559_v60 = vsel %vm17071_vm5, %v13266_v48, %v1558_v55  ;;  %v15998_v2 = vld [vmem:[#allocation3 + $0x254] ss:$8 sps:$4 sm:$0xff]   ;;  %v15996_v55 = vld [vmem:[#allocation3 + $0x250] ss:$8 sps:$4 sm:$0xff]   ;;  %v16001_v48 = vld [vmem:[#allocation3 + $0x260] ss:$8 sps:$4 sm:$0xff]  }
 0x191   : > { %1825 = vmatmul.mubr.bf16.gmra.mrb[16].mxu0 %v13275_v49  ;;  %v1561_v49 = vrot.slane %v16369_v57, 5  ;;  %v16006_v57 = vld [vmem:[#allocation3 + $0x270] ss:$8 sps:$4 sm:$0xff]  }
 0x192   : > { %1834 = vmatprep.mubr.bf16.mxu0 %v17042_v36 }
 0x193   : > { %v1562_v61 = vsel %vm17071_vm5, %v1560_v56, %v1561_v49  ;;  %v16008_v56 = vld [vmem:[#allocation3 + $0x274] ss:$8 sps:$4 sm:$0xff]   ;;  %v16012_v49 = vld [vmem:[#allocation3 + $0x284] ss:$8 sps:$4 sm:$0xff]  }
 0x194   : > { %v13282_v63 = vcombine.low %v1559_v60, %v1562_v61  ;;  %v15980_v60 = vld [vmem:[%s16805_s11 + $0x3c] sm:$0xff]   ;;  %v15984_v61 = vld [vmem:[%s16805_s11 + $0x48] sm:$0xff]  }
 0x199   : > { %1835 = vmatmul.mubr.bf16.gmra.mrb[20].mxu0 %v13276_v58  ;;  %v1566_v58 = vsel %vm17071_vm5, %v13267_v17, %v1565_v62  ;;  %v15985_v62 = vld [vmem:[%s16805_s11 + $0x54] sm:$0xff]  }
 0x19a   : > { %1844 = vmatprep.mubr.bf16.mxu0 %v17042_v36  ;;  %v13283_v8 = vcombine.low %v1566_v58, %v1569_v6  ;;  %v15994_v17 = vld [vmem:[%s16805_s11 + $0x78] sm:$0xff]   ;;  %v16004_v58 = vld [vmem:[%s16805_s11 + $0xa8] sm:$0xff]  }
 0x19b   : > { %v13367_v6 = vld [vmem:[%s16805_s11 + $0xc] sm:$0xf] }
 0x19c   : > { %v2541_v7 = vshrl.u32 %v13367_v6, 16 }
 0x1a1   : > { %1845 = vmatmul.mubr.bf16.gmra.mrb[24].mxu0 %v13277_v0  ;;  %v1576_v0 = vsel %vm17071_vm5, %v1574_v11, %v1575_v13  ;;  %v2554_v11 = vshrl.u32 %v17230_v41, 16  ;;  %v16005_v13 = vld [vmem:[%s16805_s11 + $0xb4] sm:$0xff]  }
 0x1a2   : > { %1854 = vmatprep.mubr.bf16.mxu0 %v17042_v36  ;;  %v13284_v16 = vcombine.low %v1573_v20, %v1576_v0  ;;  %v17238_v20 = vld [vmem:[%s16805_s11 + $0x1c] sm:$0xf]  ;;  %v2543_v0 = vrot.slane %v2541_v7, 4 }
 0x1a3   : > { %v2556_v15 = vrot.slane %v2554_v11, 4  ;;  %v2574_v19 = vshll.u32 %v17238_v20, 16 }
 0x1a9   : > { %1855 = vmatmul.mubr.bf16.gmra.mrb[28].mxu0 %v13278_v22  ;;  %v1583_v22 = vsel %vm17071_vm5, %v1581_v18, %v1582_v21  ;;  %v2568_v18 = vshll.u32 %v13370_v12, 16  ;;  %v2578_v21 = vshrl.u32 %v17238_v20, 16 }
 0x1aa   : > { %1864 = vmatprep.mubr.bf16.mxu0 %v17042_v36  ;;  %v13285_v30 = vcombine.low %v1580_v23, %v1583_v22  ;;  %v2557_v22 = vor.u32 %v2556_v15, %v2552_v44 }
 0x1ab   : > { %v2570_v28 = vrot.slane %v2568_v18, 5  ;;  %v17295_v18 = vld [vmem:[%s16805_s11 + $0x38] sm:$0x1] }
 0x1b1   : > { %1865 = vmatmul.mubr.bf16.gmra.mrb[32].mxu0 %v13279_v29  ;;  %v1587_v29 = vsel %vm17071_vm5, %v13270_v32, %v1586_v25  ;;  %v2567_v25 = vrot.slane %v2565_v3, 4  ;;  %v2580_v32 = vrot.slane %v2578_v21, 4 }
 0x1b2   : > { %1874 = vmatprep.mubr.bf16.mxu0 %v17042_v36  ;;  %v13286_v38 = vcombine.low %v1587_v29, %v1590_v10  ;;  %v2558_v10 = vrot.slane %v2557_v22, 4 }
 0x1b9   : > { %1875 = vmatmul.mubr.bf16.gmra.mrb[36].mxu0 %v13280_v47  ;;  %v15981_v47 = vld [vmem:[#allocation3 + $0x220] ss:$8 sps:$4 sm:$0xff]  }
 0x1ba   : > { %1884 = vmatprep.mubr.bf16.mxu0 %v17042_v36 }
 0x1c1   : > { %1885 = vmatmul.mubr.bf16.gmra.mrb[40].mxu0 %v13281_v39  ;;  %v15979_v39 = vld [vmem:[%s16805_s11 + $0x30] sm:$0xff]  }
 0x1c2   : > { %1894 = vmatprep.mubr.bf16.mxu0 %v17042_v36 }
 0x1c9   : > { %1895 = vmatmul.mubr.bf16.gmra.mrb[44].mxu0 %v13282_v63  ;;  %v15990_v63 = vld [vmem:[%s16805_s11 + $0x6c] sm:$0xff]  }
 0x1ca   : > { %1904 = vmatprep.mubr.bf16.mxu0 %v17042_v36 }
 0x1d1   : > { %1905 = vmatmul.mubr.bf16.gmra.mrb[48].mxu0 %v13283_v8  ;;  %v2544_v8 = vshll.u32 %v13367_v6, 16  ;;  %v16013_v6 = vld [vmem:[#allocation3 + $0x290] ss:$8 sps:$4 sm:$0xff]  }
 0x1d2   : > { %1914 = vmatprep.mubr.bf16.mxu0 %v17042_v36 }
 0x1d3   : > { %v2546_v14 = vrot.slane %v2544_v8, 5 }
 0x1d5   : > { %v2547_v23 = vor.u32 %v2546_v14, %v2543_v0  ;;  %v17292_v0 = vld [vmem:[%s16805_s11 + $0x40] sm:$0xf] }
 0x1d7   : > { %v2548_v29 = vrot.slane %v2547_v23, 4  ;;  %v16016_v23 = vld [vmem:[#allocation3 + $0x2a0] ss:$8 sps:$4 sm:$0xff]  }
 0x1d9   : > { %1915 = vmatmul.mubr.bf16.gmra.mrb[52].mxu0 %v13284_v16  ;;  %v17241_v16 = vld [vmem:[%s16805_s11 + $0x14] sm:$0x1] }
 0x1da   : > { %1924 = vmatprep.mubr.bf16.mxu0 %v17042_v36  ;;  %v2560_v24 = vshll.u32 %v17241_v16, 16 }
 0x1e1   : > { %1925 = vmatmul.mubr.bf16.gmra.mrb[56].mxu0 %v13285_v30  ;;  %v2576_v30 = vrot.slane %v2574_v19, 5 }
 0x1e2   : > { %1934 = vmatprep.mubr.bf16.mxu0 %v17042_v36 }
 0x1e9   : > { %1935 = vmatmul.mubr.bf16.gmra.mrb[60].mxu0 %v13286_v38  ;;  %v2562_v38 = vrot.slane %v2560_v24, 5 }
 0x1ea   : > { %2267 = vmatprep.mubr.bf16.mxu0 %v17042_v36 }
 0x1f1   : > { %2268 = vmatmul.mubr.bf16.vlgmr.msra.gmra.mrb[0].mxu0 %v15970_v26  ;;  %v17253_v26 = vld [vmem:[%s16805_s11 + $0x28] sm:$0xf] }
 0x1f2   : > { %3118 = vmatpush1.bf16.msra.mxu0 %v15971_v42  ;;  %2277 = vmatprep.mubr.bf16.mxu0 %v17042_v36  ;;  %v2571_v42 = vor.u32 %v2570_v28, %v2567_v25  ;;  %v2646_v25 = vshll.u32 %v17292_v0, 16  ;;  %v2650_v28 = vshrl.u32 %v17292_v0, 16 }
 0x1f3   : > { %3119 = vmatprep.subr.bf16.mxu0 %v15978_v43  ;;  %v2581_v43 = vor.u32 %v2580_v32, %v2576_v30 }
 0x1f6   : > { %3120 = vmatpush1.bf16.msra.mxu0 %v15976_v45  ;;  %v2584_v45 = vshll.u32 %v17249_v35, 16 }
 0x1f7   : > { %3121 = vmatprep.subr.bf16.mxu0 %v15983_v46  ;;  %v2589_v46 = vshrl.u32 %v13373_v27, 16 }
 0x1f9   : > { %2278 = vmatmul.mubr.bf16.gmra.mrb[4].mxu0 %v15974_v31  ;;  %v2592_v31 = vshll.u32 %v13373_v27, 16 }
 0x1fa   : > { %2287 = vmatprep.mubr.bf16.mxu0 %v17042_v36  ;;  %3122 = vmatpush1.bf16.msra.mxu0 %v15981_v47  ;;  %v2598_v47 = vshll.u32 %v17253_v26, 16 }
 0x1fb   : > { %3123 = vmatprep.subr.bf16.mxu0 %v15988_v50  ;;  %v2602_v50 = vshrl.u32 %v17253_v26, 16 }
 0x1fe   : > { %3124 = vmatpush1.bf16.msra.mxu0 %v15986_v51  ;;  %v17261_v51 = vsel %vm16813_vm2, %v2548_v29, %v2552_v44 }
 0x1ff   : > { %3125 = vmatprep.subr.bf16.mxu0 %v15993_v52  ;;  %20788 = vst [vmem:[#allocation13_spill] sm:$0xff] %v17261_v51  ;;  %v17265_v52 = vsel %vm16813_vm2, %v2558_v10, %v2562_v38  ;;  %v2632_v10 = vshll.u32 %v17295_v18, 16  ;;  %v16019_v38 = vld [vmem:[#allocation3 + $0x2b0] ss:$8 sps:$4 sm:$0xff]  }
 0x200   : > { %20789 = vst [vmem:[#allocation14_spill] sm:$0xff] %v17265_v52 }
 0x201   : > { %2288 = vmatmul.mubr.bf16.gmra.mrb[8].mxu0 %v15975_v53  ;;  %v2572_v53 = vrot.slane %v2571_v42, 4 }
 0x202   : > { %2297 = vmatprep.mubr.bf16.mxu0 %v17042_v36  ;;  %3126 = vmatpush1.bf16.msra.mxu0 %v15991_v54  ;;  %v2582_v54 = vrot.slane %v2581_v43, 4 }
 0x203   : > { %3127 = vmatprep.subr.bf16.mxu0 %v15998_v2  ;;  %v2586_v2 = vrot.slane %v2584_v45, 5  ;;  %v2648_v45 = vrot.slane %v2646_v25, 5 }
 0x206   : > { %3128 = vmatpush1.bf16.msra.mxu0 %v15996_v55  ;;  %v2591_v55 = vrot.slane %v2589_v46, 4  ;;  %v2652_v46 = vrot.slane %v2650_v28, 4 }
 0x207   : > { %3129 = vmatprep.subr.bf16.mxu0 %v16003_v34  ;;  %v2594_v34 = vrot.slane %v2592_v31, 5  ;;  %v16024_v31 = vld [vmem:[#allocation3 + $0x2c4] ss:$8 sps:$4 sm:$0xff]  }
 0x209   : > { %2298 = vmatmul.mubr.bf16.gmra.mrb[12].mxu0 %v15979_v39  ;;  %v13415_v39 = vcombine.low %v17261_v51, %v17265_v52  ;;  %v17465_v51 = vld [vmem:[%s16805_s11 + $0x98] sm:$0x1] }
 0x20a   : > { %2307 = vmatprep.mubr.bf16.mxu0 %v17042_v36  ;;  %3130 = vmatpush1.bf16.msra.mxu0 %v16001_v48  ;;  %v2600_v48 = vrot.slane %v2598_v47, 5  ;;  %v17310_v47 = vld [vmem:[%s16805_s11 + $0x44] sm:$0x1] }
 0x20b   : > { %3131 = vmatprep.subr.bf16.mxu0 %v16008_v56  ;;  %v2604_v56 = vrot.slane %v2602_v50, 4 }
 0x20e   : > { %3132 = vmatpush1.bf16.msra.mxu0 %v16006_v57  ;;  %v16010_v57 = vld [vmem:[#allocation3 + $0x280] ss:$8 sps:$4 sm:$0xff]  }
 0x20f   : > { %3711 = vmatprep.subr.bf16.mxu0 %v16012_v49  ;;  %v17270_v49 = vld [vmem:[%s16805_s11 + $0x2c] sm:$0x1] }
 0x211   : > { %2308 = vmatmul.mubr.bf16.gmra.mrb[16].mxu0 %v15980_v60  ;;  %v13376_v60 = vld [vmem:[%s16805_s11 + $0x30] sm:$0xf] }
 0x212   : > { %2317 = vmatprep.mubr.bf16.mxu0 %v17042_v36 }
 0x219   : > { %2318 = vmatmul.mubr.bf16.gmra.mrb[20].mxu0 %v15984_v61  ;;  %v16015_v61 = vld [vmem:[#allocation3 + $0x294] ss:$8 sps:$4 sm:$0xff]  }
 0x21a   : > { %2327 = vmatprep.mubr.bf16.mxu0 %v17042_v36 }
 0x221   : > { %2328 = vmatmul.mubr.bf16.gmra.mrb[24].mxu0 %v15985_v62  ;;  %v17274_v62 = vld [vmem:[%s16805_s11 + $0x34] sm:$0xf] }
 0x222   : > { %2337 = vmatprep.mubr.bf16.mxu0 %v17042_v36  ;;  %v2622_v7 = vshll.u32 %v17274_v62, 16  ;;  %v2626_v8 = vshrl.u32 %v17274_v62, 16 }
 0x224   : > { %v2624_v19 = vrot.slane %v2622_v7, 5  ;;  %v2628_v21 = vrot.slane %v2626_v8, 4 }
 0x226   : > { %v2629_v29 = vor.u32 %v2628_v21, %v2624_v19  ;;  %v17337_v21 = vld [vmem:[%s16805_s11 + $0x58] sm:$0xf] }
 0x229   : > { %2338 = vmatmul.mubr.bf16.gmra.mrb[28].mxu0 %v15989_v37  ;;  %v17278_v37 = vsel %vm16813_vm2, %v2572_v53, %v2576_v30  ;;  %v16021_v30 = vld [vmem:[#allocation3 + $0x2b4] ss:$8 sps:$4 sm:$0xff]   ;;  %v13382_v53 = vld [vmem:[%s16805_s11 + $0x48] sm:$0xf] }
 0x22a   : > { %2347 = vmatprep.mubr.bf16.mxu0 %v17042_v36 }
 0x231   : > { %2348 = vmatmul.mubr.bf16.gmra.mrb[32].mxu0 %v15990_v63  ;;  %v17282_v63 = vsel %vm16813_vm2, %v2582_v54, %v2586_v2  ;;  %v17316_v54 = vld [vmem:[%s16805_s11 + $0x4c] sm:$0xf] }
 0x232   : > { %2357 = vmatprep.mubr.bf16.mxu0 %v17042_v36  ;;  %v13416_v11 = vcombine.low %v17278_v37, %v17282_v63 }
 0x239   : > { %2358 = vmatmul.mubr.bf16.gmra.mrb[36].mxu0 %v15994_v17  ;;  %v2595_v17 = vor.u32 %v2594_v34, %v2591_v55  ;;  %v2630_v55 = vrot.slane %v2629_v29, 4  ;;  %v2634_v34 = vrot.slane %v2632_v10, 5 }
 0x23a   : > { %2367 = vmatprep.mubr.bf16.mxu0 %v17042_v36 }
 0x23b   : > { %v2596_v12 = vrot.slane %v2595_v17, 4  ;;  %v2664_v17 = vshll.u32 %v13382_v53, 16 }
 0x23d   : > { %v17301_v32 = vsel %vm16813_vm2, %v2596_v12, %v2600_v48 }
 0x241   : > { %2368 = vmatmul.mubr.bf16.gmra.mrb[40].mxu0 %v15995_v1  ;;  %v2605_v1 = vor.u32 %v2604_v56, %v2600_v48  ;;  %v2653_v56 = vor.u32 %v2652_v46, %v2648_v45 }
 0x242   : > { %2377 = vmatprep.mubr.bf16.mxu0 %v17042_v36 }
 0x243   : > { %v2606_v14 = vrot.slane %v2605_v1, 4  ;;  %v2670_v1 = vshll.u32 %v17316_v54, 16  ;;  %v2654_v8 = vrot.slane %v2653_v56, 4  ;;  %v13388_v56 = vld [vmem:[%s16805_s11 + $0x60] sm:$0xf] }
 0x249   : > { %2378 = vmatmul.mubr.bf16.gmra.mrb[44].mxu0 %v15999_v4  ;;  %v2608_v4 = vshll.u32 %v17270_v49, 16 }
 0x24a   : > { %2387 = vmatprep.mubr.bf16.mxu0 %v17042_v36 }
 0x24b   : > { %v2610_v44 = vrot.slane %v2608_v4, 5  ;;  %v2674_v4 = vshrl.u32 %v17316_v54, 16 }
 0x251   : > { %2388 = vmatmul.mubr.bf16.gmra.mrb[48].mxu0 %v16000_v5  ;;  %v2613_v5 = vshrl.u32 %v13376_v60, 16 }
 0x252   : > { %2397 = vmatprep.mubr.bf16.mxu0 %v17042_v36 }
 0x253   : > { %v2615_v15 = vrot.slane %v2613_v5, 4 }
 0x259   : > { %2398 = vmatmul.mubr.bf16.gmra.mrb[52].mxu0 %v16004_v58  ;;  %v2616_v58 = vshll.u32 %v13376_v60, 16  ;;  %v16027_v60 = vld [vmem:[#allocation3 + $0x2d4] ss:$8 sps:$4 sm:$0xff]  }
 0x25a   : > { %2407 = vmatprep.mubr.bf16.mxu0 %v17042_v36 }
 0x25b   : > { %v2618_v3 = vrot.slane %v2616_v58, 5  ;;  %v17328_v58 = vsel %vm16813_vm2, %v2630_v55, %v2634_v34 }
 0x25c   : > { %20790 = vst [vmem:[#allocation15_spill] sm:$0xff] %v17328_v58 }
 0x25d   : > { %v2619_v27 = vor.u32 %v2618_v3, %v2615_v15  ;;  %v17333_v3 = vld [vmem:[%s16805_s11 + $0x50] sm:$0x1] }
 0x25f   : > { %v2620_v2 = vrot.slane %v2619_v27, 4  ;;  %v2680_v27 = vshll.u32 %v17333_v3, 16 }
 0x261   : > { %2408 = vmatmul.mubr.bf16.gmra.mrb[56].mxu0 %v16005_v13  ;;  %v13379_v13 = vld [vmem:[%s16805_s11 + $0x3c] sm:$0xf]  ;;  %v17324_v5 = vsel %vm16813_vm2, %v2620_v2, %v2624_v19  ;;  %v13385_v19 = vld [vmem:[%s16805_s11 + $0x54] sm:$0xf] }
 0x262   : > { %2417 = vmatprep.mubr.bf16.mxu0 %v17042_v36  ;;  %v2637_v22 = vshrl.u32 %v13379_v13, 16  ;;  %v2640_v24 = vshll.u32 %v13379_v13, 16  ;;  %v2666_v13 = vrot.slane %v2664_v17, 5  ;;  %v13418_v15 = vcombine.low %v17324_v5, %v17328_v58 }
 0x263   : > { %v2685_v29 = vshrl.u32 %v13385_v19, 16  ;;  %v2688_v10 = vshll.u32 %v13385_v19, 16 }
 0x264   : > { %v2639_v42 = vrot.slane %v2637_v22, 4  ;;  %v2642_v43 = vrot.slane %v2640_v24, 5  ;;  %v16033_v24 = vld [vmem:[#allocation3 + $0x2f4] ss:$8 sps:$4 sm:$0xff]  }
 0x265   : > { %v2687_v2 = vrot.slane %v2685_v29, 4  ;;  %v2690_v55 = vrot.slane %v2688_v10, 5 }
 0x266   : > { %v2643_v48 = vor.u32 %v2642_v43, %v2639_v42  ;;  %v2698_v42 = vshrl.u32 %v17337_v21, 16  ;;  %v16031_v43 = vld [vmem:[#allocation3 + $0x2f0] ss:$8 sps:$4 sm:$0xff]  }
 0x267   : > { %v2691_v17 = vor.u32 %v2690_v55, %v2687_v2 }
 0x268   : > { %v2644_v7 = vrot.slane %v2643_v48, 4  ;;  %v17354_v48 = vld [vmem:[%s16805_s11 + $0x5c] sm:$0x1] }
 0x269   : > { %2418 = vmatmul.mubr.bf16.gmra.mrb[60].mxu0 %v16009_v33  ;;  %v17306_v33 = vsel %vm16813_vm2, %v2606_v14, %v2610_v44  ;;  %v2672_v14 = vrot.slane %v2670_v1, 5  ;;  %v2676_v44 = vrot.slane %v2674_v4, 4  ;;  %v2704_v4 = vshll.u32 %v17354_v48, 16 }
 0x26a   : > { %3149 = vmatprep.mubr.bf16.mxu0 %v17042_v36  ;;  %v13417_v50 = vcombine.low %v17301_v32, %v17306_v33  ;;  %v17341_v22 = vsel %vm16813_vm2, %v2644_v7, %v2648_v45  ;;  %v16036_v45 = vld [vmem:[#allocation3 + $0x304] ss:$8 sps:$4 sm:$0xff]   ;;  %v2712_v7 = vshll.u32 %v13388_v56, 16 }
 0x26b   : > { %20791 = vst [vmem:[#allocation16_spill] sm:$0xff] %v17341_v22 }
 0x271   : > { %3150 = vmatmul.mubr.bf16.vlgmr.msra.gmra.mrb[0].mxu0 %v13415_v39  ;;  %v16022_v39 = vld [vmem:[#allocation3 + $0x2c0] ss:$8 sps:$4 sm:$0xff]  }
 0x272   : > { %3712 = vmatpush1.bf16.msra.mxu0 %v16010_v57  ;;  %3159 = vmatprep.mubr.bf16.mxu0 %v17042_v36  ;;  %v2656_v57 = vshll.u32 %v17310_v47, 16 }
 0x273   : > { %3713 = vmatprep.subr.bf16.mxu0 %v16015_v61  ;;  %v2661_v61 = vshrl.u32 %v13382_v53, 16  ;;  %v2682_v53 = vrot.slane %v2680_v27, 5 }
 0x275   : > { %v2663_v12 = vrot.slane %v2661_v61, 4 }
 0x276   : > { %3714 = vmatpush1.bf16.msra.mxu0 %v16013_v6  ;;  %v16025_v6 = vld [vmem:[#allocation3 + $0x2d0] ss:$8 sps:$4 sm:$0xff]  }
 0x277   : > { %3715 = vmatprep.subr.bf16.mxu0 %v16018_v9  ;;  %v2658_v9 = vrot.slane %v2656_v57, 5  ;;  %v2667_v28 = vor.u32 %v2666_v13, %v2663_v12  ;;  %v17358_v57 = vld [vmem:[%s16805_s11 + $0x64] sm:$0xf]  ;;  %v17374_v12 = vld [vmem:[%s16805_s11 + $0x70] sm:$0xf] }
 0x278   : > { %v2742_v10 = vshll.u32 %v17374_v12, 16 }
 0x279   : > { %3160 = vmatmul.mubr.bf16.gmra.mrb[4].mxu0 %v13416_v11  ;;  %v16030_v11 = vld [vmem:[#allocation3 + $0x2e4] ss:$8 sps:$4 sm:$0xff]   ;;  %v17345_v25 = vsel %vm16813_vm2, %v2654_v8, %v2658_v9  ;;  %v2718_v8 = vshll.u32 %v17358_v57, 16  ;;  %v2722_v9 = vshrl.u32 %v17358_v57, 16 }
 0x27a   : > { %3169 = vmatprep.mubr.bf16.mxu0 %v17042_v36  ;;  %3716 = vmatpush1.bf16.msra.mxu0 %v16016_v23  ;;  %v16028_v23 = vld [vmem:[#allocation3 + $0x2e0] ss:$8 sps:$4 sm:$0xff]   ;;  %20792 = vst [vmem:[#allocation17_spill] sm:$0xff] %v17345_v25  ;;  %v13419_v46 = vcombine.low %v17341_v22, %v17345_v25  ;;  %v2744_v2 = vrot.slane %v2742_v10, 5  ;;  %v6419_v22 = vld [vmem:[#allocation2 + $0x260] sm:$0x88] }
 0x27b   : > { %3717 = vmatprep.subr.bf16.mxu0 %v16021_v30  ;;  %v2677_v30 = vor.u32 %v2676_v44, %v2672_v14 }
 0x27e   : > { %3718 = vmatpush1.bf16.msra.mxu0 %v16019_v38  ;;  %v2694_v38 = vshll.u32 %v17337_v21, 16 }
 0x27f   : > { %3719 = vmatprep.subr.bf16.mxu0 %v16024_v31  ;;  %v2668_v31 = vrot.slane %v2667_v28, 4  ;;  %v2724_v28 = vrot.slane %v2722_v9, 4 }
 0x280   : > { %v2696_v34 = vrot.slane %v2694_v38, 5  ;;  %v2746_v38 = vshrl.u32 %v17374_v12, 16 }
 0x281   : > { %3170 = vmatmul.mubr.bf16.gmra.mrb[8].mxu0 %v13417_v50  ;;  %v2678_v50 = vrot.slane %v2677_v30, 4  ;;  %v17379_v30 = vld [vmem:[%s16805_s11 + $0x68] sm:$0x1] }
 0x282   : > { %3179 = vmatprep.mubr.bf16.mxu0 %v17042_v36  ;;  %3720 = vmatpush1.bf16.msra.mxu0 %v16022_v39  ;;  %v2700_v39 = vrot.slane %v2698_v42, 4  ;;  %v2748_v55 = vrot.slane %v2746_v38, 4 }
 0x283   : > { %3721 = vmatprep.subr.bf16.mxu0 %v16027_v60  ;;  %v17362_v60 = vsel %vm16813_vm2, %v2668_v31, %v2672_v14  ;;  %v17366_v61 = vsel %vm16813_vm2, %v2678_v50, %v2682_v53  ;;  %v2692_v14 = vrot.slane %v2691_v17, 4  ;;  %v2728_v31 = vshll.u32 %v17379_v30, 16  ;;  %v17400_v17 = vld [vmem:[%s16805_s11 + $0x7c] sm:$0xf] }
 0x284   : > { %20793 = vst [vmem:[#allocation18_spill] sm:$0xff] %v17362_v60  ;;  %20794 = vst [vmem:[#allocation19_spill] sm:$0xff] %v17366_v61  ;;  %v2701_v1 = vor.u32 %v2700_v39, %v2696_v34  ;;  %v13420_v13 = vcombine.low %v17362_v60, %v17366_v61  ;;  %v17394_v39 = vld [vmem:[%s16805_s11 + $0x74] sm:$0x1]  ;;  %v17507_v61 = vld [vmem:[%s16805_s11 + $0xb8] sm:$0xf] }
 0x285   : > { %v17385_v42 = vsel %vm16813_vm2, %v2692_v14, %v2696_v34  ;;  %v2770_v14 = vshrl.u32 %v17400_v17, 16 }
 0x286   : > { %3722 = vmatpush1.bf16.msra.mxu0 %v16025_v6  ;;  %v2709_v6 = vshrl.u32 %v13388_v56, 16  ;;  %v2702_v44 = vrot.slane %v2701_v1, 4  ;;  %20795 = vst [vmem:[#allocation20_spill] sm:$0xff] %v17385_v42  ;;  %v13394_v56 = vld [vmem:[%s16805_s11 + $0x78] sm:$0xf] }
 0x287   : > { %3723 = vmatprep.subr.bf16.mxu0 %v16030_v11  ;;  %v13391_v11 = vld [vmem:[%s16805_s11 + $0x6c] sm:$0xf]  ;;  %v2757_v9 = vshrl.u32 %v13394_v56, 16 }
 0x288   : > { %v2711_v19 = vrot.slane %v2709_v6, 4  ;;  %v2733_v27 = vshrl.u32 %v13391_v11, 16  ;;  %v2736_v29 = vshll.u32 %v13391_v11, 16  ;;  %v2760_v11 = vshll.u32 %v13394_v56, 16 }
 0x289   : > { %3180 = vmatmul.mubr.bf16.gmra.mrb[12].mxu0 %v13418_v15  ;;  %v2706_v15 = vrot.slane %v2704_v4, 5  ;;  %v2730_v4 = vrot.slane %v2728_v31, 5  ;;  %v17419_v31 = vld [vmem:[%s16805_s11 + $0x80] sm:$0x1] }
 0x28a   : > { %3189 = vmatprep.mubr.bf16.mxu0 %v17042_v36  ;;  %3724 = vmatpush1.bf16.msra.mxu0 %v16028_v23  ;;  %v2714_v23 = vrot.slane %v2712_v7, 5  ;;  %v2735_v50 = vrot.slane %v2733_v27, 4  ;;  %v2738_v53 = vrot.slane %v2736_v29, 5  ;;  %v2749_v7 = vor.u32 %v2748_v55, %v2744_v2 }
 0x28b   : > { %3725 = vmatprep.subr.bf16.mxu0 %v16033_v24  ;;  %v2720_v24 = vrot.slane %v2718_v8, 5  ;;  %v2752_v8 = vshll.u32 %v17394_v39, 16  ;;  %v2759_v29 = vrot.slane %v2757_v9, 4  ;;  %v2762_v10 = vrot.slane %v2760_v11, 5 }
 0x28c   : > { %v2739_v6 = vor.u32 %v2738_v53, %v2735_v50  ;;  %v13397_v50 = vld [vmem:[%s16805_s11 + $0x84] sm:$0xf]  ;;  %v17423_v53 = vld [vmem:[%s16805_s11 + $0x88] sm:$0xf] }
 0x28d   : > { %v2754_v27 = vrot.slane %v2752_v8, 5 }
 0x28e   : > { %3726 = vmatpush1.bf16.msra.mxu0 %v16031_v43  ;;  %v17390_v43 = vsel %vm16813_vm2, %v2702_v44, %v2706_v15  ;;  %v17405_v44 = vld [vmem:[#allocation2] sm:$0xff] }
 0x28f   : > { %4194 = vmatprep.subr.bf16.mxu0 %v16036_v45  ;;  %20796 = vst [vmem:[#allocation21_spill] sm:$0xff] %v17390_v43  ;;  %v2715_v45 = vor.u32 %v2714_v23, %v2711_v19  ;;  %v13421_v34 = vcombine.low %v17385_v42, %v17390_v43  ;;  %v2740_v23 = vrot.slane %v2739_v6, 4  ;;  %v2790_v6 = vshll.u32 %v17423_v53, 16  ;;  %v13409_v42 = vld [vmem:[%s16805_s11 + $0xb4] sm:$0xf] }
 0x291   : > { %3190 = vmatmul.mubr.bf16.gmra.mrb[16].mxu0 %v13419_v46  ;;  %v2725_v46 = vor.u32 %v2724_v28, %v2720_v24  ;;  %v2750_v28 = vrot.slane %v2749_v7, 4  ;;  %v2794_v7 = vshrl.u32 %v17423_v53, 16 }
 0x292   : > { %3199 = vmatprep.mubr.bf16.mxu0 %v17042_v36 }
 0x293   : > { %v2726_v1 = vrot.slane %v2725_v46, 4  ;;  %v17431_v55 = vsel %vm16813_vm2, %v2750_v28, %v2754_v27  ;;  %v2796_v28 = vrot.slane %v2794_v7, 4  ;;  %v17440_v27 = vld [vmem:[%s16805_s11 + $0x8c] sm:$0x1]  ;;  %v17460_v7 = vld [vmem:[%s16805_s11 + $0xa0] sm:$0xf] }
 0x294   : > { %20800 = vst [vmem:[#allocation25_spill] sm:$0xff] %v17431_v55 }
 0x295   : > { %v17414_v19 = vsel %vm16813_vm2, %v2726_v1, %v2730_v4  ;;  %v2781_v1 = vshrl.u32 %v13397_v50, 16  ;;  %v2784_v4 = vshll.u32 %v13397_v50, 16 }
 0x296   : > { %20798 = vst [vmem:[#allocation23_spill] sm:$0xff] %v17414_v19 }
 0x299   : > { %3200 = vmatmul.mubr.bf16.gmra.mrb[20].mxu0 %v13420_v13  ;;  %v2766_v13 = vshll.u32 %v17400_v17, 16 }
 0x29a   : > { %3209 = vmatprep.mubr.bf16.mxu0 %v17042_v36  ;;  %v2716_v36 = vrot.slane %v2715_v45, 4  ;;  %v2772_v45 = vrot.slane %v2770_v14, 4  ;;  %v2786_v14 = vrot.slane %v2784_v4, 5 }
 0x29b   : > { %v2768_v38 = vrot.slane %v2766_v13, 5  ;;  %v2783_v13 = vrot.slane %v2781_v1, 4 }
 0x29c   : > { %v17410_v15 = vsel %vm16813_vm2, %v2716_v36, %v2720_v24  ;;  %v17427_v24 = vsel %vm16813_vm2, %v2740_v23, %v2744_v2  ;;  %v2776_v36 = vshll.u32 %v17419_v31, 16  ;;  %v2792_v23 = vrot.slane %v2790_v6, 5 }
 0x29d   : > { %20797 = vst [vmem:[#allocation22_spill] sm:$0xff] %v17410_v15  ;;  %v13422_v46 = vcombine.low %v17410_v15, %v17414_v19  ;;  %20799 = vst [vmem:[#allocation24_spill] sm:$0xff] %v17427_v24  ;;  %v2773_v56 = vor.u32 %v2772_v45, %v2768_v38  ;;  %v13423_v2 = vcombine.low %v17427_v24, %v17431_v55  ;;  %v2838_v24 = vshll.u32 %v17460_v7, 16 }
 0x29e   : > { %v2778_v11 = vrot.slane %v2776_v36, 5  ;;  %v2787_v50 = vor.u32 %v2786_v14, %v2783_v13  ;;  %v2842_v19 = vshrl.u32 %v17460_v7, 16 }
 0x29f   : > { %v2774_v9 = vrot.slane %v2773_v56, 4  ;;  %v2800_v56 = vshll.u32 %v17440_v27, 16 }
 0x2a1   : > { %3210 = vmatmul.mubr.bf16.gmra.mrb[24].mxu0 %v13421_v34  ;;  %v2763_v34 = vor.u32 %v2762_v10, %v2759_v29  ;;  %v13400_v29 = vld [vmem:[%s16805_s11 + $0x90] sm:$0xf]  ;;  %v17444_v10 = vld [vmem:[%s16805_s11 + $0x94] sm:$0xf] }
 0x2a2   : > { %3219 = vmatprep.mubr.bf16.mxu0 %v17405_v44  ;;  %v2805_v36 = vshrl.u32 %v13400_v29, 16  ;;  %v2808_v1 = vshll.u32 %v13400_v29, 16  ;;  %v2814_v4 = vshll.u32 %v17444_v10, 16  ;;  %v2818_v6 = vshrl.u32 %v17444_v10, 16 }
 0x2a3   : > { %v2764_v8 = vrot.slane %v2763_v34, 4  ;;  %v2797_v34 = vor.u32 %v2796_v28, %v2792_v23 }
 0x2a4   : > { %v2807_v13 = vrot.slane %v2805_v36, 4  ;;  %v2810_v14 = vrot.slane %v2808_v1, 5  ;;  %v2816_v28 = vrot.slane %v2814_v4, 5  ;;  %v2820_v52 = vrot.slane %v2818_v6, 4 }
 0x2a5   : > { %v17448_v45 = vsel %vm16813_vm2, %v2764_v8, %v2768_v38  ;;  %v13403_v38 = vld [vmem:[%s16805_s11 + $0x9c] sm:$0xf]  ;;  %v2788_v8 = vrot.slane %v2787_v50, 4  ;;  %v2824_v1 = vshll.u32 %v17465_v51, 16 }
 0x2a6   : > { %20801 = vst [vmem:[#allocation26_spill] sm:$0xff] %v17448_v45  ;;  %v2829_v29 = vshrl.u32 %v13403_v38, 16  ;;  %v2832_v55 = vshll.u32 %v13403_v38, 16  ;;  %v2821_v36 = vor.u32 %v2820_v52, %v2816_v28  ;;  %v2840_v38 = vrot.slane %v2838_v24, 5 }
 0x2a7   : > { %v17471_v50 = vsel %vm16813_vm2, %v2788_v8, %v2792_v23  ;;  %v17486_v8 = vld [vmem:[%s16805_s11 + $0xac] sm:$0xf] }
 0x2a8   : > { %20803 = vst [vmem:[#allocation28_spill] sm:$0xff] %v17471_v50  ;;  %v2831_v4 = vrot.slane %v2829_v29, 4  ;;  %v2834_v6 = vrot.slane %v2832_v55, 5  ;;  %v2822_v43 = vrot.slane %v2821_v36, 4  ;;  %v2866_v24 = vshrl.u32 %v17486_v8, 16 }
 0x2a9   : > { %3220 = vmatmul.mubr.bf16.gmra.mrb[28].mxu0 %v13422_v46  ;;  %v17452_v46 = vsel %vm16813_vm2, %v2774_v9, %v2778_v11  ;;  %v2798_v9 = vrot.slane %v2797_v34, 4  ;;  %v2802_v11 = vrot.slane %v2800_v56, 5  ;;  %v2811_v56 = vor.u32 %v2810_v14, %v2807_v13 }
 0x2aa   : > { %3229 = vmatprep.mubr.bf16.mxu0 %v17405_v44  ;;  %20802 = vst [vmem:[#allocation27_spill] sm:$0xff] %v17452_v46 }
 0x2ab   : > { %v17476_v34 = vsel %vm16813_vm2, %v2798_v9, %v2802_v11  ;;  %v2812_v15 = vrot.slane %v2811_v56, 4  ;;  %v2826_v9 = vrot.slane %v2824_v1, 5  ;;  %v2835_v11 = vor.u32 %v2834_v6, %v2831_v4 }
 0x2ac   : > { %20804 = vst [vmem:[#allocation29_spill] sm:$0xff] %v17476_v34  ;;  %v13425_v23 = vcombine.low %v17471_v50, %v17476_v34  ;;  %v2868_v34 = vrot.slane %v2866_v24, 4  ;;  %v17503_v50 = vld [vmem:[%s16805_s11 + $0xb0] sm:$0x1] }
 0x2ad   : > { %v17494_v29 = vsel %vm16813_vm2, %v2812_v15, %v2816_v28  ;;  %v2836_v56 = vrot.slane %v2835_v11, 4  ;;  %v2872_v11 = vshll.u32 %v17503_v50, 16 }
 0x2ae   : > { %20805 = vst [vmem:[#allocation30_spill] sm:$0xff] %v17494_v29 }
 0x2af   : > { %v17511_v15 = vsel %vm16813_vm2, %v2836_v56, %v2840_v38 }
 0x2b0   : > { %20807 = vst [vmem:[#allocation32_spill] sm:$0xff] %v17511_v15 }
 0x2b1   : > { %3230 = vmatmul.mubr.bf16.gmra.mrb[32].mxu0 %v13423_v2  ;;  %v13424_v2 = vcombine.low %v17448_v45, %v17452_v46  ;;  %v2844_v46 = vrot.slane %v2842_v19, 4  ;;  %v17480_v45 = vld [vmem:[%s16805_s11 + $0xa4] sm:$0x1]  ;;  %v2862_v19 = vshll.u32 %v17486_v8, 16 }
 0x2b2   : > { %3239 = vmatprep.mubr.bf16.mxu0 %v17405_v44  ;;  %v2848_v52 = vshll.u32 %v17480_v45, 16 }
 0x2b3   : > { %v2845_v13 = vor.u32 %v2844_v46, %v2840_v38  ;;  %v17498_v46 = vsel %vm16813_vm2, %v2822_v43, %v2826_v9 }
 0x2b4   : > { %20806 = vst [vmem:[#allocation31_spill] sm:$0xff] %v17498_v46  ;;  %v2850_v1 = vrot.slane %v2848_v52, 5  ;;  %v2880_v52 = vshll.u32 %v13409_v42, 16 }
 0x2b5   : > { %v2846_v36 = vrot.slane %v2845_v13, 4  ;;  %v2877_v13 = vshrl.u32 %v13409_v42, 16  ;;  %v17528_v42 = vld [vmem:[%s16805_s11 + $0xc4] sm:$0xf] }
 0x2b7   : > { %v17515_v43 = vsel %vm16813_vm2, %v2846_v36, %v2850_v1  ;;  %v2879_v56 = vrot.slane %v2877_v13, 4  ;;  %v2882_v36 = vrot.slane %v2880_v52, 5 }
 0x2b8   : > { %20808 = vst [vmem:[#allocation33_spill] sm:$0xff] %v17515_v43  ;;  %v13427_v38 = vcombine.low %v17511_v15, %v17515_v43  ;;  %v17545_v15 = vld [vmem:[%s16805_s11 + $0xc8] sm:$0x1] }
 0x2b9   : > { %3240 = vmatmul.mubr.bf16.gmra.mrb[36].mxu0 %v13424_v2  ;;  %v13406_v2 = vld [vmem:[%s16805_s11 + $0xa8] sm:$0xf] }
 0x2ba   : > { %3249 = vmatprep.mubr.bf16.mxu0 %v17405_v44  ;;  %v2853_v14 = vshrl.u32 %v13406_v2, 16  ;;  %v2856_v55 = vshll.u32 %v13406_v2, 16  ;;  %v2864_v2 = vrot.slane %v2862_v19, 5 }
 0x2bc   : > { %v2855_v4 = vrot.slane %v2853_v14, 4  ;;  %v2858_v6 = vrot.slane %v2856_v55, 5  ;;  %v2869_v9 = vor.u32 %v2868_v34, %v2864_v2  ;;  %v2886_v14 = vshll.u32 %v17507_v61, 16 }
 0x2bd   : > { %v2890_v55 = vshrl.u32 %v17507_v61, 16  ;;  %v2874_v34 = vrot.slane %v2872_v11, 5 }
 0x2be   : > { %v2859_v28 = vor.u32 %v2858_v6, %v2855_v4  ;;  %v2870_v24 = vrot.slane %v2869_v9, 4  ;;  %v2888_v1 = vrot.slane %v2886_v14, 5  ;;  %v17524_v6 = vld [vmem:[%s16805_s11 + $0xbc] sm:$0x1]  ;;  %v2910_v14 = vshll.u32 %v17528_v42, 16 }
 0x2bf   : > { %v2892_v4 = vrot.slane %v2890_v55, 4  ;;  %v2896_v11 = vshll.u32 %v17524_v6, 16  ;;  %v2914_v55 = vshrl.u32 %v17528_v42, 16 }
 0x2c0   : > { %v2860_v19 = vrot.slane %v2859_v28, 4  ;;  %v17536_v43 = vsel %vm16813_vm2, %v2870_v24, %v2874_v34  ;;  %v2883_v28 = vor.u32 %v2882_v36, %v2879_v56  ;;  %v2912_v36 = vrot.slane %v2910_v14, 5 }
 0x2c1   : > { %3250 = vmatmul.mubr.bf16.gmra.mrb[40].mxu0 %v13425_v23  ;;  %v13426_v23 = vcombine.low %v17494_v29, %v17498_v46  ;;  %20810 = vst [vmem:[#allocation35_spill] sm:$0xff] %v17536_v43  ;;  %v2893_v9 = vor.u32 %v2892_v4, %v2888_v1  ;;  %v2898_v24 = vrot.slane %v2896_v11, 5  ;;  %v2916_v4 = vrot.slane %v2914_v55, 4 }
 0x2c2   : > { %3259 = vmatprep.mubr.bf16.mxu0 %v17405_v44  ;;  %v17532_v46 = vsel %vm16813_vm2, %v2860_v19, %v2864_v2  ;;  %v2920_v11 = vshll.u32 %v17545_v15, 16 }
 0x2c3   : > { %20809 = vst [vmem:[#allocation34_spill] sm:$0xff] %v17532_v46  ;;  %v13428_v2 = vcombine.low %v17532_v46, %v17536_v43  ;;  %v2894_v19 = vrot.slane %v2893_v9, 4  ;;  %v2917_v9 = vor.u32 %v2916_v4, %v2912_v36  ;;  %v3443_v4 = vrot.slane %v17241_v16, 5  ;;  %v16039_v16 = vld [vmem:[#allocation3 + $0x314] ss:$8 sps:$4 sm:$0xff]  }
 0x2c4   : > { %v2922_v55 = vrot.slane %v2920_v11, 5 }
 0x2c5   : > { %v17554_v43 = vsel %vm16813_vm2, %v2894_v19, %v2898_v24  ;;  %v2918_v14 = vrot.slane %v2917_v9, 4  ;;  %v13447_v19 = vld [vmem:[%s16805_s11 + $0xc] sm:$0xe]  ;;  %v13448_v9 = vld [vmem:[%s16805_s11 + $0x18] sm:$0xe] }
 0x2c6   : > { %20812 = vst [vmem:[#allocation37_spill] sm:$0xff] %v17554_v43 }
 0x2c9   : > { %3260 = vmatmul.mubr.bf16.gmra.mrb[44].mxu0 %v13426_v23  ;;  %v13412_v23 = vld [vmem:[%s16805_s11 + $0xc0] sm:$0xf] }
 0x2ca   : > { %3269 = vmatprep.mubr.bf16.mxu0 %v17405_v44  ;;  %v2901_v13 = vshrl.u32 %v13412_v23, 16  ;;  %v2904_v52 = vshll.u32 %v13412_v23, 16 }
 0x2cc   : > { %v2903_v34 = vrot.slane %v2901_v13, 4  ;;  %v2906_v56 = vrot.slane %v2904_v52, 5 }
 0x2d1   : > { %3270 = vmatmul.mubr.bf16.gmra.mrb[48].mxu0 %v13427_v38  ;;  %v2884_v38 = vrot.slane %v2883_v28, 4  ;;  %v2907_v28 = vor.u32 %v2906_v56, %v2903_v34  ;;  %v13463_v34 = vrot.slane %v13447_v19, 9 }
 0x2d2   : > { %3279 = vmatprep.mubr.bf16.mxu0 %v17405_v44 }
 0x2d3   : > { %v17549_v23 = vsel %vm16813_vm2, %v2884_v38, %v2888_v1  ;;  %v2908_v52 = vrot.slane %v2907_v28, 4  ;;  %v3440_v38 = vrot.slane %v17230_v41, 5  ;;  %v3447_v41 = vrot.slane %v17238_v20, 5 }
 0x2d4   : > { %20811 = vst [vmem:[#allocation36_spill] sm:$0xff] %v17549_v23  ;;  %v13429_v13 = vcombine.low %v17549_v23, %v17554_v43  ;;  %v3454_v20 = vrot.slane %v17253_v26, 5  ;;  %v17918_v23 = vld [vmem:[%s16805_s11 + $0xb8] sm:$0xf] }
 0x2d5   : > { %v17562_v1 = vsel %vm16813_vm2, %v2908_v52, %v2912_v36  ;;  %v3442_v56 = vrot.slane %v3440_v38, 4  ;;  %v3441_v36 = vsel %vm17071_vm5, %v13463_v34, %v3440_v38  ;;  %v13464_v52 = vrot.slane %v13448_v9, 9  ;;  %v13449_v34 = vld [vmem:[%s16805_s11 + $0x24] sm:$0xe]  ;;  %v16040_v9 = vld [vmem:[#allocation3 + $0x320] ss:$8 sps:$4 sm:$0xff]  }
 0x2d6   : > { %20813 = vst [vmem:[#allocation38_spill] sm:$0xff] %v17562_v1 }
 0x2d7   : > { %v3444_v28 = vsel %vm17071_vm5, %v3442_v56, %v3443_v4  ;;  %v3448_v38 = vsel %vm17071_vm5, %v13464_v52, %v3447_v41  ;;  %v16042_v56 = vld [vmem:[#allocation3 + $0x324] ss:$8 sps:$4 sm:$0xff]   ;;  %v16043_v52 = vld [vmem:[#allocation3 + $0x330] ss:$8 sps:$4 sm:$0xff]  }
 0x2d8   : > { %v13479_v11 = vcombine.low %v3441_v36, %v3444_v28  ;;  %v3456_v36 = vrot.slane %v3454_v20, 4  ;;  %v3457_v28 = vrot.slane %v17270_v49, 5  ;;  %v16048_v49 = vld [vmem:[#allocation3 + $0x344] ss:$8 sps:$4 sm:$0xff]  }
 0x2d9   : > { %3280 = vmatmul.mubr.bf16.gmra.mrb[52].mxu0 %v13428_v2  ;;  %v17566_v2 = vsel %vm16813_vm2, %v2918_v14, %v2922_v55  ;;  %v3449_v14 = vrot.slane %v3447_v41, 4  ;;  %v3450_v55 = vrot.slane %v17249_v35, 5  ;;  %v13465_v35 = vrot.slane %v13449_v34, 9 }
 0x2da   : > { %3289 = vmatprep.mubr.bf16.mxu0 %v17405_v44  ;;  %20814 = vst [vmem:[#allocation39_spill] sm:$0xff] %v17566_v2  ;;  %v13430_v24 = vcombine.low %v17562_v1, %v17566_v2  ;;  %v3458_v41 = vsel %vm17071_vm5, %v3456_v36, %v3457_v28 }
 0x2db   : > { %v3451_v19 = vsel %vm17071_vm5, %v3449_v14, %v3450_v55  ;;  %v3455_v26 = vsel %vm17071_vm5, %v13465_v35, %v3454_v20  ;;  %v13450_v14 = vld [vmem:[%s16805_s11 + $0x30] sm:$0xe]  ;;  %v16051_v20 = vld [vmem:[#allocation3 + $0x354] ss:$8 sps:$4 sm:$0xff]   ;;  %v13451_v35 = vld [vmem:[%s16805_s11 + $0x3c] sm:$0xe] }
 0x2dc   : > { %v13480_v4 = vcombine.low %v3448_v38, %v3451_v19  ;;  %v13481_v55 = vcombine.low %v3455_v26, %v3458_v41  ;;  %v3464_v19 = vrot.slane %v17295_v18, 5  ;;  %v16054_v18 = vld [vmem:[#allocation3 + $0x364] ss:$8 sps:$4 sm:$0xff]   ;;  %v13467_v28 = vrot.slane %v13451_v35, 9  ;;  %v16052_v26 = vld [vmem:[#allocation3 + $0x360] ss:$8 sps:$4 sm:$0xff]  }
 0x2dd   : > { %v16057_v41 = vld [vmem:[#allocation3 + $0x374] ss:$8 sps:$4 sm:$0xff]  }
 0x2e1   : > { %3290 = vmatmul.mubr.bf16.gmra.mrb[56].mxu0 %v13429_v13  ;;  %v16034_v13 = vld [vmem:[#allocation3 + $0x300] ss:$8 sps:$4 sm:$0xff]  }
 0x2e2   : > { %3299 = vmatprep.mubr.bf16.mxu0 %v17405_v44 }
 0x2e9   : > { %3300 = vmatmul.mubr.bf16.gmra.mrb[60].mxu0 %v13430_v24  ;;  %v16037_v24 = vld [vmem:[#allocation3 + $0x310] ss:$8 sps:$4 sm:$0xff]  }
 0x2ea   : > { %3743 = vmatprep.mubr.bf16.mxu0 %v17405_v44 }
 0x2f1   : > { %3744 = vmatmul.mubr.bf16.vlgmr.msra.gmra.mrb[0].mxu0 %v13479_v11  ;;  %v16045_v11 = vld [vmem:[#allocation3 + $0x334] ss:$8 sps:$4 sm:$0xff]  }
 0x2f2   : > { %4195 = vmatpush1.bf16.msra.mxu0 %v16034_v13  ;;  %3753 = vmatprep.mubr.bf16.mxu0 %v17405_v44  ;;  %v3461_v13 = vrot.slane %v17274_v62, 5 }
 0x2f3   : > { %4196 = vmatprep.subr.bf16.mxu0 %v16039_v16  ;;  %v13466_v16 = vrot.slane %v13450_v14, 9  ;;  %v16055_v14 = vld [vmem:[#allocation3 + $0x370] ss:$8 sps:$4 sm:$0xff]  }
 0x2f4   : > { %v3463_v38 = vrot.slane %v3461_v13, 4 }
 0x2f5   : > { %v3462_v62 = vsel %vm17071_vm5, %v13466_v16, %v3461_v13 }
 0x2f6   : > { %4197 = vmatpush1.bf16.msra.mxu0 %v16037_v24  ;;  %v16046_v24 = vld [vmem:[#allocation3 + $0x340] ss:$8 sps:$4 sm:$0xff]   ;;  %v3465_v34 = vsel %vm17071_vm5, %v3463_v38, %v3464_v19  ;;  %v3478_v19 = vrot.slane %v17333_v3, 5  ;;  %v3485_v3 = vrot.slane %v17354_v48, 5 }
 0x2f7   : > { %4198 = vmatprep.subr.bf16.mxu0 %v16042_v56  ;;  %v3468_v56 = vrot.slane %v17292_v0, 5  ;;  %v13482_v36 = vcombine.low %v3462_v62, %v3465_v34  ;;  %v13453_v62 = vld [vmem:[%s16805_s11 + $0x54] sm:$0xe] }
 0x2f9   : > { %3754 = vmatmul.mubr.bf16.gmra.mrb[4].mxu0 %v13480_v4  ;;  %v16049_v4 = vld [vmem:[#allocation3 + $0x350] ss:$8 sps:$4 sm:$0xff]   ;;  %v3469_v0 = vsel %vm17071_vm5, %v13467_v28, %v3468_v56 }
 0x2fa   : > { %3763 = vmatprep.mubr.bf16.mxu0 %v17405_v44  ;;  %4199 = vmatpush1.bf16.msra.mxu0 %v16040_v9  ;;  %v3470_v9 = vrot.slane %v3468_v56, 4  ;;  %v13469_v56 = vrot.slane %v13453_v62, 9  ;;  %v13454_v28 = vld [vmem:[%s16805_s11 + $0x60] sm:$0xe]  ;;  %v13457_v62 = vld [vmem:[%s16805_s11 + $0x84] sm:$0xe] }
 0x2fb   : > { %4200 = vmatprep.subr.bf16.mxu0 %v16045_v11  ;;  %v3471_v11 = vrot.slane %v17310_v47, 5  ;;  %v16061_v47 = vld [vmem:[#allocation3 + $0x384] ss:$8 sps:$4 sm:$0xff]  }
 0x2fd   : > { %v3472_v13 = vsel %vm17071_vm5, %v3470_v9, %v3471_v11  ;;  %v13470_v9 = vrot.slane %v13454_v28, 9 }
 0x2fe   : > { %4201 = vmatpush1.bf16.msra.mxu0 %v16043_v52  ;;  %v3475_v52 = vrot.slane %v17316_v54, 5 }
 0x2ff   : > { %4202 = vmatprep.subr.bf16.mxu0 %v16048_v49  ;;  %v13452_v49 = vld [vmem:[%s16805_s11 + $0x48] sm:$0xe] }
 0x300   : > { %v13468_v16 = vrot.slane %v13452_v49, 9  ;;  %v3477_v38 = vrot.slane %v3475_v52, 4  ;;  %v3499_v49 = vrot.slane %v17394_v39, 5 }
 0x301   : > { %3764 = vmatmul.mubr.bf16.gmra.mrb[8].mxu0 %v13481_v55  ;;  %v13483_v55 = vcombine.low %v3469_v0, %v3472_v13  ;;  %v3496_v0 = vrot.slane %v17374_v12, 5  ;;  %v13455_v13 = vld [vmem:[%s16805_s11 + $0x6c] sm:$0xe] }
 0x302   : > { %3773 = vmatprep.mubr.bf16.mxu0 %v17405_v44  ;;  %4203 = vmatpush1.bf16.msra.mxu0 %v16046_v24  ;;  %v3476_v54 = vsel %vm17071_vm5, %v13468_v16, %v3475_v52  ;;  %v3479_v24 = vsel %vm17071_vm5, %v3477_v38, %v3478_v19  ;;  %v13471_v52 = vrot.slane %v13455_v13, 9  ;;  %v13456_v16 = vld [vmem:[%s16805_s11 + $0x78] sm:$0xe] }
 0x303   : > { %4204 = vmatprep.subr.bf16.mxu0 %v16051_v20  ;;  %v3482_v20 = vrot.slane %v17337_v21, 5  ;;  %v13484_v34 = vcombine.low %v3476_v54, %v3479_v24  ;;  %v13472_v38 = vrot.slane %v13456_v16, 9  ;;  %v3506_v54 = vrot.slane %v17419_v31, 5  ;;  %v13461_v16 = vld [vmem:[%s16805_s11 + $0xb4] sm:$0xe] }
 0x305   : > { %v3483_v35 = vsel %vm17071_vm5, %v13469_v56, %v3482_v20 }
 0x306   : > { %4205 = vmatpush1.bf16.msra.mxu0 %v16049_v4  ;;  %v3484_v4 = vrot.slane %v3482_v20, 4  ;;  %v3510_v20 = vrot.slane %v17423_v53, 5 }
 0x307   : > { %4206 = vmatprep.subr.bf16.mxu0 %v16054_v18 }
 0x308   : > { %v3486_v18 = vsel %vm17071_vm5, %v3484_v4, %v3485_v3  ;;  %v3512_v56 = vrot.slane %v3510_v20, 4  ;;  %v3513_v4 = vrot.slane %v17440_v27, 5 }
 0x309   : > { %3774 = vmatmul.mubr.bf16.gmra.mrb[12].mxu0 %v13482_v36  ;;  %v3489_v36 = vrot.slane %v17358_v57, 5  ;;  %v13485_v21 = vcombine.low %v3483_v35, %v3486_v18  ;;  %v3517_v35 = vrot.slane %v17444_v10, 5  ;;  %v13458_v18 = vld [vmem:[%s16805_s11 + $0x90] sm:$0xe] }
 0x30a   : > { %3783 = vmatprep.mubr.bf16.mxu0 %v17405_v44  ;;  %4207 = vmatpush1.bf16.msra.mxu0 %v16052_v26  ;;  %v3492_v26 = vrot.slane %v17379_v30, 5  ;;  %v3497_v30 = vsel %vm17071_vm5, %v13471_v52, %v3496_v0  ;;  %v3514_v3 = vsel %vm17071_vm5, %v3512_v56, %v3513_v4  ;;  %v13460_v52 = vld [vmem:[%s16805_s11 + $0xa8] sm:$0xe]  ;;  %v16059_v4 = vld [vmem:[#allocation3 + $0x380] ss:$8 sps:$4 sm:$0xff]  }
 0x30b   : > { %4208 = vmatprep.subr.bf16.mxu0 %v16057_v41  ;;  %v3491_v11 = vrot.slane %v3489_v36, 4  ;;  %v3490_v48 = vsel %vm17071_vm5, %v13470_v9, %v3489_v36  ;;  %v13474_v36 = vrot.slane %v13458_v18, 9  ;;  %v3519_v28 = vrot.slane %v3517_v35, 4  ;;  %v16069_v18 = vld [vmem:[#allocation3 + $0x3a0] ss:$8 sps:$4 sm:$0xff]  }
 0x30d   : > { %v3493_v41 = vsel %vm17071_vm5, %v3491_v11, %v3492_v26  ;;  %v3518_v27 = vsel %vm17071_vm5, %v13474_v36, %v3517_v35  ;;  %v3524_v11 = vrot.slane %v17460_v7, 5  ;;  %v13459_v26 = vld [vmem:[%s16805_s11 + $0x9c] sm:$0xe]  ;;  %v16062_v35 = vld [vmem:[%s16805_s11 + $0x24] sm:$0xff]  }
 0x30e   : > { %4209 = vmatpush1.bf16.msra.mxu0 %v16055_v14  ;;  %v13486_v57 = vcombine.low %v3490_v48, %v3493_v41  ;;  %v3498_v14 = vrot.slane %v3496_v0, 4  ;;  %v13475_v48 = vrot.slane %v13459_v26, 9  ;;  %v3527_v0 = vrot.slane %v17480_v45, 5  ;;  %v16074_v36 = vld [vmem:[#allocation3 + $0x3b0] ss:$8 sps:$4 sm:$0xff]  }
 0x30f   : > { %5044 = vmatprep.subr.bf16.mxu0 %v16061_v47  ;;  %v3526_v41 = vrot.slane %v3524_v11, 4  ;;  %v16091_v26 = vld [vmem:[#allocation3 + $0x3e4] ss:$8 sps:$4 sm:$0xff]  }
 0x310   : > { %v3500_v47 = vsel %vm17071_vm5, %v3498_v14, %v3499_v49  ;;  %v13476_v14 = vrot.slane %v13460_v52, 9  ;;  %v16073_v52 = vld [vmem:[%s16805_s11 + $0x60] sm:$0xff]  }
 0x311   : > { %3784 = vmatmul.mubr.bf16.gmra.mrb[16].mxu0 %v13483_v55  ;;  %v3503_v55 = vrot.slane %v17400_v17, 5  ;;  %v13487_v12 = vcombine.low %v3497_v30, %v3500_v47  ;;  %v3528_v13 = vsel %vm17071_vm5, %v3526_v41, %v3527_v0  ;;  %v3534_v30 = vrot.slane %v17503_v50, 5  ;;  %v16096_v41 = vld [vmem:[#allocation3 + $0x3f4] ss:$8 sps:$4 sm:$0xff]   ;;  %v16094_v0 = vld [vmem:[#allocation3 + $0x3f0] ss:$8 sps:$4 sm:$0xff]  }
 0x312   : > { %3793 = vmatprep.mubr.bf16.mxu0 %v17405_v44 }
 0x313   : > { %v3505_v19 = vrot.slane %v3503_v55, 4  ;;  %v3504_v39 = vsel %vm17071_vm5, %v13472_v38, %v3503_v55  ;;  %v3538_v55 = vrot.slane %v17507_v61, 5 }
 0x315   : > { %v3507_v24 = vsel %vm17071_vm5, %v3505_v19, %v3506_v54  ;;  %v3540_v38 = vrot.slane %v3538_v55, 4  ;;  %v3541_v19 = vrot.slane %v17524_v6, 5 }
 0x316   : > { %v13488_v17 = vcombine.low %v3504_v39, %v3507_v24  ;;  %v3545_v39 = vrot.slane %v17528_v42, 5  ;;  %v13462_v24 = vld [vmem:[%s16805_s11 + $0xc0] sm:$0xe]  ;;  %v16058_v42 = vld [vmem:[%s16805_s11 + $0x18] sm:$0xff]  }
 0x317   : > { %v3542_v54 = vsel %vm17071_vm5, %v3540_v38, %v3541_v19 }
 0x319   : > { %3794 = vmatmul.mubr.bf16.gmra.mrb[20].mxu0 %v13484_v34  ;;  %v13473_v34 = vrot.slane %v13457_v62, 9  ;;  %v3547_v62 = vrot.slane %v3545_v39, 4 }
 0x31a   : > { %3803 = vmatprep.mubr.bf16.mxu0 %v17405_v44 }
 0x31b   : > { %v3511_v31 = vsel %vm17071_vm5, %v13473_v34, %v3510_v20  ;;  %v13478_v20 = vrot.slane %v13462_v24, 9  ;;  %v17736_v24 = vld [vmem:[%s16805_s11 + $0x28] sm:$0xf] }
 0x31c   : > { %v13489_v53 = vcombine.low %v3511_v31, %v3514_v3  ;;  %v16066_v31 = vld [vmem:[#allocation3 + $0x394] ss:$8 sps:$4 sm:$0xff]   ;;  %v16071_v3 = vld [vmem:[#allocation3 + $0x3a4] ss:$8 sps:$4 sm:$0xff]  }
 0x31d   : > { %v3546_v6 = vsel %vm17071_vm5, %v13478_v20, %v3545_v39  ;;  %v16093_v39 = vld [vmem:[%s16805_s11 + $0xc0] sm:$0xff]  }
 0x321   : > { %3804 = vmatmul.mubr.bf16.gmra.mrb[24].mxu0 %v13485_v21  ;;  %v3520_v21 = vrot.slane %v17465_v51, 5  ;;  %v3525_v51 = vsel %vm17071_vm5, %v13475_v48, %v3524_v11  ;;  %v16084_v11 = vld [vmem:[#allocation3 + $0x3d0] ss:$8 sps:$4 sm:$0xff]   ;;  %v16089_v48 = vld [vmem:[#allocation3 + $0x3e0] ss:$8 sps:$4 sm:$0xff]  }
 0x322   : > { %3813 = vmatprep.mubr.bf16.mxu0 %v17405_v44  ;;  %v13491_v7 = vcombine.low %v3525_v51, %v3528_v13  ;;  %v16100_v51 = vld [vmem:[#allocation3 + $0x404] ss:$8 sps:$4 sm:$0xff]   ;;  %v16068_v13 = vld [vmem:[%s16805_s11 + $0x48] sm:$0xff]  }
 0x323   : > { %v3521_v9 = vsel %vm17071_vm5, %v3519_v28, %v3520_v21  ;;  %v16081_v28 = vld [vmem:[#allocation3 + $0x3c4] ss:$8 sps:$4 sm:$0xff]  }
 0x324   : > { %v13490_v10 = vcombine.low %v3518_v27, %v3521_v9  ;;  %v16063_v21 = vld [vmem:[%s16805_s11 + $0x30] sm:$0xff]   ;;  %v16086_v9 = vld [vmem:[#allocation3 + $0x3d4] ss:$8 sps:$4 sm:$0xff]  }
 0x325   : > { %v16079_v27 = vld [vmem:[#allocation3 + $0x3c0] ss:$8 sps:$4 sm:$0xff]  }
 0x329   : > { %3814 = vmatmul.mubr.bf16.gmra.mrb[28].mxu0 %v13486_v57  ;;  %v3531_v57 = vrot.slane %v17486_v8, 5 }
 0x32a   : > { %3823 = vmatprep.mubr.bf16.mxu0 %v17405_v44 }
 0x32b   : > { %v3533_v49 = vrot.slane %v3531_v57, 4  ;;  %v3532_v45 = vsel %vm17071_vm5, %v13476_v14, %v3531_v57  ;;  %v16072_v57 = vld [vmem:[%s16805_s11 + $0x54] sm:$0xff]  }
 0x32c   : > { %v16078_v14 = vld [vmem:[%s16805_s11 + $0x78] sm:$0xff]  }
 0x32d   : > { %v3535_v47 = vsel %vm17071_vm5, %v3533_v49, %v3534_v30  ;;  %v16082_v49 = vld [vmem:[%s16805_s11 + $0x84] sm:$0xff]   ;;  %v16083_v30 = vld [vmem:[%s16805_s11 + $0x90] sm:$0xff]  }
 0x32e   : > { %v13492_v8 = vcombine.low %v3532_v45, %v3535_v47  ;;  %v16087_v45 = vld [vmem:[%s16805_s11 + $0x9c] sm:$0xff]   ;;  %v16088_v47 = vld [vmem:[%s16805_s11 + $0xa8] sm:$0xff]  }
 0x331   : > { %3824 = vmatmul.mubr.bf16.gmra.mrb[32].mxu0 %v13487_v12  ;;  %v13477_v12 = vrot.slane %v13461_v16, 9  ;;  %v13575_v16 = vld [vmem:[%s16805_s11 + $0x18] sm:$0xf] }
 0x332   : > { %3833 = vmatprep.mubr.bf16.mxu0 %v17405_v44  ;;  %v4503_v38 = vshll.u32 %v13575_v16, 16 }
 0x333   : > { %v3539_v50 = vsel %vm17071_vm5, %v13477_v12, %v3538_v55  ;;  %v16092_v55 = vld [vmem:[%s16805_s11 + $0xb4] sm:$0xff]   ;;  %v4500_v12 = vshrl.u32 %v13575_v16, 16 }
 0x334   : > { %v13493_v61 = vcombine.low %v3539_v50, %v3542_v54  ;;  %v13578_v54 = vld [vmem:[%s16805_s11 + $0x24] sm:$0xf]  ;;  %v4505_v20 = vrot.slane %v4503_v38, 5 }
 0x339   : > { %3834 = vmatmul.mubr.bf16.gmra.mrb[36].mxu0 %v13488_v17  ;;  %v3548_v17 = vrot.slane %v17545_v15, 5  ;;  %v16064_v15 = vld [vmem:[#allocation3 + $0x390] ss:$8 sps:$4 sm:$0xff]  }
 0x33a   : > { %3843 = vmatprep.mubr.bf16.mxu0 %v17405_v44 }
 0x33b   : > { %v3549_v34 = vsel %vm17071_vm5, %v3547_v62, %v3548_v17 }
 0x33c   : > { %v13494_v56 = vcombine.low %v3546_v6, %v3549_v34  ;;  %v17739_v6 = vld [vmem:[%s16805_s11 + $0x20] sm:$0x1]  ;;  %v4524_v34 = vshrl.u32 %v13578_v54, 16 }
 0x341   : > { %3844 = vmatmul.mubr.bf16.gmra.mrb[40].mxu0 %v13489_v53  ;;  %v16076_v53 = vld [vmem:[#allocation3 + $0x3b4] ss:$8 sps:$4 sm:$0xff]  }
 0x342   : > { %3853 = vmatprep.mubr.bf16.mxu0 %v17405_v44 }
 0x349   : > { %3854 = vmatmul.mubr.bf16.gmra.mrb[44].mxu0 %v13490_v10  ;;  %v16067_v10 = vld [vmem:[%s16805_s11 + $0x3c] sm:$0xff]  }
 0x34a   : > { %3863 = vmatprep.mubr.bf16.mxu0 %v17405_v44 }
 0x351   : > { %3864 = vmatmul.mubr.bf16.gmra.mrb[48].mxu0 %v13491_v7  ;;  %v16077_v7 = vld [vmem:[%s16805_s11 + $0x6c] sm:$0xff]  }
 0x352   : > { %3873 = vmatprep.mubr.bf16.mxu0 %v17405_v44 }
 0x359   : > { %3874 = vmatmul.mubr.bf16.gmra.mrb[52].mxu0 %v13492_v8  ;;  %v17728_v8 = vld [vmem:[%s16805_s11 + $0x1c] sm:$0xf] }
 0x35a   : > { %3883 = vmatprep.mubr.bf16.mxu0 %v17405_v44  ;;  %v4509_v19 = vshll.u32 %v17728_v8, 16  ;;  %v4513_v50 = vshrl.u32 %v17728_v8, 16 }
 0x35c   : > { %v4511_v62 = vrot.slane %v4509_v19, 5  ;;  %v4515_v17 = vrot.slane %v4513_v50, 4  ;;  %v16098_v19 = vld [vmem:[#allocation3 + $0x400] ss:$8 sps:$4 sm:$0xff]  }
 0x35d   : > { %v17762_v50 = vld [vmem:[%s16805_s11 + $0x38] sm:$0x1] }
 0x361   : > { %3884 = vmatmul.mubr.bf16.gmra.mrb[56].mxu0 %v13493_v61  ;;  %v4502_v61 = vrot.slane %v4500_v12, 4 }
 0x362   : > { %3893 = vmatprep.mubr.bf16.mxu0 %v17405_v44 }
 0x369   : > { %3894 = vmatmul.mubr.bf16.gmra.mrb[60].mxu0 %v13494_v56  ;;  %v4527_v56 = vshll.u32 %v13578_v54, 16  ;;  %v13584_v54 = vld [vmem:[%s16805_s11 + $0x3c] sm:$0xf] }
 0x36a   : > { %4226 = vmatprep.mubr.bf16.mxu0 %v17405_v44 }
 0x371   : > { %4227 = vmatmul.mubr.bf16.vlgmr.msra.gmra.mrb[0].mxu0 %v16058_v42  ;;  %v4533_v42 = vshll.u32 %v17736_v24, 16 }
 0x372   : > { %5045 = vmatpush1.bf16.msra.mxu0 %v16059_v4  ;;  %4236 = vmatprep.mubr.bf16.mxu0 %v17405_v44  ;;  %v4537_v4 = vshrl.u32 %v17736_v24, 16 }
 0x373   : > { %5046 = vmatprep.subr.bf16.mxu0 %v16066_v31  ;;  %v4506_v31 = vor.u32 %v4505_v20, %v4502_v61  ;;  %v17766_v61 = vld [vmem:[%s16805_s11 + $0x40] sm:$0xf] }
 0x376   : > { %5047 = vmatpush1.bf16.msra.mxu0 %v16064_v15  ;;  %v4516_v15 = vor.u32 %v4515_v17, %v4511_v62 }
 0x377   : > { %5048 = vmatprep.subr.bf16.mxu0 %v16071_v3  ;;  %v4519_v3 = vshll.u32 %v17739_v6, 16 }
 0x379   : > { %4237 = vmatmul.mubr.bf16.gmra.mrb[4].mxu0 %v16062_v35  ;;  %v4526_v35 = vrot.slane %v4524_v34, 4 }
 0x37a   : > { %4246 = vmatprep.mubr.bf16.mxu0 %v17405_v44  ;;  %5049 = vmatpush1.bf16.msra.mxu0 %v16069_v18  ;;  %v4529_v18 = vrot.slane %v4527_v56, 5  ;;  %v4567_v56 = vshll.u32 %v17762_v50, 16 }
 0x37b   : > { %5050 = vmatprep.subr.bf16.mxu0 %v16076_v53  ;;  %v4535_v53 = vrot.slane %v4533_v42, 5  ;;  %v4572_v42 = vshrl.u32 %v13584_v54, 16 }
 0x37e   : > { %5051 = vmatpush1.bf16.msra.mxu0 %v16074_v36  ;;  %v4539_v36 = vrot.slane %v4537_v4, 4  ;;  %v4575_v4 = vshll.u32 %v13584_v54, 16 }
 0x37f   : > { %5052 = vmatprep.subr.bf16.mxu0 %v16081_v28  ;;  %v16097_v28 = vld [vmem:[%s16805_s11 + $0xcc] sm:$0xff]  }
 0x381   : > { %4247 = vmatmul.mubr.bf16.gmra.mrb[8].mxu0 %v16063_v21  ;;  %v17747_v21 = vld [vmem:[%s16805_s11 + $0x2c] sm:$0x1] }
 0x382   : > { %4256 = vmatprep.mubr.bf16.mxu0 %v17405_v44  ;;  %5053 = vmatpush1.bf16.msra.mxu0 %v16079_v27  ;;  %v13581_v27 = vld [vmem:[%s16805_s11 + $0x30] sm:$0xf] }
 0x383   : > { %5054 = vmatprep.subr.bf16.mxu0 %v16086_v9  ;;  %v4507_v9 = vrot.slane %v4506_v31, 4  ;;  %v16101_v31 = vld [vmem:[#allocation3 + $0x410] ss:$8 sps:$4 sm:$0xff]  }
 0x386   : > { %5055 = vmatpush1.bf16.msra.mxu0 %v16084_v11  ;;  %v4517_v11 = vrot.slane %v4516_v15, 4  ;;  %v4581_v15 = vshll.u32 %v17766_v61, 16 }
 0x387   : > { %5056 = vmatprep.subr.bf16.mxu0 %v16091_v26  ;;  %v4521_v26 = vrot.slane %v4519_v3, 5  ;;  %v4585_v3 = vshrl.u32 %v17766_v61, 16 }
 0x389   : > { %4257 = vmatmul.mubr.bf16.gmra.mrb[12].mxu0 %v16067_v10  ;;  %v17751_v10 = vld [vmem:[%s16805_s11 + $0x34] sm:$0xf] }
 0x38a   : > { %4266 = vmatprep.mubr.bf16.mxu0 %v17405_v44  ;;  %5057 = vmatpush1.bf16.msra.mxu0 %v16089_v48  ;;  %v4530_v48 = vor.u32 %v4529_v18, %v4526_v35  ;;  %v16106_v35 = vld [vmem:[#allocation3 + $0x424] ss:$8 sps:$4 sm:$0xff]  }
 0x38b   : > { %5058 = vmatprep.subr.bf16.mxu0 %v16096_v41  ;;  %v4540_v41 = vor.u32 %v4539_v36, %v4535_v53  ;;  %v13587_v36 = vld [vmem:[%s16805_s11 + $0x48] sm:$0xf] }
 0x38e   : > { %5059 = vmatpush1.bf16.msra.mxu0 %v16094_v0  ;;  %v4543_v0 = vshll.u32 %v17747_v21, 16 }
 0x38f   : > { %5638 = vmatprep.subr.bf16.mxu0 %v16100_v51  ;;  %v4548_v51 = vshrl.u32 %v13581_v27, 16 }
 0x391   : > { %4267 = vmatmul.mubr.bf16.gmra.mrb[16].mxu0 %v16068_v13  ;;  %v4551_v13 = vshll.u32 %v13581_v27, 16 }
 0x392   : > { %4276 = vmatprep.mubr.bf16.mxu0 %v17405_v44 }
 0x399   : > { %4277 = vmatmul.mubr.bf16.gmra.mrb[20].mxu0 %v16072_v57  ;;  %v4557_v57 = vshll.u32 %v17751_v10, 16 }
 0x39a   : > { %4286 = vmatprep.mubr.bf16.mxu0 %v17405_v44 }
 0x39b   : > { %v4559_v12 = vrot.slane %v4557_v57, 5 }
 0x3a1   : > { %4287 = vmatmul.mubr.bf16.gmra.mrb[24].mxu0 %v16073_v52  ;;  %v4561_v52 = vshrl.u32 %v17751_v10, 16 }
 0x3a2   : > { %4296 = vmatprep.mubr.bf16.mxu0 %v17405_v44 }
 0x3a3   : > { %v4563_v38 = vrot.slane %v4561_v52, 4 }
 0x3a5   : > { %v4564_v34 = vor.u32 %v4563_v38, %v4559_v12 }
 0x3a7   : > { %v4565_v27 = vrot.slane %v4564_v34, 4  ;;  %v17798_v34 = vld [vmem:[%s16805_s11 + $0x58] sm:$0xf] }
 0x3a9   : > { %4297 = vmatmul.mubr.bf16.gmra.mrb[28].mxu0 %v16077_v7  ;;  %v4512_v7 = vsel %vm16813_vm2, %v4507_v9, %v4511_v62  ;;  %v4569_v9 = vrot.slane %v4567_v56, 5 }
 0x3aa   : > { %4306 = vmatprep.mubr.bf16.mxu0 %v17405_v44 }
 0x3b1   : > { %4307 = vmatmul.mubr.bf16.gmra.mrb[32].mxu0 %v16078_v14  ;;  %v4522_v14 = vsel %vm16813_vm2, %v4517_v11, %v4521_v26  ;;  %v4574_v11 = vrot.slane %v4572_v42, 4  ;;  %v4577_v26 = vrot.slane %v4575_v4, 5 }
 0x3b2   : > { %4316 = vmatprep.mubr.bf16.mxu0 %v17405_v44  ;;  %v13623_v16 = vcombine.low %v4512_v7, %v4522_v14  ;;  %v16109_v7 = vld [vmem:[#allocation3 + $0x434] ss:$8 sps:$4 sm:$0xff]  }
 0x3b9   : > { %4317 = vmatmul.mubr.bf16.gmra.mrb[36].mxu0 %v16082_v49  ;;  %v4531_v49 = vrot.slane %v4530_v48, 4  ;;  %v17781_v48 = vld [vmem:[%s16805_s11 + $0x44] sm:$0x1] }
 0x3ba   : > { %4326 = vmatprep.mubr.bf16.mxu0 %v17405_v44 }
 0x3bb   : > { %v4536_v20 = vsel %vm16813_vm2, %v4531_v49, %v4535_v53  ;;  %v17787_v49 = vld [vmem:[#allocation2] sm:$0xff] }
 0x3c1   : > { %4327 = vmatmul.mubr.bf16.gmra.mrb[40].mxu0 %v16083_v30  ;;  %v4541_v30 = vrot.slane %v4540_v41, 4  ;;  %v4587_v41 = vrot.slane %v4585_v3, 4 }
 0x3c2   : > { %4336 = vmatprep.mubr.bf16.mxu0 %v17405_v44 }
 0x3c9   : > { %4337 = vmatmul.mubr.bf16.gmra.mrb[44].mxu0 %v16087_v45  ;;  %v4545_v45 = vrot.slane %v4543_v0, 5  ;;  %v16104_v0 = vld [vmem:[#allocation3 + $0x420] ss:$8 sps:$4 sm:$0xff]  }
 0x3ca   : > { %4346 = vmatprep.mubr.bf16.mxu0 %v17405_v44 }
 0x3cb   : > { %v4546_v62 = vsel %vm16813_vm2, %v4541_v30, %v4545_v45  ;;  %v4570_v30 = vsel %vm16813_vm2, %v4565_v27, %v4569_v9  ;;  %v4578_v45 = vor.u32 %v4577_v26, %v4574_v11  ;;  %v4629_v27 = vshll.u32 %v17798_v34, 16 }
 0x3cc   : > { %v13624_v18 = vcombine.low %v4536_v20, %v4546_v62  ;;  %v17794_v20 = vld [vmem:[%s16805_s11 + $0x50] sm:$0x1]  ;;  %v4633_v9 = vshrl.u32 %v17798_v34, 16 }
 0x3cd   : > { %v4579_v56 = vrot.slane %v4578_v45, 4 }
 0x3d1   : > { %4347 = vmatmul.mubr.bf16.gmra.mrb[48].mxu0 %v16088_v47  ;;  %v4550_v47 = vrot.slane %v4548_v51, 4  ;;  %v4596_v51 = vshrl.u32 %v13587_v36, 16 }
 0x3d2   : > { %4356 = vmatprep.mubr.bf16.mxu0 %v17405_v44 }
 0x3d3   : > { %v4598_v38 = vrot.slane %v4596_v51, 4 }
 0x3d9   : > { %4357 = vmatmul.mubr.bf16.gmra.mrb[52].mxu0 %v16092_v55  ;;  %v4553_v55 = vrot.slane %v4551_v13, 5  ;;  %v4599_v13 = vshll.u32 %v13587_v36, 16 }
 0x3da   : > { %4366 = vmatprep.mubr.bf16.mxu0 %v17405_v44 }
 0x3db   : > { %v4554_v17 = vor.u32 %v4553_v55, %v4550_v47  ;;  %v4591_v55 = vshll.u32 %v17781_v48, 16 }
 0x3dd   : > { %v4555_v53 = vrot.slane %v4554_v17, 4  ;;  %v13590_v17 = vld [vmem:[%s16805_s11 + $0x54] sm:$0xf]  ;;  %v4593_v4 = vrot.slane %v4591_v55, 5  ;;  %v13593_v55 = vld [vmem:[%s16805_s11 + $0x60] sm:$0xf] }
 0x3de   : > { %v4623_v36 = vshll.u32 %v13590_v17, 16 }
 0x3df   : > { %v4560_v14 = vsel %vm16813_vm2, %v4555_v53, %v4559_v12  ;;  %v16112_v12 = vld [vmem:[#allocation3 + $0x444] ss:$8 sps:$4 sm:$0xff]   ;;  %v4620_v53 = vshrl.u32 %v13590_v17, 16 }
 0x3e0   : > { %v13625_v62 = vcombine.low %v4560_v14, %v4570_v30  ;;  %v4631_v14 = vrot.slane %v4629_v27, 5  ;;  %v4635_v30 = vrot.slane %v4633_v9, 4 }
 0x3e1   : > { %4367 = vmatmul.mubr.bf16.gmra.mrb[56].mxu0 %v16093_v39  ;;  %v16103_v39 = vld [vmem:[#allocation3 + $0x414] ss:$8 sps:$4 sm:$0xff]  }
 0x3e2   : > { %4376 = vmatprep.mubr.bf16.mxu0 %v17405_v44 }
 0x3e9   : > { %4377 = vmatmul.mubr.bf16.gmra.mrb[60].mxu0 %v16097_v28  ;;  %v17778_v28 = vld [vmem:[%s16805_s11 + $0x4c] sm:$0xf] }
 0x3ea   : > { %5076 = vmatprep.mubr.bf16.mxu0 %v17405_v44  ;;  %v4605_v57 = vshll.u32 %v17778_v28, 16  ;;  %v4609_v52 = vshrl.u32 %v17778_v28, 16 }
 0x3ec   : > { %v4607_v54 = vrot.slane %v4605_v57, 5  ;;  %v16118_v57 = vld [vmem:[#allocation3 + $0x464] ss:$8 sps:$4 sm:$0xff]  }
 0x3f1   : > { %5077 = vmatmul.mubr.bf16.vlgmr.msra.gmra.mrb[0].mxu0 %v13623_v16  ;;  %v16107_v16 = vld [vmem:[#allocation3 + $0x430] ss:$8 sps:$4 sm:$0xff]  }
 0x3f2   : > { %5639 = vmatpush1.bf16.msra.mxu0 %v16098_v19  ;;  %5086 = vmatprep.mubr.bf16.mxu0 %v17405_v44  ;;  %v4583_v44 = vrot.slane %v4581_v15, 5  ;;  %v4601_v19 = vrot.slane %v4599_v13, 5 }
 0x3f3   : > { %5640 = vmatprep.subr.bf16.mxu0 %v16103_v39  ;;  %v4611_v39 = vrot.slane %v4609_v52, 4  ;;  %v4622_v52 = vrot.slane %v4620_v53, 4 }
 0x3f4   : > { %v4588_v47 = vor.u32 %v4587_v41, %v4583_v44  ;;  %v4602_v15 = vor.u32 %v4601_v19, %v4598_v38  ;;  %v4584_v11 = vsel %vm16813_vm2, %v4579_v56, %v4583_v44  ;;  %v16113_v41 = vld [vmem:[#allocation3 + $0x450] ss:$8 sps:$4 sm:$0xff]   ;;  %v17813_v44 = vld [vmem:[%s16805_s11 + $0x64] sm:$0xf]  ;;  %v4644_v56 = vshrl.u32 %v13593_v55, 16 }
 0x3f5   : > { %v4612_v3 = vor.u32 %v4611_v39, %v4607_v54  ;;  %v16121_v19 = vld [vmem:[#allocation3 + $0x474] ss:$8 sps:$4 sm:$0xff]  }
 0x3f6   : > { %5641 = vmatpush1.bf16.msra.mxu0 %v16101_v31  ;;  %v4589_v42 = vrot.slane %v4588_v47, 4  ;;  %v16110_v31 = vld [vmem:[#allocation3 + $0x440] ss:$8 sps:$4 sm:$0xff]   ;;  %v17809_v47 = vld [vmem:[%s16805_s11 + $0x5c] sm:$0x1]  ;;  %v4646_v53 = vrot.slane %v4644_v56, 4 }
 0x3f7   : > { %5642 = vmatprep.subr.bf16.mxu0 %v16106_v35  ;;  %v4615_v35 = vshll.u32 %v17794_v20, 16  ;;  %v4613_v51 = vrot.slane %v4612_v3, 4  ;;  %v4639_v17 = vshll.u32 %v17809_v47, 16 }
 0x3f8   : > { %v4594_v26 = vsel %vm16813_vm2, %v4589_v42, %v4593_v4  ;;  %v4647_v42 = vshll.u32 %v13593_v55, 16  ;;  %v4653_v4 = vshll.u32 %v17813_v44, 16 }
 0x3f9   : > { %5087 = vmatmul.mubr.bf16.gmra.mrb[4].mxu0 %v13624_v18  ;;  %v16115_v18 = vld [vmem:[#allocation3 + $0x454] ss:$8 sps:$4 sm:$0xff]   ;;  %v4617_v13 = vrot.slane %v4615_v35, 5  ;;  %v13626_v45 = vcombine.low %v4584_v11, %v4594_v26  ;;  %v17824_v11 = vld [vmem:[%s16805_s11 + $0x68] sm:$0x1] }
 0x3fa   : > { %5096 = vmatprep.mubr.bf16.mxu0 %v17787_v49  ;;  %5643 = vmatpush1.bf16.msra.mxu0 %v16104_v0  ;;  %v4603_v0 = vrot.slane %v4602_v15, 4  ;;  %v4655_v27 = vrot.slane %v4653_v4, 5  ;;  %v13596_v26 = vld [vmem:[%s16805_s11 + $0x6c] sm:$0xf]  ;;  %v17843_v4 = vld [vmem:[%s16805_s11 + $0x74] sm:$0x1] }
 0x3fb   : > { %5644 = vmatprep.subr.bf16.mxu0 %v16109_v7  ;;  %v4625_v7 = vrot.slane %v4623_v36, 5  ;;  %v4618_v39 = vsel %vm16813_vm2, %v4613_v51, %v4617_v13  ;;  %v4649_v36 = vrot.slane %v4647_v42, 5 }
 0x3fc   : > { %v4608_v38 = vsel %vm16813_vm2, %v4603_v0, %v4607_v54  ;;  %v16119_v54 = vld [vmem:[#allocation3 + $0x470] ss:$8 sps:$4 sm:$0xff]  }
 0x3fd   : > { %v13627_v15 = vcombine.low %v4608_v38, %v4618_v39  ;;  %v4650_v13 = vor.u32 %v4649_v36, %v4646_v53  ;;  %v17840_v38 = vld [vmem:[%s16805_s11 + $0x7c] sm:$0xf] }
 0x3fe   : > { %5645 = vmatpush1.bf16.msra.mxu0 %v16107_v16  ;;  %v16116_v16 = vld [vmem:[#allocation3 + $0x460] ss:$8 sps:$4 sm:$0xff]  }
 0x3ff   : > { %5646 = vmatprep.subr.bf16.mxu0 %v16112_v12  ;;  %v4626_v12 = vor.u32 %v4625_v7, %v4622_v52  ;;  %v4663_v52 = vshll.u32 %v17824_v11, 16  ;;  %v4668_v7 = vshrl.u32 %v13596_v26, 16 }
 0x401   : > { %5097 = vmatmul.mubr.bf16.gmra.mrb[8].mxu0 %v13625_v62  ;;  %v4636_v62 = vor.u32 %v4635_v30, %v4631_v14  ;;  %v4627_v3 = vrot.slane %v4626_v12, 4  ;;  %v4671_v30 = vshll.u32 %v13596_v26, 16  ;;  %v4665_v12 = vrot.slane %v4663_v52, 5 }
 0x402   : > { %5106 = vmatprep.mubr.bf16.mxu0 %v17787_v49  ;;  %5647 = vmatpush1.bf16.msra.mxu0 %v16110_v31  ;;  %v4657_v31 = vshrl.u32 %v17813_v44, 16 }
 0x403   : > { %5648 = vmatprep.subr.bf16.mxu0 %v16115_v18  ;;  %v4637_v35 = vrot.slane %v4636_v62, 4  ;;  %v4641_v18 = vrot.slane %v4639_v17, 5  ;;  %v4632_v0 = vsel %vm16813_vm2, %v4627_v3, %v4631_v14  ;;  %v4670_v62 = vrot.slane %v4668_v7, 4  ;;  %v13602_v7 = vld [vmem:[%s16805_s11 + $0x84] sm:$0xf] }
 0x404   : > { %v4659_v9 = vrot.slane %v4657_v31, 4  ;;  %v4673_v17 = vrot.slane %v4671_v30, 5  ;;  %v4705_v3 = vshrl.u32 %v17840_v38, 16  ;;  %v17858_v30 = vld [vmem:[%s16805_s11 + $0x88] sm:$0xf] }
 0x405   : > { %v4642_v51 = vsel %vm16813_vm2, %v4637_v35, %v4641_v18 }
 0x406   : > { %5649 = vmatpush1.bf16.msra.mxu0 %v16113_v41  ;;  %v17828_v41 = vld [vmem:[%s16805_s11 + $0x70] sm:$0xf]  ;;  %v13628_v14 = vcombine.low %v4632_v0, %v4642_v51  ;;  %v4674_v53 = vor.u32 %v4673_v17, %v4670_v62  ;;  %v4725_v62 = vshll.u32 %v17858_v30, 16  ;;  %v4729_v17 = vshrl.u32 %v17858_v30, 16 }
 0x407   : > { %5650 = vmatprep.subr.bf16.mxu0 %v16118_v57  ;;  %v4660_v57 = vor.u32 %v4659_v9, %v4655_v27  ;;  %v4681_v55 = vshrl.u32 %v17828_v41, 16  ;;  %v4687_v9 = vshll.u32 %v17843_v4, 16 }
 0x409   : > { %5107 = vmatmul.mubr.bf16.gmra.mrb[12].mxu0 %v13626_v45  ;;  %v4677_v45 = vshll.u32 %v17828_v41, 16  ;;  %v4661_v39 = vrot.slane %v4660_v57, 4  ;;  %v4683_v42 = vrot.slane %v4681_v55, 4  ;;  %v17854_v57 = vld [vmem:[%s16805_s11 + $0x80] sm:$0x1]  ;;  %v4689_v55 = vrot.slane %v4687_v9, 5 }
 0x40a   : > { %5116 = vmatprep.mubr.bf16.mxu0 %v17787_v49  ;;  %5651 = vmatpush1.bf16.msra.mxu0 %v16116_v16  ;;  %v13599_v16 = vld [vmem:[%s16805_s11 + $0x78] sm:$0xf] }
 0x40b   : > { %5652 = vmatprep.subr.bf16.mxu0 %v16121_v19  ;;  %v4651_v19 = vrot.slane %v4650_v13, 4  ;;  %v4679_v56 = vrot.slane %v4677_v45, 5  ;;  %v4692_v31 = vshrl.u32 %v13599_v16, 16  ;;  %v4666_v18 = vsel %vm16813_vm2, %v4661_v39, %v4665_v12 }
 0x40c   : > { %v4707_v13 = vrot.slane %v4705_v3, 4  ;;  %v4716_v39 = vshrl.u32 %v13602_v7, 16  ;;  %v4719_v12 = vshll.u32 %v13602_v7, 16 }
 0x40d   : > { %v4656_v35 = vsel %vm16813_vm2, %v4651_v19, %v4655_v27  ;;  %v4684_v36 = vor.u32 %v4683_v42, %v4679_v56  ;;  %v4694_v26 = vrot.slane %v4692_v31, 4  ;;  %v4675_v27 = vrot.slane %v4674_v53, 4 }
 0x40e   : > { %5653 = vmatpush1.bf16.msra.mxu0 %v16119_v54  ;;  %v4695_v54 = vshll.u32 %v13599_v16, 16  ;;  %v13629_v52 = vcombine.low %v4656_v35, %v4666_v18  ;;  %v4711_v19 = vshll.u32 %v17854_v57, 16  ;;  %v4718_v35 = vrot.slane %v4716_v39, 4 }
 0x40f   : > { %v4685_v45 = vrot.slane %v4684_v36, 4  ;;  %v4680_v42 = vsel %vm16813_vm2, %v4675_v27, %v4679_v56  ;;  %v4721_v18 = vrot.slane %v4719_v12, 5  ;;  %v4727_v53 = vrot.slane %v4725_v62, 5 }
 0x410   : > { %v4697_v0 = vrot.slane %v4695_v54, 5  ;;  %v4713_v3 = vrot.slane %v4711_v19, 5  ;;  %v4731_v36 = vrot.slane %v4729_v17, 4 }
 0x411   : > { %5117 = vmatmul.mubr.bf16.gmra.mrb[16].mxu0 %v13627_v15  ;;  %v4701_v15 = vshll.u32 %v17840_v38, 16  ;;  %v4690_v31 = vsel %vm16813_vm2, %v4685_v45, %v4689_v55  ;;  %v4722_v7 = vor.u32 %v4721_v18, %v4718_v35  ;;  %v17888_v35 = vld [vmem:[%s16805_s11 + $0xa0] sm:$0xf] }
 0x412   : > { %5126 = vmatprep.mubr.bf16.mxu0 %v17787_v49  ;;  %v4698_v16 = vor.u32 %v4697_v0, %v4694_v26  ;;  %v13630_v9 = vcombine.low %v4680_v42, %v4690_v31  ;;  %v17869_v26 = vld [vmem:[%s16805_s11 + $0x8c] sm:$0x1]  ;;  %v13605_v0 = vld [vmem:[%s16805_s11 + $0x90] sm:$0xf]  ;;  %v4732_v27 = vor.u32 %v4731_v36, %v4727_v53 }
 0x413   : > { %v4703_v51 = vrot.slane %v4701_v15, 5  ;;  %v4735_v45 = vshll.u32 %v17869_v26, 16  ;;  %v4740_v55 = vshrl.u32 %v13605_v0, 16  ;;  %v4723_v39 = vrot.slane %v4722_v7, 4 }
 0x414   : > { %v4699_v54 = vrot.slane %v4698_v16, 4  ;;  %v4743_v16 = vshll.u32 %v13605_v0, 16  ;;  %v4733_v12 = vrot.slane %v4732_v27, 4  ;;  %v4773_v27 = vshll.u32 %v17888_v35, 16 }
 0x415   : > { %v4737_v62 = vrot.slane %v4735_v45, 5  ;;  %v4742_v17 = vrot.slane %v4740_v55, 4  ;;  %v4728_v18 = vsel %vm16813_vm2, %v4723_v39, %v4727_v53  ;;  %v4777_v45 = vshrl.u32 %v17888_v35, 16  ;;  %v13611_v55 = vld [vmem:[%s16805_s11 + $0xa8] sm:$0xf] }
 0x416   : > { %v4745_v42 = vrot.slane %v4743_v16, 5  ;;  %v17900_v16 = vld [vmem:[%s16805_s11 + $0xac] sm:$0xf] }
 0x417   : > { %v4738_v36 = vsel %vm16813_vm2, %v4733_v12, %v4737_v62  ;;  %v4775_v62 = vrot.slane %v4773_v27, 5  ;;  %v4797_v2 = vshll.u32 %v17900_v16, 16  ;;  %v4801_v1 = vshrl.u32 %v17900_v16, 16 }
 0x418   : > { %v13632_v53 = vcombine.low %v4728_v18, %v4738_v36 }
 0x419   : > { %5127 = vmatmul.mubr.bf16.gmra.mrb[20].mxu0 %v13628_v14  ;;  %v4708_v14 = vor.u32 %v4707_v13, %v4703_v51  ;;  %v17873_v13 = vld [vmem:[%s16805_s11 + $0x94] sm:$0xf]  ;;  %v4799_v27 = vrot.slane %v4797_v2, 5  ;;  %v4821_v2 = vshll.u32 %v17918_v23, 16 }
 0x41a   : > { %5136 = vmatprep.mubr.bf16.mxu0 %v17787_v49  ;;  %v4753_v19 = vshrl.u32 %v17873_v13, 16 }
 0x41b   : > { %v4709_v15 = vrot.slane %v4708_v14, 4  ;;  %v4749_v14 = vshll.u32 %v17873_v13, 16 }
 0x41d   : > { %v4714_v56 = vsel %vm16813_vm2, %v4709_v15, %v4713_v3  ;;  %v4751_v31 = vrot.slane %v4749_v14, 5  ;;  %v17884_v15 = vld [vmem:[%s16805_s11 + $0x98] sm:$0x1]  ;;  %v13608_v3 = vld [vmem:[%s16805_s11 + $0x9c] sm:$0xf] }
 0x41e   : > { %v4767_v7 = vshll.u32 %v13608_v3, 16 }
 0x420   : > { %v4769_v12 = vrot.slane %v4767_v7, 5 }
 0x421   : > { %5137 = vmatmul.mubr.bf16.gmra.mrb[24].mxu0 %v13629_v52  ;;  %v4704_v52 = vsel %vm16813_vm2, %v4699_v54, %v4703_v51  ;;  %v4755_v54 = vrot.slane %v4753_v19, 4 }
 0x422   : > { %5146 = vmatprep.mubr.bf16.mxu0 %v17787_v49  ;;  %v13631_v51 = vcombine.low %v4704_v52, %v4714_v56  ;;  %v4759_v52 = vshll.u32 %v17884_v15, 16  ;;  %v4764_v56 = vshrl.u32 %v13608_v3, 16  ;;  %v4791_v3 = vshll.u32 %v13611_v55, 16 }
 0x423   : > { %v4756_v0 = vor.u32 %v4755_v54, %v4751_v31  ;;  %v4788_v54 = vshrl.u32 %v13611_v55, 16  ;;  %v17914_v55 = vld [vmem:[%s16805_s11 + $0xb0] sm:$0x1] }
 0x424   : > { %v4766_v39 = vrot.slane %v4764_v56, 4  ;;  %v4793_v7 = vrot.slane %v4791_v3, 5 }
 0x425   : > { %v4757_v19 = vrot.slane %v4756_v0, 4  ;;  %v4790_v56 = vrot.slane %v4788_v54, 4 }
 0x427   : > { %v4794_v29 = vor.u32 %v4793_v7, %v4790_v56  ;;  %v17929_v7 = vld [vmem:[%s16805_s11 + $0xbc] sm:$0x1] }
 0x429   : > { %5147 = vmatmul.mubr.bf16.gmra.mrb[28].mxu0 %v13630_v9  ;;  %v4746_v9 = vor.u32 %v4745_v42, %v4742_v17  ;;  %v4779_v17 = vrot.slane %v4777_v45, 4  ;;  %v17903_v42 = vld [vmem:[%s16805_s11 + $0xa4] sm:$0x1]  ;;  %v4803_v45 = vrot.slane %v4801_v1, 4  ;;  %v4825_v1 = vshrl.u32 %v17918_v23, 16 }
 0x42a   : > { %5156 = vmatprep.mubr.bf16.mxu0 %v17787_v49  ;;  %v4795_v54 = vrot.slane %v4794_v29, 4 }
 0x42b   : > { %v4747_v14 = vrot.slane %v4746_v9, 4  ;;  %v4770_v9 = vor.u32 %v4769_v12, %v4766_v39  ;;  %v4780_v0 = vor.u32 %v4779_v17, %v4775_v62  ;;  %v4804_v60 = vor.u32 %v4803_v45, %v4799_v27  ;;  %v13617_v45 = vld [vmem:[%s16805_s11 + $0xc0] sm:$0xf] }
 0x42d   : > { %v4752_v18 = vsel %vm16813_vm2, %v4747_v14, %v4751_v31  ;;  %v4771_v31 = vrot.slane %v4770_v9, 4  ;;  %v4781_v14 = vrot.slane %v4780_v0, 4  ;;  %v4805_v3 = vrot.slane %v4804_v60, 4 }
 0x42e   : > { %v4823_v0 = vrot.slane %v4821_v2, 5  ;;  %v4831_v60 = vshll.u32 %v17929_v7, 16 }
 0x42f   : > { %v4776_v12 = vsel %vm16813_vm2, %v4771_v31, %v4775_v62  ;;  %v4836_v31 = vshrl.u32 %v13617_v45, 16 }
 0x431   : > { %5157 = vmatmul.mubr.bf16.gmra.mrb[32].mxu0 %v13631_v51  ;;  %v4761_v51 = vrot.slane %v4759_v52, 5  ;;  %v4783_v52 = vshll.u32 %v17903_v42, 16 }
 0x432   : > { %5166 = vmatprep.mubr.bf16.mxu0 %v17787_v49 }
 0x433   : > { %v4762_v36 = vsel %vm16813_vm2, %v4757_v19, %v4761_v51  ;;  %v4785_v46 = vrot.slane %v4783_v52, 5  ;;  %v4807_v19 = vshll.u32 %v17914_v55, 16  ;;  %v4827_v52 = vrot.slane %v4825_v1, 4 }
 0x434   : > { %v13633_v43 = vcombine.low %v4752_v18, %v4762_v36  ;;  %v4833_v1 = vrot.slane %v4831_v60, 5 }
 0x435   : > { %v4786_v17 = vsel %vm16813_vm2, %v4781_v14, %v4785_v46  ;;  %v4809_v18 = vrot.slane %v4807_v19, 5  ;;  %v4828_v29 = vor.u32 %v4827_v52, %v4823_v0  ;;  %v4839_v14 = vshll.u32 %v13617_v45, 16 }
 0x436   : > { %v13634_v56 = vcombine.low %v4776_v12, %v4786_v17  ;;  %v4838_v12 = vrot.slane %v4836_v31, 4 }
 0x437   : > { %v4810_v62 = vsel %vm16813_vm2, %v4805_v3, %v4809_v18  ;;  %v4829_v2 = vrot.slane %v4828_v29, 4  ;;  %v4841_v17 = vrot.slane %v4839_v14, 5  ;;  %v17944_v18 = vld [vmem:[%s16805_s11 + $0xc8] sm:$0x1] }
 0x439   : > { %5167 = vmatmul.mubr.bf16.gmra.mrb[36].mxu0 %v13632_v53  ;;  %v13614_v53 = vld [vmem:[%s16805_s11 + $0xb4] sm:$0xf]  ;;  %v4842_v45 = vor.u32 %v4841_v17, %v4838_v12 }
 0x43a   : > { %5176 = vmatprep.mubr.bf16.mxu0 %v17787_v49  ;;  %v4812_v51 = vshrl.u32 %v13614_v53, 16  ;;  %v4815_v39 = vshll.u32 %v13614_v53, 16  ;;  %v4800_v53 = vsel %vm16813_vm2, %v4795_v54, %v4799_v27  ;;  %v17959_v12 = vld [vmem:[%s16805_s11 + $0xd4] sm:$0x1] }
 0x43b   : > { %v13635_v27 = vcombine.low %v4800_v53, %v4810_v62  ;;  %v4855_v62 = vshll.u32 %v17944_v18, 16 }
 0x43c   : > { %v4814_v36 = vrot.slane %v4812_v51, 4  ;;  %v4817_v9 = vrot.slane %v4815_v39, 5 }
 0x43e   : > { %v4818_v46 = vor.u32 %v4817_v9, %v4814_v36  ;;  %v13620_v36 = vld [vmem:[%s16805_s11 + $0xcc] sm:$0xf]  ;;  %v17948_v9 = vld [vmem:[%s16805_s11 + $0xd0] sm:$0xf] }
 0x43f   : > { %v4863_v29 = vshll.u32 %v13620_v36, 16  ;;  %v4869_v60 = vshll.u32 %v17948_v9, 16  ;;  %v4873_v31 = vshrl.u32 %v17948_v9, 16 }
 0x440   : > { %v4819_v39 = vrot.slane %v4818_v46, 4  ;;  %v4860_v46 = vshrl.u32 %v13620_v36, 16 }
 0x441   : > { %5177 = vmatmul.mubr.bf16.gmra.mrb[40].mxu0 %v13633_v43  ;;  %v17933_v43 = vld [vmem:[%s16805_s11 + $0xc4] sm:$0xf] }
 0x442   : > { %5186 = vmatprep.mubr.bf16.mxu0 %v17787_v49  ;;  %v4845_v19 = vshll.u32 %v17933_v43, 16  ;;  %v4849_v51 = vshrl.u32 %v17933_v43, 16  ;;  %v4824_v52 = vsel %vm16813_vm2, %v4819_v39, %v4823_v0  ;;  %v4865_v39 = vrot.slane %v4863_v29, 5 }
 0x444   : > { %v4847_v54 = vrot.slane %v4845_v19, 5  ;;  %v4851_v3 = vrot.slane %v4849_v51, 4  ;;  %v4843_v19 = vrot.slane %v4842_v45, 4  ;;  %v4857_v51 = vrot.slane %v4855_v62, 5 }
 0x446   : > { %v4852_v53 = vor.u32 %v4851_v3, %v4847_v54  ;;  %v4848_v17 = vsel %vm16813_vm2, %v4843_v19, %v4847_v54 }
 0x448   : > { %v4853_v0 = vrot.slane %v4852_v53, 4 }
 0x449   : > { %5187 = vmatmul.mubr.bf16.gmra.mrb[44].mxu0 %v13634_v56  ;;  %v4834_v56 = vsel %vm16813_vm2, %v4829_v2, %v4833_v1  ;;  %v4871_v2 = vrot.slane %v4869_v60, 5  ;;  %v4875_v1 = vrot.slane %v4873_v31, 4  ;;  %v5367_v60 = vrot.slane %v17728_v8, 5  ;;  %v13655_v31 = vld [vmem:[%s16805_s11 + $0x18] sm:$0xe] }
 0x44a   : > { %5196 = vmatprep.mubr.bf16.mxu0 %v17787_v49  ;;  %v13636_v14 = vcombine.low %v4824_v52, %v4834_v56  ;;  %v4858_v3 = vsel %vm16813_vm2, %v4853_v0, %v4857_v51  ;;  %v4879_v56 = vshll.u32 %v17959_v12, 16  ;;  %v13671_v19 = vrot.slane %v13655_v31, 9  ;;  %v16129_v31 = vld [vmem:[#allocation6 + $0x18] sm:$0xff]  }
 0x44b   : > { %v4876_v52 = vor.u32 %v4875_v1, %v4871_v2  ;;  %v13637_v45 = vcombine.low %v4848_v17, %v4858_v3  ;;  %v5369_v0 = vrot.slane %v5367_v60, 4  ;;  %v5370_v51 = vrot.slane %v17739_v6, 5  ;;  %v16124_v1 = vld [vmem:[#allocation6 + $0x48] sm:$0xff]   ;;  %v13656_v3 = vld [vmem:[%s16805_s11 + $0x24] sm:$0xe] }
 0x44c   : > { %v5374_v8 = vrot.slane %v17736_v24, 5 }
 0x44d   : > { %v4877_v62 = vrot.slane %v4876_v52, 4  ;;  %v5371_v17 = vsel %vm17071_vm5, %v5369_v0, %v5370_v51  ;;  %v16126_v52 = vld [vmem:[#allocation6 + $0x50] sm:$0xff]   ;;  %v5384_v0 = vrot.slane %v17762_v50, 5 }
 0x451   : > { %5197 = vmatmul.mubr.bf16.gmra.mrb[48].mxu0 %v13635_v27  ;;  %v4862_v27 = vrot.slane %v4860_v46, 4  ;;  %v4881_v46 = vrot.slane %v4879_v56, 5  ;;  %v13672_v56 = vrot.slane %v13656_v3, 9 }
 0x452   : > { %5206 = vmatprep.mubr.bf16.mxu0 %v17787_v49 }
 0x453   : > { %v4866_v36 = vor.u32 %v4865_v39, %v4862_v27  ;;  %v4882_v54 = vsel %vm16813_vm2, %v4877_v62, %v4881_v46  ;;  %v16122_v27 = vld [vmem:[#allocation6 + $0x40] sm:$0xff]   ;;  %v16127_v62 = vld [vmem:[#allocation6 + $0x10] sm:$0xff]   ;;  %v16128_v46 = vld [vmem:[#allocation6 + $0x58] sm:$0xff]   ;;  %v5375_v24 = vsel %vm17071_vm5, %v13672_v56, %v5374_v8 }
 0x454   : > { %v16123_v39 = vld [vmem:[#allocation6] sm:$0xff]   ;;  %14270 = vmatprep.subr.bf16.mxu1 %v16122_v27  ;;  %v5388_v27 = vrot.slane %v17766_v61, 5 }
 0x455   : > { %v4867_v53 = vrot.slane %v4866_v36, 4  ;;  %14271 = vmatpush3.bf16.msra.mxu1 %v16123_v39  ;;  %v16125_v36 = vld [vmem:[#allocation6 + $0x8] sm:$0xff]  }
 0x456   : > { %14272 = vmatprep.subr.bf16.mxu1 %v16124_v1  ;;  %v13658_v39 = vld [vmem:[%s16805_s11 + $0x3c] sm:$0xe] }
 0x457   : > { %v4872_v29 = vsel %vm16813_vm2, %v4867_v53, %v4871_v2  ;;  %v5368_v2 = vsel %vm17071_vm5, %v13671_v19, %v5367_v60  ;;  %v5377_v53 = vrot.slane %v17747_v21, 5  ;;  %v13657_v60 = vld [vmem:[%s16805_s11 + $0x30] sm:$0xe] }
 0x458   : > { %v13687_v6 = vcombine.low %v5368_v2, %v5371_v17  ;;  %v13674_v2 = vrot.slane %v13658_v39, 9  ;;  %v5390_v17 = vrot.slane %v5388_v27, 4 }
 0x459   : > { %5207 = vmatmul.mubr.bf16.gmra.mrb[52].mxu0 %v13636_v14  ;;  %v13638_v14 = vcombine.low %v4872_v29, %v4882_v54  ;;  %14273 = vmatpush3.bf16.msra.mxu1 %v16125_v36  ;;  %v5381_v54 = vrot.slane %v17751_v10, 5  ;;  %v5395_v36 = vrot.slane %v17778_v28, 5 }
 0x45a   : > { %5216 = vmatprep.mubr.bf16.mxu0 %v17787_v49  ;;  %14274 = vmatprep.subr.bf16.mxu1 %v16126_v52  ;;  %v5389_v50 = vsel %vm17071_vm5, %v13674_v2, %v5388_v27  ;;  %v13662_v27 = vld [vmem:[%s16805_s11 + $0x6c] sm:$0xe]  ;;  %v5419_v2 = vrot.slane %v17843_v4, 5 }
 0x45b   : > { %v5383_v19 = vrot.slane %v5381_v54, 4  ;;  %v5397_v56 = vrot.slane %v5395_v36, 4  ;;  %v13678_v39 = vrot.slane %v13662_v27, 9  ;;  %v13667_v27 = vld [vmem:[%s16805_s11 + $0xa8] sm:$0xe] }
 0x45d   : > { %14275 = vmatpush3.bf16.msra.mxu1 %v16127_v62  ;;  %v5385_v10 = vsel %vm17071_vm5, %v5383_v19, %v5384_v0  ;;  %v5402_v62 = vrot.slane %v17798_v34, 5  ;;  %v5412_v0 = vrot.slane %v17824_v11, 5 }
 0x45e   : > { %14276 = vmatprep.subr.bf16.mxu1 %v16128_v46  ;;  %v13660_v46 = vld [vmem:[%s16805_s11 + $0x54] sm:$0xe] }
 0x461   : > { %5217 = vmatmul.mubr.bf16.gmra.mrb[56].mxu0 %v13637_v45  ;;  %v5376_v45 = vrot.slane %v5374_v8, 4  ;;  %14277 = vmatpush3.bf16.msra.mxu1 %v16129_v31  ;;  %v5391_v8 = vrot.slane %v17781_v48, 5  ;;  %v5409_v31 = vrot.slane %v17813_v44, 5 }
 0x462   : > { %5226 = vmatprep.mubr.bf16.mxu0 %v17787_v49 }
 0x463   : > { %v5378_v29 = vsel %vm17071_vm5, %v5376_v45, %v5377_v53  ;;  %v5392_v3 = vsel %vm17071_vm5, %v5390_v17, %v5391_v8  ;;  %v5398_v45 = vrot.slane %v17794_v20, 5  ;;  %v5411_v19 = vrot.slane %v5409_v31, 4 }
 0x464   : > { %v13688_v21 = vcombine.low %v5375_v24, %v5378_v29  ;;  %v13690_v61 = vcombine.low %v5389_v50, %v5392_v3  ;;  %v13676_v24 = vrot.slane %v13660_v46, 9  ;;  %v5404_v29 = vrot.slane %v5402_v62, 4  ;;  %v13663_v50 = vld [vmem:[%s16805_s11 + $0x78] sm:$0xe] }
 0x465   : > { %v5399_v53 = vsel %vm17071_vm5, %v5397_v56, %v5398_v45  ;;  %v5423_v8 = vrot.slane %v17840_v38, 5  ;;  %v13679_v3 = vrot.slane %v13663_v50, 9  ;;  %v13664_v56 = vld [vmem:[%s16805_s11 + $0x84] sm:$0xe]  ;;  %v5437_v46 = vrot.slane %v17873_v13, 5  ;;  %v16131_v13 = vld [vmem:[#allocation6 + $0x20] sm:$0xff]  }
 0x466   : > { %v5403_v20 = vsel %vm17071_vm5, %v13676_v24, %v5402_v62  ;;  %v13680_v45 = vrot.slane %v13664_v56, 9  ;;  %v13683_v50 = vrot.slane %v13667_v27, 9  ;;  %v16141_v27 = vld [vmem:[#allocation6 + $0x88] sm:$0xff]  }
 0x467   : > { %v5424_v4 = vsel %vm17071_vm5, %v13679_v3, %v5423_v8  ;;  %v5454_v3 = vrot.slane %v17914_v55, 5 }
 0x469   : > { %5227 = vmatmul.mubr.bf16.gmra.mrb[60].mxu0 %v13638_v14  ;;  %v13673_v14 = vrot.slane %v13657_v60, 9 }
 0x46a   : > { %5670 = vmatprep.mubr.bf16.mxu0 %v17787_v49 }
 0x46b   : > { %v5382_v51 = vsel %vm17071_vm5, %v13673_v14, %v5381_v54  ;;  %v5405_v54 = vrot.slane %v17809_v47, 5 }
 0x46c   : > { %v13689_v1 = vcombine.low %v5382_v51, %v5385_v10  ;;  %v5413_v51 = vsel %vm17071_vm5, %v5411_v19, %v5412_v0  ;;  %v5416_v10 = vrot.slane %v17828_v41, 5  ;;  %v16132_v0 = vld [vmem:[#allocation6 + $0x68] sm:$0xff]  }
 0x46d   : > { %v5406_v60 = vsel %vm17071_vm5, %v5404_v29, %v5405_v54  ;;  %v5439_v29 = vrot.slane %v5437_v46, 4  ;;  %v5440_v54 = vrot.slane %v17884_v15, 5  ;;  %v5447_v15 = vrot.slane %v17903_v42, 5 }
 0x46e   : > { %v13692_v34 = vcombine.low %v5403_v20, %v5406_v60  ;;  %v5417_v11 = vsel %vm17071_vm5, %v13678_v39, %v5416_v10  ;;  %v5444_v60 = vrot.slane %v17888_v35, 5  ;;  %v6431_v42 = vshrl.u32 %v17787_v49, 16  ;;  %v16135_v39 = vld [vmem:[#allocation6 + $0x30] sm:$0xff]  }
 0x46f   : > { %v5441_v20 = vsel %vm17071_vm5, %v5439_v29, %v5440_v54  ;;  %v5465_v54 = vrot.slane %v17933_v43, 5 }
 0x470   : > { %v5446_v19 = vrot.slane %v5444_v60, 4 }
 0x471   : > { %5671 = vmatmul.mubr.bf16.vlgmr.msra.gmra.mrb[0].mxu0 %v13687_v6  ;;  %v13659_v6 = vld [vmem:[%s16805_s11 + $0x48] sm:$0xe] }
 0x472   : > { %5680 = vmatprep.mubr.bf16.mxu0 %v17787_v49  ;;  %v13675_v52 = vrot.slane %v13659_v6, 9  ;;  %v5426_v6 = vrot.slane %v17854_v57, 5 }
 0x474   : > { %v5396_v48 = vsel %vm17071_vm5, %v13675_v52, %v5395_v36  ;;  %v5425_v36 = vrot.slane %v5423_v8, 4  ;;  %v5430_v52 = vrot.slane %v17858_v30, 5  ;;  %v6434_v8 = vshll.u32 %v17787_v49, 16 }
 0x475   : > { %v13691_v28 = vcombine.low %v5396_v48, %v5399_v53  ;;  %v5433_v53 = vrot.slane %v17869_v26, 5 }
 0x476   : > { %v5432_v48 = vrot.slane %v5430_v52, 4  ;;  %v5431_v57 = vsel %vm17071_vm5, %v13680_v45, %v5430_v52  ;;  %v5458_v45 = vrot.slane %v17918_v23, 5 }
 0x478   : > { %v5434_v62 = vsel %vm17071_vm5, %v5432_v48, %v5433_v53  ;;  %v13668_v53 = vld [vmem:[%s16805_s11 + $0xb4] sm:$0xe] }
 0x479   : > { %5681 = vmatmul.mubr.bf16.gmra.mrb[4].mxu0 %v13688_v21  ;;  %v13661_v21 = vld [vmem:[%s16805_s11 + $0x60] sm:$0xe]  ;;  %v13696_v30 = vcombine.low %v5431_v57, %v5434_v62 }
 0x47a   : > { %5690 = vmatprep.mubr.bf16.mxu0 %v17787_v49  ;;  %v13677_v14 = vrot.slane %v13661_v21, 9  ;;  %v16130_v21 = vld [vmem:[#allocation6 + $0x60] sm:$0xff]  }
 0x47b   : > { %14278 = vmatprep.subr.bf16.mxu1 %v16130_v21  ;;  %v5468_v21 = vrot.slane %v17944_v18, 5 }
 0x47c   : > { %v5410_v47 = vsel %vm17071_vm5, %v13677_v14, %v5409_v31  ;;  %v13666_v31 = vld [vmem:[%s16805_s11 + $0x9c] sm:$0xe]  ;;  %14279 = vmatpush3.bf16.msra.mxu1 %v16131_v13 }
 0x47d   : > { %v13693_v44 = vcombine.low %v5410_v47, %v5413_v51  ;;  %v13682_v14 = vrot.slane %v13666_v31, 9  ;;  %v16133_v47 = vld [vmem:[#allocation6 + $0x28] sm:$0xff]   ;;  %14280 = vmatprep.subr.bf16.mxu1 %v16132_v0  ;;  %v5448_v51 = vsel %vm17071_vm5, %v5446_v19, %v5447_v15  ;;  %v5467_v31 = vrot.slane %v5465_v54, 4 }
 0x47e   : > { %v5475_v0 = vrot.slane %v17959_v12, 5  ;;  %v16142_v12 = vld [vmem:[#allocation6 + $0xd0] sm:$0xff]  }
 0x47f   : > { %v5445_v35 = vsel %vm17071_vm5, %v13682_v14, %v5444_v60  ;;  %v5469_v13 = vsel %vm17071_vm5, %v5467_v31, %v5468_v21  ;;  %v13670_v14 = vld [vmem:[%s16805_s11 + $0xcc] sm:$0xe] }
 0x480   : > { %14281 = vmatpush3.bf16.msra.mxu1 %v16133_v47  ;;  %v13686_v43 = vrot.slane %v13670_v14, 9  ;;  %v16138_v47 = vld [vmem:[#allocation6 + $0xc0] sm:$0xff]  }
 0x481   : > { %5691 = vmatmul.mubr.bf16.gmra.mrb[8].mxu0 %v13689_v1  ;;  %v5418_v1 = vrot.slane %v5416_v10, 4  ;;  %v5451_v10 = vrot.slane %v17900_v16, 5 }
 0x482   : > { %5700 = vmatprep.mubr.bf16.mxu0 %v17787_v49 }
 0x483   : > { %v5420_v17 = vsel %vm17071_vm5, %v5418_v1, %v5419_v2  ;;  %v6374_v1 = vld [vmem:[#allocation2 + $0x8] sm:$0x88]  ;;  %v13698_v2 = vcombine.low %v5445_v35, %v5448_v51  ;;  %v5452_v55 = vsel %vm17071_vm5, %v13683_v50, %v5451_v10  ;;  %v16139_v35 = vld [vmem:[#allocation6 + $0x80] sm:$0xff]   ;;  %v5895_v50 = vld [vmem:[%s20584_s3] sm:$0x3] }
 0x484   : > { %v13694_v41 = vcombine.low %v5417_v11, %v5420_v17  ;;  %v6426_v11 = vshrl.u32 %v6374_v1, 16  ;;  %v6433_v17 = vrot.slane %v6431_v42, 7  ;;  %v16144_v42 = vld [vmem:[#allocation6 + $0xd8] sm:$0xff]   ;;  %v16147_v1 = vld [vmem:[#allocation6 + $0xa0] sm:$0xff]  }
 0x486   : > { %v13752_v16 = vrot.slane %v6426_v11, 11  ;;  %v6438_v52 = vrot.slane %v6433_v17, 4  ;;  %v5897_v11 = vlaneseq }
 0x489   : > { %5701 = vmatmul.mubr.bf16.gmra.mrb[12].mxu0 %v13690_v61  ;;  %v5427_v61 = vsel %vm17071_vm5, %v5425_v36, %v5426_v6  ;;  %v16136_v36 = vld [vmem:[#allocation6 + $0x78] sm:$0xff]   ;;  %v6436_v6 = vor.u32 %v6434_v8, %v6433_v17  ;;  %v5898_v17 = vshrl.u32 %v5897_v11, 7 }
 0x48a   : > { %5710 = vmatprep.mubr.bf16.mxu0 %v17787_v49  ;;  %v13695_v38 = vcombine.low %v5424_v4, %v5427_v61  ;;  %v16137_v4 = vld [vmem:[#allocation6 + $0x38] sm:$0xff]   ;;  %v20815_v61 = vmov 0 }
 0x48b   : > { %v20816_v61 = vsel %vm18073_vm8, 4294967295, %v20815_v61  ;;  %v6437_v56 = vsel %vm18073_vm8, %v13752_v16, %v6436_v6  ;;  %v6446_v48 = vsel %vm18073_vm8, %v6438_v52, %v6436_v6  ;;  %v5899_v8 = vsub.s32 0, %v5898_v17 }
 0x48c   : > { %20817 = vst [vmem:[#allocation40_spill] sm:$0xff] %v20816_v61  ;;  %v13768_v57 = vcombine.low %v6437_v56, %v6446_v48  ;;  %v13769_v62 = vcombine.high %v6437_v56, %v6446_v48  ;;  %v16153_v48 = vld [vmem:[#allocation6 + $0xb8] sm:$0xff]  }
 0x48d   : > { %v18113_v16 = vrot.slane %v5895_v50, %v5899_v8 }
 0x48e   : > { %7065 = vmatprep.mubr.bf16.mxu1 %v13769_v62 }
 0x491   : > { %5711 = vmatmul.mubr.bf16.gmra.mrb[16].mxu0 %v13691_v28  ;;  %v13665_v28 = vld [vmem:[%s16805_s11 + $0x90] sm:$0xe] }
 0x492   : > { %5720 = vmatprep.mubr.bf16.mxu0 %v17787_v49  ;;  %v13681_v24 = vrot.slane %v13665_v28, 9  ;;  %v13684_v28 = vrot.slane %v13668_v53, 9 }
 0x494   : > { %v5438_v26 = vsel %vm17071_vm5, %v13681_v24, %v5437_v46  ;;  %v5461_v24 = vrot.slane %v17929_v7, 5  ;;  %v5459_v23 = vsel %vm17071_vm5, %v13684_v28, %v5458_v45 }
 0x499   : > { %5721 = vmatmul.mubr.bf16.gmra.mrb[20].mxu0 %v13692_v34  ;;  %v13697_v34 = vcombine.low %v5438_v26, %v5441_v20  ;;  %v13669_v26 = vld [vmem:[%s16805_s11 + $0xc0] sm:$0xe]  ;;  %s16609_s11 = smov [#allocation8]  }
 0x49a   : > { %5730 = vmatprep.mubr.bf16.mxu0 %v17787_v49  ;;  %v13685_v60 = vrot.slane %v13669_v26, 9  ;;  %s16534_s12 = sshll.u32 %s16609_s11, 4  ;;  %s16535_s12 = int_to_ptr.vmem [resolvable:$false] %s16534_s12 }
 0x49b   : > { %s16536_s13 = scalar_lea.vmem %s16535_s12, 8192  ;;  %p16537_p4 = scmp.lt.s32.totalorder %s20534_s6, %s16535_s12 }
 0x49c   : > { %v5466_v7 = vsel %vm17071_vm5, %v13685_v60, %v5465_v54  ;;  %p16538_p7 = scmp.lt.s32.totalorder %s16536_s13, %s16530_s22 }
 0x49d   : > { %v13701_v19 = vcombine.low %v5466_v7, %v5469_v13 }
 0x49e   : > { %p16539_p8 = por %p16538_p7, %p16537_p4 }
 0x4a0   : > { %p16540_p11 = pnand %p16539_p8, %p16533_p3 }
 0x4a1   : > { %5731 = vmatmul.mubr.bf16.gmra.mrb[24].mxu0 %v13693_v44  ;;  %v16134_v44 = vld [vmem:[#allocation6 + $0x70] sm:$0xff]  }
 0x4a2   : > { %5740 = vmatprep.mubr.bf16.mxu0 %v17787_v49  ;;  %14282 = vmatprep.subr.bf16.mxu1 %v16134_v44  ;;  %v16143_v44 = vld [vmem:[#allocation6 + $0x90] sm:$0xff]  }
 0x4a3   : > { %14283 = vmatpush3.bf16.msra.mxu1 %v16135_v39  ;;  %v16145_v39 = vld [vmem:[#allocation6 + $0x98] sm:$0xff]  }
 0x4a4   : > { %14284 = vmatprep.subr.bf16.mxu1 %v16136_v36  ;;  %v16151_v36 = vld [vmem:[#allocation6 + $0xb0] sm:$0xff]  }
 0x4a7   : > { %14285 = vmatpush3.bf16.msra.mxu1 %v16137_v4 }
 0x4a8   : > { %14382 = vmatprep.subr.bf16.mxu1 %v16138_v47 }
 0x4a9   : > { %5741 = vmatmul.mubr.bf16.gmra.mrb[28].mxu0 %v13694_v41  ;;  %v5453_v41 = vrot.slane %v5451_v10, 4  ;;  %v16140_v10 = vld [vmem:[#allocation6 + $0xc8] sm:$0xff]  }
 0x4aa   : > { %5750 = vmatprep.mubr.bf16.mxu0 %v17787_v49  ;;  %7066 = vmatmul.mubr.bf16.vlgmr.msra.gmra.mrb[0].mxu1 %v13768_v57 }
 0x4ab   : > { %14383 = vmatpush3.bf16.msra.mxu1 %v16139_v35 }
 0x4ac   : > { %14384 = vmatprep.subr.bf16.mxu1 %v16140_v10  ;;  %v6380_v10 = vld [vmem:[#allocation2 + $0x58] sm:$0x88] }
 0x4ad   : > { %v6470_v11 = vshrl.u32 %v6380_v10, 16 }
 0x4af   : > { %14385 = vmatpush3.bf16.msra.mxu1 %v16141_v27 }
 0x4b0   : > { %14386 = vmatprep.subr.bf16.mxu1 %v16142_v12 }
 0x4b1   : > { %5751 = vmatmul.mubr.bf16.gmra.mrb[32].mxu0 %v13695_v38  ;;  %v5455_v38 = vsel %vm17071_vm5, %v5453_v41, %v5454_v3  ;;  %v5903_v41 = vsub.s32 1, %v5898_v17  ;;  %v16150_v3 = vld [vmem:[#allocation6 + $0xf0] sm:$0xff]  }
 0x4b2   : > { %5760 = vmatprep.mubr.bf16.mxu0 %v17787_v49  ;;  %v13699_v46 = vcombine.low %v5452_v55, %v5455_v38 }
 0x4b3   : > { %14387 = vmatpush3.bf16.msra.mxu1 %v16143_v44  ;;  %v18115_v6 = vrot.slane %v5895_v50, %v5903_v41 }
 0x4b4   : > { %14388 = vmatprep.subr.bf16.mxu1 %v16144_v42 }
 0x4b7   : > { %14389 = vmatpush3.bf16.msra.mxu1 %v16145_v39  ;;  %v16154_v39 = vld [vmem:[#allocation6 + $0x140] sm:$0xff]  }
 0x4b9   : > { %5761 = vmatmul.mubr.bf16.gmra.mrb[36].mxu0 %v13696_v30  ;;  %v5460_v30 = vrot.slane %v5458_v45, 4  ;;  %v16152_v45 = vld [vmem:[#allocation6 + $0xf8] sm:$0xff]  }
 0x4ba   : > { %5770 = vmatprep.mubr.bf16.mxu0 %v17787_v49 }
 0x4bb   : > { %v5462_v29 = vsel %vm17071_vm5, %v5460_v30, %v5461_v24  ;;  %v6377_v24 = vld [vmem:[#allocation2 + $0x30] sm:$0x88] }
 0x4bc   : > { %v13700_v20 = vcombine.low %v5459_v23, %v5462_v29 }
 0x4c1   : > { %5771 = vmatmul.mubr.bf16.gmra.mrb[40].mxu0 %v13697_v34  ;;  %v5472_v34 = vrot.slane %v17948_v9, 5 }
 0x4c2   : > { %5780 = vmatprep.mubr.bf16.mxu0 %v17787_v49 }
 0x4c3   : > { %v5474_v15 = vrot.slane %v5472_v34, 4  ;;  %v5473_v18 = vsel %vm17071_vm5, %v13686_v43, %v5472_v34 }
 0x4c5   : > { %v5476_v51 = vsel %vm17071_vm5, %v5474_v15, %v5475_v0 }
 0x4c6   : > { %v13702_v9 = vcombine.low %v5473_v18, %v5476_v51 }
 0x4c9   : > { %5781 = vmatmul.mubr.bf16.gmra.mrb[44].mxu0 %v13698_v2  ;;  %v16149_v2 = vld [vmem:[#allocation6 + $0xa8] sm:$0xff]  }
 0x4ca   : > { %5790 = vmatprep.mubr.bf16.mxu0 %v17787_v49 }
 0x4d1   : > { %5791 = vmatmul.mubr.bf16.gmra.mrb[48].mxu0 %v13699_v46 }
 0x4d2   : > { %5800 = vmatprep.mubr.bf16.mxu0 %v17787_v49 }
 0x4d9   : > { %5801 = vmatmul.mubr.bf16.gmra.mrb[52].mxu0 %v13700_v20  ;;  %v6448_v20 = vshrl.u32 %v6377_v24, 16 }
 0x4da   : > { %5810 = vmatprep.mubr.bf16.mxu0 %v17787_v49 }
 0x4e1   : > { %5811 = vmatmul.mubr.bf16.gmra.mrb[56].mxu0 %v13701_v19 }
 0x4e2   : > { %5820 = vmatprep.mubr.bf16.mxu0 %v17787_v49  ;;  %v16146_v49 = vld [vmem:[#allocation6 + $0xe0] sm:$0xff]  }
 0x4e3   : > { %14390 = vmatprep.subr.bf16.mxu1 %v16146_v49 }
 0x4e4   : > { %14391 = vmatpush3.bf16.msra.mxu1 %v16147_v1 }
 0x4e5   : > { %14392 = vmatprep.subr.bf16.mxu1 %v16148_v59 }
 0x4e8   : > { %14393 = vmatpush3.bf16.msra.mxu1 %v16149_v2 }
 0x4e9   : > { %5821 = vmatmul.mubr.bf16.gmra.mrb[60].mxu0 %v13702_v9  ;;  %14394 = vmatprep.subr.bf16.mxu1 %v16150_v3  ;;  %v13753_v9 = vrot.slane %v6448_v20, 11 }
 0x4ec   : > { %14395 = vmatpush3.bf16.msra.mxu1 %v16151_v36 }
 0x4ed   : > { %14396 = vmatprep.subr.bf16.mxu1 %v16152_v45 }
 0x4f0   : > { %14397 = vmatpush3.bf16.msra.mxu1 %v16153_v48 }
 0x4f1   : > { %14494 = vmatprep.subr.bf16.mxu1 %v16154_v39 }
 0x544   : > { %v5672_v4 = vpop.f32.mrb[0].mxu0 }
 0x545   : > { %v5907_v52 = vadd.f32 %v18113_v16, %v5672_v4  ;;  %v5674_v56 = vpop.f32.mrb[1].mxu0 }
 0x546   : > { %v5908_v55 = vadd.f32 %v18115_v6, %v5674_v56  ;;  %v5676_v38 = vpop.f32.mrb[2].mxu0 }
 0x547   : > { %v5971_v53 = vmax.f32 %v5907_v52, 0.0  ;;  %v5909_v57 = vadd.f32 %v18113_v16, %v5676_v38  ;;  %v5678_v62 = vpop.f32.mrb[3].mxu0 }
 0x548   : > { %v5972_v46 = vmax.f32 %v5908_v55, 0.0  ;;  %v5910_v28 = vadd.f32 %v18115_v6, %v5678_v62 }
 0x549   : > { %v5973_v30 = vmax.f32 %v5909_v57, 0.0 }
 0x54a   : > { %v14237_v23 = vpack.c.bf16 %v5972_v46, %v5971_v53  ;;  %v5974_v29 = vmax.f32 %v5910_v28, 0.0 }
 0x54b   : > { %v18126_v35 = vpack.c.bf16 %v5973_v30, %v5971_v53 }
 0x54c   : > { %6271 = vst [vmem:[#allocation2 + $0x38] sm:$0xff] %v14237_v23  ;;  %v14238_v54 = vpack.c.bf16 %v5974_v29, %v5973_v30  ;;  %v5682_v26 = vpop.f32.mrb[4].mxu0  ;;  %v6453_v60 = vshrl.u32 %v14237_v23, 16  ;;  %v6456_v14 = vshll.u32 %v14237_v23, 16  ;;  %v18124_v47 = vpack.c.bf16 %v5974_v29, %v5972_v46 }
 0x54d   : > { %v5911_v31 = vadd.f32 %v18113_v16, %v5682_v26  ;;  %v5684_v21 = vpop.f32.mrb[5].mxu0  ;;  %v13754_v46 = vrot.slane %v6470_v11, 11 }
 0x54e   : > { %6272 = vst [vmem:[#allocation2 + $0x40] sm:$0xff] %v14238_v54  ;;  %v5912_v7 = vadd.f32 %v18115_v6, %v5684_v21  ;;  %v5686_v13 = vpop.f32.mrb[6].mxu0  ;;  %v6455_v34 = vrot.slane %v6453_v60, 7  ;;  %v6462_v19 = vshrl.u32 %v14238_v54, 16  ;;  %v6465_v42 = vshll.u32 %v14238_v54, 16 }
 0x54f   : > { %v5975_v43 = vmax.f32 %v5911_v31, 0.0  ;;  %v5913_v15 = vadd.f32 %v18113_v16, %v5686_v13  ;;  %v5688_v0 = vpop.f32.mrb[7].mxu0  ;;  %v6383_v54 = vld [vmem:[#allocation2 + $0x80] sm:$0x88] }
 0x550   : > { %v5976_v18 = vmax.f32 %v5912_v7, 0.0  ;;  %v5914_v51 = vadd.f32 %v18115_v6, %v5688_v0  ;;  %v6458_v12 = vor.u32 %v6456_v14, %v6455_v34  ;;  %v6464_v44 = vrot.slane %v6462_v19, 7 }
 0x551   : > { %v5977_v27 = vmax.f32 %v5913_v15, 0.0  ;;  %v6460_v59 = vrot.slane %v6455_v34, 4  ;;  %v6492_v14 = vshrl.u32 %v6383_v54, 16 }
 0x552   : > { %v14239_v49 = vpack.c.bf16 %v5976_v18, %v5975_v43  ;;  %v5978_v1 = vmax.f32 %v5914_v51, 0.0  ;;  %v6467_v2 = vor.u32 %v6465_v42, %v6464_v44  ;;  %v6459_v36 = vsel %vm18073_vm8, %v13753_v9, %v6458_v12 }
 0x553   : > { %v18142_v31 = vpack.c.bf16 %v5977_v27, %v5975_v43 }
 0x554   : > { %6273 = vst [vmem:[#allocation2 + $0x60] sm:$0xff] %v14239_v49  ;;  %v14240_v17 = vpack.c.bf16 %v5978_v1, %v5977_v27  ;;  %v5692_v8 = vpop.f32.mrb[8].mxu0  ;;  %v6475_v50 = vshrl.u32 %v14239_v49, 16  ;;  %v6468_v4 = vsel %vm18073_vm8, %v6460_v59, %v6467_v2  ;;  %v6478_v52 = vshll.u32 %v14239_v49, 16 }
 0x555   : > { %v18130_v41 = vadd.f32 %v18113_v16, %v5692_v8  ;;  %v5694_v3 = vpop.f32.mrb[9].mxu0  ;;  %v13771_v38 = vcombine.high %v6459_v36, %v6468_v4  ;;  %v13770_v45 = vcombine.low %v6459_v36, %v6468_v4  ;;  %v18140_v60 = vpack.c.bf16 %v5978_v1, %v5976_v18 }
 0x556   : > { %6274 = vst [vmem:[#allocation2 + $0x68] sm:$0xff] %v14240_v17  ;;  %v5916_v56 = vadd.f32 %v18115_v6, %v5694_v3  ;;  %v5696_v55 = vpop.f32.mrb[10].mxu0  ;;  %v6477_v48 = vrot.slane %v6475_v50, 7  ;;  %v6484_v28 = vshrl.u32 %v14240_v17, 16  ;;  %v6487_v29 = vshll.u32 %v14240_v17, 16 }
 0x557   : > { %v5979_v53 = vmax.f32 %v18130_v41, 0.0  ;;  %v5917_v57 = vadd.f32 %v18113_v16, %v5696_v55  ;;  %v5698_v62 = vpop.f32.mrb[11].mxu0  ;;  %7073 = vmatprep.mubr.bf16.mxu1 %v13771_v38  ;;  %v13755_v2 = vrot.slane %v6492_v14, 11  ;;  %v6386_v3 = vld [vmem:[#allocation2 + $0xa8] sm:$0x88] }
 0x558   : > { %v5980_v30 = vmax.f32 %v5916_v56, 0.0  ;;  %v5918_v24 = vadd.f32 %v18115_v6, %v5698_v62  ;;  %v6480_v23 = vor.u32 %v6478_v52, %v6477_v48  ;;  %7074 = vmatmul.mubr.bf16.gmra.mrb[4].mxu1 %v13770_v45  ;;  %v6486_v20 = vrot.slane %v6484_v28, 7 }
 0x559   : > { %v5981_v26 = vmax.f32 %v5917_v57, 0.0  ;;  %v6482_v13 = vrot.slane %v6477_v48, 4  ;;  %v6514_v57 = vshrl.u32 %v6386_v3, 16 }
 0x55a   : > { %v14241_v21 = vpack.c.bf16 %v5980_v30, %v5979_v53  ;;  %v5982_v7 = vmax.f32 %v5918_v24, 0.0  ;;  %v6489_v34 = vor.u32 %v6487_v29, %v6486_v20  ;;  %v6481_v10 = vsel %vm18073_vm8, %v13754_v46, %v6480_v23 }
 0x55b   : > { %v18157_v56 = vpack.c.bf16 %v5981_v26, %v5979_v53 }
 0x55c   : > { %6275 = vst [vmem:[#allocation2 + $0x88] sm:$0xff] %v14241_v21  ;;  %v14242_v19 = vpack.c.bf16 %v5982_v7, %v5981_v26  ;;  %v5702_v15 = vpop.f32.mrb[12].mxu0  ;;  %v6497_v0 = vshrl.u32 %v14241_v21, 16  ;;  %v6490_v43 = vsel %vm18073_vm8, %v6482_v13, %v6489_v34  ;;  %v6500_v18 = vshll.u32 %v14241_v21, 16 }
 0x55d   : > { %v18145_v51 = vadd.f32 %v18113_v16, %v5702_v15  ;;  %v5704_v9 = vpop.f32.mrb[13].mxu0  ;;  %v13773_v44 = vcombine.high %v6481_v10, %v6490_v43  ;;  %v13772_v42 = vcombine.low %v6481_v10, %v6490_v43  ;;  %v18155_v52 = vpack.c.bf16 %v5982_v7, %v5980_v30  ;;  %v6389_v43 = vld [vmem:[#allocation2 + $0xd0] sm:$0x88] }
 0x55e   : > { %6276 = vst [vmem:[#allocation2 + $0x90] sm:$0xff] %v14242_v19  ;;  %v5920_v27 = vadd.f32 %v18115_v6, %v5704_v9  ;;  %v5706_v12 = vpop.f32.mrb[14].mxu0  ;;  %v6499_v39 = vrot.slane %v6497_v0, 7  ;;  %v6506_v11 = vshrl.u32 %v14242_v19, 16  ;;  %v6509_v41 = vshll.u32 %v14242_v19, 16 }
 0x55f   : > { %v5983_v49 = vmax.f32 %v18145_v51, 0.0  ;;  %v5921_v1 = vadd.f32 %v18113_v16, %v5706_v12  ;;  %v5708_v59 = vpop.f32.mrb[15].mxu0  ;;  %7081 = vmatprep.mubr.bf16.mxu1 %v13773_v44  ;;  %v13756_v19 = vrot.slane %v6514_v57, 11 }
 0x560   : > { %v5984_v17 = vmax.f32 %v5920_v27, 0.0  ;;  %v5922_v8 = vadd.f32 %v18115_v6, %v5708_v59  ;;  %v6502_v50 = vor.u32 %v6500_v18, %v6499_v39  ;;  %7082 = vmatmul.mubr.bf16.gmra.mrb[8].mxu1 %v13772_v42  ;;  %v6508_v4 = vrot.slane %v6506_v11, 7 }
 0x561   : > { %v5985_v36 = vmax.f32 %v5921_v1, 0.0  ;;  %v6504_v45 = vrot.slane %v6499_v39, 4 }
 0x562   : > { %v14243_v55 = vpack.c.bf16 %v5984_v17, %v5983_v49  ;;  %v5986_v38 = vmax.f32 %v5922_v8, 0.0  ;;  %v6511_v48 = vor.u32 %v6509_v41, %v6508_v4  ;;  %v6503_v29 = vsel %vm18073_vm8, %v13755_v2, %v6502_v50 }
 0x563   : > { %v18172_v44 = vpack.c.bf16 %v5985_v36, %v5983_v49  ;;  %v6536_v2 = vshrl.u32 %v6389_v43, 16 }
 0x564   : > { %6277 = vst [vmem:[#allocation2 + $0xb0] sm:$0xff] %v14243_v55  ;;  %v14244_v62 = vpack.c.bf16 %v5986_v38, %v5985_v36  ;;  %v5712_v46 = vpop.f32.mrb[16].mxu0  ;;  %v6519_v28 = vshrl.u32 %v14243_v55, 16  ;;  %v6512_v53 = vsel %vm18073_vm8, %v6504_v45, %v6511_v48  ;;  %v6522_v30 = vshll.u32 %v14243_v55, 16 }
 0x565   : > { %v18160_v24 = vadd.f32 %v18113_v16, %v5712_v46  ;;  %v5714_v23 = vpop.f32.mrb[17].mxu0  ;;  %v13775_v20 = vcombine.high %v6503_v29, %v6512_v53  ;;  %v13774_v21 = vcombine.low %v6503_v29, %v6512_v53  ;;  %v18170_v12 = vpack.c.bf16 %v5986_v38, %v5984_v17 }
 0x566   : > { %6278 = vst [vmem:[#allocation2 + $0xb8] sm:$0xff] %v14244_v62  ;;  %v5924_v54 = vadd.f32 %v18115_v6, %v5714_v23  ;;  %v5716_v26 = vpop.f32.mrb[18].mxu0  ;;  %v6521_v7 = vrot.slane %v6519_v28, 7  ;;  %v6528_v15 = vshrl.u32 %v14244_v62, 16  ;;  %v6531_v10 = vshll.u32 %v14244_v62, 16 }
 0x567   : > { %v5987_v13 = vmax.f32 %v18160_v24, 0.0  ;;  %v5925_v34 = vadd.f32 %v18113_v16, %v5716_v26  ;;  %v5718_v14 = vpop.f32.mrb[19].mxu0  ;;  %7089 = vmatprep.mubr.bf16.mxu1 %v13775_v20  ;;  %v13757_v28 = vrot.slane %v6536_v2, 11 }
 0x568   : > { %v5988_v0 = vmax.f32 %v5924_v54, 0.0  ;;  %v5926_v51 = vadd.f32 %v18115_v6, %v5718_v14  ;;  %v6524_v9 = vor.u32 %v6522_v30, %v6521_v7  ;;  %7090 = vmatmul.mubr.bf16.gmra.mrb[12].mxu1 %v13774_v21  ;;  %v6530_v27 = vrot.slane %v6528_v15, 7  ;;  %v6392_v54 = vld [vmem:[#allocation2 + $0xf8] sm:$0x88] }
 0x569   : > { %v5989_v18 = vmax.f32 %v5925_v34, 0.0  ;;  %v6526_v1 = vrot.slane %v6521_v7, 4 }
 0x56a   : > { %v14245_v42 = vpack.c.bf16 %v5988_v0, %v5987_v13  ;;  %v5990_v39 = vmax.f32 %v5926_v51, 0.0  ;;  %v6533_v59 = vor.u32 %v6531_v10, %v6530_v27  ;;  %v6525_v4 = vsel %vm18073_vm8, %v13756_v19, %v6524_v9 }
 0x56b   : > { %v18187_v7 = vpack.c.bf16 %v5989_v18, %v5987_v13  ;;  %v6558_v51 = vshrl.u32 %v6392_v54, 16 }
 0x56c   : > { %6279 = vst [vmem:[#allocation2 + $0xd8] sm:$0xff] %v14245_v42  ;;  %v14246_v11 = vpack.c.bf16 %v5990_v39, %v5989_v18  ;;  %v5722_v8 = vpop.f32.mrb[20].mxu0  ;;  %v6541_v50 = vshrl.u32 %v14245_v42, 16  ;;  %v6534_v49 = vsel %vm18073_vm8, %v6526_v1, %v6533_v59  ;;  %v6544_v17 = vshll.u32 %v14245_v42, 16 }
 0x56d   : > { %v18175_v41 = vadd.f32 %v18113_v16, %v5722_v8  ;;  %v5724_v3 = vpop.f32.mrb[21].mxu0  ;;  %v13777_v38 = vcombine.high %v6525_v4, %v6534_v49  ;;  %v13776_v45 = vcombine.low %v6525_v4, %v6534_v49  ;;  %v18185_v21 = vpack.c.bf16 %v5990_v39, %v5988_v0 }
 0x56e   : > { %6280 = vst [vmem:[#allocation2 + $0xe0] sm:$0xff] %v14246_v11  ;;  %v5928_v36 = vadd.f32 %v18115_v6, %v5724_v3  ;;  %v5726_v55 = vpop.f32.mrb[22].mxu0  ;;  %v6543_v48 = vrot.slane %v6541_v50, 7  ;;  %v6550_v24 = vshrl.u32 %v14246_v11, 16  ;;  %v6553_v30 = vshll.u32 %v14246_v11, 16 }
 0x56f   : > { %v5991_v57 = vmax.f32 %v18175_v41, 0.0  ;;  %v5929_v62 = vadd.f32 %v18113_v16, %v5726_v55  ;;  %v5728_v46 = vpop.f32.mrb[23].mxu0  ;;  %7097 = vmatprep.mubr.bf16.mxu1 %v13777_v38  ;;  %v13758_v3 = vrot.slane %v6558_v51, 11  ;;  %v6395_v38 = vld [vmem:[#allocation2 + $0x120] sm:$0x88] }
 0x570   : > { %v5992_v23 = vmax.f32 %v5928_v36, 0.0  ;;  %v5930_v29 = vadd.f32 %v18115_v6, %v5728_v46  ;;  %v6546_v53 = vor.u32 %v6544_v17, %v6543_v48  ;;  %7098 = vmatmul.mubr.bf16.gmra.mrb[16].mxu1 %v13776_v45  ;;  %v6552_v20 = vrot.slane %v6550_v24, 7 }
 0x571   : > { %v5993_v26 = vmax.f32 %v5929_v62, 0.0  ;;  %v6548_v19 = vrot.slane %v6543_v48, 4 }
 0x572   : > { %v14247_v34 = vpack.c.bf16 %v5992_v23, %v5991_v57  ;;  %v5994_v14 = vmax.f32 %v5930_v29, 0.0  ;;  %v6555_v15 = vor.u32 %v6553_v30, %v6552_v20  ;;  %v6547_v1 = vsel %vm18073_vm8, %v13757_v28, %v6546_v53 }
 0x573   : > { %v18202_v46 = vpack.c.bf16 %v5993_v26, %v5991_v57  ;;  %v6580_v30 = vshrl.u32 %v6395_v38, 16 }
 0x574   : > { %6281 = vst [vmem:[#allocation2 + $0x100] sm:$0xff] %v14247_v34  ;;  %v14248_v9 = vpack.c.bf16 %v5994_v14, %v5993_v26  ;;  %v5732_v10 = vpop.f32.mrb[24].mxu0  ;;  %v6563_v43 = vshrl.u32 %v14247_v34, 16  ;;  %v6556_v13 = vsel %vm18073_vm8, %v6548_v19, %v6555_v15  ;;  %v6566_v0 = vshll.u32 %v14247_v34, 16 }
 0x575   : > { %v18190_v27 = vadd.f32 %v18113_v16, %v5732_v10  ;;  %v5734_v42 = vpop.f32.mrb[25].mxu0  ;;  %v13779_v59 = vcombine.high %v6547_v1, %v6556_v13  ;;  %v13778_v2 = vcombine.low %v6547_v1, %v6556_v13  ;;  %v18200_v62 = vpack.c.bf16 %v5994_v14, %v5992_v23 }
 0x576   : > { %6282 = vst [vmem:[#allocation2 + $0x108] sm:$0xff] %v14248_v9  ;;  %v5932_v18 = vadd.f32 %v18115_v6, %v5734_v42  ;;  %v5736_v39 = vpop.f32.mrb[26].mxu0  ;;  %v6565_v11 = vrot.slane %v6563_v43, 7  ;;  %v6572_v4 = vshrl.u32 %v14248_v9, 16  ;;  %v6575_v55 = vshll.u32 %v14248_v9, 16 }
 0x577   : > { %v5995_v8 = vmax.f32 %v18190_v27, 0.0  ;;  %v5933_v50 = vadd.f32 %v18113_v16, %v5736_v39  ;;  %v5738_v41 = vpop.f32.mrb[27].mxu0  ;;  %7105 = vmatprep.mubr.bf16.mxu1 %v13779_v59  ;;  %v13759_v13 = vrot.slane %v6580_v30, 11 }
 0x578   : > { %v5996_v49 = vmax.f32 %v5932_v18, 0.0  ;;  %v5934_v17 = vadd.f32 %v18115_v6, %v5738_v41  ;;  %v6568_v36 = vor.u32 %v6566_v0, %v6565_v11  ;;  %7106 = vmatmul.mubr.bf16.gmra.mrb[20].mxu1 %v13778_v2  ;;  %v6574_v48 = vrot.slane %v6572_v4, 7 }
 0x579   : > { %v5997_v45 = vmax.f32 %v5933_v50, 0.0  ;;  %v6570_v29 = vrot.slane %v6565_v11, 4  ;;  %v6398_v11 = vld [vmem:[#allocation2 + $0x148] sm:$0x88] }
 0x57a   : > { %v14249_v28 = vpack.c.bf16 %v5996_v49, %v5995_v8  ;;  %v5998_v24 = vmax.f32 %v5934_v17, 0.0  ;;  %v6577_v53 = vor.u32 %v6575_v55, %v6574_v48  ;;  %v6569_v51 = vsel %vm18073_vm8, %v13758_v3, %v6568_v36 }
 0x57b   : > { %v18217_v4 = vpack.c.bf16 %v5997_v45, %v5995_v8  ;;  %v6602_v48 = vshrl.u32 %v6398_v11, 16 }
 0x57c   : > { %6283 = vst [vmem:[#allocation2 + $0x128] sm:$0xff] %v14249_v28  ;;  %v14250_v54 = vpack.c.bf16 %v5998_v24, %v5997_v45  ;;  %v5742_v20 = vpop.f32.mrb[28].mxu0  ;;  %v6585_v34 = vshrl.u32 %v14249_v28, 16  ;;  %v6578_v57 = vsel %vm18073_vm8, %v6570_v29, %v6577_v53  ;;  %v6588_v23 = vshll.u32 %v14249_v28, 16 }
 0x57d   : > { %v18205_v19 = vadd.f32 %v18113_v16, %v5742_v20  ;;  %v5744_v15 = vpop.f32.mrb[29].mxu0  ;;  %v13781_v9 = vcombine.high %v6569_v51, %v6578_v57  ;;  %v13780_v10 = vcombine.low %v6569_v51, %v6578_v57  ;;  %v18215_v3 = vpack.c.bf16 %v5998_v24, %v5996_v49 }
 0x57e   : > { %6284 = vst [vmem:[#allocation2 + $0x130] sm:$0xff] %v14250_v54  ;;  %v5936_v26 = vadd.f32 %v18115_v6, %v5744_v15  ;;  %v5746_v14 = vpop.f32.mrb[30].mxu0  ;;  %v6587_v43 = vrot.slane %v6585_v34, 7  ;;  %v6594_v0 = vshrl.u32 %v14250_v54, 16  ;;  %v6597_v2 = vshll.u32 %v14250_v54, 16 }
 0x57f   : > { %v5999_v27 = vmax.f32 %v18205_v19, 0.0  ;;  %v5937_v42 = vadd.f32 %v18113_v16, %v5746_v14  ;;  %v5748_v1 = vpop.f32.mrb[31].mxu0  ;;  %7113 = vmatprep.mubr.bf16.mxu1 %v13781_v9 }
 0x580   : > { %v6000_v18 = vmax.f32 %v5936_v26, 0.0  ;;  %v5938_v39 = vadd.f32 %v18115_v6, %v5748_v1  ;;  %v6590_v59 = vor.u32 %v6588_v23, %v6587_v43  ;;  %7114 = vmatmul.mubr.bf16.gmra.mrb[24].mxu1 %v13780_v10  ;;  %v6596_v41 = vrot.slane %v6594_v0, 7  ;;  %v6401_v1 = vld [vmem:[#allocation2 + $0x170] sm:$0x88] }
 0x581   : > { %v6001_v50 = vmax.f32 %v5937_v42, 0.0  ;;  %v6592_v55 = vrot.slane %v6587_v43, 4  ;;  %v13760_v26 = vrot.slane %v6602_v48, 11 }
 0x582   : > { %v14251_v17 = vpack.c.bf16 %v6000_v18, %v5999_v27  ;;  %v6002_v36 = vmax.f32 %v5938_v39, 0.0  ;;  %v6599_v38 = vor.u32 %v6597_v2, %v6596_v41  ;;  %v6591_v20 = vsel %vm18073_vm8, %v13759_v13, %v6590_v59 }
 0x583   : > { %v18232_v59 = vpack.c.bf16 %v6001_v50, %v5999_v27 }
 0x584   : > { %6285 = vst [vmem:[#allocation2 + $0x150] sm:$0xff] %v14251_v17  ;;  %v14252_v28 = vpack.c.bf16 %v6002_v36, %v6001_v50  ;;  %v5752_v29 = vpop.f32.mrb[32].mxu0  ;;  %v6607_v53 = vshrl.u32 %v14251_v17, 16  ;;  %v6600_v8 = vsel %vm18073_vm8, %v6592_v55, %v6599_v38  ;;  %v6610_v49 = vshll.u32 %v14251_v17, 16 }
 0x585   : > { %v18220_v30 = vadd.f32 %v18113_v16, %v5752_v29  ;;  %v5754_v54 = vpop.f32.mrb[33].mxu0  ;;  %v13783_v34 = vcombine.high %v6591_v20, %v6600_v8  ;;  %v13782_v19 = vcombine.low %v6591_v20, %v6600_v8  ;;  %v18230_v39 = vpack.c.bf16 %v6002_v36, %v6000_v18 }
 0x586   : > { %6286 = vst [vmem:[#allocation2 + $0x158] sm:$0xff] %v14252_v28  ;;  %v5940_v45 = vadd.f32 %v18115_v6, %v5754_v54  ;;  %v5756_v24 = vpop.f32.mrb[34].mxu0  ;;  %v6609_v15 = vrot.slane %v6607_v53, 7  ;;  %v6616_v14 = vshrl.u32 %v14252_v28, 16  ;;  %v6619_v42 = vshll.u32 %v14252_v28, 16 }
 0x587   : > { %v6003_v51 = vmax.f32 %v18220_v30, 0.0  ;;  %v5941_v57 = vadd.f32 %v18113_v16, %v5756_v24  ;;  %v5758_v23 = vpop.f32.mrb[35].mxu0  ;;  %7121 = vmatprep.mubr.bf16.mxu1 %v13783_v34  ;;  %v6624_v55 = vshrl.u32 %v6401_v1, 16 }
 0x588   : > { %v6004_v9 = vmax.f32 %v5940_v45, 0.0  ;;  %v5942_v10 = vadd.f32 %v18115_v6, %v5758_v23  ;;  %v6612_v43 = vor.u32 %v6610_v49, %v6609_v15  ;;  %7122 = vmatmul.mubr.bf16.gmra.mrb[28].mxu1 %v13782_v19  ;;  %v6618_v0 = vrot.slane %v6616_v14, 7  ;;  %v6404_v14 = vld [vmem:[#allocation2 + $0x198] sm:$0x88] }
 0x589   : > { %v6005_v13 = vmax.f32 %v5941_v57, 0.0  ;;  %v6614_v41 = vrot.slane %v6609_v15, 4  ;;  %v13761_v34 = vrot.slane %v6624_v55, 11  ;;  %v6646_v55 = vshrl.u32 %v6404_v14, 16 }
 0x58a   : > { %v14253_v2 = vpack.c.bf16 %v6004_v9, %v6003_v51  ;;  %v6006_v11 = vmax.f32 %v5942_v10, 0.0  ;;  %v6621_v17 = vor.u32 %v6619_v42, %v6618_v0  ;;  %v6613_v30 = vsel %vm18073_vm8, %v13760_v26, %v6612_v43 }
 0x58b   : > { %v18247_v1 = vpack.c.bf16 %v6005_v13, %v6003_v51 }
 0x58c   : > { %6287 = vst [vmem:[#allocation2 + $0x178] sm:$0xff] %v14253_v2  ;;  %v14254_v38 = vpack.c.bf16 %v6006_v11, %v6005_v13  ;;  %v5762_v48 = vpop.f32.mrb[36].mxu0  ;;  %v6629_v29 = vshrl.u32 %v14253_v2, 16  ;;  %v6622_v27 = vsel %vm18073_vm8, %v6614_v41, %v6621_v17  ;;  %v6632_v18 = vshll.u32 %v14253_v2, 16 }
 0x58d   : > { %v18235_v53 = vadd.f32 %v18113_v16, %v5762_v48  ;;  %v5764_v28 = vpop.f32.mrb[37].mxu0  ;;  %v13785_v54 = vcombine.high %v6613_v30, %v6622_v27  ;;  %v13784_v20 = vcombine.low %v6613_v30, %v6622_v27  ;;  %v18245_v42 = vpack.c.bf16 %v6006_v11, %v6004_v9 }
 0x58e   : > { %6288 = vst [vmem:[#allocation2 + $0x180] sm:$0xff] %v14254_v38  ;;  %v5944_v50 = vadd.f32 %v18115_v6, %v5764_v28  ;;  %v5766_v36 = vpop.f32.mrb[38].mxu0  ;;  %v6631_v8 = vrot.slane %v6629_v29, 7  ;;  %v6638_v19 = vshrl.u32 %v14254_v38, 16  ;;  %v6641_v26 = vshll.u32 %v14254_v38, 16 }
 0x58f   : > { %v6007_v49 = vmax.f32 %v18235_v53, 0.0  ;;  %v5945_v45 = vadd.f32 %v18113_v16, %v5766_v36  ;;  %v5768_v24 = vpop.f32.mrb[39].mxu0  ;;  %7129 = vmatprep.mubr.bf16.mxu1 %v13785_v54 }
 0x590   : > { %v6008_v15 = vmax.f32 %v5944_v50, 0.0  ;;  %v5946_v57 = vadd.f32 %v18115_v6, %v5768_v24  ;;  %v6634_v23 = vor.u32 %v6632_v18, %v6631_v8  ;;  %7130 = vmatmul.mubr.bf16.gmra.mrb[32].mxu1 %v13784_v20  ;;  %v6640_v43 = vrot.slane %v6638_v19, 7 }
 0x591   : > { %v6009_v10 = vmax.f32 %v5945_v45, 0.0  ;;  %v6636_v41 = vrot.slane %v6631_v8, 4  ;;  %v13762_v8 = vrot.slane %v6646_v55, 11 }
 0x592   : > { %v14255_v0 = vpack.c.bf16 %v6008_v15, %v6007_v49  ;;  %v6010_v2 = vmax.f32 %v5946_v57, 0.0  ;;  %v6643_v17 = vor.u32 %v6641_v26, %v6640_v43  ;;  %v6635_v30 = vsel %vm18073_vm8, %v13761_v34, %v6634_v23  ;;  %v6407_v23 = vld [vmem:[#allocation2 + $0x1c0] sm:$0x88] }
 0x593   : > { %v6668_v55 = vshrl.u32 %v6407_v23, 16 }
 0x594   : > { %6289 = vst [vmem:[#allocation2 + $0x1a0] sm:$0xff] %v14255_v0  ;;  %v14256_v48 = vpack.c.bf16 %v6010_v2, %v6009_v10  ;;  %v5772_v29 = vpop.f32.mrb[40].mxu0  ;;  %v6651_v53 = vshrl.u32 %v14255_v0, 16  ;;  %v6644_v51 = vsel %vm18073_vm8, %v6636_v41, %v6643_v17  ;;  %v6654_v9 = vshll.u32 %v14255_v0, 16 }
 0x595   : > { %v18250_v28 = vadd.f32 %v18113_v16, %v5772_v29  ;;  %v5774_v38 = vpop.f32.mrb[41].mxu0  ;;  %v13787_v27 = vcombine.high %v6635_v30, %v6644_v51  ;;  %v13786_v18 = vcombine.low %v6635_v30, %v6644_v51  ;;  %v18260_v43 = vpack.c.bf16 %v6010_v2, %v6008_v15 }
 0x596   : > { %6290 = vst [vmem:[#allocation2 + $0x1a8] sm:$0xff] %v14256_v48  ;;  %v5948_v13 = vadd.f32 %v18115_v6, %v5774_v38  ;;  %v5776_v11 = vpop.f32.mrb[42].mxu0  ;;  %v6653_v50 = vrot.slane %v6651_v53, 7  ;;  %v6660_v45 = vshrl.u32 %v14256_v48, 16  ;;  %v6663_v57 = vshll.u32 %v14256_v48, 16 }
 0x597   : > { %v6011_v36 = vmax.f32 %v18250_v28, 0.0  ;;  %v5949_v54 = vadd.f32 %v18113_v16, %v5776_v11  ;;  %v5778_v20 = vpop.f32.mrb[43].mxu0  ;;  %7137 = vmatprep.mubr.bf16.mxu1 %v13787_v27  ;;  %v18262_v0 = vpack.c.bf16 %v6009_v10, %v6007_v49 }
 0x598   : > { %v6012_v24 = vmax.f32 %v5948_v13, 0.0  ;;  %v5950_v34 = vadd.f32 %v18115_v6, %v5778_v20  ;;  %v6656_v19 = vor.u32 %v6654_v9, %v6653_v50  ;;  %7138 = vmatmul.mubr.bf16.gmra.mrb[36].mxu1 %v13786_v18  ;;  %v6662_v14 = vrot.slane %v6660_v45, 7 }
 0x599   : > { %v6013_v26 = vmax.f32 %v5949_v54, 0.0  ;;  %v6658_v29 = vrot.slane %v6653_v50, 4  ;;  %v13763_v20 = vrot.slane %v6668_v55, 11 }
 0x59a   : > { %v14257_v41 = vpack.c.bf16 %v6012_v24, %v6011_v36  ;;  %v6014_v17 = vmax.f32 %v5950_v34, 0.0  ;;  %v6665_v53 = vor.u32 %v6663_v57, %v6662_v14  ;;  %v6657_v9 = vsel %vm18073_vm8, %v13762_v8, %v6656_v19 }
 0x59c   : > { %6291 = vst [vmem:[#allocation2 + $0x1c8] sm:$0xff] %v14257_v41  ;;  %v14258_v28 = vpack.c.bf16 %v6014_v17, %v6013_v26  ;;  %v5782_v38 = vpop.f32.mrb[44].mxu0  ;;  %v6673_v30 = vshrl.u32 %v14257_v41, 16  ;;  %v6666_v49 = vsel %vm18073_vm8, %v6658_v29, %v6665_v53  ;;  %v6676_v15 = vshll.u32 %v14257_v41, 16  ;;  %v6410_v41 = vld [vmem:[#allocation2 + $0x1e8] sm:$0x88] }
 0x59d   : > { %v18265_v51 = vadd.f32 %v18113_v16, %v5782_v38  ;;  %v5784_v48 = vpop.f32.mrb[45].mxu0  ;;  %v13789_v13 = vcombine.high %v6657_v9, %v6666_v49  ;;  %v13788_v11 = vcombine.low %v6657_v9, %v6666_v49  ;;  %v14286_v29 = vpop.f32.mrb[0].mxu1  ;;  %v18278_v53 = vpack.c.bf16 %v6014_v17, %v6012_v24 }
 0x59e   : > { %6292 = vst [vmem:[#allocation2 + $0x1d0] sm:$0xff] %v14258_v28  ;;  %v18272_v10 = vadd.f32 %v18115_v6, %v5784_v48  ;;  %v5786_v2 = vpop.f32.mrb[46].mxu0  ;;  %v6675_v27 = vrot.slane %v6673_v30, 7  ;;  %v6682_v45 = vshrl.u32 %v14258_v28, 16  ;;  %v6685_v57 = vshll.u32 %v14258_v28, 16  ;;  %v14287_v55 = vpop.f32.mrb[1].mxu1 }
 0x59f   : > { %v6015_v18 = vmax.f32 %v18265_v51, 0.0  ;;  %v5953_v50 = vadd.f32 %v18113_v16, %v5786_v2  ;;  %v5788_v54 = vpop.f32.mrb[47].mxu0  ;;  %7145 = vmatprep.mubr.bf16.mxu1 %v13789_v13  ;;  %v18280_v38 = vpack.c.bf16 %v6013_v26, %v6011_v36  ;;  %v18282_v49 = vadd.f32 %v14287_v55, %v14286_v29 }
 0x5a0   : > { %v6016_v8 = vmax.f32 %v18272_v10, 0.0  ;;  %v5954_v34 = vadd.f32 %v18115_v6, %v5788_v54  ;;  %v6678_v19 = vor.u32 %v6676_v15, %v6675_v27  ;;  %7146 = vmatmul.mubr.bf16.gmra.mrb[40].mxu1 %v13788_v11  ;;  %v6684_v14 = vrot.slane %v6682_v45, 7  ;;  %v14289_v10 = vpop.f32.mrb[2].mxu1 }
 0x5a1   : > { %v6017_v23 = vmax.f32 %v5953_v50, 0.0  ;;  %v6680_v48 = vrot.slane %v6675_v27, 4  ;;  %20818 = vst [vmem:[#allocation41_spill] sm:$0xff] %v18282_v49  ;;  %v6690_v2 = vshrl.u32 %v6410_v41, 16  ;;  %v14290_v11 = vpop.f32.mrb[3].mxu1 }
 0x5a2   : > { %v14259_v30 = vpack.c.bf16 %v6016_v8, %v6015_v18  ;;  %v6018_v51 = vmax.f32 %v5954_v34, 0.0  ;;  %v6687_v9 = vor.u32 %v6685_v57, %v6684_v14  ;;  %v6679_v36 = vsel %vm18073_vm8, %v13763_v20, %v6678_v19 }
 0x5a3   : > { %v18291_v17 = vadd.f32 %v14290_v11, %v14289_v10  ;;  %v18299_v49 = vpack.c.bf16 %v6017_v23, %v6015_v18 }
 0x5a4   : > { %6293 = vst [vmem:[#allocation2 + $0x1f0] sm:$0xff] %v14259_v30  ;;  %v14260_v15 = vpack.c.bf16 %v6018_v51, %v6017_v23  ;;  %v5792_v28 = vpop.f32.mrb[48].mxu0  ;;  %v6695_v13 = vshrl.u32 %v14259_v30, 16  ;;  %v6688_v26 = vsel %vm18073_vm8, %v6680_v48, %v6687_v9  ;;  %v6698_v55 = vshll.u32 %v14259_v30, 16 }
 0x5a5   : > { %v18285_v50 = vadd.f32 %v18113_v16, %v5792_v28  ;;  %v5794_v24 = vpop.f32.mrb[49].mxu0  ;;  %20819 = vst [vmem:[#allocation42_spill] sm:$0xff] %v18291_v17  ;;  %v13791_v45 = vcombine.high %v6679_v36, %v6688_v26  ;;  %v13790_v34 = vcombine.low %v6679_v36, %v6688_v26  ;;  %v13764_v48 = vrot.slane %v6690_v2, 11  ;;  %v6413_v17 = vld [vmem:[#allocation2 + $0x210] sm:$0x88] }
 0x5a6   : > { %6294 = vst [vmem:[#allocation2 + $0x1f8] sm:$0xff] %v14260_v15  ;;  %v5956_v27 = vadd.f32 %v18115_v6, %v5794_v24  ;;  %v5796_v54 = vpop.f32.mrb[50].mxu0  ;;  %v6697_v57 = vrot.slane %v6695_v13, 7  ;;  %v6704_v28 = vshrl.u32 %v14260_v15, 16  ;;  %v6707_v24 = vshll.u32 %v14260_v15, 16 }
 0x5a7   : > { %v6019_v14 = vmax.f32 %v18285_v50, 0.0  ;;  %v5957_v41 = vadd.f32 %v18113_v16, %v5796_v54  ;;  %v5798_v29 = vpop.f32.mrb[51].mxu0  ;;  %7153 = vmatprep.mubr.bf16.mxu1 %v13791_v45  ;;  %v18297_v26 = vpack.c.bf16 %v6018_v51, %v6016_v8 }
 0x5a8   : > { %v6020_v20 = vmax.f32 %v5956_v27, 0.0  ;;  %v5958_v19 = vadd.f32 %v18115_v6, %v5798_v29  ;;  %7154 = vmatmul.mubr.bf16.gmra.mrb[44].mxu1 %v13790_v34  ;;  %v6700_v10 = vor.u32 %v6698_v55, %v6697_v57  ;;  %v6706_v11 = vrot.slane %v6704_v28, 7 }
 0x5a9   : > { %v6021_v9 = vmax.f32 %v5957_v41, 0.0  ;;  %v6702_v50 = vrot.slane %v6697_v57, 4  ;;  %v6712_v29 = vshrl.u32 %v6413_v17, 16 }
 0x5aa   : > { %v14261_v36 = vpack.c.bf16 %v6020_v20, %v6019_v14  ;;  %v6022_v13 = vmax.f32 %v5958_v19, 0.0  ;;  %v6709_v54 = vor.u32 %v6707_v24, %v6706_v11  ;;  %v6701_v15 = vsel %vm18073_vm8, %v13764_v48, %v6700_v10 }
 0x5ab   : > { %v13765_v10 = vrot.slane %v6712_v29, 11 }
 0x5ac   : > { %6295 = vst [vmem:[#allocation2 + $0x218] sm:$0xff] %v14261_v36  ;;  %v14262_v30 = vpack.c.bf16 %v6022_v13, %v6021_v9  ;;  %v5802_v27 = vpop.f32.mrb[52].mxu0  ;;  %v6717_v45 = vshrl.u32 %v14261_v36, 16  ;;  %v6710_v8 = vsel %vm18073_vm8, %v6702_v50, %v6709_v54  ;;  %v6720_v19 = vshll.u32 %v14261_v36, 16 }
 0x5ad   : > { %v18302_v2 = vadd.f32 %v18113_v16, %v5802_v27  ;;  %v5804_v34 = vpop.f32.mrb[53].mxu0  ;;  %v13793_v23 = vcombine.high %v6701_v15, %v6710_v8  ;;  %v13792_v57 = vcombine.low %v6701_v15, %v6710_v8  ;;  %v18312_v15 = vpack.c.bf16 %v6022_v13, %v6020_v20 }
 0x5ae   : > { %6296 = vst [vmem:[#allocation2 + $0x220] sm:$0xff] %v14262_v30  ;;  %v5960_v51 = vadd.f32 %v18115_v6, %v5804_v34  ;;  %v5806_v18 = vpop.f32.mrb[54].mxu0  ;;  %v6719_v41 = vrot.slane %v6717_v45, 7  ;;  %v6726_v11 = vshrl.u32 %v14262_v30, 16  ;;  %v6729_v50 = vshll.u32 %v14262_v30, 16 }
 0x5af   : > { %v6023_v17 = vmax.f32 %v18302_v2, 0.0  ;;  %v5961_v55 = vadd.f32 %v18113_v16, %v5806_v18  ;;  %v5808_v28 = vpop.f32.mrb[55].mxu0  ;;  %7161 = vmatprep.mubr.bf16.mxu1 %v13793_v23  ;;  %v18314_v8 = vpack.c.bf16 %v6021_v9, %v6019_v14 }
 0x5b0   : > { %v6024_v24 = vmax.f32 %v5960_v51, 0.0  ;;  %v5962_v48 = vadd.f32 %v18115_v6, %v5808_v28  ;;  %7162 = vmatmul.mubr.bf16.gmra.mrb[48].mxu1 %v13792_v57  ;;  %v6722_v27 = vor.u32 %v6720_v19, %v6719_v41  ;;  %v6728_v34 = vrot.slane %v6726_v11, 7 }
 0x5b1   : > { %v6025_v54 = vmax.f32 %v5961_v55, 0.0  ;;  %v6724_v18 = vrot.slane %v6719_v41, 4  ;;  %v6734_v28 = vshrl.u32 %v6416_v40, 16 }
 0x5b2   : > { %v14263_v45 = vpack.c.bf16 %v6024_v24, %v6023_v17  ;;  %v6026_v2 = vmax.f32 %v5962_v48, 0.0  ;;  %v6731_v36 = vor.u32 %v6729_v50, %v6728_v34  ;;  %v6723_v57 = vsel %vm18073_vm8, %v13765_v10, %v6722_v27 }
 0x5b3   : > { %v13766_v27 = vrot.slane %v6734_v28, 11 }
 0x5b4   : > { %6297 = vst [vmem:[#allocation2 + $0x240] sm:$0xff] %v14263_v45  ;;  %v14264_v51 = vpack.c.bf16 %v6026_v2, %v6025_v54  ;;  %v5812_v25 = vpop.f32.mrb[56].mxu0  ;;  %v6739_v23 = vshrl.u32 %v14263_v45, 16  ;;  %v6732_v20 = vsel %vm18073_vm8, %v6724_v18, %v6731_v36  ;;  %v6742_v11 = vshll.u32 %v14263_v45, 16 }
 0x5b5   : > { %v18317_v30 = vadd.f32 %v18113_v16, %v5812_v25  ;;  %v5814_v29 = vpop.f32.mrb[57].mxu0  ;;  %v13795_v13 = vcombine.high %v6723_v57, %v6732_v20  ;;  %v13794_v41 = vcombine.low %v6723_v57, %v6732_v20  ;;  %v18327_v57 = vpack.c.bf16 %v6026_v2, %v6024_v24 }
 0x5b6   : > { %6298 = vst [vmem:[#allocation2 + $0x248] sm:$0xff] %v14264_v51  ;;  %v5964_v14 = vadd.f32 %v18115_v6, %v5814_v29  ;;  %v5816_v9 = vpop.f32.mrb[58].mxu0  ;;  %v6741_v55 = vrot.slane %v6739_v23, 7  ;;  %v6748_v48 = vshrl.u32 %v14264_v51, 16  ;;  %v6751_v34 = vshll.u32 %v14264_v51, 16 }
 0x5b7   : > { %v6027_v40 = vmax.f32 %v18317_v30, 0.0  ;;  %v5965_v19 = vadd.f32 %v18113_v16, %v5816_v9  ;;  %v5818_v25 = vpop.f32.mrb[59].mxu0  ;;  %7169 = vmatprep.mubr.bf16.mxu1 %v13795_v13  ;;  %v18329_v20 = vpack.c.bf16 %v6025_v54, %v6023_v17 }
 0x5b8   : > { %v6028_v50 = vmax.f32 %v5964_v14, 0.0  ;;  %v5966_v10 = vadd.f32 %v18115_v6, %v5818_v25  ;;  %7170 = vmatmul.mubr.bf16.gmra.mrb[52].mxu1 %v13794_v41  ;;  %v6744_v36 = vor.u32 %v6742_v11, %v6741_v55  ;;  %v6750_v29 = vrot.slane %v6748_v48, 7 }
 0x5b9   : > { %v6029_v18 = vmax.f32 %v5965_v19, 0.0  ;;  %20820 = vst [vmem:[#allocation43_spill] sm:$0xff] %v18329_v20  ;;  %v6746_v9 = vrot.slane %v6741_v55, 4  ;;  %v6756_v25 = vshrl.u32 %v6419_v22, 16 }
 0x5ba   : > { %v14265_v23 = vpack.c.bf16 %v6028_v50, %v6027_v40  ;;  %v6030_v30 = vmax.f32 %v5966_v10, 0.0  ;;  %v6753_v45 = vor.u32 %v6751_v34, %v6750_v29  ;;  %v6745_v41 = vsel %vm18073_vm8, %v13766_v27, %v6744_v36 }
 0x5bb   : > { %v13767_v27 = vrot.slane %v6756_v25, 11 }
 0x5bc   : > { %6299 = vst [vmem:[#allocation2 + $0x268] sm:$0xff] %v14265_v23  ;;  %v14266_v14 = vpack.c.bf16 %v6030_v30, %v6029_v18  ;;  %v5822_v58 = vpop.f32.mrb[60].mxu0  ;;  %v6761_v13 = vshrl.u32 %v14265_v23, 16  ;;  %v6754_v24 = vsel %vm18073_vm8, %v6746_v9, %v6753_v45  ;;  %v6764_v10 = vshll.u32 %v14265_v23, 16 }
 0x5bd   : > { %v5967_v51 = vadd.f32 %v18113_v16, %v5822_v58  ;;  %v5824_v28 = vpop.f32.mrb[61].mxu0  ;;  %v13797_v2 = vcombine.high %v6745_v41, %v6754_v24  ;;  %v13796_v55 = vcombine.low %v6745_v41, %v6754_v24  ;;  %v18339_v20 = vpack.c.bf16 %v6030_v30, %v6028_v50  ;;  %v16156_v30 = vld [vmem:[#allocation6 + $0x148] sm:$0xff]  }
 0x5be   : > { %6300 = vst [vmem:[#allocation2 + $0x270] sm:$0xff] %v14266_v14  ;;  %v5968_v17 = vadd.f32 %v18115_v6, %v5824_v28  ;;  %v5826_v54 = vpop.f32.mrb[62].mxu0  ;;  %v6763_v19 = vrot.slane %v6761_v13, 7  ;;  %v6770_v58 = vshrl.u32 %v14266_v14, 16  ;;  %v6773_v36 = vshll.u32 %v14266_v14, 16 }
 0x5bf   : > { %v6031_v11 = vmax.f32 %v5967_v51, 0.0  ;;  %v5969_v22 = vadd.f32 %v18113_v16, %v5826_v54  ;;  %v5828_v48 = vpop.f32.mrb[63].mxu0  ;;  %7177 = vmatprep.mubr.bf16.mxu1 %v13797_v2  ;;  %v18341_v51 = vpack.c.bf16 %v6029_v18, %v6027_v40  ;;  %v18347_v54 = vld [vmem:[#allocation2] sm:$0xff]  ;;  %v16155_v18 = vld [vmem:[#allocation6 + $0x100] sm:$0xff]   ;;  %v16157_v2 = vld [vmem:[#allocation6 + $0x108] sm:$0xff]  }
 0x5c0   : > { %v6032_v34 = vmax.f32 %v5968_v17, 0.0  ;;  %v5970_v29 = vadd.f32 %v18115_v6, %v5828_v48  ;;  %7178 = vmatmul.mubr.bf16.gmra.mrb[56].mxu1 %v13796_v55  ;;  %v6766_v45 = vor.u32 %v6764_v10, %v6763_v19  ;;  %v6772_v28 = vrot.slane %v6770_v58, 7  ;;  %v16158_v55 = vld [vmem:[#allocation6 + $0x150] sm:$0xff]   ;;  %v16162_v48 = vld [vmem:[#allocation6 + $0x160] sm:$0xff]   ;;  %v16165_v58 = vld [vmem:[#allocation6 + $0x128] sm:$0xff]  }
 0x5c1   : > { %v6033_v9 = vmax.f32 %v5969_v22, 0.0  ;;  %v6768_v16 = vrot.slane %v6763_v19, 4  ;;  %v13817_v50 = vcombine.high %v18347_v54, %v18347_v54  ;;  %v13816_v40 = vcombine.low %v18347_v54, %v18347_v54  ;;  %v16159_v19 = vld [vmem:[#allocation6 + $0x110] sm:$0xff]   ;;  %v16161_v22 = vld [vmem:[#allocation6 + $0x118] sm:$0xff]   ;;  %v16163_v10 = vld [vmem:[#allocation6 + $0x120] sm:$0xff]  }
 0x5c2   : > { %v14267_v41 = vpack.c.bf16 %v6032_v34, %v6031_v11  ;;  %v6034_v13 = vmax.f32 %v5970_v29, 0.0  ;;  %v6775_v24 = vor.u32 %v6773_v36, %v6772_v28  ;;  %v6767_v6 = vsel %vm18073_vm8, %v13767_v27, %v6766_v45  ;;  %v16160_v11 = vld [vmem:[#allocation6 + $0x158] sm:$0xff]   ;;  %v16166_v34 = vld [vmem:[#allocation6 + $0x170] sm:$0xff]   ;;  %v16170_v27 = vld [vmem:[#allocation6 + $0x1c0] sm:$0xff]  }
 0x5c3   : > { %v16169_v29 = vld [vmem:[#allocation6 + $0x138] sm:$0xff]   ;;  %v18386_v45 = vld [vmem:[#allocation2 + $0xd8] sm:$0xff] }
 0x5c4   : > { %6301 = vst [vmem:[#allocation2 + $0x290] sm:$0xff] %v14267_v41  ;;  %v14268_v23 = vpack.c.bf16 %v6034_v13, %v6033_v9  ;;  %v6776_v14 = vsel %vm18073_vm8, %v6768_v16, %v6775_v24  ;;  %v18372_v36 = vld [vmem:[#allocation2 + $0x88] sm:$0xff]  ;;  %v18376_v9 = vld [vmem:[#allocation2 + $0xb8] sm:$0xff]  ;;  %20828 = vst [vmem:[#allocation51_spill] sm:$0xff] %v18386_v45 }
 0x5c5   : > { %v13799_v25 = vcombine.high %v6767_v6, %v6776_v14  ;;  %v13798_v17 = vcombine.low %v6767_v6, %v6776_v14  ;;  %20824 = vst [vmem:[#allocation47_spill] sm:$0xff] %v18372_v36  ;;  %20825 = vst [vmem:[#allocation48_spill] sm:$0xff] %v18376_v9  ;;  %v18392_v41 = vld [vmem:[#allocation2 + $0x108] sm:$0xff]  ;;  %v18398_v13 = vld [vmem:[#allocation2 + $0x130] sm:$0xff] }
 0x5c6   : > { %6302 = vst [vmem:[#allocation2 + $0x298] sm:$0xff] %v14268_v23  ;;  %20829 = vst [vmem:[#allocation52_spill] sm:$0xff] %v18392_v41  ;;  %v18400_v16 = vld [vmem:[#allocation2 + $0x128] sm:$0xff]  ;;  %v18412_v6 = vld [vmem:[#allocation2 + $0x180] sm:$0xff] }
 0x5c7   : > { %7185 = vmatprep.mubr.bf16.mxu1 %v13799_v25  ;;  %20831 = vst [vmem:[#allocation54_spill] sm:$0xff] %v18398_v13  ;;  %20832 = vst [vmem:[#allocation55_spill] sm:$0xff] %v18400_v16  ;;  %v18414_v14 = vld [vmem:[#allocation2 + $0x1d0] sm:$0xff]  ;;  %v18416_v25 = vld [vmem:[#allocation2 + $0x178] sm:$0xff] }
 0x5c8   : > { %7186 = vmatmul.mubr.bf16.gmra.mrb[60].mxu1 %v13798_v17  ;;  %20835 = vst [vmem:[#allocation58_spill] sm:$0xff] %v18412_v6  ;;  %20836 = vst [vmem:[#allocation59_spill] sm:$0xff] %v18416_v25  ;;  %v18423_v17 = vld [vmem:[#allocation2 + $0x218] sm:$0xff]  ;;  %v8632_v24 = vld [vmem:[#allocation2 + $0x260] sm:$0x88] }
 0x5c9   : > { %7547 = vmatprep.mubr.bf16.mxu1 %v13817_v50  ;;  %v18425_v50 = vld [vmem:[#allocation2 + $0x220] sm:$0xff]  ;;  %v7715_v6 = vld [vmem:[#allocation2 + $0x68] sm:$0xff] }
 0x5ca   : > { %v20851_v13 = vld [vmem:[#allocation18_spill] sm:$0xff] }
 0x5cb   : > { %v6313_v16 = vunpack.c.l.bf16 %v20851_v13 }
 0x5d0   : > { %7548 = vmatmul.mubr.bf16.vlgmr.msra.gmra.mrb[64].mxu1 %v13816_v40 }
 0x5d1   : > { %7555 = vmatprep.mubr.bf16.mxu1 %v18124_v47  ;;  %14495 = vmatpush3.bf16.msra.mxu1 %v16155_v18  ;;  %v16164_v47 = vld [vmem:[#allocation6 + $0x168] sm:$0xff]   ;;  %v20637_v18 = vshll.u32 %v18414_v14, 16 }
 0x5d2   : > { %14496 = vmatprep.subr.bf16.mxu1 %v16156_v30  ;;  %v18430_v30 = vld [vmem:[#allocation2 + $0x240] sm:$0xff] }
 0x5d5   : > { %14497 = vmatpush3.bf16.msra.mxu1 %v16157_v2  ;;  %v20633_v2 = vshrl.u32 %v18425_v50, 16 }
 0x5d6   : > { %14498 = vmatprep.subr.bf16.mxu1 %v16158_v55  ;;  %v18440_v55 = vld [vmem:[#allocation2 + $0x248] sm:$0xff] }
 0x5d8   : > { %7556 = vmatmul.mubr.bf16.gmra.mrb[68].mxu1 %v18126_v35  ;;  %v16167_v35 = vld [vmem:[#allocation6 + $0x130] sm:$0xff]  }
 0x5d9   : > { %7563 = vmatprep.mubr.bf16.mxu1 %v18140_v60  ;;  %14499 = vmatpush3.bf16.msra.mxu1 %v16159_v19  ;;  %v16168_v60 = vld [vmem:[#allocation6 + $0x178] sm:$0xff]   ;;  %v20624_v19 = vshrl.u32 %v18430_v30, 16 }
 0x5da   : > { %14500 = vmatprep.subr.bf16.mxu1 %v16160_v11  ;;  %v8626_v11 = vld [vmem:[#allocation2 + $0x210] sm:$0x88] }
 0x5dd   : > { %14501 = vmatpush3.bf16.msra.mxu1 %v16161_v22  ;;  %v18443_v22 = vld [vmem:[#allocation2 + $0x268] sm:$0xff] }
 0x5de   : > { %14502 = vmatprep.subr.bf16.mxu1 %v16162_v48  ;;  %v8629_v48 = vld [vmem:[#allocation2 + $0x238] sm:$0x88] }
 0x5e0   : > { %7564 = vmatmul.mubr.bf16.gmra.mrb[72].mxu1 %v18142_v31  ;;  %v18362_v31 = vld [vmem:[#allocation2 + $0x68] sm:$0xff] }
 0x5e1   : > { %7571 = vmatprep.mubr.bf16.mxu1 %v18155_v52  ;;  %14503 = vmatpush3.bf16.msra.mxu1 %v16163_v10  ;;  %20821 = vst [vmem:[#allocation44_spill] sm:$0xff] %v18362_v31  ;;  %v18365_v52 = vld [vmem:[#allocation2 + $0x60] sm:$0xff]  ;;  %v20627_v10 = vshll.u32 %v18423_v17, 16  ;;  %v20856_v31 = vld [vmem:[#allocation23_spill] sm:$0xff] }
 0x5e2   : > { %14504 = vmatprep.subr.bf16.mxu1 %v16164_v47  ;;  %20822 = vst [vmem:[#allocation45_spill] sm:$0xff] %v18365_v52  ;;  %v20629_v47 = vshrl.u32 %v18440_v55, 16 }
 0x5e5   : > { %14505 = vmatpush3.bf16.msra.mxu1 %v16165_v58  ;;  %v18448_v58 = vld [vmem:[#allocation2 + $0x270] sm:$0xff] }
 0x5e6   : > { %14506 = vmatprep.subr.bf16.mxu1 %v16166_v34  ;;  %v8903_v34 = vshrl.u32 %v8626_v11, 16  ;;  %v20631_v28 = vshrl.u32 %v18448_v58, 16 }
 0x5e8   : > { %7572 = vmatmul.mubr.bf16.gmra.mrb[76].mxu1 %v18157_v56  ;;  %v13924_v23 = vrot.slane %v8903_v34, 11  ;;  %v8941_v56 = vrot.slane %v20629_v47, 7 }
 0x5e9   : > { %7579 = vmatprep.mubr.bf16.mxu1 %v18170_v12  ;;  %14507 = vmatpush3.bf16.msra.mxu1 %v16167_v35  ;;  %v18370_v12 = vld [vmem:[#allocation2 + $0x90] sm:$0xff]  ;;  %v8919_v35 = vrot.slane %v20633_v2, 7 }
 0x5ea   : > { %14508 = vmatprep.subr.bf16.mxu1 %v16168_v60  ;;  %20823 = vst [vmem:[#allocation46_spill] sm:$0xff] %v18370_v12  ;;  %v20635_v60 = vshll.u32 %v18425_v50, 16 }
 0x5ed   : > { %14509 = vmatpush3.bf16.msra.mxu1 %v16169_v29  ;;  %v20625_v29 = vshrl.u32 %v18443_v22, 16 }
 0x5ee   : > { %14606 = vmatprep.subr.bf16.mxu1 %v16170_v27  ;;  %v8925_v27 = vshrl.u32 %v8629_v48, 16  ;;  %v8922_v48 = vor.u32 %v8919_v35, %v20635_v60 }
 0x5ef   : > { %v8954_v35 = vrot.slane %v20625_v29, 7 }
 0x5f0   : > { %7580 = vmatmul.mubr.bf16.gmra.mrb[80].mxu1 %v18172_v44  ;;  %v20630_v44 = vshll.u32 %v18443_v22, 16 }
 0x5f1   : > { %7587 = vmatprep.mubr.bf16.mxu1 %v18185_v21  ;;  %v18380_v21 = vld [vmem:[#allocation2 + $0xb0] sm:$0xff] }
 0x5f2   : > { %20826 = vst [vmem:[#allocation49_spill] sm:$0xff] %v18380_v21  ;;  %v8957_v29 = vor.u32 %v8954_v35, %v20630_v44  ;;  %v7710_v44 = vld [vmem:[#allocation2 + $0x20] sm:$0x11] }
 0x5f3   : > { %v7722_v21 = vld [vmem:[#allocation2 + $0xc0] sm:$0x11] }
 0x5f8   : > { %7588 = vmatmul.mubr.bf16.gmra.mrb[84].mxu1 %v18187_v7 }
 0x5f9   : > { %7595 = vmatprep.mubr.bf16.mxu1 %v18200_v62  ;;  %v18384_v62 = vld [vmem:[#allocation2 + $0xe0] sm:$0xff] }
 0x5fa   : > { %20827 = vst [vmem:[#allocation50_spill] sm:$0xff] %v18384_v62 }
 0x600   : > { %7596 = vmatmul.mubr.bf16.gmra.mrb[88].mxu1 %v18202_v46  ;;  %v18394_v46 = vld [vmem:[#allocation2 + $0x100] sm:$0xff] }
 0x601   : > { %7603 = vmatprep.mubr.bf16.mxu1 %v18215_v3  ;;  %20830 = vst [vmem:[#allocation53_spill] sm:$0xff] %v18394_v46  ;;  %v20632_v3 = vshll.u32 %v18440_v55, 16  ;;  %v7718_v46 = vld [vmem:[#allocation2 + $0x90] sm:$0xff] }
 0x608   : > { %7604 = vmatmul.mubr.bf16.gmra.mrb[92].mxu1 %v18217_v4  ;;  %v18406_v4 = vld [vmem:[#allocation2 + $0x158] sm:$0xff] }
 0x609   : > { %7611 = vmatprep.mubr.bf16.mxu1 %v18230_v39  ;;  %20833 = vst [vmem:[#allocation56_spill] sm:$0xff] %v18406_v4  ;;  %v18408_v39 = vld [vmem:[#allocation2 + $0x150] sm:$0xff] }
 0x60a   : > { %20834 = vst [vmem:[#allocation57_spill] sm:$0xff] %v18408_v39 }
 0x610   : > { %7612 = vmatmul.mubr.bf16.gmra.mrb[96].mxu1 %v18232_v59  ;;  %v20626_v59 = vshll.u32 %v18430_v30, 16 }
 0x611   : > { %7619 = vmatprep.mubr.bf16.mxu1 %v18245_v42  ;;  %v20636_v42 = vshrl.u32 %v18414_v14, 16 }
 0x613   : > { %v8875_v40 = vrot.slane %v20636_v42, 7 }
 0x618   : > { %7620 = vmatmul.mubr.bf16.gmra.mrb[100].mxu1 %v18247_v1  ;;  %v20628_v1 = vshrl.u32 %v18423_v17, 16 }
 0x619   : > { %7627 = vmatprep.mubr.bf16.mxu1 %v18260_v43  ;;  %v18437_v43 = vor.u32 %v8875_v40, %v20637_v18  ;;  %v6306_v40 = vunpack.c.l.bf16 %v17282_v63  ;;  %v13925_v63 = vrot.slane %v8925_v27, 11  ;;  %v18486_v27 = vld [vmem:[%s20585_s4] ss:$0 sm:$0xff] }
 0x61b   : > { %20837 = vst [vmem:[#allocation60_spill] sm:$0xff] %v18437_v43  ;;  %v6345_v47 = vadd.f32 %v18486_v27, %v6306_v40 }
 0x620   : > { %7628 = vmatmul.mubr.bf16.gmra.mrb[104].mxu1 %v18262_v0  ;;  %v6305_v0 = vunpack.c.l.bf16 %v17278_v37  ;;  %v8932_v37 = vrot.slane %v20624_v19, 7 }
 0x621   : > { %7635 = vmatprep.mubr.bf16.mxu1 %v18278_v53  ;;  %v8910_v53 = vrot.slane %v20628_v1, 7  ;;  %v20634_v1 = vshll.u32 %v18448_v58, 16 }
 0x622   : > { %v8935_v34 = vor.u32 %v8932_v37, %v20626_v59  ;;  %v8963_v59 = vrot.slane %v20631_v28, 7 }
 0x623   : > { %v8913_v11 = vor.u32 %v8910_v53, %v20627_v10  ;;  %v8915_v7 = vrot.slane %v8910_v53, 4 }
 0x625   : > { %v18475_v19 = vsel %vm18073_vm8, %v13924_v23, %v8913_v11  ;;  %v18479_v53 = vsel %vm18073_vm8, %v8915_v7, %v8922_v48  ;;  %v8937_v11 = vrot.slane %v8932_v37, 4  ;;  %v8944_v7 = vor.u32 %v8941_v56, %v20632_v3  ;;  %v18513_v3 = vld [vmem:[#allocation2 + $0x298] sm:$0xff] }
 0x626   : > { %20838 = vst [vmem:[#allocation61_spill] sm:$0xff] %v18475_v19  ;;  %20839 = vst [vmem:[#allocation62_spill] sm:$0xff] %v18479_v53  ;;  %v20870_v19 = vld [vmem:[#allocation31_spill] sm:$0xff] }
 0x627   : > { %v18506_v37 = vsel %vm18073_vm8, %v8937_v11, %v8944_v7  ;;  %20842 = vst [vmem:[#allocation65_spill] sm:$0xff] %v18513_v3  ;;  %v6307_v11 = vunpack.c.l.bf16 %v17301_v32  ;;  %v18520_v7 = vld [vmem:[#allocation2 + $0x290] sm:$0xff]  ;;  %v6308_v32 = vunpack.c.l.bf16 %v17306_v33  ;;  %v20848_v3 = vld [vmem:[#allocation43_spill] sm:$0xff]  ;;  %v6326_v43 = vunpack.c.l.bf16 %v20870_v19 }
 0x628   : > { %7636 = vmatmul.mubr.bf16.gmra.mrb[108].mxu1 %v18280_v38  ;;  %v8947_v38 = vshrl.u32 %v8632_v24, 16  ;;  %v6344_v24 = vadd.f32 %v18486_v27, %v6305_v0  ;;  %20841 = vst [vmem:[#allocation64_spill] sm:$0xff] %v18506_v37  ;;  %20843 = vst [vmem:[#allocation66_spill] sm:$0xff] %v18520_v7  ;;  %v7732_v37 = vld [vmem:[#allocation2 + $0x150] sm:$0xff] }
 0x629   : > { %7643 = vmatprep.mubr.bf16.mxu1 %v18297_v26  ;;  %v18502_v26 = vsel %vm18073_vm8, %v13925_v63, %v8935_v34  ;;  %v8959_v63 = vrot.slane %v8954_v35, 4  ;;  %v8966_v34 = vor.u32 %v8963_v59, %v20634_v1 }
 0x62a   : > { %20840 = vst [vmem:[#allocation63_spill] sm:$0xff] %v18502_v26  ;;  %v13926_v56 = vrot.slane %v8947_v38, 11 }
 0x62b   : > { %v14292_v48 = vpop.f32.mrb[4].mxu1 }
 0x62c   : > { %v14293_v10 = vpop.f32.mrb[5].mxu1  ;;  %v18525_v40 = vsel %vm18073_vm8, %v13926_v56, %v8957_v29  ;;  %v7757_v29 = vshrl.u32 %v18347_v54, 16  ;;  %v6346_v56 = vadd.f32 %v18486_v27, %v6307_v11 }
 0x62d   : > { %v14294_v23 = vadd.f32 %v14293_v10, %v14292_v48  ;;  %v14295_v0 = vpop.f32.mrb[6].mxu1  ;;  %20844 = vst [vmem:[#allocation67_spill] sm:$0xff] %v18525_v40  ;;  %v18529_v48 = vsel %vm18073_vm8, %v8959_v63, %v8966_v34 }
 0x62e   : > { %v14296_v2 = vpop.f32.mrb[7].mxu1  ;;  %20845 = vst [vmem:[#allocation68_spill] sm:$0xff] %v18529_v48 }
 0x62f   : > { %v18518_v38 = vadd.f32 %v14294_v23, %v6344_v24  ;;  %v14297_v10 = vadd.f32 %v14296_v2, %v14295_v0  ;;  %v7760_v23 = vshll.u32 %v18347_v54, 16  ;;  %v7759_v2 = vrot.slane %v7757_v29, 4 }
 0x630   : > { %7644 = vmatmul.mubr.bf16.gmra.mrb[112].mxu1 %v18299_v49  ;;  %v6309_v49 = vunpack.c.l.bf16 %v17324_v5 }
 0x631   : > { %v18534_v35 = vadd.f32 %v14297_v10, %v6345_v47  ;;  %7651 = vmatprep.mubr.bf16.mxu1 %v18312_v15  ;;  %v6347_v15 = vadd.f32 %v18486_v27, %v6308_v32  ;;  %v7762_v0 = vrot.slane %v7760_v23, 5  ;;  %v20846_v10 = vld [vmem:[#allocation15_spill] sm:$0xff]  ;;  %v7712_v32 = vld [vmem:[#allocation2 + $0x40] sm:$0xff]  ;;  %v7776_v23 = vshll.u32 %v7710_v44, 16 }
 0x632   : > { %v6310_v59 = vunpack.c.l.bf16 %v20846_v10 }
 0x633   : > { %v14298_v47 = vpop.f32.mrb[8].mxu1  ;;  %v7763_v29 = vor.u32 %v7762_v0, %v7759_v2 }
 0x634   : > { %v14299_v34 = vpop.f32.mrb[9].mxu1 }
 0x635   : > { %v14300_v11 = vadd.f32 %v14299_v34, %v14298_v47  ;;  %v14301_v33 = vpop.f32.mrb[10].mxu1  ;;  %v7711_v34 = vld [vmem:[#allocation2 + $0x38] sm:$0xff] }
 0x636   : > { %v14302_v24 = vpop.f32.mrb[11].mxu1  ;;  %v7781_v60 = vshrl.u32 %v7711_v34, 16  ;;  %v7784_v42 = vshll.u32 %v7711_v34, 16 }
 0x637   : > { %v18562_v63 = vadd.f32 %v14300_v11, %v6346_v56  ;;  %v14303_v28 = vadd.f32 %v14302_v24, %v14301_v33  ;;  %v6348_v56 = vadd.f32 %v18486_v27, %v6309_v49  ;;  %v7790_v33 = vshll.u32 %v7712_v32, 16 }
 0x638   : > { %7652 = vmatmul.mubr.bf16.gmra.mrb[116].mxu1 %v18314_v8  ;;  %v7794_v11 = vshrl.u32 %v7712_v32, 16  ;;  %v6349_v8 = vadd.f32 %v18486_v27, %v6310_v59  ;;  %v20849_v32 = vld [vmem:[#allocation17_spill] sm:$0xff]  ;;  %v7713_v59 = vld [vmem:[#allocation2 + $0x48] sm:$0x11] }
 0x639   : > { %v18568_v47 = vadd.f32 %v14303_v28, %v6347_v15  ;;  %7659 = vmatprep.mubr.bf16.mxu1 %v18327_v57  ;;  %v7764_v28 = vrot.slane %v7763_v29, 4  ;;  %v7778_v15 = vrot.slane %v7776_v23, 5  ;;  %v20847_v57 = vld [vmem:[#allocation16_spill] sm:$0xff]  ;;  %v7792_v49 = vrot.slane %v7790_v33, 5  ;;  %v7714_v29 = vld [vmem:[#allocation2 + $0x60] sm:$0xff] }
 0x63a   : > { %v6311_v18 = vunpack.c.l.bf16 %v20847_v57  ;;  %v7796_v7 = vrot.slane %v7794_v11, 4  ;;  %v7814_v11 = vshll.u32 %v7715_v6, 16 }
 0x63b   : > { %v14304_v5 = vpop.f32.mrb[12].mxu1  ;;  %v7769_v34 = vsel %vm16813_vm2, %v7764_v28, %v7762_v0  ;;  %v7808_v0 = vshll.u32 %v7714_v29, 16 }
 0x63c   : > { %v14305_v24 = vpop.f32.mrb[13].mxu1  ;;  %v6350_v33 = vadd.f32 %v18486_v27, %v6311_v18  ;;  %v7716_v18 = vld [vmem:[#allocation2 + $0x70] sm:$0x11]  ;;  %v18590_v41 = vrot.slane %v7814_v11, 5 }
 0x63d   : > { %v14306_v1 = vadd.f32 %v14305_v24, %v14304_v5  ;;  %v14307_v54 = vpop.f32.mrb[14].mxu1  ;;  %v6312_v5 = vunpack.c.l.bf16 %v20849_v32  ;;  %v7805_v32 = vshrl.u32 %v7714_v29, 16  ;;  %v7810_v13 = vrot.slane %v7808_v0, 5 }
 0x63e   : > { %v14308_v10 = vpop.f32.mrb[15].mxu1 }
 0x63f   : > { %v18574_v2 = vadd.f32 %v14306_v1, %v6348_v56  ;;  %v14309_v44 = vadd.f32 %v14308_v10, %v14307_v54  ;;  %v7779_v1 = vsel %vm16813_vm2, %v7764_v28, %v7778_v15  ;;  %v7783_v54 = vrot.slane %v7781_v60, 4 }
 0x640   : > { %7660 = vmatmul.mubr.bf16.gmra.mrb[120].mxu1 %v20848_v3  ;;  %v7786_v56 = vrot.slane %v7784_v42, 5  ;;  %v7818_v10 = vshrl.u32 %v7715_v6, 16  ;;  %v6351_v4 = vadd.f32 %v18486_v27, %v6312_v5  ;;  %v13865_v39 = vcombine.high %v7769_v34, %v7779_v1 }
 0x641   : > { %v18578_v24 = vadd.f32 %v14309_v44, %v6349_v8  ;;  %7667 = vmatprep.mubr.bf16.mxu1 %v18339_v20  ;;  %v7797_v8 = vor.u32 %v7796_v7, %v7792_v49  ;;  %v7800_v44 = vshll.u32 %v7713_v59, 16  ;;  %v7807_v29 = vrot.slane %v7805_v32, 4 }
 0x642   : > { %v7787_v60 = vor.u32 %v7786_v56, %v7783_v54  ;;  %v7820_v6 = vrot.slane %v7818_v10, 4  ;;  %v7824_v56 = vshll.u32 %v7716_v18, 16  ;;  %v7717_v10 = vld [vmem:[#allocation2 + $0x88] sm:$0xff] }
 0x643   : > { %v14310_v3 = vpop.f32.mrb[16].mxu1  ;;  %v7798_v7 = vrot.slane %v7797_v8, 4  ;;  %v7802_v59 = vrot.slane %v7800_v44, 5  ;;  %v7842_v44 = vshrl.u32 %v7718_v46, 16  ;;  %v7811_v18 = vor.u32 %v7810_v13, %v7807_v29  ;;  %v20854_v29 = vld [vmem:[#allocation21_spill] sm:$0xff] }
 0x644   : > { %v14311_v57 = vpop.f32.mrb[17].mxu1  ;;  %v7788_v54 = vrot.slane %v7787_v60, 4  ;;  %v7821_v11 = vor.u32 %v7820_v6, %v18590_v41  ;;  %v7832_v62 = vshll.u32 %v7717_v10, 16  ;;  %v6316_v13 = vunpack.c.l.bf16 %v20854_v29 }
 0x645   : > { %v14312_v20 = vadd.f32 %v14311_v57, %v14310_v3  ;;  %v14313_v25 = vpop.f32.mrb[18].mxu1  ;;  %v20852_v3 = vld [vmem:[#allocation19_spill] sm:$0xff]  ;;  %v18600_v8 = vsel %vm16813_vm2, %v7798_v7, %v7802_v59 }
 0x646   : > { %v14314_v28 = vpop.f32.mrb[19].mxu1  ;;  %v6314_v57 = vunpack.c.l.bf16 %v20852_v3  ;;  %v7793_v6 = vsel %vm16813_vm2, %v7788_v54, %v7792_v49  ;;  %v7826_v3 = vrot.slane %v7824_v56, 5  ;;  %v7812_v49 = vrot.slane %v7811_v18, 4  ;;  %v7719_v54 = vld [vmem:[#allocation2 + $0x98] sm:$0x11] }
 0x647   : > { %v18588_v42 = vadd.f32 %v14312_v20, %v6350_v33  ;;  %v14315_v15 = vadd.f32 %v14314_v28, %v14313_v25  ;;  %v6352_v25 = vadd.f32 %v18486_v27, %v6313_v16  ;;  %v16173_v56 = vld [vmem:[#allocation6 + $0x188] sm:$0xff]   ;;  %v7848_v18 = vshll.u32 %v7719_v54, 16 }
 0x648   : > { %7668 = vmatmul.mubr.bf16.gmra.mrb[124].mxu1 %v18341_v51  ;;  %v13864_v51 = vcombine.low %v7769_v34, %v7779_v1  ;;  %v6353_v60 = vadd.f32 %v18486_v27, %v6314_v57  ;;  %v16172_v34 = vld [vmem:[#allocation6 + $0x1c8] sm:$0xff]   ;;  %v7829_v1 = vshrl.u32 %v7717_v10, 16  ;;  %v7844_v57 = vrot.slane %v7842_v44, 4 }
 0x649   : > { %v18594_v5 = vadd.f32 %v14315_v15, %v6351_v4  ;;  %8429 = vmatprep.mubr.bf16.mxu1 %v13865_v39  ;;  %v7838_v4 = vshll.u32 %v7718_v46, 16  ;;  %v20853_v39 = vld [vmem:[#allocation20_spill] sm:$0xff]  ;;  %v13867_v46 = vcombine.high %v7793_v6, %v18600_v8 }
 0x64a   : > { %v6315_v32 = vunpack.c.l.bf16 %v20853_v39  ;;  %v16171_v15 = vld [vmem:[#allocation6 + $0x180] sm:$0xff]   ;;  %v7822_v39 = vrot.slane %v7821_v11, 4  ;;  %v7831_v10 = vrot.slane %v7829_v1, 4  ;;  %v16175_v1 = vld [vmem:[#allocation6 + $0x190] sm:$0xff]  }
 0x64b   : > { %v14316_v33 = vpop.f32.mrb[20].mxu1 }
 0x64c   : > { %v14317_v20 = vpop.f32.mrb[21].mxu1 }
 0x64d   : > { %v14318_v0 = vadd.f32 %v14317_v20, %v14316_v33  ;;  %v14319_v28 = vpop.f32.mrb[22].mxu1  ;;  %v18609_v33 = vrot.slane %v7838_v4, 5  ;;  %v7721_v20 = vld [vmem:[#allocation2 + $0xb8] sm:$0xff]  ;;  %v18617_v4 = vsel %vm16813_vm2, %v7822_v39, %v7826_v3  ;;  %v20855_v3 = vld [vmem:[#allocation22_spill] sm:$0xff] }
 0x64e   : > { %v14320_v16 = vpop.f32.mrb[23].mxu1  ;;  %v7862_v44 = vshll.u32 %v7721_v20, 16  ;;  %v6317_v39 = vunpack.c.l.bf16 %v20855_v3 }
 0x64f   : > { %v18606_v7 = vadd.f32 %v14318_v0, %v6352_v25  ;;  %v14321_v59 = vadd.f32 %v14320_v16, %v14319_v28  ;;  %v7720_v25 = vld [vmem:[#allocation2 + $0xb0] sm:$0xff]  ;;  %v7834_v0 = vrot.slane %v7832_v62, 5  ;;  %v16174_v28 = vld [vmem:[#allocation6 + $0x1d0] sm:$0xff]   ;;  %v6355_v62 = vadd.f32 %v18486_v27, %v6316_v13 }
 0x650   : > { %8430 = vmatmul.mubr.bf16.vlgmr.msra.gmra.mrb[128].mxu1 %v13864_v51  ;;  %v6354_v51 = vadd.f32 %v18486_v27, %v6315_v32  ;;  %v7817_v32 = vsel %vm16813_vm2, %v7812_v49, %v18590_v41  ;;  %v7724_v41 = vld [vmem:[#allocation2 + $0xe0] sm:$0xff] }
 0x651   : > { %v18612_v45 = vadd.f32 %v14321_v59, %v6353_v60  ;;  %8437 = vmatprep.mubr.bf16.mxu1 %v13867_v46  ;;  %14607 = vmatpush3.bf16.msra.mxu1 %v16171_v15  ;;  %v7866_v60 = vshrl.u32 %v7721_v20, 16  ;;  %v7845_v15 = vor.u32 %v7844_v57, %v18609_v33  ;;  %v7853_v59 = vshrl.u32 %v7720_v25, 16 }
 0x652   : > { %14608 = vmatprep.subr.bf16.mxu1 %v16172_v34  ;;  %v7856_v46 = vshll.u32 %v7720_v25, 16  ;;  %v13866_v20 = vcombine.low %v7793_v6, %v18600_v8  ;;  %v13869_v57 = vcombine.high %v7817_v32, %v18617_v4  ;;  %v7835_v54 = vor.u32 %v7834_v0, %v7831_v10  ;;  %v16176_v25 = vld [vmem:[#allocation6 + $0x1d8] sm:$0xff]   ;;  %v7723_v0 = vld [vmem:[#allocation2 + $0xd8] sm:$0xff] }
 0x653   : > { %v14322_v11 = vpop.f32.mrb[24].mxu1  ;;  %v7868_v12 = vrot.slane %v7866_v60, 4  ;;  %v7846_v49 = vrot.slane %v7845_v15, 4  ;;  %v7855_v3 = vrot.slane %v7853_v59, 4  ;;  %v6318_v8 = vunpack.c.l.bf16 %v20856_v31  ;;  %v16178_v60 = vld [vmem:[#allocation6 + $0x1e0] sm:$0xff]  }
 0x654   : > { %v14323_v16 = vpop.f32.mrb[25].mxu1  ;;  %v7858_v36 = vrot.slane %v7856_v46, 5  ;;  %v7872_v10 = vshll.u32 %v7722_v21, 16  ;;  %v6356_v15 = vadd.f32 %v18486_v27, %v6317_v39  ;;  %v7877_v21 = vshrl.u32 %v7723_v0, 16 }
 0x655   : > { %v14324_v29 = vadd.f32 %v14323_v16, %v14322_v11  ;;  %v14325_v34 = vpop.f32.mrb[26].mxu1  ;;  %14609 = vmatpush3.bf16.msra.mxu1 %v16173_v56  ;;  %v18629_v16 = vrot.slane %v7862_v44, 5  ;;  %v7850_v56 = vrot.slane %v7848_v18, 5  ;;  %v7890_v44 = vshrl.u32 %v7724_v41, 16 }
 0x656   : > { %v14326_v9 = vpop.f32.mrb[27].mxu1  ;;  %14610 = vmatprep.subr.bf16.mxu1 %v16174_v28  ;;  %v16177_v28 = vld [vmem:[#allocation6 + $0x198] sm:$0xff]   ;;  %v7859_v46 = vor.u32 %v7858_v36, %v7855_v3 }
 0x657   : > { %v18627_v11 = vadd.f32 %v14324_v29, %v6354_v51  ;;  %v14327_v13 = vadd.f32 %v14326_v9, %v14325_v34  ;;  %v7836_v51 = vrot.slane %v7835_v54, 4  ;;  %v7886_v9 = vshll.u32 %v7724_v41, 16 }
 0x658   : > { %8438 = vmatmul.mubr.bf16.gmra.mrb[132].mxu1 %v13866_v20  ;;  %v7869_v18 = vor.u32 %v7868_v12, %v18629_v16  ;;  %v18638_v31 = vsel %vm16813_vm2, %v7846_v49, %v7850_v56  ;;  %v7880_v34 = vshll.u32 %v7723_v0, 16  ;;  %v6357_v54 = vadd.f32 %v18486_v27, %v6318_v8  ;;  %v16180_v56 = vld [vmem:[#allocation6 + $0x1e8] sm:$0xff]  }
 0x659   : > { %v18632_v6 = vadd.f32 %v14327_v13, %v6355_v62  ;;  %8445 = vmatprep.mubr.bf16.mxu1 %v13869_v57  ;;  %14611 = vmatpush3.bf16.msra.mxu1 %v16175_v1  ;;  %v20857_v62 = vld [vmem:[#allocation24_spill] sm:$0xff]  ;;  %v13868_v12 = vcombine.low %v7817_v32, %v18617_v4  ;;  %v7841_v41 = vsel %vm16813_vm2, %v7836_v51, %v18609_v33  ;;  %v18646_v49 = vrot.slane %v7886_v9, 5  ;;  %v7727_v32 = vld [vmem:[#allocation2 + $0x108] sm:$0xff]  ;;  %v16181_v51 = vld [vmem:[#allocation6 + $0x1a8] sm:$0xff]  }
 0x65a   : > { %14612 = vmatprep.subr.bf16.mxu1 %v16176_v25  ;;  %v6319_v1 = vunpack.c.l.bf16 %v20857_v62  ;;  %v7874_v25 = vrot.slane %v7872_v10, 5  ;;  %v16179_v13 = vld [vmem:[#allocation6 + $0x1a0] sm:$0xff]   ;;  %v7892_v36 = vrot.slane %v7890_v44, 4  ;;  %v13871_v8 = vcombine.high %v7841_v41, %v18638_v31  ;;  %v20858_v62 = vld [vmem:[#allocation25_spill] sm:$0xff] }
 0x65b   : > { %v14328_v29 = vpop.f32.mrb[28].mxu1  ;;  %v7870_v10 = vrot.slane %v7869_v18, 4  ;;  %v7882_v4 = vrot.slane %v7880_v34, 5  ;;  %v6320_v52 = vunpack.c.l.bf16 %v20858_v62  ;;  %v7914_v34 = vshrl.u32 %v7727_v32, 16 }
 0x65c   : > { %v14329_v59 = vpop.f32.mrb[29].mxu1  ;;  %v7893_v9 = vor.u32 %v7892_v36, %v18646_v49 }
 0x65d   : > { %v14330_v20 = vadd.f32 %v14329_v59, %v14328_v29  ;;  %v14331_v57 = vpop.f32.mrb[30].mxu1  ;;  %14613 = vmatpush3.bf16.msra.mxu1 %v16177_v28  ;;  %v7725_v28 = vld [vmem:[#allocation2 + $0xe8] sm:$0x11]  ;;  %v7860_v29 = vrot.slane %v7859_v46, 4  ;;  %v7879_v59 = vrot.slane %v7877_v21, 4  ;;  %v18658_v46 = vsel %vm16813_vm2, %v7870_v10, %v7874_v25  ;;  %v16183_v25 = vld [vmem:[#allocation6 + $0x1b0] sm:$0xff]  }
 0x65e   : > { %v14332_v39 = vpop.f32.mrb[31].mxu1  ;;  %14614 = vmatprep.subr.bf16.mxu1 %v16178_v60  ;;  %v7896_v44 = vshll.u32 %v7725_v28, 16  ;;  %v7726_v60 = vld [vmem:[#allocation2 + $0x100] sm:$0xff]  ;;  %v7910_v21 = vshll.u32 %v7727_v32, 16  ;;  %v13870_v28 = vcombine.low %v7841_v41, %v18638_v31  ;;  %v7894_v62 = vrot.slane %v7893_v9, 4 }
 0x65f   : > { %v18648_v3 = vadd.f32 %v14330_v20, %v6356_v15  ;;  %v14333_v0 = vadd.f32 %v14332_v39, %v14331_v57  ;;  %v16182_v15 = vld [vmem:[#allocation6 + $0x1f0] sm:$0xff]   ;;  %v6358_v20 = vadd.f32 %v18486_v27, %v6319_v1  ;;  %v7901_v1 = vshrl.u32 %v7726_v60, 16 }
 0x660   : > { %8446 = vmatmul.mubr.bf16.gmra.mrb[136].mxu1 %v13868_v12  ;;  %v20860_v57 = vld [vmem:[#allocation26_spill] sm:$0xff]  ;;  %v7883_v12 = vor.u32 %v7882_v4, %v7879_v59  ;;  %v7728_v4 = vld [vmem:[#allocation2 + $0x110] sm:$0x11] }
 0x661   : > { %v18652_v33 = vadd.f32 %v14333_v0, %v6357_v54  ;;  %8453 = vmatprep.mubr.bf16.mxu1 %v13871_v8  ;;  %14615 = vmatpush3.bf16.msra.mxu1 %v16179_v13  ;;  %v6321_v54 = vunpack.c.l.bf16 %v20860_v57  ;;  %v18664_v13 = vsel %vm16813_vm2, %v7860_v29, %v18629_v16  ;;  %v6359_v0 = vadd.f32 %v18486_v27, %v6320_v52  ;;  %v16184_v16 = vld [vmem:[#allocation6 + $0x1f8] sm:$0xff]  }
 0x662   : > { %14616 = vmatprep.subr.bf16.mxu1 %v16180_v56  ;;  %v7904_v8 = vshll.u32 %v7726_v60, 16  ;;  %v13873_v32 = vcombine.high %v18664_v13, %v18658_v46  ;;  %v7898_v57 = vrot.slane %v7896_v44, 5  ;;  %v7916_v52 = vrot.slane %v7914_v34, 4  ;;  %v7730_v60 = vld [vmem:[#allocation2 + $0x130] sm:$0xff]  ;;  %v7729_v44 = vld [vmem:[#allocation2 + $0x128] sm:$0xff] }
 0x663   : > { %20859 = vst [vmem:[#allocation15_spill] sm:$0xff] %v18652_v33  ;;  %v14334_v18 = vpop.f32.mrb[32].mxu1  ;;  %v7884_v31 = vrot.slane %v7883_v12, 4  ;;  %v7903_v41 = vrot.slane %v7901_v1, 4  ;;  %v6360_v34 = vadd.f32 %v18486_v27, %v6321_v54 }
 0x664   : > { %v14335_v39 = vpop.f32.mrb[33].mxu1  ;;  %v7906_v9 = vrot.slane %v7904_v8, 5  ;;  %v7925_v8 = vshrl.u32 %v7729_v44, 16 }
 0x665   : > { %v14336_v36 = vadd.f32 %v14335_v39, %v14334_v18  ;;  %v14337_v56 = vpop.f32.mrb[34].mxu1  ;;  %14617 = vmatpush3.bf16.msra.mxu1 %v16181_v51  ;;  %v18672_v18 = vrot.slane %v7910_v21, 5  ;;  %v20862_v51 = vld [vmem:[#allocation27_spill] sm:$0xff] }
 0x666   : > { %v14338_v10 = vpop.f32.mrb[35].mxu1  ;;  %14618 = vmatprep.subr.bf16.mxu1 %v16182_v15  ;;  %v6322_v39 = vunpack.c.l.bf16 %v20862_v51  ;;  %v16185_v15 = vld [vmem:[#allocation6 + $0x1b8] sm:$0xff]   ;;  %v7907_v54 = vor.u32 %v7906_v9, %v7903_v41  ;;  %v20866_v41 = vld [vmem:[#allocation29_spill] sm:$0xff] }
 0x667   : > { %v18670_v29 = vadd.f32 %v14336_v36, %v6358_v20  ;;  %v14339_v59 = vadd.f32 %v14338_v10, %v14337_v56  ;;  %v7920_v20 = vshll.u32 %v7728_v4, 16  ;;  %v7934_v36 = vshll.u32 %v7730_v60, 16  ;;  %v16187_v56 = vld [vmem:[#allocation6 + $0x240] sm:$0xff]  }
 0x668   : > { %8454 = vmatmul.mubr.bf16.gmra.mrb[140].mxu1 %v13870_v28  ;;  %v7899_v10 = vsel %vm16813_vm2, %v7894_v62, %v7898_v57  ;;  %v7938_v28 = vshrl.u32 %v7730_v60, 16  ;;  %v6361_v4 = vadd.f32 %v18486_v27, %v6322_v39  ;;  %v13872_v62 = vcombine.low %v18664_v13, %v18658_v46  ;;  %v7731_v39 = vld [vmem:[#allocation2 + $0x138] sm:$0x11] }
 0x669   : > { %20861 = vst [vmem:[#allocation16_spill] sm:$0xff] %v18670_v29  ;;  %v18675_v48 = vadd.f32 %v14339_v59, %v6359_v0  ;;  %8461 = vmatprep.mubr.bf16.mxu1 %v13873_v32  ;;  %14619 = vmatpush3.bf16.msra.mxu1 %v16183_v25  ;;  %v7917_v0 = vor.u32 %v7916_v52, %v18672_v18  ;;  %v20864_v32 = vld [vmem:[#allocation28_spill] sm:$0xff]  ;;  %v7928_v59 = vshll.u32 %v7729_v44, 16  ;;  %v7922_v52 = vrot.slane %v7920_v20, 5  ;;  %v7733_v13 = vld [vmem:[#allocation2 + $0x158] sm:$0xff] }
 0x66a   : > { %14620 = vmatprep.subr.bf16.mxu1 %v16184_v16  ;;  %v6323_v12 = vunpack.c.l.bf16 %v20864_v32  ;;  %v7889_v16 = vsel %vm16813_vm2, %v7884_v31, %v18646_v49  ;;  %v18688_v60 = vrot.slane %v7934_v36, 5  ;;  %v7927_v49 = vrot.slane %v7925_v8, 4 }
 0x66b   : > { %20863 = vst [vmem:[#allocation43_spill] sm:$0xff] %v18675_v48  ;;  %v14340_v21 = vpop.f32.mrb[36].mxu1  ;;  %v13875_v57 = vcombine.high %v7889_v16, %v7899_v10  ;;  %v7918_v32 = vrot.slane %v7917_v0, 4  ;;  %v7930_v31 = vrot.slane %v7928_v59, 5  ;;  %v6324_v9 = vunpack.c.l.bf16 %v20866_v41  ;;  %v20899_v48 = vld [vmem:[#allocation14_spill] sm:$0xff] }
 0x66c   : > { %v14341_v1 = vpop.f32.mrb[37].mxu1  ;;  %v7908_v46 = vrot.slane %v7907_v54, 4  ;;  %v7944_v20 = vshll.u32 %v7731_v39, 16  ;;  %v7949_v36 = vshrl.u32 %v7732_v37, 16  ;;  %v13874_v41 = vcombine.low %v7889_v16, %v7899_v10 }
 0x66d   : > { %v14342_v25 = vadd.f32 %v14341_v1, %v14340_v21  ;;  %v14343_v51 = vpop.f32.mrb[38].mxu1  ;;  %14621 = vmatpush3.bf16.msra.mxu1 %v16185_v15  ;;  %v7940_v1 = vrot.slane %v7938_v28, 4  ;;  %v7952_v28 = vshll.u32 %v7732_v37, 16  ;;  %v7931_v59 = vor.u32 %v7930_v31, %v7927_v49  ;;  %v7735_v37 = vld [vmem:[#allocation2 + $0x178] sm:$0xff] }
 0x66e   : > { %v14344_v40 = vpop.f32.mrb[39].mxu1  ;;  %14718 = vmatprep.subr.bf16.mxu1 %v16187_v56  ;;  %v7973_v10 = vshrl.u32 %v7735_v37, 16  ;;  %v7976_v16 = vshll.u32 %v7735_v37, 16  ;;  %v7737_v37 = vld [vmem:[#allocation2 + $0x188] sm:$0x11] }
 0x66f   : > { %v18690_v44 = vadd.f32 %v14342_v25, %v6360_v34  ;;  %v14345_v21 = vadd.f32 %v14344_v40, %v14343_v51  ;;  %v6362_v34 = vadd.f32 %v18486_v27, %v6323_v12  ;;  %v7923_v40 = vsel %vm16813_vm2, %v7918_v32, %v7922_v52 }
 0x670   : > { %8462 = vmatmul.mubr.bf16.gmra.mrb[144].mxu1 %v13872_v62  ;;  %v7941_v0 = vor.u32 %v7940_v1, %v18688_v60  ;;  %v7958_v25 = vshll.u32 %v7733_v13, 16  ;;  %v7962_v51 = vshrl.u32 %v7733_v13, 16  ;;  %v7913_v12 = vsel %vm16813_vm2, %v7908_v46, %v18672_v18 }
 0x671   : > { %20865 = vst [vmem:[#allocation17_spill] sm:$0xff] %v18690_v44  ;;  %v18693_v15 = vadd.f32 %v14345_v21, %v6361_v4  ;;  %8469 = vmatprep.mubr.bf16.mxu1 %v13875_v57  ;;  %v20868_v4 = vld [vmem:[#allocation30_spill] sm:$0xff]  ;;  %v6363_v21 = vadd.f32 %v18486_v27, %v6324_v9  ;;  %v13877_v52 = vcombine.high %v7913_v12, %v7923_v40  ;;  %v7946_v32 = vrot.slane %v7944_v20, 5 }
 0x672   : > { %v6325_v62 = vunpack.c.l.bf16 %v20868_v4  ;;  %v7951_v1 = vrot.slane %v7949_v36, 4  ;;  %v7942_v31 = vrot.slane %v7941_v0, 4  ;;  %v7954_v13 = vrot.slane %v7952_v28, 5  ;;  %v7736_v4 = vld [vmem:[#allocation2 + $0x180] sm:$0xff] }
 0x673   : > { %20867 = vst [vmem:[#allocation12_spill] sm:$0xff] %v18693_v15  ;;  %v14346_v56 = vpop.f32.mrb[40].mxu1  ;;  %v7960_v9 = vrot.slane %v7958_v25, 5  ;;  %v7964_v53 = vrot.slane %v7962_v51, 4  ;;  %v7982_v46 = vshll.u32 %v7736_v4, 16  ;;  %v7986_v20 = vshrl.u32 %v7736_v4, 16 }
 0x674   : > { %v14347_v8 = vpop.f32.mrb[41].mxu1  ;;  %v18712_v0 = vsel %vm16813_vm2, %v7942_v31, %v7946_v32  ;;  %v7955_v28 = vor.u32 %v7954_v13, %v7951_v1  ;;  %v20872_v25 = vld [vmem:[#allocation32_spill] sm:$0xff]  ;;  %v7975_v32 = vrot.slane %v7973_v10, 4  ;;  %v18722_v1 = vld [vmem:[#allocation2 + $0x1a8] sm:$0xff]  ;;  %v13876_v13 = vcombine.low %v7913_v12, %v7923_v40  ;;  %v20877_v40 = vld [vmem:[#allocation34_spill] sm:$0xff] }
 0x675   : > { %v14348_v57 = vadd.f32 %v14347_v8, %v14346_v56  ;;  %v14349_v54 = vpop.f32.mrb[42].mxu1  ;;  %v7932_v56 = vrot.slane %v7931_v59, 4  ;;  %v7734_v8 = vld [vmem:[#allocation2 + $0x160] sm:$0x11]  ;;  %v6327_v51 = vunpack.c.l.bf16 %v20872_v25  ;;  %20874 = vst [vmem:[#allocation20_spill] sm:$0xff] %v18722_v1  ;;  %v7988_v25 = vrot.slane %v7986_v20, 4 }
 0x676   : > { %v14350_v39 = vpop.f32.mrb[43].mxu1  ;;  %v7968_v59 = vshll.u32 %v7734_v8, 16  ;;  %v7984_v8 = vrot.slane %v7982_v46, 5  ;;  %v7992_v10 = vshll.u32 %v7737_v37, 16  ;;  %v6329_v12 = vunpack.c.l.bf16 %v20877_v40  ;;  %v20881_v37 = vld [vmem:[#allocation37_spill] sm:$0xff] }
 0x677   : > { %v18704_v26 = vadd.f32 %v14348_v57, %v6362_v34  ;;  %v14351_v49 = vadd.f32 %v14350_v39, %v14349_v54  ;;  %v6364_v34 = vadd.f32 %v18486_v27, %v6325_v62  ;;  %v20873_v57 = vld [vmem:[#allocation33_spill] sm:$0xff]  ;;  %v7965_v39 = vor.u32 %v7964_v53, %v7960_v9 }
 0x678   : > { %8470 = vmatmul.mubr.bf16.gmra.mrb[148].mxu1 %v13874_v41  ;;  %v6328_v19 = vunpack.c.l.bf16 %v20873_v57  ;;  %v6365_v62 = vadd.f32 %v18486_v27, %v6326_v43  ;;  %v18726_v57 = vld [vmem:[#allocation2 + $0x1a0] sm:$0xff]  ;;  %v7994_v40 = vrot.slane %v7992_v10, 5 }
 0x679   : > { %20869 = vst [vmem:[#allocation18_spill] sm:$0xff] %v18704_v26  ;;  %v18707_v18 = vadd.f32 %v14351_v49, %v6363_v21  ;;  %8477 = vmatprep.mubr.bf16.mxu1 %v13877_v52  ;;  %v18719_v21 = vsel %vm16813_vm2, %v7932_v56, %v18688_v60  ;;  %v7978_v49 = vrot.slane %v7976_v16, 5  ;;  %20875 = vst [vmem:[#allocation21_spill] sm:$0xff] %v18726_v57  ;;  %v7956_v56 = vrot.slane %v7955_v28, 4  ;;  %v20887_v26 = vld [vmem:[#allocation39_spill] sm:$0xff] }
 0x67a   : > { %v13879_v4 = vcombine.high %v18719_v21, %v18712_v0  ;;  %v7966_v43 = vrot.slane %v7965_v39, 4  ;;  %v8006_v16 = vshll.u32 %v18722_v1, 16  ;;  %v20687_v20 = vshrl.u32 %v18726_v57, 16  ;;  %v18760_v39 = vld [vmem:[#allocation2 + $0x30] sm:$0x88] }
 0x67b   : > { %20871 = vst [vmem:[#allocation19_spill] sm:$0xff] %v18707_v18  ;;  %v14352_v36 = vpop.f32.mrb[44].mxu1  ;;  %v7979_v46 = vor.u32 %v7978_v49, %v7975_v32  ;;  %v18745_v32 = vsel %vm16813_vm2, %v7956_v56, %v7960_v9  ;;  %v7740_v49 = vld [vmem:[#allocation2 + $0x1b0] sm:$0x11] }
 0x67c   : > { %v14353_v54 = vpop.f32.mrb[45].mxu1  ;;  %v7999_v56 = vrot.slane %v20687_v20, 4  ;;  %v8016_v10 = vshll.u32 %v7740_v49, 16  ;;  %v18775_v49 = vld [vmem:[#allocation2 + $0x1f0] sm:$0xff] }
 0x67d   : > { %v14354_v41 = vadd.f32 %v14353_v54, %v14352_v36  ;;  %v14355_v52 = vpop.f32.mrb[46].mxu1  ;;  %v7970_v36 = vrot.slane %v7968_v59, 5  ;;  %v7989_v59 = vor.u32 %v7988_v25, %v7984_v8  ;;  %v6366_v54 = vadd.f32 %v18486_v27, %v6327_v51  ;;  %20888 = vst [vmem:[#allocation26_spill] sm:$0xff] %v18775_v49 }
 0x67e   : > { %v14356_v31 = vpop.f32.mrb[47].mxu1  ;;  %v20883_v51 = vshrl.u32 %v18722_v1, 16  ;;  %v7980_v9 = vrot.slane %v7979_v46, 4  ;;  %v18765_v1 = vld [vmem:[#allocation2 + $0x38] sm:$0xff]  ;;  %v8018_v20 = vrot.slane %v8016_v10, 5 }
 0x67f   : > { %v18728_v60 = vadd.f32 %v14354_v41, %v6364_v34  ;;  %v14357_v53 = vadd.f32 %v14356_v31, %v14355_v52  ;;  %v20879_v34 = vld [vmem:[#allocation35_spill] sm:$0xff]  ;;  %v20880_v52 = vld [vmem:[#allocation36_spill] sm:$0xff]  ;;  %v18751_v25 = vsel %vm16813_vm2, %v7966_v43, %v7970_v36  ;;  %v18753_v31 = vrot.slane %v8006_v16, 5 }
 0x680   : > { %8478 = vmatmul.mubr.bf16.gmra.mrb[152].mxu1 %v13876_v13  ;;  %v8012_v28 = vrot.slane %v20883_v51, 4  ;;  %v20884_v36 = vshll.u32 %v18726_v57, 16  ;;  %v20886_v51 = vld [vmem:[#allocation38_spill] sm:$0xff]  ;;  %v18778_v57 = vld [vmem:[#allocation2 + $0x68] sm:$0xff] }
 0x681   : > { %20876 = vst [vmem:[#allocation22_spill] sm:$0xff] %v18728_v60  ;;  %v18733_v18 = vadd.f32 %v14357_v53, %v6365_v62  ;;  %8485 = vmatprep.mubr.bf16.mxu1 %v13879_v4  ;;  %v13878_v62 = vcombine.low %v18719_v21, %v18712_v0  ;;  %v18747_v4 = vld [vmem:[#allocation2 + $0x1c8] sm:$0xff]  ;;  %v6367_v21 = vadd.f32 %v18486_v27, %v6328_v19  ;;  %v7990_v60 = vrot.slane %v7989_v59, 4 }
 0x682   : > { %20882 = vst [vmem:[#allocation24_spill] sm:$0xff] %v18747_v4  ;;  %v8002_v43 = vrot.slane %v20884_v36, 5  ;;  %v13881_v19 = vcombine.high %v18745_v32, %v18751_v25  ;;  %v8013_v36 = vor.u32 %v8012_v28, %v18753_v31  ;;  %20889 = vst [vmem:[#allocation27_spill] sm:$0xff] %v18778_v57  ;;  %v20892_v16 = vshrl.u32 %v18747_v4, 16 }
 0x683   : > { %20878 = vst [vmem:[#allocation23_spill] sm:$0xff] %v18733_v18  ;;  %v14358_v13 = vpop.f32.mrb[48].mxu1  ;;  %v18790_v28 = vsel %vm16813_vm2, %v7990_v60, %v7994_v40 }
 0x684   : > { %v14359_v53 = vpop.f32.mrb[49].mxu1  ;;  %v8023_v46 = vrot.slane %v20892_v16, 4  ;;  %v20897_v16 = vshrl.u32 %v18414_v14, 16 }
 0x685   : > { %v14360_v41 = vadd.f32 %v14359_v53, %v14358_v13  ;;  %v14361_v0 = vpop.f32.mrb[50].mxu1 }
 0x686   : > { %v14362_v18 = vpop.f32.mrb[51].mxu1 }
 0x687   : > { %v18767_v13 = vadd.f32 %v14360_v41, %v6366_v54  ;;  %v14363_v53 = vadd.f32 %v14362_v18, %v14361_v0  ;;  %v20890_v54 = vld [vmem:[#allocation13_spill] sm:$0xff]  ;;  %v18785_v0 = vsel %vm16813_vm2, %v7980_v9, %v7984_v8  ;;  %v20895_v9 = vshll.u32 %v18747_v4, 16 }
 0x688   : > { %8486 = vmatmul.mubr.bf16.gmra.mrb[156].mxu1 %v13878_v62  ;;  %v6303_v18 = vunpack.c.l.bf16 %v20890_v54  ;;  %v8003_v62 = vor.u32 %v8002_v43, %v7999_v56  ;;  %v7743_v8 = vld [vmem:[#allocation2 + $0x1d8] sm:$0x11]  ;;  %v8014_v56 = vrot.slane %v8013_v36, 4  ;;  %v20896_v43 = vshll.u32 %v18414_v14, 16 }
 0x689   : > { %20885 = vst [vmem:[#allocation25_spill] sm:$0xff] %v18767_v13  ;;  %v18781_v41 = vadd.f32 %v14363_v53, %v6367_v21  ;;  %8493 = vmatprep.mubr.bf16.mxu1 %v13881_v19  ;;  %v18794_v13 = vld [vmem:[#allocation2 + $0x1f8] sm:$0xff]  ;;  %v18796_v21 = vld [vmem:[#allocation2 + $0x60] sm:$0xff]  ;;  %v6368_v19 = vadd.f32 %v18486_v27, %v6329_v12  ;;  %v8026_v54 = vrot.slane %v20895_v9, 5  ;;  %v20898_v4 = vunpack.c.l.bf16 %v20879_v34 }
 0x68a   : > { %20893 = vst [vmem:[#allocation29_spill] sm:$0xff] %v18794_v13  ;;  %20894 = vst [vmem:[#allocation30_spill] sm:$0xff] %v18796_v21  ;;  %v8032_v10 = vrot.slane %v20896_v43, 5  ;;  %v6304_v36 = vunpack.c.l.bf16 %v20899_v48  ;;  %v13880_v43 = vcombine.low %v18745_v32, %v18751_v25  ;;  %v13883_v14 = vcombine.high %v18785_v0, %v18790_v28 }
 0x68b   : > { %20891 = vst [vmem:[#allocation28_spill] sm:$0xff] %v18781_v41  ;;  %v14364_v53 = vpop.f32.mrb[52].mxu1  ;;  %v8036_v41 = vrot.slane %v20897_v16, 4  ;;  %v6369_v9 = vadd.f32 %v18486_v27, %v20898_v4  ;;  %v8004_v16 = vrot.slane %v8003_v62, 4  ;;  %v8027_v34 = vor.u32 %v8026_v54, %v8023_v46 }
 0x68c   : > { %v14365_v40 = vpop.f32.mrb[53].mxu1  ;;  %v8040_v15 = vshll.u32 %v7743_v8, 16  ;;  %v18823_v4 = vsel %vm16813_vm2, %v8014_v56, %v8018_v20  ;;  %v20901_v48 = vshrl.u32 %v18775_v49, 16  ;;  %v20902_v32 = vshll.u32 %v18775_v49, 16 }
 0x68d   : > { %v14366_v12 = vadd.f32 %v14365_v40, %v14364_v53  ;;  %v14367_v44 = vpop.f32.mrb[54].mxu1  ;;  %v8037_v60 = vor.u32 %v8036_v41, %v8032_v10  ;;  %v18830_v33 = vadd.f32 %v18486_v27, %v6303_v18  ;;  %v20905_v20 = vshrl.u32 %v18794_v13, 16  ;;  %v7746_v18 = vld [vmem:[#allocation2 + $0x200] sm:$0x11] }
 0x68e   : > { %v14368_v29 = vpop.f32.mrb[55].mxu1  ;;  %v8047_v59 = vrot.slane %v20901_v48, 4  ;;  %v8050_v25 = vrot.slane %v20902_v32, 5  ;;  %v13882_v41 = vcombine.low %v18785_v0, %v18790_v28  ;;  %v20906_v8 = vshll.u32 %v18425_v50, 16 }
 0x68f   : > { %v18819_v53 = vadd.f32 %v14366_v12, %v6368_v19  ;;  %v14369_v40 = vadd.f32 %v14368_v29, %v14367_v44  ;;  %v20904_v29 = vshll.u32 %v18794_v13, 16  ;;  %v8060_v46 = vrot.slane %v20905_v20, 4 }
 0x690   : > { %8494 = vmatmul.mubr.bf16.gmra.mrb[160].mxu1 %v13880_v43  ;;  %v18845_v19 = vsel %vm16813_vm2, %v8004_v16, %v18753_v31  ;;  %v18849_v54 = vrot.slane %v20906_v8, 5  ;;  %v20907_v56 = vshrl.u32 %v18425_v50, 16  ;;  %v20908_v43 = vunpack.c.l.bf16 %v20880_v52  ;;  %v7749_v31 = vld [vmem:[#allocation2 + $0x228] sm:$0x11] }
 0x691   : > { %20900 = vst [vmem:[#allocation31_spill] sm:$0xff] %v18819_v53  ;;  %v18832_v62 = vadd.f32 %v14369_v40, %v6369_v9  ;;  %8501 = vmatprep.mubr.bf16.mxu1 %v13883_v14  ;;  %v18836_v44 = vrot.slane %v20904_v29, 5  ;;  %v13885_v0 = vcombine.high %v18845_v19, %v18823_v4  ;;  %v8028_v28 = vrot.slane %v8027_v34, 4 }
 0x692   : > { %v8084_v12 = vrot.slane %v20907_v56, 4  ;;  %v6370_v14 = vadd.f32 %v18486_v27, %v20908_v43  ;;  %v8042_v40 = vrot.slane %v8040_v15, 5  ;;  %v8038_v48 = vrot.slane %v8037_v60, 4  ;;  %v16379_v27 = vld [vmem:[%s20585_s4] ss:$0 sm:$0xff] }
 0x693   : > { %20903 = vst [vmem:[#allocation32_spill] sm:$0xff] %v18832_v62  ;;  %v14370_v9 = vpop.f32.mrb[56].mxu1  ;;  %v8051_v32 = vor.u32 %v8050_v25, %v8047_v59  ;;  %v20909_v29 = vshll.u32 %v18440_v55, 16  ;;  %v20910_v50 = vshrl.u32 %v18440_v55, 16  ;;  %v20911_v34 = vunpack.c.l.bf16 %v20881_v37  ;;  %v7752_v59 = vld [vmem:[#allocation2 + $0x250] sm:$0x11] }
 0x694   : > { %v14371_v16 = vpop.f32.mrb[57].mxu1  ;;  %v8061_v43 = vor.u32 %v8060_v46, %v18836_v44  ;;  %v8064_v60 = vshll.u32 %v7746_v18, 16  ;;  %v20913_v55 = vshll.u32 %v18423_v17, 16  ;;  %v20915_v37 = vshrl.u32 %v18430_v30, 16 }
 0x695   : > { %v18860_v20 = vrot.slane %v20909_v29, 5  ;;  %v8108_v8 = vrot.slane %v20910_v50, 4  ;;  %v14372_v56 = vadd.f32 %v14371_v16, %v14370_v9  ;;  %v14373_v52 = vpop.f32.mrb[58].mxu1  ;;  %v6371_v15 = vadd.f32 %v16379_v27, %v20911_v34 }
 0x696   : > { %v14374_v25 = vpop.f32.mrb[59].mxu1  ;;  %v20912_v29 = vshrl.u32 %v18423_v17, 16  ;;  %v8074_v50 = vrot.slane %v20913_v55, 5  ;;  %v8085_v9 = vor.u32 %v8084_v12, %v18849_v54  ;;  %v8088_v16 = vshll.u32 %v7749_v31, 16 }
 0x697   : > { %v18875_v13 = vadd.f32 %v14372_v56, %v6370_v14  ;;  %v14375_v62 = vadd.f32 %v14374_v25, %v14373_v52  ;;  %v8095_v34 = vrot.slane %v20915_v37, 4  ;;  %v20916_v46 = vshll.u32 %v18430_v30, 16 }
 0x698   : > { %v8071_v49 = vrot.slane %v20912_v29, 4  ;;  %v6343_v53 = vadd.f32 %v16379_v27, %v6304_v36  ;;  %8502 = vmatmul.mubr.bf16.gmra.mrb[164].mxu1 %v13882_v41  ;;  %v18883_v29 = vsel %vm16813_vm2, %v8028_v28, %v8032_v10  ;;  %v8109_v17 = vor.u32 %v8108_v8, %v18860_v20  ;;  %v7755_v8 = vld [vmem:[#allocation2 + $0x278] sm:$0x11] }
 0x699   : > { %20914 = vst [vmem:[#allocation33_spill] sm:$0xff] %v18875_v13  ;;  %v8098_v18 = vrot.slane %v20916_v46, 5  ;;  %v8112_v55 = vshll.u32 %v7752_v59, 16  ;;  %v18886_v12 = vadd.f32 %v14375_v62, %v6371_v15  ;;  %8509 = vmatprep.mubr.bf16.mxu1 %v13885_v0  ;;  %v8052_v14 = vrot.slane %v8051_v32, 4 }
 0x69a   : > { %v20918_v31 = vshll.u32 %v18448_v58, 16  ;;  %v20919_v30 = vshrl.u32 %v18448_v58, 16  ;;  %v18896_v36 = vsel %vm16813_vm2, %v8038_v48, %v8042_v40  ;;  %v8062_v10 = vrot.slane %v8061_v43, 4 }
 0x69b   : > { %20917 = vst [vmem:[#allocation34_spill] sm:$0xff] %v18886_v12  ;;  %v8066_v41 = vrot.slane %v8064_v60, 5  ;;  %v8075_v28 = vor.u32 %v8074_v50, %v8071_v49  ;;  %v14376_v59 = vpop.f32.mrb[60].mxu1  ;;  %v20920_v62 = vunpack.c.l.bf16 %v20886_v51  ;;  %v8086_v32 = vrot.slane %v8085_v9, 4  ;;  %v20924_v9 = vld [vmem:[#allocation41_spill] sm:$0xff] }
 0x69c   : > { %v18890_v56 = vrot.slane %v20918_v31, 5  ;;  %v8132_v52 = vrot.slane %v20919_v30, 4  ;;  %v8090_v15 = vrot.slane %v8088_v16, 5  ;;  %v8099_v25 = vor.u32 %v8098_v18, %v8095_v34  ;;  %v14377_v37 = vpop.f32.mrb[61].mxu1 }
 0x69d   : > { %v6372_v0 = vadd.f32 %v16379_v27, %v20920_v62  ;;  %v8110_v46 = vrot.slane %v8109_v17, 4  ;;  %v8114_v31 = vrot.slane %v8112_v55, 5  ;;  %v20921_v58 = vshrl.u32 %v18443_v22, 16  ;;  %v14379_v60 = vpop.f32.mrb[62].mxu1  ;;  %v18913_v55 = vld [vmem:[#allocation2 + $0x40] sm:$0xff] }
 0x69e   : > { %v20922_v40 = vshll.u32 %v18443_v22, 16  ;;  %v14378_v43 = vadd.f32 %v14377_v37, %v14376_v59  ;;  %v20923_v49 = vunpack.c.l.bf16 %v20887_v26  ;;  %v8133_v51 = vor.u32 %v8132_v52, %v18890_v56  ;;  %v14380_v34 = vpop.f32.mrb[63].mxu1 }
 0x69f   : > { %v8119_v30 = vrot.slane %v20921_v58, 4  ;;  %v8136_v62 = vshll.u32 %v7755_v8, 16  ;;  %v7194_v16 = vadd.f32 %v20924_v9, %v18830_v33  ;;  %v13884_v18 = vcombine.low %v18845_v19, %v18823_v4  ;;  %v18960_v58 = vld [vmem:[#allocation2 + $0x1d0] sm:$0xff] }
 0x6a0   : > { %v8122_v48 = vrot.slane %v20922_v40, 5  ;;  %v6373_v50 = vadd.f32 %v16379_v27, %v20923_v49  ;;  %v13887_v17 = vcombine.high %v18883_v29, %v18896_v36  ;;  %v8076_v22 = vrot.slane %v8075_v28, 4  ;;  %v10832_v40 = vld [vmem:[#allocation2 + $0x1c0] sm:$0x88] }
 0x6a1   : > { %v18915_v59 = vadd.f32 %v14378_v43, %v6372_v0  ;;  %v14381_v26 = vadd.f32 %v14380_v34, %v14379_v60  ;;  %v18919_v27 = vsel %vm16813_vm2, %v8062_v10, %v8066_v41  ;;  %v8100_v52 = vrot.slane %v8099_v25, 4  ;;  %8510 = vmatmul.mubr.bf16.gmra.mrb[168].mxu1 %v13884_v18  ;;  %v20927_v25 = vld [vmem:[#allocation42_spill] sm:$0xff]  ;;  %v18983_v18 = vld [vmem:[#allocation2 + $0x218] sm:$0xff] }
 0x6a2   : > { %v18924_v33 = vsel %vm16813_vm2, %v8052_v14, %v18836_v44  ;;  %v18928_v4 = vsel %vm16813_vm2, %v8086_v32, %v8090_v15  ;;  %v18932_v19 = vsel %vm16813_vm2, %v8110_v46, %v8114_v31  ;;  %v8123_v28 = vor.u32 %v8122_v48, %v8119_v30  ;;  %8517 = vmatprep.mubr.bf16.mxu1 %v13887_v17  ;;  %v18947_v15 = vld [vmem:[#allocation2 + $0x1c8] sm:$0xff]  ;;  %v18985_v17 = vld [vmem:[#allocation2 + $0x220] sm:$0xff] }
 0x6a3   : > { %20925 = vst [vmem:[#allocation35_spill] sm:$0xff] %v18915_v59  ;;  %v18934_v8 = vadd.f32 %v14381_v26, %v6373_v50  ;;  %v8134_v10 = vrot.slane %v8133_v51, 4  ;;  %v8138_v41 = vrot.slane %v8136_v62, 5  ;;  %v8653_v0 = vshrl.u32 %v18913_v55, 16  ;;  %20928 = vst [vmem:[#allocation37_spill] sm:$0xff] %v18947_v15  ;;  %v14398_v46 = vpop.f32.mrb[64].mxu1 }
 0x6a4   : > { %v7195_v37 = vadd.f32 %v20927_v25, %v6343_v53  ;;  %v13886_v44 = vcombine.low %v18883_v29, %v18896_v36  ;;  %v13889_v14 = vcombine.high %v18924_v33, %v18919_v27  ;;  %v18945_v32 = vsel %vm16813_vm2, %v8076_v22, %v18849_v54  ;;  %v18962_v54 = vld [vmem:[#allocation2 + $0x1f0] sm:$0xff]  ;;  %v14399_v30 = vpop.f32.mrb[65].mxu1  ;;  %v18974_v50 = vld [vmem:[#allocation2 + $0x1f8] sm:$0xff]  ;;  %v18999_v48 = vld [vmem:[#allocation2 + $0x268] sm:$0xff] }
 0x6a5   : > { %20926 = vst [vmem:[#allocation36_spill] sm:$0xff] %v18934_v8  ;;  %v18958_v36 = vsel %vm16813_vm2, %v8100_v52, %v18860_v20  ;;  %v18968_v43 = vrot.slane %v8123_v28, 4  ;;  %v20929_v60 = vshrl.u32 %v18765_v1, 16  ;;  %v14400_v20 = vadd.f32 %v14399_v30, %v14398_v46  ;;  %v14401_v51 = vpop.f32.mrb[66].mxu1  ;;  %v18991_v46 = vld [vmem:[#allocation2 + $0x240] sm:$0xff]  ;;  %20932 = vst [vmem:[#allocation13_spill] sm:$0xff] %v18999_v48 }
 0x6a6   : > { %v18978_v62 = vsel %vm16813_vm2, %v8134_v10, %v8138_v41  ;;  %v18980_v9 = vrot.slane %v8653_v0, 7  ;;  %v20696_v34 = vshrl.u32 %v18947_v15, 16  ;;  %v14402_v22 = vpop.f32.mrb[67].mxu1  ;;  %v20701_v26 = vshll.u32 %v18947_v15, 16  ;;  %20930 = vst [vmem:[#allocation38_spill] sm:$0xff] %v18991_v46  ;;  %v19010_v52 = vld [vmem:[#allocation2 + $0x270] sm:$0xff] }
 0x6a7   : > { %v18972_v49 = vrot.slane %v20929_v60, 7  ;;  %v20697_v28 = vshrl.u32 %v18960_v58, 16  ;;  %v20698_v25 = vshrl.u32 %v18962_v54, 16  ;;  %v18993_v10 = vadd.f32 %v14400_v20, %v7194_v16  ;;  %v18997_v60 = vld [vmem:[#allocation2 + $0x248] sm:$0xff]  ;;  %20934 = vst [vmem:[#allocation41_spill] sm:$0xff] %v19010_v52 }
 0x6a8   : > { %v14403_v41 = vadd.f32 %v14402_v22, %v14401_v51  ;;  %v10835_v20 = vld [vmem:[#allocation2 + $0x1e8] sm:$0x88]  ;;  %v11052_v29 = vshrl.u32 %v10832_v40, 16  ;;  %v11059_v31 = vrot.slane %v20696_v34, 7  ;;  %v19019_v22 = vld [vmem:[#allocation2 + $0x290] sm:$0xff]  ;;  %v20936_v8 = vshll.u32 %v18960_v58, 16 }
 0x6a9   : > { %20931 = vst [vmem:[#allocation39_spill] sm:$0xff] %v18993_v10  ;;  %8518 = vmatmul.mubr.bf16.gmra.mrb[172].mxu1 %v13886_v44  ;;  %v11068_v16 = vrot.slane %v20697_v28, 7  ;;  %20935 = vst [vmem:[#allocation42_spill] sm:$0xff] %v19019_v22  ;;  %v11074_v30 = vshrl.u32 %v10835_v20, 16  ;;  %v11081_v0 = vrot.slane %v20698_v25, 7  ;;  %v20937_v40 = vshll.u32 %v18962_v54, 16 }
 0x6aa   : > { %v19005_v51 = vadd.f32 %v14403_v41, %v7195_v37  ;;  %8525 = vmatprep.mubr.bf16.mxu1 %v13889_v14  ;;  %v14081_v34 = vrot.slane %v11052_v29, 11  ;;  %v11062_v28 = vor.u32 %v11059_v31, %v20701_v26  ;;  %v11064_v41 = vrot.slane %v11059_v31, 4  ;;  %v10838_v15 = vld [vmem:[#allocation2 + $0x210] sm:$0x88] }
 0x6ab   : > { %v14404_v37 = vpop.f32.mrb[68].mxu1  ;;  %v11071_v20 = vor.u32 %v11068_v16, %v20936_v8  ;;  %v14082_v12 = vrot.slane %v11074_v30, 11  ;;  %v11084_v13 = vor.u32 %v11081_v0, %v20937_v40  ;;  %v20938_v29 = vshrl.u32 %v18974_v50, 16  ;;  %v10841_v30 = vld [vmem:[#allocation2 + $0x238] sm:$0x88] }
 0x6ac   : > { %20933 = vst [vmem:[#allocation14_spill] sm:$0xff] %v19005_v51  ;;  %v14405_v53 = vpop.f32.mrb[69].mxu1  ;;  %v19040_v31 = vsel %vm18073_vm8, %v14081_v34, %v11062_v28  ;;  %v20941_v16 = vcombine.low %v18924_v33, %v18919_v27  ;;  %v20944_v27 = vshrl.u32 %v18983_v18, 16  ;;  %v20950_v40 = vshll.u32 %v18983_v18, 16 }
 0x6ad   : > { %v14406_v51 = vadd.f32 %v14405_v53, %v14404_v37  ;;  %v14407_v10 = vpop.f32.mrb[70].mxu1  ;;  %v11090_v44 = vrot.slane %v20938_v29, 7  ;;  %20939 = vst [vmem:[#allocation69_spill] sm:$0xff] %v19040_v31  ;;  %v19044_v8 = vsel %vm18073_vm8, %v11064_v41, %v11071_v20  ;;  %v11096_v41 = vshrl.u32 %v10838_v15, 16 }
 0x6ae   : > { %v14408_v59 = vpop.f32.mrb[71].mxu1  ;;  %20940 = vst [vmem:[#allocation70_spill] sm:$0xff] %v19044_v8  ;;  %v11103_v33 = vrot.slane %v20944_v27, 7  ;;  %v20945_v20 = vshrl.u32 %v18985_v17, 16 }
 0x6af   : > { %v19036_v53 = vadd.f32 %v14406_v51, %v18518_v38  ;;  %v14409_v37 = vadd.f32 %v14408_v59, %v14407_v10  ;;  %v11086_v59 = vrot.slane %v11081_v0, 4  ;;  %v20942_v10 = vshll.u32 %v18974_v50, 16 }
 0x6b0   : > { %v20943_v51 = vcombine.high %v18945_v32, %v18928_v4  ;;  %v11112_v29 = vrot.slane %v20945_v20, 7  ;;  %v19069_v0 = vsel %vm18073_vm8, %v14082_v12, %v11084_v13  ;;  %v14083_v20 = vrot.slane %v11096_v41, 11  ;;  %v10844_v12 = vld [vmem:[#allocation2 + $0x260] sm:$0x88] }
 0x6b1   : > { %8526 = vmatmul.mubr.bf16.gmra.mrb[176].mxu1 %v20941_v16  ;;  %v11093_v34 = vor.u32 %v11090_v44, %v20942_v10  ;;  %v19056_v28 = vadd.f32 %v14409_v37, %v18534_v35  ;;  %v19065_v16 = vld [vmem:[#allocation2 + $0x298] sm:$0xff]  ;;  %20947 = vst [vmem:[#allocation72_spill] sm:$0xff] %v19069_v0  ;;  %v11118_v44 = vshrl.u32 %v10841_v30, 16  ;;  %v20949_v37 = vshrl.u32 %v18991_v46, 16 }
 0x6b2   : > { %8533 = vmatprep.mubr.bf16.mxu1 %v20943_v51  ;;  %20946 = vst [vmem:[#allocation71_spill] sm:$0xff] %v19065_v16  ;;  %v11106_v13 = vor.u32 %v11103_v33, %v20950_v40  ;;  %v20951_v30 = vshll.u32 %v18985_v17, 16  ;;  %v20709_v8 = vshrl.u32 %v19065_v16, 16  ;;  %v20953_v41 = vshrl.u32 %v18997_v60, 16 }
 0x6b3   : > { %v19073_v35 = vsel %vm18073_vm8, %v11086_v59, %v11093_v34  ;;  %v11125_v15 = vrot.slane %v20949_v37, 7  ;;  %v14410_v10 = vpop.f32.mrb[72].mxu1  ;;  %v20708_v59 = vshll.u32 %v19019_v22, 16  ;;  %v11108_v34 = vrot.slane %v11103_v33, 4 }
 0x6b4   : > { %20948 = vst [vmem:[#allocation73_spill] sm:$0xff] %v19073_v35  ;;  %v14411_v38 = vpop.f32.mrb[73].mxu1  ;;  %v11115_v26 = vor.u32 %v11112_v29, %v20951_v30  ;;  %v20952_v37 = vshll.u32 %v18991_v46, 16  ;;  %v14084_v27 = vrot.slane %v11118_v44, 11  ;;  %v11134_v35 = vrot.slane %v20953_v41, 7 }
 0x6b5   : > { %v14412_v14 = vadd.f32 %v14411_v38, %v14410_v10  ;;  %v14413_v51 = vpop.f32.mrb[74].mxu1  ;;  %v19093_v0 = vsel %vm18073_vm8, %v14083_v20, %v11106_v13  ;;  %v11130_v29 = vrot.slane %v11125_v15, 4  ;;  %v11140_v30 = vshrl.u32 %v10844_v12, 16 }
 0x6b6   : > { %v11128_v25 = vor.u32 %v11125_v15, %v20952_v37  ;;  %v14414_v40 = vpop.f32.mrb[75].mxu1  ;;  %20954 = vst [vmem:[#allocation74_spill] sm:$0xff] %v19093_v0  ;;  %v19097_v33 = vsel %vm18073_vm8, %v11108_v34, %v11115_v26  ;;  %v10847_v37 = vld [vmem:[#allocation2 + $0x288] sm:$0x88]  ;;  %v20956_v20 = vcombine.low %v18945_v32, %v18928_v4  ;;  %v20957_v26 = vshll.u32 %v18997_v60, 16 }
 0x6b7   : > { %20955 = vst [vmem:[#allocation75_spill] sm:$0xff] %v19097_v33  ;;  %v19100_v38 = vadd.f32 %v14412_v14, %v18562_v63  ;;  %v14415_v10 = vadd.f32 %v14414_v40, %v14413_v51  ;;  %v14085_v15 = vrot.slane %v11140_v30, 11  ;;  %v20958_v12 = vshrl.u32 %v18999_v48, 16 }
 0x6b8   : > { %v11137_v13 = vor.u32 %v11134_v35, %v20957_v26  ;;  %v20959_v63 = vshrl.u32 %v19010_v52, 16  ;;  %v20960_v40 = vcombine.high %v18958_v36, %v18932_v19  ;;  %v19123_v4 = vsel %vm18073_vm8, %v14084_v27, %v11128_v25 }
 0x6b9   : > { %8534 = vmatmul.mubr.bf16.gmra.mrb[180].mxu1 %v20956_v20  ;;  %v11147_v34 = vrot.slane %v20958_v12, 7  ;;  %v19116_v51 = vadd.f32 %v14415_v10, %v18568_v47  ;;  %20961 = vst [vmem:[#allocation76_spill] sm:$0xff] %v19123_v4  ;;  %v11162_v32 = vshrl.u32 %v10847_v37, 16  ;;  %v20962_v35 = vshrl.u32 %v19019_v22, 16 }
 0x6ba   : > { %v11156_v14 = vrot.slane %v20959_v63, 7  ;;  %8541 = vmatprep.mubr.bf16.mxu1 %v20960_v40  ;;  %v19129_v20 = vsel %vm18073_vm8, %v11130_v29, %v11137_v13  ;;  %v20964_v26 = vshll.u32 %v18999_v48, 16  ;;  %v20965_v12 = vshll.u32 %v19010_v52, 16 }
 0x6bb   : > { %v11169_v30 = vrot.slane %v20962_v35, 7  ;;  %20963 = vst [vmem:[#allocation77_spill] sm:$0xff] %v19129_v20  ;;  %v11152_v10 = vrot.slane %v11147_v34, 4  ;;  %v14416_v40 = vpop.f32.mrb[76].mxu1  ;;  %v20710_v44 = vshll.u32 %v19065_v16, 16  ;;  %v11178_v35 = vrot.slane %v20709_v8, 7 }
 0x6bc   : > { %v11150_v47 = vor.u32 %v11147_v34, %v20964_v26  ;;  %v11159_v63 = vor.u32 %v11156_v14, %v20965_v12  ;;  %v14417_v37 = vpop.f32.mrb[77].mxu1  ;;  %v14086_v14 = vrot.slane %v11162_v32, 11  ;;  %v8129_v25 = vsel %vm16813_vm2, %v18968_v43, %v18890_v56 }
 0x6bd   : > { %v11172_v29 = vor.u32 %v11169_v30, %v20708_v59  ;;  %v14418_v26 = vadd.f32 %v14417_v37, %v14416_v40  ;;  %v14419_v12 = vpop.f32.mrb[78].mxu1  ;;  %v11174_v32 = vrot.slane %v11169_v30, 4  ;;  %v13895_v43 = vcombine.high %v8129_v25, %v18978_v62  ;;  %v16380_v30 = vld [vmem:[#allocation2 + $0x68] sm:$0xff] }
 0x6be   : > { %v19144_v13 = vsel %vm18073_vm8, %v14085_v15, %v11150_v47  ;;  %v19148_v34 = vsel %vm18073_vm8, %v11152_v10, %v11159_v63  ;;  %v14420_v47 = vpop.f32.mrb[79].mxu1  ;;  %v8656_v10 = vshll.u32 %v18913_v55, 16  ;;  %v11181_v63 = vor.u32 %v11178_v35, %v20710_v44 }
 0x6bf   : > { %20966 = vst [vmem:[#allocation78_spill] sm:$0xff] %v19144_v13  ;;  %20967 = vst [vmem:[#allocation79_spill] sm:$0xff] %v19148_v34  ;;  %v19166_v37 = vadd.f32 %v14418_v26, %v18574_v2  ;;  %v14421_v56 = vadd.f32 %v14420_v47, %v14419_v12  ;;  %v8647_v27 = vshll.u32 %v18765_v1, 16  ;;  %v20968_v15 = vcombine.low %v18958_v36, %v18932_v19  ;;  %v8593_v12 = vld [vmem:[#allocation2 + $0x58] sm:$0x88] }
 0x6c0   : > { %v8658_v55 = vor.u32 %v8656_v10, %v18980_v9  ;;  %v8675_v41 = vshrl.u32 %v16380_v30, 16  ;;  %v19176_v35 = vsel %vm18073_vm8, %v14086_v14, %v11172_v29  ;;  %v19180_v2 = vsel %vm18073_vm8, %v11174_v32, %v11181_v63 }
 0x6c1   : > { %8542 = vmatmul.mubr.bf16.gmra.mrb[184].mxu1 %v20968_v15  ;;  %20969 = vst [vmem:[#allocation80_spill] sm:$0xff] %v19176_v35  ;;  %20970 = vst [vmem:[#allocation81_spill] sm:$0xff] %v19180_v2  ;;  %v19183_v26 = vadd.f32 %v14421_v56, %v18578_v24  ;;  %v20971_v36 = vshrl.u32 %v18760_v39, 16  ;;  %v8649_v29 = vor.u32 %v8647_v27, %v18972_v49  ;;  %v8651_v14 = vrot.slane %v18972_v49, 4  ;;  %v16381_v15 = vld [vmem:[#allocation2 + $0x60] sm:$0xff] }
 0x6c2   : > { %8549 = vmatprep.mubr.bf16.mxu1 %v13895_v43  ;;  %v8666_v47 = vshrl.u32 %v16381_v15, 16  ;;  %v8677_v63 = vrot.slane %v8675_v41, 7  ;;  %v8661_v40 = vshrl.u32 %v8593_v12, 16  ;;  %v13894_v39 = vcombine.low %v8129_v25, %v18978_v62  ;;  %v16382_v41 = vld [vmem:[#allocation2 + $0x90] sm:$0xff] }
 0x6c3   : > { %v13912_v9 = vrot.slane %v20971_v36, 11  ;;  %v14422_v10 = vpop.f32.mrb[80].mxu1  ;;  %v8659_v32 = vsel %vm18073_vm8, %v8651_v14, %v8658_v55  ;;  %v8678_v49 = vshll.u32 %v16380_v30, 16  ;;  %v8669_v44 = vshll.u32 %v16381_v15, 16 }
 0x6c4   : > { %v14423_v24 = vpop.f32.mrb[81].mxu1  ;;  %v8668_v36 = vrot.slane %v8666_v47, 7  ;;  %v8697_v14 = vshrl.u32 %v16382_v41, 16  ;;  %v13913_v62 = vrot.slane %v8661_v40, 11  ;;  %v16191_v40 = vld [vmem:[#allocation6 + $0x248] sm:$0xff]  }
 0x6c5   : > { %v14424_v56 = vadd.f32 %v14423_v24, %v14422_v10  ;;  %v14425_v43 = vpop.f32.mrb[82].mxu1  ;;  %v8650_v27 = vsel %vm18073_vm8, %v13912_v9, %v8649_v29  ;;  %v8680_v55 = vor.u32 %v8678_v49, %v8677_v63  ;;  %v8596_v9 = vld [vmem:[#allocation2 + $0x80] sm:$0x88]  ;;  %v16383_v29 = vld [vmem:[#allocation2 + $0x88] sm:$0xff] }
 0x6c6   : > { %v14426_v1 = vpop.f32.mrb[83].mxu1  ;;  %v13929_v8 = vcombine.high %v8650_v27, %v8659_v32  ;;  %v8671_v25 = vor.u32 %v8669_v44, %v8668_v36  ;;  %v8673_v10 = vrot.slane %v8668_v36, 4  ;;  %v8688_v30 = vshrl.u32 %v16383_v29, 16 }
 0x6c7   : > { %v19199_v19 = vadd.f32 %v14424_v56, %v18588_v42  ;;  %v14427_v59 = vadd.f32 %v14426_v1, %v14425_v43  ;;  %v8699_v24 = vrot.slane %v8697_v14, 7  ;;  %v16189_v56 = vld [vmem:[#allocation6 + $0x200] sm:$0xff]   ;;  %v8683_v43 = vshrl.u32 %v8596_v9, 16 }
 0x6c8   : > { %v8681_v1 = vsel %vm18073_vm8, %v8673_v10, %v8680_v55  ;;  %v8700_v44 = vshll.u32 %v16382_v41, 16  ;;  %v8691_v55 = vshll.u32 %v16383_v29, 16  ;;  %v16384_v10 = vld [vmem:[#allocation2 + $0xb8] sm:$0xff] }
 0x6c9   : > { %8550 = vmatmul.mubr.bf16.gmra.mrb[188].mxu1 %v13894_v39  ;;  %v19202_v12 = vadd.f32 %v14427_v59, %v18594_v5  ;;  %v13928_v39 = vcombine.low %v8650_v27, %v8659_v32  ;;  %v8690_v59 = vrot.slane %v8688_v30, 7  ;;  %v16193_v32 = vld [vmem:[#allocation6 + $0x208] sm:$0xff]   ;;  %v13914_v27 = vrot.slane %v8683_v43, 11  ;;  %v16195_v30 = vld [vmem:[#allocation6 + $0x250] sm:$0xff]  }
 0x6ca   : > { %9279 = vmatprep.mubr.bf16.mxu1 %v13929_v8  ;;  %v8672_v8 = vsel %vm18073_vm8, %v13913_v62, %v8671_v25  ;;  %v8702_v14 = vor.u32 %v8700_v44, %v8699_v24  ;;  %v16385_v25 = vld [vmem:[#allocation2 + $0xb0] sm:$0xff] }
 0x6cb   : > { %v14428_v47 = vpop.f32.mrb[84].mxu1  ;;  %v13931_v57 = vcombine.high %v8672_v8, %v8681_v1  ;;  %v8693_v62 = vor.u32 %v8691_v55, %v8690_v59  ;;  %v8695_v41 = vrot.slane %v8690_v59, 4 }
 0x6cc   : > { %v14429_v42 = vpop.f32.mrb[85].mxu1 }
 0x6cd   : > { %v14430_v15 = vadd.f32 %v14429_v42, %v14428_v47  ;;  %v14431_v63 = vpop.f32.mrb[86].mxu1  ;;  %v8719_v47 = vshrl.u32 %v16384_v10, 16  ;;  %v8703_v29 = vsel %vm18073_vm8, %v8695_v41, %v8702_v14  ;;  %v8694_v43 = vsel %vm18073_vm8, %v13914_v27, %v8693_v62  ;;  %v16201_v27 = vld [vmem:[#allocation6 + $0x218] sm:$0xff]  }
 0x6ce   : > { %v14432_v5 = vpop.f32.mrb[87].mxu1  ;;  %v13933_v14 = vcombine.high %v8694_v43, %v8703_v29 }
 0x6cf   : > { %v19209_v36 = vadd.f32 %v14430_v15, %v18606_v7  ;;  %v14433_v49 = vadd.f32 %v14432_v5, %v14431_v63  ;;  %v8710_v7 = vshrl.u32 %v16385_v25, 16  ;;  %v8599_v15 = vld [vmem:[#allocation2 + $0xa8] sm:$0x88]  ;;  %v8721_v24 = vrot.slane %v8719_v47, 7 }
 0x6d0   : > { %v13930_v5 = vcombine.low %v8672_v8, %v8681_v1  ;;  %v8705_v59 = vshrl.u32 %v8599_v15, 16  ;;  %v8713_v47 = vshll.u32 %v16385_v25, 16  ;;  %v16386_v1 = vld [vmem:[#allocation2 + $0xe0] sm:$0xff]  ;;  %v16203_v15 = vld [vmem:[#allocation6 + $0x260] sm:$0xff]  }
 0x6d1   : > { %9280 = vmatmul.mubr.bf16.vlgmr.msra.gmra.mrb[192].mxu1 %v13928_v39  ;;  %v19212_v9 = vadd.f32 %v14433_v49, %v18612_v45  ;;  %v8712_v44 = vrot.slane %v8710_v7, 7  ;;  %v16199_v49 = vld [vmem:[#allocation6 + $0x258] sm:$0xff]   ;;  %v8741_v8 = vshrl.u32 %v16386_v1, 16 }
 0x6d2   : > { %9287 = vmatprep.mubr.bf16.mxu1 %v13931_v57  ;;  %14719 = vmatpush3.bf16.msra.mxu1 %v16189_v56  ;;  %v16197_v57 = vld [vmem:[#allocation6 + $0x210] sm:$0xff]   ;;  %v13915_v62 = vrot.slane %v8705_v59, 11 }
 0x6d3   : > { %14720 = vmatprep.subr.bf16.mxu1 %v16191_v40  ;;  %v14434_v42 = vpop.f32.mrb[88].mxu1  ;;  %v8722_v40 = vshll.u32 %v16384_v10, 16  ;;  %v8715_v10 = vor.u32 %v8713_v47, %v8712_v44  ;;  %v8717_v7 = vrot.slane %v8712_v44, 4 }
 0x6d4   : > { %v14435_v63 = vpop.f32.mrb[89].mxu1 }
 0x6d5   : > { %v14436_v39 = vadd.f32 %v14435_v63, %v14434_v42  ;;  %v14437_v45 = vpop.f32.mrb[90].mxu1  ;;  %v8724_v41 = vor.u32 %v8722_v40, %v8721_v24  ;;  %v16387_v42 = vld [vmem:[#allocation2 + $0xd8] sm:$0xff]  ;;  %v8743_v24 = vrot.slane %v8741_v8, 7  ;;  %v8716_v59 = vsel %vm18073_vm8, %v13915_v62, %v8715_v10 }
 0x6d6   : > { %14721 = vmatpush3.bf16.msra.mxu1 %v16193_v32  ;;  %v14438_v56 = vpop.f32.mrb[91].mxu1  ;;  %v8744_v40 = vshll.u32 %v16386_v1, 16  ;;  %v8735_v8 = vshll.u32 %v16387_v42, 16  ;;  %v8605_v10 = vld [vmem:[#allocation2 + $0xf8] sm:$0x88] }
 0x6d7   : > { %14722 = vmatprep.subr.bf16.mxu1 %v16195_v30  ;;  %v19219_v55 = vadd.f32 %v14436_v39, %v18627_v11  ;;  %v14439_v21 = vadd.f32 %v14438_v56, %v14437_v45  ;;  %v8602_v30 = vld [vmem:[#allocation2 + $0xd0] sm:$0x88]  ;;  %v8732_v11 = vshrl.u32 %v16387_v42, 16  ;;  %v8725_v25 = vsel %vm18073_vm8, %v8717_v7, %v8724_v41 }
 0x6d8   : > { %v13932_v56 = vcombine.low %v8694_v43, %v8703_v29  ;;  %v13935_v41 = vcombine.high %v8716_v59, %v8725_v25  ;;  %v8746_v7 = vor.u32 %v8744_v40, %v8743_v24  ;;  %v16209_v29 = vld [vmem:[#allocation6 + $0x228] sm:$0xff]   ;;  %v8749_v40 = vshrl.u32 %v8605_v10, 16  ;;  %v16390_v10 = vld [vmem:[#allocation2 + $0x130] sm:$0xff] }
 0x6d9   : > { %9288 = vmatmul.mubr.bf16.gmra.mrb[196].mxu1 %v13930_v5  ;;  %v19222_v32 = vadd.f32 %v14439_v21, %v18632_v6  ;;  %v8727_v21 = vshrl.u32 %v8602_v30, 16  ;;  %v16205_v5 = vld [vmem:[#allocation6 + $0x220] sm:$0xff]   ;;  %v8734_v44 = vrot.slane %v8732_v11, 7  ;;  %v16388_v30 = vld [vmem:[#allocation2 + $0x108] sm:$0xff]  ;;  %v16389_v11 = vld [vmem:[#allocation2 + $0x100] sm:$0xff] }
 0x6da   : > { %9295 = vmatprep.mubr.bf16.mxu1 %v13933_v14  ;;  %14723 = vmatpush3.bf16.msra.mxu1 %v16197_v57 }
 0x6db   : > { %14724 = vmatprep.subr.bf16.mxu1 %v16199_v49  ;;  %v14440_v63 = vpop.f32.mrb[92].mxu1  ;;  %v16207_v49 = vld [vmem:[#allocation6 + $0x268] sm:$0xff]   ;;  %v13916_v43 = vrot.slane %v8727_v21, 11  ;;  %v8737_v1 = vor.u32 %v8735_v8, %v8734_v44  ;;  %v8739_v62 = vrot.slane %v8734_v44, 4  ;;  %v13934_v21 = vcombine.low %v8716_v59, %v8725_v25  ;;  %v16217_v25 = vld [vmem:[#allocation6 + $0x238] sm:$0xff]  }
 0x6dc   : > { %v14441_v39 = vpop.f32.mrb[93].mxu1  ;;  %v8766_v8 = vshll.u32 %v16388_v30, 16  ;;  %v13917_v59 = vrot.slane %v8749_v40, 11 }
 0x6dd   : > { %v14442_v45 = vadd.f32 %v14441_v39, %v14440_v63  ;;  %v14443_v6 = vpop.f32.mrb[94].mxu1  ;;  %v20972_v63 = vld [vmem:[#allocation15_spill] sm:$0xff]  ;;  %v8747_v42 = vsel %vm18073_vm8, %v8739_v62, %v8746_v7  ;;  %v8738_v44 = vsel %vm18073_vm8, %v13916_v43, %v8737_v1 }
 0x6de   : > { %14725 = vmatpush3.bf16.msra.mxu1 %v16201_v27  ;;  %v14444_v57 = vpop.f32.mrb[95].mxu1  ;;  %v8763_v27 = vshrl.u32 %v16388_v30, 16  ;;  %v13937_v7 = vcombine.high %v8738_v44, %v8747_v42  ;;  %v16391_v1 = vld [vmem:[#allocation2 + $0x128] sm:$0xff] }
 0x6df   : > { %14726 = vmatprep.subr.bf16.mxu1 %v16203_v15  ;;  %v19229_v14 = vadd.f32 %v14442_v45, %v18648_v3  ;;  %v14445_v47 = vadd.f32 %v14444_v57, %v14443_v6  ;;  %v8754_v3 = vshrl.u32 %v16389_v11, 16  ;;  %v16211_v15 = vld [vmem:[#allocation6 + $0x270] sm:$0xff]  }
 0x6e0   : > { %v8765_v24 = vrot.slane %v8763_v27, 7  ;;  %v8757_v27 = vshll.u32 %v16389_v11, 16 }
 0x6e1   : > { %9296 = vmatmul.mubr.bf16.gmra.mrb[200].mxu1 %v13932_v56  ;;  %v19232_v39 = vadd.f32 %v14445_v47, %v20972_v63  ;;  %v20973_v63 = vld [vmem:[#allocation16_spill] sm:$0xff] }
 0x6e2   : > { %9303 = vmatprep.mubr.bf16.mxu1 %v13935_v41  ;;  %14727 = vmatpush3.bf16.msra.mxu1 %v16205_v5  ;;  %v16213_v5 = vld [vmem:[#allocation6 + $0x230] sm:$0xff]   ;;  %v8756_v41 = vrot.slane %v8754_v3, 7  ;;  %v8768_v62 = vor.u32 %v8766_v8, %v8765_v24  ;;  %v8776_v3 = vshrl.u32 %v16391_v1, 16  ;;  %v13936_v8 = vcombine.low %v8738_v44, %v8747_v42  ;;  %v20976_v42 = vld [vmem:[#allocation12_spill] sm:$0xff] }
 0x6e3   : > { %14728 = vmatprep.subr.bf16.mxu1 %v16207_v49  ;;  %v14446_v45 = vpop.f32.mrb[96].mxu1  ;;  %v16215_v49 = vld [vmem:[#allocation6 + $0x278] sm:$0xff]  }
 0x6e4   : > { %v14447_v6 = vpop.f32.mrb[97].mxu1  ;;  %v8759_v30 = vor.u32 %v8757_v27, %v8756_v41  ;;  %v8761_v43 = vrot.slane %v8756_v41, 4 }
 0x6e5   : > { %v14448_v57 = vadd.f32 %v14447_v6, %v14446_v45  ;;  %v14449_v56 = vpop.f32.mrb[98].mxu1  ;;  %v20974_v45 = vld [vmem:[#allocation43_spill] sm:$0xff] }
 0x6e6   : > { %14729 = vmatpush3.bf16.msra.mxu1 %v16209_v29  ;;  %v14450_v47 = vpop.f32.mrb[99].mxu1  ;;  %v8785_v29 = vshrl.u32 %v16390_v10, 16  ;;  %v8769_v11 = vsel %vm18073_vm8, %v8761_v43, %v8768_v62  ;;  %v8760_v40 = vsel %vm18073_vm8, %v13917_v59, %v8759_v30  ;;  %v8779_v62 = vshll.u32 %v16391_v1, 16  ;;  %v16392_v43 = vld [vmem:[#allocation2 + $0x158] sm:$0xff] }
 0x6e7   : > { %14730 = vmatprep.subr.bf16.mxu1 %v16211_v15  ;;  %v19239_v2 = vadd.f32 %v14448_v57, %v20973_v63  ;;  %v14451_v35 = vadd.f32 %v14450_v47, %v14449_v56  ;;  %v16219_v15 = vld [vmem:[#allocation6 + $0x2c0] sm:$0xff]   ;;  %v8608_v56 = vld [vmem:[#allocation2 + $0x120] sm:$0x88]  ;;  %v8778_v63 = vrot.slane %v8776_v3, 7  ;;  %v13939_v34 = vcombine.high %v8760_v40, %v8769_v11  ;;  %v8611_v3 = vld [vmem:[#allocation2 + $0x148] sm:$0x88] }
 0x6e8   : > { %v8787_v24 = vrot.slane %v8785_v29, 7  ;;  %v8771_v41 = vshrl.u32 %v8608_v56, 16 }
 0x6e9   : > { %9304 = vmatmul.mubr.bf16.gmra.mrb[204].mxu1 %v13934_v21  ;;  %v19242_v6 = vadd.f32 %v14451_v35, %v20974_v45  ;;  %v8781_v59 = vor.u32 %v8779_v62, %v8778_v63  ;;  %v8783_v30 = vrot.slane %v8778_v63, 4  ;;  %v20977_v63 = vld [vmem:[#allocation18_spill] sm:$0xff] }
 0x6ea   : > { %9311 = vmatprep.mubr.bf16.mxu1 %v13937_v7  ;;  %14731 = vmatpush3.bf16.msra.mxu1 %v16213_v5  ;;  %v8788_v7 = vshll.u32 %v16390_v10, 16  ;;  %v16393_v10 = vld [vmem:[#allocation2 + $0x150] sm:$0xff] }
 0x6eb   : > { %14732 = vmatprep.subr.bf16.mxu1 %v16215_v49  ;;  %v14452_v57 = vpop.f32.mrb[100].mxu1  ;;  %v20975_v49 = vld [vmem:[#allocation17_spill] sm:$0xff]  ;;  %v8801_v13 = vshll.u32 %v16393_v10, 16 }
 0x6ec   : > { %v14453_v47 = vpop.f32.mrb[101].mxu1  ;;  %v8790_v29 = vor.u32 %v8788_v7, %v8787_v24  ;;  %v13938_v7 = vcombine.low %v8760_v40, %v8769_v11 }
 0x6ed   : > { %v14454_v21 = vadd.f32 %v14453_v47, %v14452_v57  ;;  %v14455_v35 = vpop.f32.mrb[102].mxu1  ;;  %v8807_v57 = vshrl.u32 %v16392_v43, 16 }
 0x6ee   : > { %14733 = vmatpush3.bf16.msra.mxu1 %v16217_v25  ;;  %v14456_v5 = vpop.f32.mrb[103].mxu1  ;;  %v13918_v25 = vrot.slane %v8771_v41, 11 }
 0x6ef   : > { %14830 = vmatprep.subr.bf16.mxu1 %v16219_v15  ;;  %v19249_v27 = vadd.f32 %v14454_v21, %v20975_v49  ;;  %v14457_v45 = vadd.f32 %v14456_v5, %v14455_v35  ;;  %v8798_v15 = vshrl.u32 %v16393_v10, 16  ;;  %v8791_v21 = vsel %vm18073_vm8, %v8783_v30, %v8790_v29  ;;  %v16394_v29 = vld [vmem:[#allocation2 + $0x180] sm:$0xff]  ;;  %v20978_v30 = vld [vmem:[#allocation19_spill] sm:$0xff] }
 0x6f0   : > { %v8809_v35 = vrot.slane %v8807_v57, 7  ;;  %v8810_v49 = vshll.u32 %v16392_v43, 16  ;;  %v8829_v57 = vshrl.u32 %v16394_v29, 16 }
 0x6f1   : > { %9312 = vmatmul.mubr.bf16.gmra.mrb[208].mxu1 %v13936_v8  ;;  %v19252_v44 = vadd.f32 %v14457_v45, %v20976_v42  ;;  %v8793_v8 = vshrl.u32 %v8611_v3, 16  ;;  %v8800_v41 = vrot.slane %v8798_v15, 7 }
 0x6f2   : > { %9319 = vmatprep.mubr.bf16.mxu1 %v13939_v34  ;;  %v8782_v34 = vsel %vm18073_vm8, %v13918_v25, %v8781_v59  ;;  %v8812_v20 = vor.u32 %v8810_v49, %v8809_v35  ;;  %v8614_v25 = vld [vmem:[#allocation2 + $0x170] sm:$0x88]  ;;  %v16395_v59 = vld [vmem:[#allocation2 + $0x178] sm:$0xff] }
 0x6f3   : > { %v14458_v56 = vpop.f32.mrb[104].mxu1  ;;  %v13941_v42 = vcombine.high %v8782_v34, %v8791_v21  ;;  %v13919_v11 = vrot.slane %v8793_v8, 11  ;;  %v8803_v40 = vor.u32 %v8801_v13, %v8800_v41  ;;  %v8805_v3 = vrot.slane %v8800_v41, 4  ;;  %v20979_v41 = vld [vmem:[#allocation22_spill] sm:$0xff] }
 0x6f4   : > { %v14459_v47 = vpop.f32.mrb[105].mxu1  ;;  %v8820_v43 = vshrl.u32 %v16395_v59, 16  ;;  %v13940_v49 = vcombine.low %v8782_v34, %v8791_v21  ;;  %v8832_v13 = vshll.u32 %v16394_v29, 16  ;;  %v8823_v4 = vshll.u32 %v16395_v59, 16  ;;  %v8617_v34 = vld [vmem:[#allocation2 + $0x198] sm:$0x88] }
 0x6f5   : > { %v14460_v1 = vadd.f32 %v14459_v47, %v14458_v56  ;;  %v14461_v24 = vpop.f32.mrb[106].mxu1  ;;  %v8837_v59 = vshrl.u32 %v8617_v34, 16  ;;  %v20986_v34 = vld [vmem:[#allocation28_spill] sm:$0xff] }
 0x6f6   : > { %v14462_v5 = vpop.f32.mrb[107].mxu1  ;;  %v8822_v8 = vrot.slane %v8820_v43, 7 }
 0x6f7   : > { %v19259_v45 = vadd.f32 %v14460_v1, %v20977_v63  ;;  %v14463_v62 = vadd.f32 %v14462_v5, %v14461_v24  ;;  %v8813_v1 = vsel %vm18073_vm8, %v8805_v3, %v8812_v20  ;;  %v8831_v24 = vrot.slane %v8829_v57, 7  ;;  %v20980_v20 = vld [vmem:[#allocation23_spill] sm:$0xff] }
 0x6f8   : > { %v8815_v5 = vshrl.u32 %v8614_v25, 16  ;;  %v8804_v63 = vsel %vm18073_vm8, %v13919_v11, %v8803_v40  ;;  %v8825_v25 = vor.u32 %v8823_v4, %v8822_v8  ;;  %v8827_v21 = vrot.slane %v8822_v8, 4  ;;  %v20981_v40 = vld [vmem:[#allocation20_spill] sm:$0xff] }
 0x6f9   : > { %9320 = vmatmul.mubr.bf16.gmra.mrb[212].mxu1 %v13938_v7  ;;  %v19262_v56 = vadd.f32 %v14463_v62, %v20978_v30  ;;  %v13943_v30 = vcombine.high %v8804_v63, %v8813_v1  ;;  %v8834_v33 = vor.u32 %v8832_v13, %v8831_v24  ;;  %v20982_v43 = vshrl.u32 %v20981_v40, 16  ;;  %v19282_v13 = vld [vmem:[#allocation2 + $0x1a8] sm:$0xff]  ;;  %v8620_v40 = vld [vmem:[#allocation2 + $0x1c0] sm:$0x88] }
 0x6fa   : > { %9327 = vmatprep.mubr.bf16.mxu1 %v13941_v42  ;;  %v13920_v3 = vrot.slane %v8815_v5, 11  ;;  %v20983_v5 = vld [vmem:[#allocation21_spill] sm:$0xff] }
 0x6fb   : > { %v14464_v15 = vpop.f32.mrb[108].mxu1  ;;  %v8835_v29 = vsel %vm18073_vm8, %v8827_v21, %v8834_v33  ;;  %v20984_v4 = vshrl.u32 %v20983_v5, 16 }
 0x6fc   : > { %v14465_v47 = vpop.f32.mrb[109].mxu1 }
 0x6fd   : > { %v14466_v10 = vadd.f32 %v14465_v47, %v14464_v15  ;;  %v14467_v35 = vpop.f32.mrb[110].mxu1  ;;  %v8853_v47 = vrot.slane %v20982_v43, 7  ;;  %v8844_v8 = vrot.slane %v20984_v4, 7 }
 0x6fe   : > { %v14468_v7 = vpop.f32.mrb[111].mxu1 }
 0x6ff   : > { %v19269_v62 = vadd.f32 %v14466_v10, %v20979_v41  ;;  %v14469_v42 = vadd.f32 %v14468_v7, %v14467_v35  ;;  %v13942_v7 = vcombine.low %v8804_v63, %v8813_v1  ;;  %v8854_v41 = vshll.u32 %v19282_v13, 16 }
 0x700   : > { %v13921_v1 = vrot.slane %v8837_v59, 11  ;;  %v20987_v63 = vshll.u32 %v20983_v5, 16  ;;  %v20990_v5 = vld [vmem:[#allocation31_spill] sm:$0xff] }
 0x701   : > { %9328 = vmatmul.mubr.bf16.gmra.mrb[216].mxu1 %v13940_v49  ;;  %v19272_v57 = vadd.f32 %v14469_v42, %v20980_v20  ;;  %v8826_v49 = vsel %vm18073_vm8, %v13920_v3, %v8825_v25  ;;  %v20985_v42 = vld [vmem:[#allocation25_spill] sm:$0xff]  ;;  %v8856_v21 = vor.u32 %v8854_v41, %v8853_v47  ;;  %v8849_v25 = vrot.slane %v8844_v8, 4 }
 0x702   : > { %9335 = vmatprep.mubr.bf16.mxu1 %v13943_v30  ;;  %v13945_v20 = vcombine.high %v8826_v49, %v8835_v29  ;;  %v8847_v3 = vor.u32 %v8844_v8, %v20987_v63  ;;  %v8859_v41 = vshrl.u32 %v8620_v40, 16  ;;  %v20991_v63 = vld [vmem:[#allocation32_spill] sm:$0xff] }
 0x703   : > { %v14470_v15 = vpop.f32.mrb[112].mxu1  ;;  %v20993_v40 = vld [vmem:[#allocation60_spill] sm:$0xff] }
 0x704   : > { %v14471_v11 = vpop.f32.mrb[113].mxu1  ;;  %v8848_v47 = vsel %vm18073_vm8, %v13921_v1, %v8847_v3  ;;  %v8623_v3 = vld [vmem:[#allocation2 + $0x1e8] sm:$0x88] }
 0x705   : > { %v14472_v10 = vadd.f32 %v14471_v11, %v14470_v15  ;;  %v14473_v35 = vpop.f32.mrb[114].mxu1 }
 0x706   : > { %v14474_v24 = vpop.f32.mrb[115].mxu1 }
 0x707   : > { %v19286_v33 = vadd.f32 %v14472_v10, %v20985_v42  ;;  %v14475_v30 = vadd.f32 %v14474_v24, %v14473_v35  ;;  %v8857_v10 = vsel %vm18073_vm8, %v8849_v25, %v8856_v21  ;;  %v20988_v42 = vld [vmem:[#allocation24_spill] sm:$0xff]  ;;  %v13922_v21 = vrot.slane %v8859_v41, 11 }
 0x708   : > { %v20989_v59 = vshrl.u32 %v20988_v42, 16 }
 0x709   : > { %9336 = vmatmul.mubr.bf16.gmra.mrb[220].mxu1 %v13942_v7  ;;  %v19289_v15 = vadd.f32 %v14475_v30, %v20986_v34  ;;  %v13944_v7 = vcombine.low %v8826_v49, %v8835_v29  ;;  %v13947_v34 = vcombine.high %v8848_v47, %v8857_v10  ;;  %v20992_v29 = vshll.u32 %v20988_v42, 16 }
 0x70a   : > { %9343 = vmatprep.mubr.bf16.mxu1 %v13945_v20  ;;  %v8866_v30 = vrot.slane %v20989_v59, 7  ;;  %v8881_v42 = vshrl.u32 %v8623_v3, 16 }
 0x70b   : > { %v14476_v11 = vpop.f32.mrb[116].mxu1 }
 0x70c   : > { %v14477_v43 = vpop.f32.mrb[117].mxu1  ;;  %v8869_v49 = vor.u32 %v8866_v30, %v20992_v29  ;;  %v8871_v25 = vrot.slane %v8866_v30, 4  ;;  %v20998_v29 = vld [vmem:[#allocation33_spill] sm:$0xff] }
 0x70d   : > { %v14478_v4 = vadd.f32 %v14477_v43, %v14476_v11  ;;  %v14479_v35 = vpop.f32.mrb[118].mxu1 }
 0x70e   : > { %v14480_v24 = vpop.f32.mrb[119].mxu1  ;;  %v8879_v43 = vsel %vm18073_vm8, %v8871_v25, %v20993_v40  ;;  %v8870_v41 = vsel %vm18073_vm8, %v13922_v21, %v8869_v49 }
 0x70f   : > { %v19300_v20 = vadd.f32 %v14478_v4, %v20990_v5  ;;  %v14481_v8 = vadd.f32 %v14480_v24, %v14479_v35  ;;  %v20994_v4 = vld [vmem:[#allocation29_spill] sm:$0xff]  ;;  %v13949_v16 = vcombine.high %v8870_v41, %v8879_v43 }
 0x710   : > { %v20995_v35 = vshrl.u32 %v20994_v4, 16  ;;  %v20999_v25 = vshll.u32 %v20994_v4, 16 }
 0x711   : > { %9344 = vmatmul.mubr.bf16.gmra.mrb[224].mxu1 %v13944_v7  ;;  %v19303_v0 = vadd.f32 %v14481_v8, %v20991_v63  ;;  %v13946_v8 = vcombine.low %v8848_v47, %v8857_v10  ;;  %v13923_v10 = vrot.slane %v8881_v42, 11 }
 0x712   : > { %9351 = vmatprep.mubr.bf16.mxu1 %v13947_v34  ;;  %v8897_v24 = vrot.slane %v20995_v35, 7  ;;  %v20996_v34 = vld [vmem:[#allocation26_spill] sm:$0xff] }
 0x713   : > { %v14482_v1 = vpop.f32.mrb[120].mxu1  ;;  %v20997_v30 = vshrl.u32 %v20996_v34, 16  ;;  %v21001_v47 = vshll.u32 %v20996_v34, 16  ;;  %v21003_v34 = vld [vmem:[#allocation36_spill] sm:$0xff] }
 0x714   : > { %v14483_v11 = vpop.f32.mrb[121].mxu1  ;;  %v8900_v40 = vor.u32 %v8897_v24, %v20999_v25 }
 0x715   : > { %v14484_v7 = vadd.f32 %v14483_v11, %v14482_v1  ;;  %v14485_v59 = vpop.f32.mrb[122].mxu1  ;;  %v8888_v63 = vrot.slane %v20997_v30, 7  ;;  %v21000_v1 = vld [vmem:[#allocation34_spill] sm:$0xff]  ;;  %v13948_v30 = vcombine.low %v8870_v41, %v8879_v43  ;;  %v21004_v43 = vld [vmem:[#allocation39_spill] sm:$0xff] }
 0x716   : > { %v14486_v5 = vpop.f32.mrb[123].mxu1 }
 0x717   : > { %v19317_v31 = vadd.f32 %v14484_v7, %v20998_v29  ;;  %v14487_v22 = vadd.f32 %v14486_v5, %v14485_v59  ;;  %v8891_v21 = vor.u32 %v8888_v63, %v21001_v47  ;;  %v8893_v49 = vrot.slane %v8888_v63, 4 }
 0x719   : > { %9352 = vmatmul.mubr.bf16.gmra.mrb[228].mxu1 %v13946_v8  ;;  %v19322_v11 = vadd.f32 %v14487_v22, %v21000_v1  ;;  %v8901_v7 = vsel %vm18073_vm8, %v8893_v49, %v8900_v40  ;;  %v8892_v4 = vsel %vm18073_vm8, %v13923_v10, %v8891_v21  ;;  %v21002_v22 = vld [vmem:[#allocation35_spill] sm:$0xff]  ;;  %v21005_v21 = vld [vmem:[#allocation14_spill] sm:$0xff] }
 0x71a   : > { %9359 = vmatprep.mubr.bf16.mxu1 %v13949_v16  ;;  %v13951_v42 = vcombine.high %v8892_v4, %v8901_v7  ;;  %v13950_v49 = vcombine.low %v8892_v4, %v8901_v7 }
 0x71b   : > { %v14488_v3 = vpop.f32.mrb[124].mxu1 }
 0x71c   : > { %v14489_v35 = vpop.f32.mrb[125].mxu1 }
 0x71d   : > { %v14490_v59 = vadd.f32 %v14489_v35, %v14488_v3  ;;  %v14491_v5 = vpop.f32.mrb[126].mxu1  ;;  %v21006_v35 = vld [vmem:[#allocation61_spill] sm:$0xff] }
 0x71e   : > { %v14492_v8 = vpop.f32.mrb[127].mxu1 }
 0x71f   : > { %v19331_v24 = vadd.f32 %v14490_v59, %v21002_v22  ;;  %v14493_v16 = vadd.f32 %v14492_v8, %v14491_v5  ;;  %v21007_v59 = vld [vmem:[#allocation62_spill] sm:$0xff] }
 0x720   : > { %v21008_v5 = vcombine.high %v21006_v35, %v21007_v59  ;;  %v21009_v4 = vcombine.low %v21006_v35, %v21007_v59 }
 0x721   : > { %9360 = vmatmul.mubr.bf16.gmra.mrb[232].mxu1 %v13948_v30  ;;  %v19334_v63 = vadd.f32 %v14493_v16, %v21003_v34 }
 0x722   : > { %9367 = vmatprep.mubr.bf16.mxu1 %v13951_v42 }
 0x723   : > { %v14510_v29 = vpop.f32.mrb[128].mxu1 }
 0x724   : > { %v14511_v25 = vpop.f32.mrb[129].mxu1 }
 0x725   : > { %v14512_v40 = vadd.f32 %v14511_v25, %v14510_v29  ;;  %v14513_v1 = vpop.f32.mrb[130].mxu1  ;;  %v16397_v29 = vld [vmem:[#allocation2 + $0x298] sm:$0xff] }
 0x726   : > { %v14514_v47 = vpop.f32.mrb[131].mxu1  ;;  %v8983_v25 = vshrl.u32 %v16397_v29, 16 }
 0x727   : > { %v19337_v41 = vadd.f32 %v14512_v40, %v21004_v43  ;;  %v14515_v10 = vadd.f32 %v14514_v47, %v14513_v1  ;;  %v21010_v1 = vld [vmem:[#allocation63_spill] sm:$0xff]  ;;  %v21011_v47 = vld [vmem:[#allocation64_spill] sm:$0xff] }
 0x728   : > { %v16398_v43 = vld [vmem:[#allocation2 + $0x290] sm:$0xff] }
 0x729   : > { %9368 = vmatmul.mubr.bf16.gmra.mrb[236].mxu1 %v13950_v49  ;;  %v19340_v3 = vadd.f32 %v14515_v10, %v21005_v21  ;;  %v21012_v49 = vcombine.high %v21010_v1, %v21011_v47  ;;  %v8974_v10 = vshrl.u32 %v16398_v43, 16 }
 0x72a   : > { %9375 = vmatprep.mubr.bf16.mxu1 %v21008_v5  ;;  %v8635_v5 = vld [vmem:[#allocation2 + $0x288] sm:$0x88] }
 0x72b   : > { %v14516_v8 = vpop.f32.mrb[132].mxu1  ;;  %v8969_v35 = vshrl.u32 %v8635_v5, 16  ;;  %v8976_v59 = vrot.slane %v8974_v10, 7 }
 0x72c   : > { %v14517_v30 = vpop.f32.mrb[133].mxu1 }
 0x72d   : > { %v14518_v22 = vadd.f32 %v14517_v30, %v14516_v8  ;;  %v14519_v16 = vpop.f32.mrb[134].mxu1  ;;  %v8985_v8 = vrot.slane %v8983_v25, 7  ;;  %v21014_v25 = vld [vmem:[#allocation67_spill] sm:$0xff]  ;;  %v13927_v5 = vrot.slane %v8969_v35, 11 }
 0x72e   : > { %v14520_v42 = vpop.f32.mrb[135].mxu1 }
 0x72f   : > { %v19346_v34 = vadd.f32 %v14518_v22, %v19036_v53  ;;  %v14521_v7 = vadd.f32 %v14520_v42, %v14519_v16  ;;  %v8986_v42 = vshll.u32 %v16397_v29, 16  ;;  %v8981_v29 = vrot.slane %v8976_v59, 4 }
 0x731   : > { %9376 = vmatmul.mubr.bf16.gmra.mrb[240].mxu1 %v21009_v4  ;;  %v19352_v40 = vadd.f32 %v14521_v7, %v19056_v28  ;;  %v21013_v7 = vcombine.low %v21010_v1, %v21011_v47  ;;  %v8988_v48 = vor.u32 %v8986_v42, %v8985_v8 }
 0x732   : > { %9383 = vmatprep.mubr.bf16.mxu1 %v21012_v49  ;;  %v8977_v49 = vshll.u32 %v16398_v43, 16 }
 0x733   : > { %v14522_v21 = vpop.f32.mrb[136].mxu1 }
 0x734   : > { %v14523_v53 = vpop.f32.mrb[137].mxu1  ;;  %v8979_v10 = vor.u32 %v8977_v49, %v8976_v59 }
 0x735   : > { %v14524_v30 = vadd.f32 %v14523_v53, %v14522_v21  ;;  %v14525_v22 = vpop.f32.mrb[138].mxu1  ;;  %v21015_v21 = vld [vmem:[#allocation68_spill] sm:$0xff] }
 0x736   : > { %v14526_v16 = vpop.f32.mrb[139].mxu1  ;;  %v21016_v53 = vcombine.high %v21014_v25, %v21015_v21  ;;  %v8980_v43 = vsel %vm18073_vm8, %v13927_v5, %v8979_v10  ;;  %v21017_v35 = vcombine.low %v21014_v25, %v21015_v21  ;;  %v16399_v5 = vld [vmem:[#allocation2 + $0x38] sm:$0xff]  ;;  %v16400_v10 = vld [vmem:[#allocation2 + $0x40] sm:$0xff] }
 0x737   : > { %v19358_v4 = vadd.f32 %v14524_v30, %v19100_v38  ;;  %v14527_v28 = vadd.f32 %v14526_v16, %v14525_v22  ;;  %v8989_v30 = vsel %vm18073_vm8, %v8981_v29, %v8988_v48  ;;  %v13977_v29 = vcombine.high %v16399_v5, %v16400_v10 }
 0x738   : > { %v13959_v16 = vcombine.high %v8980_v43, %v8989_v30  ;;  %v13958_v49 = vcombine.low %v8980_v43, %v8989_v30  ;;  %v16223_v30 = vld [vmem:[#allocation6 + $0x2c8] sm:$0xff]  }
 0x739   : > { %9384 = vmatmul.mubr.bf16.gmra.mrb[244].mxu1 %v21013_v7  ;;  %v19364_v52 = vadd.f32 %v14527_v28, %v19116_v51 }
 0x73a   : > { %9391 = vmatprep.mubr.bf16.mxu1 %v21016_v53 }
 0x73b   : > { %v14528_v46 = vpop.f32.mrb[140].mxu1 }
 0x73c   : > { %v14529_v38 = vpop.f32.mrb[141].mxu1 }
 0x73d   : > { %v14530_v22 = vadd.f32 %v14529_v38, %v14528_v46  ;;  %v14531_v1 = vpop.f32.mrb[142].mxu1 }
 0x73e   : > { %v14532_v47 = vpop.f32.mrb[143].mxu1 }
 0x73f   : > { %v19374_v51 = vadd.f32 %v14530_v22, %v19166_v37  ;;  %v14533_v8 = vadd.f32 %v14532_v47, %v14531_v1  ;;  %v16221_v1 = vld [vmem:[#allocation6 + $0x280] sm:$0xff]   ;;  %v13976_v47 = vcombine.low %v16399_v5, %v16400_v10  ;;  %v16231_v10 = vld [vmem:[#allocation6 + $0x2d8] sm:$0xff]  }
 0x741   : > { %9392 = vmatmul.mubr.bf16.gmra.mrb[248].mxu1 %v21017_v35  ;;  %v19380_v59 = vadd.f32 %v14533_v8, %v19183_v26  ;;  %v21018_v35 = vld [vmem:[#allocation45_spill] sm:$0xff] }
 0x742   : > { %9399 = vmatprep.mubr.bf16.mxu1 %v13959_v16 }
 0x743   : > { %v14534_v48 = vpop.f32.mrb[144].mxu1 }
 0x744   : > { %v14535_v46 = vpop.f32.mrb[145].mxu1 }
 0x745   : > { %v14536_v42 = vadd.f32 %v14535_v46, %v14534_v48  ;;  %v14537_v28 = vpop.f32.mrb[146].mxu1  ;;  %v16225_v46 = vld [vmem:[#allocation6 + $0x288] sm:$0xff]  }
 0x746   : > { %v14538_v7 = vpop.f32.mrb[147].mxu1 }
 0x747   : > { %v19383_v53 = vadd.f32 %v14536_v42, %v19199_v19  ;;  %v14539_v37 = vadd.f32 %v14538_v7, %v14537_v28  ;;  %v16227_v42 = vld [vmem:[#allocation6 + $0x2d0] sm:$0xff]  }
 0x749   : > { %9400 = vmatmul.mubr.bf16.gmra.mrb[252].mxu1 %v13958_v49  ;;  %v19386_v25 = vadd.f32 %v14539_v37, %v19202_v12  ;;  %v21019_v12 = vld [vmem:[#allocation44_spill] sm:$0xff] }
 0x74a   : > { %9761 = vmatprep.mubr.bf16.mxu1 %v13977_v29  ;;  %v21020_v48 = vcombine.high %v21018_v35, %v21019_v12 }
 0x74b   : > { %v14540_v26 = vpop.f32.mrb[148].mxu1 }
 0x74c   : > { %v14541_v21 = vpop.f32.mrb[149].mxu1 }
 0x74d   : > { %v14542_v38 = vadd.f32 %v14541_v21, %v14540_v26  ;;  %v14543_v22 = vpop.f32.mrb[150].mxu1  ;;  %v21021_v26 = vcombine.low %v21018_v35, %v21019_v12  ;;  %v16239_v35 = vld [vmem:[#allocation6 + $0x2e8] sm:$0xff]  }
 0x74e   : > { %v14544_v8 = vpop.f32.mrb[151].mxu1 }
 0x74f   : > { %v19389_v19 = vadd.f32 %v14542_v38, %v19209_v36  ;;  %v14545_v43 = vadd.f32 %v14544_v8, %v14543_v22  ;;  %v16229_v36 = vld [vmem:[#allocation6 + $0x290] sm:$0xff]   ;;  %v21022_v38 = vld [vmem:[#allocation47_spill] sm:$0xff]  ;;  %v16235_v8 = vld [vmem:[#allocation6 + $0x2e0] sm:$0xff]  }
 0x750   : > { %v21023_v22 = vld [vmem:[#allocation46_spill] sm:$0xff] }
 0x751   : > { %9762 = vmatmul.mubr.bf16.vlgmr.msra.gmra.mrb[0].mxu1 %v13976_v47  ;;  %v19392_v16 = vadd.f32 %v14545_v43, %v19212_v9  ;;  %v16233_v47 = vld [vmem:[#allocation6 + $0x298] sm:$0xff]  }
 0x752   : > { %9769 = vmatprep.mubr.bf16.mxu1 %v21020_v48  ;;  %14831 = vmatpush3.bf16.msra.mxu1 %v16221_v1  ;;  %v21024_v1 = vcombine.high %v21022_v38, %v21023_v22 }
 0x753   : > { %14832 = vmatprep.subr.bf16.mxu1 %v16223_v30  ;;  %v14546_v28 = vpop.f32.mrb[152].mxu1 }
 0x754   : > { %v14547_v7 = vpop.f32.mrb[153].mxu1 }
 0x755   : > { %v14548_v49 = vadd.f32 %v14547_v7, %v14546_v28  ;;  %v14549_v37 = vpop.f32.mrb[154].mxu1  ;;  %v21025_v28 = vcombine.low %v21022_v38, %v21023_v22  ;;  %v16247_v38 = vld [vmem:[#allocation6 + $0x2f8] sm:$0xff]  }
 0x756   : > { %14833 = vmatpush3.bf16.msra.mxu1 %v16225_v46  ;;  %v14550_v5 = vpop.f32.mrb[155].mxu1  ;;  %v16237_v46 = vld [vmem:[#allocation6 + $0x2a0] sm:$0xff]  }
 0x757   : > { %14834 = vmatprep.subr.bf16.mxu1 %v16227_v42  ;;  %v19398_v9 = vadd.f32 %v14548_v49, %v19219_v55  ;;  %v14551_v29 = vadd.f32 %v14550_v5, %v14549_v37  ;;  %v21026_v49 = vld [vmem:[#allocation49_spill] sm:$0xff]  ;;  %v21027_v37 = vld [vmem:[#allocation48_spill] sm:$0xff] }
 0x758   : > { %v16241_v5 = vld [vmem:[#allocation6 + $0x2a8] sm:$0xff]  }
 0x759   : > { %9770 = vmatmul.mubr.bf16.gmra.mrb[4].mxu1 %v21021_v26  ;;  %v19404_v21 = vadd.f32 %v14551_v29, %v19222_v32 }
 0x75a   : > { %9777 = vmatprep.mubr.bf16.mxu1 %v21024_v1  ;;  %14835 = vmatpush3.bf16.msra.mxu1 %v16229_v36  ;;  %v21028_v36 = vcombine.high %v21026_v49, %v21027_v37 }
 0x75b   : > { %14836 = vmatprep.subr.bf16.mxu1 %v16231_v10  ;;  %v14552_v30 = vpop.f32.mrb[156].mxu1  ;;  %v16243_v10 = vld [vmem:[#allocation6 + $0x2f0] sm:$0xff]  }
 0x75c   : > { %v14553_v43 = vpop.f32.mrb[157].mxu1 }
 0x75d   : > { %v14554_v55 = vadd.f32 %v14553_v43, %v14552_v30  ;;  %v14555_v48 = vpop.f32.mrb[158].mxu1  ;;  %v21029_v30 = vcombine.low %v21026_v49, %v21027_v37 }
 0x75e   : > { %14837 = vmatpush3.bf16.msra.mxu1 %v16233_v47  ;;  %v14556_v42 = vpop.f32.mrb[159].mxu1  ;;  %v16245_v47 = vld [vmem:[#allocation6 + $0x2b0] sm:$0xff]  }
 0x75f   : > { %14838 = vmatprep.subr.bf16.mxu1 %v16235_v8  ;;  %v19410_v32 = vadd.f32 %v14554_v55, %v19229_v14  ;;  %v14557_v12 = vadd.f32 %v14556_v42, %v14555_v48  ;;  %v21030_v55 = vld [vmem:[#allocation51_spill] sm:$0xff]  ;;  %v21031_v48 = vld [vmem:[#allocation50_spill] sm:$0xff] }
 0x760   : > { %v16249_v42 = vld [vmem:[#allocation6 + $0x2b8] sm:$0xff]   ;;  %v21033_v37 = vcombine.low %v21030_v55, %v21031_v48 }
 0x761   : > { %9778 = vmatmul.mubr.bf16.gmra.mrb[8].mxu1 %v21025_v28  ;;  %v19416_v7 = vadd.f32 %v14557_v12, %v19232_v39 }
 0x762   : > { %9785 = vmatprep.mubr.bf16.mxu1 %v21028_v36  ;;  %14839 = vmatpush3.bf16.msra.mxu1 %v16237_v46  ;;  %v21032_v46 = vcombine.high %v21030_v55, %v21031_v48  ;;  %v21038_v48 = vld [vmem:[#allocation55_spill] sm:$0xff] }
 0x763   : > { %14840 = vmatprep.subr.bf16.mxu1 %v16239_v35  ;;  %v14558_v29 = vpop.f32.mrb[160].mxu1  ;;  %v16250_v35 = vld [vmem:[#allocation6 + $0x340] sm:$0xff]  }
 0x764   : > { %v14559_v26 = vpop.f32.mrb[161].mxu1 }
 0x765   : > { %v14560_v14 = vadd.f32 %v14559_v26, %v14558_v29  ;;  %v14561_v1 = vpop.f32.mrb[162].mxu1  ;;  %v21034_v29 = vld [vmem:[#allocation53_spill] sm:$0xff]  ;;  %v21035_v26 = vld [vmem:[#allocation52_spill] sm:$0xff] }
 0x766   : > { %14841 = vmatpush3.bf16.msra.mxu1 %v16241_v5  ;;  %v14562_v8 = vpop.f32.mrb[163].mxu1  ;;  %v21037_v55 = vcombine.low %v21034_v29, %v21035_v26 }
 0x767   : > { %14842 = vmatprep.subr.bf16.mxu1 %v16243_v10  ;;  %v19422_v39 = vadd.f32 %v14560_v14, %v19239_v2  ;;  %v14563_v22 = vadd.f32 %v14562_v8, %v14561_v1  ;;  %v21036_v14 = vcombine.high %v21034_v29, %v21035_v26  ;;  %v21043_v29 = vld [vmem:[#allocation56_spill] sm:$0xff] }
 0x769   : > { %9786 = vmatmul.mubr.bf16.gmra.mrb[12].mxu1 %v21029_v30  ;;  %v19428_v43 = vadd.f32 %v14563_v22, %v19242_v6 }
 0x76a   : > { %9793 = vmatprep.mubr.bf16.mxu1 %v21032_v46  ;;  %14843 = vmatpush3.bf16.msra.mxu1 %v16245_v47  ;;  %v21039_v46 = vld [vmem:[#allocation54_spill] sm:$0xff] }
 0x76b   : > { %14844 = vmatprep.subr.bf16.mxu1 %v16247_v38  ;;  %v14564_v12 = vpop.f32.mrb[164].mxu1 }
 0x76c   : > { %v14565_v28 = vpop.f32.mrb[165].mxu1 }
 0x76d   : > { %v14566_v2 = vadd.f32 %v14565_v28, %v14564_v12  ;;  %v14567_v36 = vpop.f32.mrb[166].mxu1 }
 0x76e   : > { %14845 = vmatpush3.bf16.msra.mxu1 %v16249_v42  ;;  %v14568_v5 = vpop.f32.mrb[167].mxu1  ;;  %v21040_v42 = vcombine.high %v21038_v48, %v21039_v46 }
 0x76f   : > { %14942 = vmatprep.subr.bf16.mxu1 %v16250_v35  ;;  %v19434_v49 = vadd.f32 %v14566_v2, %v19249_v27  ;;  %v14569_v6 = vadd.f32 %v14568_v5, %v14567_v36 }
 0x771   : > { %9794 = vmatmul.mubr.bf16.gmra.mrb[16].mxu1 %v21033_v37  ;;  %v19440_v10 = vadd.f32 %v14569_v6, %v19252_v44  ;;  %v21041_v6 = vcombine.low %v21038_v48, %v21039_v46  ;;  %v21042_v37 = vld [vmem:[#allocation57_spill] sm:$0xff]  ;;  %v21047_v48 = vld [vmem:[#allocation58_spill] sm:$0xff] }
 0x772   : > { %9801 = vmatprep.mubr.bf16.mxu1 %v21036_v14  ;;  %v21044_v26 = vcombine.high %v21042_v37, %v21043_v29 }
 0x774   : > { %v14570_v1 = vpop.f32.mrb[168].mxu1 }
 0x775   : > { %v14571_v47 = vpop.f32.mrb[169].mxu1 }
 0x776   : > { %v14572_v8 = vadd.f32 %v14571_v47, %v14570_v1  ;;  %v14573_v38 = vpop.f32.mrb[170].mxu1 }
 0x777   : > { %v14574_v22 = vpop.f32.mrb[171].mxu1 }
 0x778   : > { %v19446_v27 = vadd.f32 %v14572_v8, %v19259_v45  ;;  %v14575_v30 = vadd.f32 %v14574_v22, %v14573_v38 }
 0x779   : > { %9802 = vmatmul.mubr.bf16.gmra.mrb[20].mxu1 %v21037_v55  ;;  %v21046_v55 = vld [vmem:[#allocation59_spill] sm:$0xff] }
 0x77a   : > { %v19452_v44 = vadd.f32 %v14575_v30, %v19262_v56  ;;  %9809 = vmatprep.mubr.bf16.mxu1 %v21040_v42  ;;  %v21045_v30 = vcombine.low %v21042_v37, %v21043_v29  ;;  %v21048_v46 = vcombine.high %v21046_v55, %v21047_v48 }
 0x77c   : > { %v14576_v35 = vpop.f32.mrb[172].mxu1 }
 0x77d   : > { %v14577_v12 = vpop.f32.mrb[173].mxu1 }
 0x77e   : > { %v14578_v28 = vadd.f32 %v14577_v12, %v14576_v35  ;;  %v14579_v2 = vpop.f32.mrb[174].mxu1 }
 0x77f   : > { %v14580_v36 = vpop.f32.mrb[175].mxu1 }
 0x780   : > { %v19458_v45 = vadd.f32 %v14578_v28, %v19269_v62  ;;  %v14581_v5 = vadd.f32 %v14580_v36, %v14579_v2 }
 0x781   : > { %9810 = vmatmul.mubr.bf16.gmra.mrb[24].mxu1 %v21041_v6 }
 0x782   : > { %v19464_v56 = vadd.f32 %v14581_v5, %v19272_v57  ;;  %9817 = vmatprep.mubr.bf16.mxu1 %v21044_v26  ;;  %v16401_v5 = vld [vmem:[#allocation2 + $0x1a0] sm:$0xff] }
 0x783   : > { %v13995_v6 = vcombine.high %v16401_v5, %v19282_v13 }
 0x784   : > { %v14582_v14 = vpop.f32.mrb[176].mxu1 }
 0x785   : > { %v14583_v1 = vpop.f32.mrb[177].mxu1 }
 0x786   : > { %v14584_v47 = vadd.f32 %v14583_v1, %v14582_v14  ;;  %v14585_v8 = vpop.f32.mrb[178].mxu1 }
 0x787   : > { %v14586_v38 = vpop.f32.mrb[179].mxu1 }
 0x788   : > { %v19470_v62 = vadd.f32 %v14584_v47, %v19286_v33  ;;  %v14587_v22 = vadd.f32 %v14586_v38, %v14585_v8  ;;  %v13994_v47 = vcombine.low %v16401_v5, %v19282_v13 }
 0x789   : > { %9818 = vmatmul.mubr.bf16.gmra.mrb[28].mxu1 %v21045_v30  ;;  %v16403_v30 = vld [vmem:[#allocation2 + $0x1c8] sm:$0xff] }
 0x78a   : > { %v19476_v57 = vadd.f32 %v14587_v22, %v19289_v15  ;;  %9825 = vmatprep.mubr.bf16.mxu1 %v21048_v46  ;;  %v21049_v15 = vcombine.low %v21046_v55, %v21047_v48  ;;  %v16402_v22 = vld [vmem:[#allocation2 + $0x1d0] sm:$0xff] }
 0x78b   : > { %v13997_v46 = vcombine.high %v16403_v30, %v16402_v22 }
 0x78c   : > { %v14588_v42 = vpop.f32.mrb[180].mxu1 }
 0x78d   : > { %v14589_v35 = vpop.f32.mrb[181].mxu1 }
 0x78e   : > { %v14590_v12 = vadd.f32 %v14589_v35, %v14588_v42  ;;  %v14591_v28 = vpop.f32.mrb[182].mxu1 }
 0x78f   : > { %v14592_v2 = vpop.f32.mrb[183].mxu1 }
 0x790   : > { %v19482_v33 = vadd.f32 %v14590_v12, %v19300_v20  ;;  %v14593_v36 = vadd.f32 %v14592_v2, %v14591_v28  ;;  %v13996_v12 = vcombine.low %v16403_v30, %v16402_v22  ;;  %v16404_v2 = vld [vmem:[#allocation2 + $0x1f0] sm:$0xff] }
 0x791   : > { %9826 = vmatmul.mubr.bf16.gmra.mrb[32].mxu1 %v21049_v15 }
 0x792   : > { %v19489_v37 = vadd.f32 %v14593_v36, %v19303_v0  ;;  %9833 = vmatprep.mubr.bf16.mxu1 %v13995_v6  ;;  %v16405_v36 = vld [vmem:[#allocation2 + $0x1f8] sm:$0xff] }
 0x793   : > { %v13999_v5 = vcombine.high %v16404_v2, %v16405_v36 }
 0x794   : > { %v14594_v29 = vpop.f32.mrb[184].mxu1 }
 0x795   : > { %v14595_v26 = vpop.f32.mrb[185].mxu1 }
 0x796   : > { %v14596_v14 = vadd.f32 %v14595_v26, %v14594_v29  ;;  %v14597_v1 = vpop.f32.mrb[186].mxu1 }
 0x797   : > { %v14598_v20 = vpop.f32.mrb[187].mxu1 }
 0x798   : > { %v19493_v8 = vadd.f32 %v14596_v14, %v19317_v31  ;;  %v14599_v38 = vadd.f32 %v14598_v20, %v14597_v1  ;;  %v13998_v14 = vcombine.low %v16404_v2, %v16405_v36  ;;  %v16406_v20 = vld [vmem:[#allocation2 + $0x218] sm:$0xff] }
 0x799   : > { %9834 = vmatmul.mubr.bf16.gmra.mrb[36].mxu1 %v13994_v47 }
 0x79a   : > { %v19496_v55 = vadd.f32 %v14599_v38, %v19322_v11  ;;  %9841 = vmatprep.mubr.bf16.mxu1 %v13997_v46  ;;  %v16407_v38 = vld [vmem:[#allocation2 + $0x220] sm:$0xff] }
 0x79b   : > { %v14001_v22 = vcombine.high %v16406_v20, %v16407_v38 }
 0x79c   : > { %v14600_v0 = vpop.f32.mrb[188].mxu1 }
 0x79d   : > { %v14601_v48 = vpop.f32.mrb[189].mxu1 }
 0x79e   : > { %v14602_v42 = vadd.f32 %v14601_v48, %v14600_v0  ;;  %v14603_v35 = vpop.f32.mrb[190].mxu1 }
 0x79f   : > { %v14604_v28 = vpop.f32.mrb[191].mxu1 }
 0x7a0   : > { %v19499_v13 = vadd.f32 %v14602_v42, %v19331_v24  ;;  %v14605_v31 = vadd.f32 %v14604_v28, %v14603_v35  ;;  %v14000_v42 = vcombine.low %v16406_v20, %v16407_v38  ;;  %v16408_v28 = vld [vmem:[#allocation2 + $0x240] sm:$0xff] }
 0x7a1   : > { %9842 = vmatmul.mubr.bf16.gmra.mrb[40].mxu1 %v13996_v12 }
 0x7a2   : > { %v19502_v6 = vadd.f32 %v14605_v31, %v19334_v63  ;;  %9849 = vmatprep.mubr.bf16.mxu1 %v13999_v5  ;;  %v16409_v31 = vld [vmem:[#allocation2 + $0x248] sm:$0xff] }
 0x7a3   : > { %v14003_v2 = vcombine.high %v16408_v28, %v16409_v31 }
 0x7a4   : > { %v14622_v11 = vpop.f32.mrb[192].mxu1 }
 0x7a5   : > { %v14623_v15 = vpop.f32.mrb[193].mxu1 }
 0x7a6   : > { %v14624_v29 = vadd.f32 %v14623_v15, %v14622_v11  ;;  %v14625_v26 = vpop.f32.mrb[194].mxu1  ;;  %v9922_v11 = vld [vmem:[#allocation2 + $0x38] sm:$0xff] }
 0x7a7   : > { %v14626_v1 = vpop.f32.mrb[195].mxu1  ;;  %v9971_v20 = vshrl.u32 %v9922_v11, 16  ;;  %v9974_v38 = vshll.u32 %v9922_v11, 16 }
 0x7a8   : > { %v19505_v47 = vadd.f32 %v14624_v29, %v19337_v41  ;;  %v14627_v24 = vadd.f32 %v14626_v1, %v14625_v26 }
 0x7a9   : > { %9850 = vmatmul.mubr.bf16.gmra.mrb[44].mxu1 %v13998_v14 }
 0x7aa   : > { %v19508_v30 = vadd.f32 %v14627_v24, %v19340_v3  ;;  %9857 = vmatprep.mubr.bf16.mxu1 %v14001_v22  ;;  %v9923_v3 = vld [vmem:[#allocation2 + $0x40] sm:$0xff]  ;;  %v14002_v24 = vcombine.low %v16408_v28, %v16409_v31  ;;  %v9973_v28 = vrot.slane %v9971_v20, 4  ;;  %v9976_v31 = vrot.slane %v9974_v38, 5 }
 0x7ab   : > { %v9980_v29 = vshll.u32 %v9923_v3, 16  ;;  %v9984_v26 = vshrl.u32 %v9923_v3, 16 }
 0x7ac   : > { %v14628_v63 = vpop.f32.mrb[196].mxu1 }
 0x7ad   : > { %v14629_v46 = vpop.f32.mrb[197].mxu1 }
 0x7ae   : > { %v14630_v0 = vadd.f32 %v14629_v46, %v14628_v63  ;;  %v14631_v48 = vpop.f32.mrb[198].mxu1  ;;  %v16410_v46 = vld [vmem:[#allocation2 + $0x268] sm:$0xff] }
 0x7af   : > { %v14632_v35 = vpop.f32.mrb[199].mxu1 }
 0x7b0   : > { %v19511_v12 = vadd.f32 %v14630_v0, %v19346_v34  ;;  %v14633_v41 = vadd.f32 %v14632_v35, %v14631_v48  ;;  %v9982_v48 = vrot.slane %v9980_v29, 5 }
 0x7b1   : > { %9858 = vmatmul.mubr.bf16.gmra.mrb[48].mxu1 %v14000_v42  ;;  %v9986_v42 = vrot.slane %v9984_v26, 4  ;;  %v9977_v26 = vor.u32 %v9976_v31, %v9973_v28 }
 0x7b2   : > { %v19514_v36 = vadd.f32 %v14633_v41, %v19352_v40  ;;  %9865 = vmatprep.mubr.bf16.mxu1 %v14003_v2  ;;  %v16411_v40 = vld [vmem:[#allocation2 + $0x270] sm:$0xff]  ;;  %v9924_v41 = vld [vmem:[#allocation2 + $0x48] sm:$0x11] }
 0x7b3   : > { %v14005_v0 = vcombine.high %v16410_v46, %v16411_v40  ;;  %v9926_v2 = vld [vmem:[#allocation2 + $0x68] sm:$0xff]  ;;  %v9978_v28 = vrot.slane %v9977_v26, 4 }
 0x7b4   : > { %21050 = vst [vmem:[#allocation15_spill] sm:$0xff] %v19514_v36  ;;  %v14634_v5 = vpop.f32.mrb[200].mxu1 }
 0x7b5   : > { %v14635_v15 = vpop.f32.mrb[201].mxu1 }
 0x7b6   : > { %v14636_v14 = vadd.f32 %v14635_v15, %v14634_v5  ;;  %v14637_v1 = vpop.f32.mrb[202].mxu1  ;;  %v9925_v5 = vld [vmem:[#allocation2 + $0x60] sm:$0xff]  ;;  %v9990_v15 = vshll.u32 %v9924_v41, 16 }
 0x7b7   : > { %v14638_v34 = vpop.f32.mrb[203].mxu1 }
 0x7b8   : > { %v19517_v22 = vadd.f32 %v14636_v14, %v19358_v4  ;;  %v14639_v63 = vadd.f32 %v14638_v34, %v14637_v1  ;;  %v9987_v4 = vor.u32 %v9986_v42, %v9982_v48  ;;  %v10004_v14 = vshll.u32 %v9926_v2, 16 }
 0x7b9   : > { %9866 = vmatmul.mubr.bf16.gmra.mrb[52].mxu1 %v14002_v24  ;;  %v10008_v1 = vshrl.u32 %v9926_v2, 16  ;;  %v14004_v24 = vcombine.low %v16410_v46, %v16411_v40  ;;  %v9992_v38 = vrot.slane %v9990_v15, 5  ;;  %v21053_v2 = vld [vmem:[#allocation66_spill] sm:$0xff]  ;;  %v19531_v40 = vld [vmem:[#allocation2 + $0x90] sm:$0xff] }
 0x7ba   : > { %21051 = vst [vmem:[#allocation16_spill] sm:$0xff] %v19517_v22  ;;  %v19520_v35 = vadd.f32 %v14639_v63, %v19364_v52  ;;  %9873 = vmatprep.mubr.bf16.mxu1 %v14005_v0  ;;  %v9995_v22 = vshrl.u32 %v9925_v5, 16  ;;  %v9998_v52 = vshll.u32 %v9925_v5, 16  ;;  %v9988_v20 = vrot.slane %v9987_v4, 4 }
 0x7bb   : > { %v10006_v36 = vrot.slane %v10004_v14, 5  ;;  %v10010_v42 = vrot.slane %v10008_v1, 4  ;;  %v20747_v1 = vshrl.u32 %v19531_v40, 16 }
 0x7bc   : > { %21052 = vst [vmem:[#allocation43_spill] sm:$0xff] %v19520_v35  ;;  %v14640_v3 = vpop.f32.mrb[204].mxu1  ;;  %v9927_v35 = vld [vmem:[#allocation2 + $0x70] sm:$0x11]  ;;  %v9997_v31 = vrot.slane %v9995_v22, 4  ;;  %v9993_v15 = vsel %vm16813_vm2, %v9988_v20, %v9992_v38  ;;  %v9983_v22 = vsel %vm16813_vm2, %v9978_v28, %v9982_v48 }
 0x7bd   : > { %v14641_v11 = vpop.f32.mrb[205].mxu1  ;;  %v10011_v14 = vor.u32 %v10010_v42, %v10006_v36  ;;  %v14025_v38 = vcombine.high %v9983_v22, %v9993_v15  ;;  %v10034_v28 = vrot.slane %v20747_v1, 4 }
 0x7be   : > { %v14642_v34 = vadd.f32 %v14641_v11, %v14640_v3  ;;  %v14643_v61 = vpop.f32.mrb[206].mxu1  ;;  %v21054_v3 = vld [vmem:[#allocation65_spill] sm:$0xff]  ;;  %v19533_v11 = vld [vmem:[#allocation2 + $0x88] sm:$0xff] }
 0x7bf   : > { %v14644_v29 = vpop.f32.mrb[207].mxu1  ;;  %v21055_v46 = vcombine.high %v21053_v2, %v21054_v3  ;;  %21056 = vst [vmem:[#allocation17_spill] sm:$0xff] %v19533_v11  ;;  %v21058_v42 = vcombine.low %v21053_v2, %v21054_v3 }
 0x7c0   : > { %v19523_v63 = vadd.f32 %v14642_v34, %v19374_v51  ;;  %v14645_v0 = vadd.f32 %v14644_v29, %v14643_v61  ;;  %v10000_v51 = vrot.slane %v9998_v52, 5  ;;  %v10014_v61 = vshll.u32 %v9927_v35, 16 }
 0x7c1   : > { %9874 = vmatmul.mubr.bf16.gmra.mrb[56].mxu1 %v14004_v24  ;;  %v20746_v35 = vshrl.u32 %v19533_v11, 16  ;;  %v20748_v52 = vshll.u32 %v19533_v11, 16 }
 0x7c2   : > { %v19526_v41 = vadd.f32 %v14645_v0, %v19380_v59  ;;  %9881 = vmatprep.mubr.bf16.mxu1 %v21055_v46  ;;  %v20745_v59 = vshll.u32 %v19531_v40, 16  ;;  %v10001_v26 = vor.u32 %v10000_v51, %v9997_v31  ;;  %v10012_v46 = vrot.slane %v10011_v14, 4 }
 0x7c3   : > { %v10021_v2 = vrot.slane %v20746_v35, 4  ;;  %v10024_v3 = vrot.slane %v20748_v52, 5  ;;  %v16251_v35 = vld [vmem:[#allocation6 + $0x300] sm:$0xff]  }
 0x7c4   : > { %v14646_v5 = vpop.f32.mrb[208].mxu1  ;;  %v10030_v48 = vrot.slane %v20745_v59, 5  ;;  %v10002_v51 = vrot.slane %v10001_v26, 4  ;;  %v14024_v26 = vcombine.low %v9983_v22, %v9993_v15 }
 0x7c5   : > { %v14647_v4 = vpop.f32.mrb[209].mxu1 }
 0x7c6   : > { %v14648_v34 = vadd.f32 %v14647_v4, %v14646_v5  ;;  %v14649_v24 = vpop.f32.mrb[210].mxu1  ;;  %v10016_v5 = vrot.slane %v10014_v61, 5  ;;  %v9930_v4 = vld [vmem:[#allocation2 + $0x98] sm:$0x11]  ;;  %v10007_v52 = vsel %vm16813_vm2, %v10002_v51, %v10006_v36 }
 0x7c7   : > { %v14650_v29 = vpop.f32.mrb[211].mxu1  ;;  %v10038_v14 = vshll.u32 %v9930_v4, 16  ;;  %v10025_v4 = vor.u32 %v10024_v3, %v10021_v2  ;;  %v19584_v2 = vld [vmem:[#allocation2 + $0xe0] sm:$0xff] }
 0x7c8   : > { %v19544_v0 = vadd.f32 %v14648_v34, %v19383_v53  ;;  %v14651_v20 = vadd.f32 %v14650_v29, %v14649_v24  ;;  %v19556_v53 = vld [vmem:[#allocation2 + $0xb8] sm:$0xff]  ;;  %v19562_v34 = vld [vmem:[#allocation2 + $0xb0] sm:$0xff]  ;;  %v10017_v29 = vsel %vm16813_vm2, %v10012_v46, %v10016_v5 }
 0x7c9   : > { %9882 = vmatmul.mubr.bf16.gmra.mrb[60].mxu1 %v21058_v42  ;;  %v20753_v11 = vshll.u32 %v19562_v34, 16  ;;  %v10040_v22 = vrot.slane %v10038_v14, 5  ;;  %v16254_v14 = vld [vmem:[#allocation6 + $0x350] sm:$0xff]  }
 0x7ca   : > { %21057 = vst [vmem:[#allocation12_spill] sm:$0xff] %v19544_v0  ;;  %v19554_v31 = vadd.f32 %v14651_v20, %v19386_v25  ;;  %10643 = vmatprep.mubr.bf16.mxu1 %v14025_v38  ;;  %v10035_v25 = vor.u32 %v10034_v28, %v10030_v48  ;;  %v20751_v20 = vshll.u32 %v19556_v53, 16  ;;  %v20754_v38 = vshrl.u32 %v19556_v53, 16 }
 0x7cb   : > { %v20752_v0 = vshrl.u32 %v19562_v34, 16  ;;  %v14027_v28 = vcombine.high %v10007_v52, %v10017_v29  ;;  %v10048_v3 = vrot.slane %v20753_v11, 5  ;;  %v16255_v11 = vld [vmem:[#allocation6 + $0x310] sm:$0xff]  }
 0x7cc   : > { %21059 = vst [vmem:[#allocation18_spill] sm:$0xff] %v19554_v31  ;;  %v14652_v61 = vpop.f32.mrb[212].mxu1  ;;  %v16252_v31 = vld [vmem:[#allocation6 + $0x348] sm:$0xff]   ;;  %v10036_v15 = vrot.slane %v10035_v25, 4  ;;  %v10058_v36 = vrot.slane %v20754_v38, 4 }
 0x7cd   : > { %v14653_v24 = vpop.f32.mrb[213].mxu1 }
 0x7ce   : > { %v14654_v42 = vadd.f32 %v14653_v24, %v14652_v61  ;;  %v14655_v59 = vpop.f32.mrb[214].mxu1  ;;  %v9933_v61 = vld [vmem:[#allocation2 + $0xc0] sm:$0x11]  ;;  %v19577_v24 = vrot.slane %v20751_v20, 5 }
 0x7cf   : > { %v14656_v1 = vpop.f32.mrb[215].mxu1 }
 0x7d0   : > { %v19573_v46 = vadd.f32 %v14654_v42, %v19389_v19  ;;  %v14657_v5 = vadd.f32 %v14656_v1, %v14655_v59  ;;  %v16253_v19 = vld [vmem:[#allocation6 + $0x308] sm:$0xff]   ;;  %v10026_v59 = vrot.slane %v10025_v4, 4  ;;  %v10045_v1 = vrot.slane %v20752_v0, 4 }
 0x7d1   : > { %10644 = vmatmul.mubr.bf16.vlgmr.msra.gmra.mrb[64].mxu1 %v14024_v26  ;;  %v10062_v26 = vshll.u32 %v9933_v61, 16  ;;  %v19590_v42 = vld [vmem:[#allocation2 + $0xd8] sm:$0xff]  ;;  %v20755_v4 = vshll.u32 %v19584_v2, 16 }
 0x7d2   : > { %21060 = vst [vmem:[#allocation19_spill] sm:$0xff] %v19573_v46  ;;  %v19582_v51 = vadd.f32 %v14657_v5, %v19392_v16  ;;  %10651 = vmatprep.mubr.bf16.mxu1 %v14027_v28  ;;  %14943 = vmatpush3.bf16.msra.mxu1 %v16251_v35  ;;  %v10041_v35 = vsel %vm16813_vm2, %v10036_v15, %v10040_v22  ;;  %v20756_v46 = vshrl.u32 %v19590_v42, 16  ;;  %v20757_v15 = vshll.u32 %v19590_v42, 16  ;;  %v16256_v22 = vld [vmem:[#allocation6 + $0x358] sm:$0xff]  }
 0x7d3   : > { %14944 = vmatprep.subr.bf16.mxu1 %v16252_v31  ;;  %v10059_v5 = vor.u32 %v10058_v36, %v19577_v24  ;;  %v14026_v28 = vcombine.low %v10007_v52, %v10017_v29  ;;  %v10031_v61 = vsel %vm16813_vm2, %v10026_v59, %v10030_v48  ;;  %v21063_v48 = vshrl.u32 %v19584_v2, 16 }
 0x7d4   : > { %21061 = vst [vmem:[#allocation22_spill] sm:$0xff] %v19582_v51  ;;  %v14658_v25 = vpop.f32.mrb[216].mxu1  ;;  %v10049_v51 = vor.u32 %v10048_v3, %v10045_v1  ;;  %v14029_v52 = vcombine.high %v10031_v61, %v10041_v35  ;;  %v19613_v3 = vld [vmem:[#allocation2 + $0x108] sm:$0xff] }
 0x7d5   : > { %v14659_v16 = vpop.f32.mrb[217].mxu1  ;;  %v10060_v29 = vrot.slane %v10059_v5, 4  ;;  %v10082_v59 = vrot.slane %v21063_v48, 4  ;;  %v14028_v48 = vcombine.low %v10031_v61, %v10041_v35 }
 0x7d6   : > { %v14660_v20 = vadd.f32 %v14659_v16, %v14658_v25  ;;  %v14661_v0 = vpop.f32.mrb[218].mxu1  ;;  %14945 = vmatpush3.bf16.msra.mxu1 %v16253_v19  ;;  %v10064_v19 = vrot.slane %v10062_v26, 5  ;;  %v9936_v25 = vld [vmem:[#allocation2 + $0xe8] sm:$0x11]  ;;  %v19606_v16 = vrot.slane %v20755_v4, 5 }
 0x7d7   : > { %v14662_v38 = vpop.f32.mrb[219].mxu1  ;;  %14946 = vmatprep.subr.bf16.mxu1 %v16254_v14  ;;  %v16258_v14 = vld [vmem:[#allocation6 + $0x360] sm:$0xff]   ;;  %v10086_v5 = vshll.u32 %v9936_v25, 16 }
 0x7d8   : > { %v19602_v36 = vadd.f32 %v14660_v20, %v19398_v9  ;;  %v14663_v31 = vadd.f32 %v14662_v38, %v14661_v0  ;;  %v16257_v9 = vld [vmem:[#allocation6 + $0x318] sm:$0xff]   ;;  %v10050_v0 = vrot.slane %v10049_v51, 4  ;;  %v10069_v20 = vrot.slane %v20756_v46, 4 }
 0x7d9   : > { %10652 = vmatmul.mubr.bf16.gmra.mrb[68].mxu1 %v14026_v28  ;;  %v10072_v38 = vrot.slane %v20757_v15, 5  ;;  %v19619_v28 = vld [vmem:[#allocation2 + $0x100] sm:$0xff]  ;;  %v20758_v51 = vshll.u32 %v19613_v3, 16 }
 0x7da   : > { %21062 = vst [vmem:[#allocation23_spill] sm:$0xff] %v19602_v36  ;;  %v19611_v1 = vadd.f32 %v14663_v31, %v19404_v21  ;;  %10659 = vmatprep.mubr.bf16.mxu1 %v14029_v52  ;;  %14947 = vmatpush3.bf16.msra.mxu1 %v16255_v11  ;;  %v10065_v31 = vsel %vm16813_vm2, %v10060_v29, %v10064_v19  ;;  %v20759_v36 = vshrl.u32 %v19619_v28, 16  ;;  %v20760_v29 = vshll.u32 %v19619_v28, 16  ;;  %v16260_v19 = vld [vmem:[#allocation6 + $0x368] sm:$0xff]  }
 0x7db   : > { %14948 = vmatprep.subr.bf16.mxu1 %v16256_v22  ;;  %v10083_v11 = vor.u32 %v10082_v59, %v19606_v16  ;;  %v16259_v22 = vld [vmem:[#allocation6 + $0x320] sm:$0xff]   ;;  %v10055_v25 = vsel %vm16813_vm2, %v10050_v0, %v19577_v24  ;;  %v19636_v52 = vrot.slane %v20758_v51, 5  ;;  %v21066_v24 = vshrl.u32 %v19613_v3, 16 }
 0x7dc   : > { %21064 = vst [vmem:[#allocation20_spill] sm:$0xff] %v19611_v1  ;;  %v14664_v26 = vpop.f32.mrb[220].mxu1  ;;  %v10073_v1 = vor.u32 %v10072_v38, %v10069_v20  ;;  %v14031_v61 = vcombine.high %v10055_v25, %v10065_v31  ;;  %v19643_v38 = vld [vmem:[#allocation2 + $0x130] sm:$0xff] }
 0x7dd   : > { %v14665_v21 = vpop.f32.mrb[221].mxu1  ;;  %v10106_v0 = vrot.slane %v21066_v24, 4  ;;  %v14030_v24 = vcombine.low %v10055_v25, %v10065_v31 }
 0x7de   : > { %v14666_v4 = vadd.f32 %v14665_v21, %v14664_v26  ;;  %v14667_v46 = vpop.f32.mrb[222].mxu1  ;;  %14949 = vmatpush3.bf16.msra.mxu1 %v16257_v9  ;;  %v10084_v9 = vrot.slane %v10083_v11, 4  ;;  %v10088_v26 = vrot.slane %v10086_v5, 5  ;;  %v9939_v21 = vld [vmem:[#allocation2 + $0x110] sm:$0x11] }
 0x7df   : > { %v14668_v15 = vpop.f32.mrb[223].mxu1  ;;  %14950 = vmatprep.subr.bf16.mxu1 %v16258_v14  ;;  %v16262_v14 = vld [vmem:[#allocation6 + $0x370] sm:$0xff]   ;;  %v10110_v11 = vshll.u32 %v9939_v21, 16 }
 0x7e0   : > { %v19632_v59 = vadd.f32 %v14666_v4, %v19410_v32  ;;  %v14669_v35 = vadd.f32 %v14668_v15, %v14667_v46  ;;  %v16261_v32 = vld [vmem:[#allocation6 + $0x328] sm:$0xff]   ;;  %v10074_v46 = vrot.slane %v10073_v1, 4  ;;  %v10093_v4 = vrot.slane %v20759_v36, 4 }
 0x7e1   : > { %10660 = vmatmul.mubr.bf16.gmra.mrb[72].mxu1 %v14028_v48  ;;  %v10096_v15 = vrot.slane %v20760_v29, 5  ;;  %v19649_v48 = vld [vmem:[#allocation2 + $0x128] sm:$0xff]  ;;  %v20761_v1 = vshll.u32 %v19643_v38, 16 }
 0x7e2   : > { %21065 = vst [vmem:[#allocation21_spill] sm:$0xff] %v19632_v59  ;;  %v19641_v20 = vadd.f32 %v14669_v35, %v19416_v7  ;;  %10667 = vmatprep.mubr.bf16.mxu1 %v14031_v61  ;;  %14951 = vmatpush3.bf16.msra.mxu1 %v16259_v22  ;;  %v10089_v35 = vsel %vm16813_vm2, %v10084_v9, %v10088_v26  ;;  %v20762_v59 = vshrl.u32 %v19649_v48, 16  ;;  %v20763_v9 = vshll.u32 %v19649_v48, 16  ;;  %v16264_v26 = vld [vmem:[#allocation6 + $0x378] sm:$0xff]  }
 0x7e3   : > { %14952 = vmatprep.subr.bf16.mxu1 %v16260_v19  ;;  %v10107_v22 = vor.u32 %v10106_v0, %v19636_v52  ;;  %v16263_v19 = vld [vmem:[#allocation6 + $0x330] sm:$0xff]   ;;  %v10079_v21 = vsel %vm16813_vm2, %v10074_v46, %v19606_v16  ;;  %v10126_v61 = vrot.slane %v20761_v1, 5  ;;  %v21069_v16 = vshrl.u32 %v19643_v38, 16 }
 0x7e4   : > { %21067 = vst [vmem:[#allocation25_spill] sm:$0xff] %v19641_v20  ;;  %v14670_v5 = vpop.f32.mrb[224].mxu1  ;;  %v10097_v20 = vor.u32 %v10096_v15, %v10093_v4  ;;  %v14033_v25 = vcombine.high %v10079_v21, %v10089_v35  ;;  %v19671_v15 = vld [vmem:[#allocation2 + $0x158] sm:$0xff] }
 0x7e5   : > { %v14671_v7 = vpop.f32.mrb[225].mxu1  ;;  %v10130_v46 = vrot.slane %v21069_v16, 4  ;;  %v14032_v16 = vcombine.low %v10079_v21, %v10089_v35 }
 0x7e6   : > { %v14672_v51 = vadd.f32 %v14671_v7, %v14670_v5  ;;  %v14673_v36 = vpop.f32.mrb[226].mxu1  ;;  %14953 = vmatpush3.bf16.msra.mxu1 %v16261_v32  ;;  %v10108_v32 = vrot.slane %v10107_v22, 4  ;;  %v10112_v5 = vrot.slane %v10110_v11, 5  ;;  %v9942_v7 = vld [vmem:[#allocation2 + $0x138] sm:$0x11] }
 0x7e7   : > { %v14674_v29 = vpop.f32.mrb[227].mxu1  ;;  %14954 = vmatprep.subr.bf16.mxu1 %v16262_v14  ;;  %v16267_v14 = vld [vmem:[#allocation6 + $0x3c0] sm:$0xff]   ;;  %v10134_v22 = vshll.u32 %v9942_v7, 16 }
 0x7e8   : > { %v19662_v0 = vadd.f32 %v14672_v51, %v19422_v39  ;;  %v14675_v31 = vadd.f32 %v14674_v29, %v14673_v36  ;;  %v16265_v39 = vld [vmem:[#allocation6 + $0x338] sm:$0xff]   ;;  %v10098_v36 = vrot.slane %v10097_v20, 4  ;;  %v10117_v51 = vrot.slane %v20762_v59, 4 }
 0x7e9   : > { %10668 = vmatmul.mubr.bf16.gmra.mrb[76].mxu1 %v14030_v24  ;;  %v10120_v29 = vrot.slane %v20763_v9, 5  ;;  %v19677_v24 = vld [vmem:[#allocation2 + $0x150] sm:$0xff]  ;;  %v20767_v20 = vshrl.u32 %v19671_v15, 16  ;;  %v10136_v21 = vrot.slane %v10134_v22, 5 }
 0x7ea   : > { %21068 = vst [vmem:[#allocation28_spill] sm:$0xff] %v19662_v0  ;;  %v19669_v4 = vadd.f32 %v14675_v31, %v19428_v43  ;;  %10675 = vmatprep.mubr.bf16.mxu1 %v14033_v25  ;;  %14955 = vmatpush3.bf16.msra.mxu1 %v16263_v19  ;;  %v10113_v31 = vsel %vm16813_vm2, %v10108_v32, %v10112_v5  ;;  %v20764_v19 = vshll.u32 %v19671_v15, 16  ;;  %v20765_v0 = vshll.u32 %v19677_v24, 16 }
 0x7eb   : > { %14956 = vmatprep.subr.bf16.mxu1 %v16264_v26  ;;  %v10131_v25 = vor.u32 %v10130_v46, %v10126_v61  ;;  %v10103_v26 = vsel %vm16813_vm2, %v10098_v36, %v19636_v52  ;;  %v10121_v7 = vor.u32 %v10120_v29, %v10117_v51  ;;  %v10154_v52 = vrot.slane %v20767_v20, 4  ;;  %v19698_v51 = vld [vmem:[#allocation2 + $0x180] sm:$0xff] }
 0x7ec   : > { %21070 = vst [vmem:[#allocation24_spill] sm:$0xff] %v19669_v4  ;;  %v14676_v11 = vpop.f32.mrb[228].mxu1  ;;  %v20766_v4 = vshrl.u32 %v19677_v24, 16  ;;  %v14035_v46 = vcombine.high %v10103_v26, %v10113_v31 }
 0x7ed   : > { %v14677_v43 = vpop.f32.mrb[229].mxu1  ;;  %v10132_v35 = vrot.slane %v10131_v25, 4  ;;  %v20768_v25 = vshll.u32 %v19698_v51, 16 }
 0x7ee   : > { %v14678_v1 = vadd.f32 %v14677_v43, %v14676_v11  ;;  %v14679_v59 = vpop.f32.mrb[230].mxu1  ;;  %14957 = vmatpush3.bf16.msra.mxu1 %v16265_v39  ;;  %v9945_v39 = vld [vmem:[#allocation2 + $0x160] sm:$0x11]  ;;  %v10150_v11 = vrot.slane %v20764_v19, 5 }
 0x7ef   : > { %v14680_v9 = vpop.f32.mrb[231].mxu1  ;;  %15054 = vmatprep.subr.bf16.mxu1 %v16267_v14  ;;  %v10158_v29 = vshll.u32 %v9945_v39, 16  ;;  %v19704_v14 = vld [vmem:[#allocation2 + $0x178] sm:$0xff]  ;;  %v10137_v43 = vsel %vm16813_vm2, %v10132_v35, %v10136_v21 }
 0x7f0   : > { %v19689_v32 = vadd.f32 %v14678_v1, %v19434_v49  ;;  %v14681_v5 = vadd.f32 %v14680_v9, %v14679_v59  ;;  %v10122_v49 = vrot.slane %v10121_v7, 4  ;;  %v10141_v59 = vrot.slane %v20766_v4, 4 }
 0x7f1   : > { %10676 = vmatmul.mubr.bf16.gmra.mrb[80].mxu1 %v14032_v16  ;;  %v10144_v1 = vrot.slane %v20765_v0, 5  ;;  %v14034_v7 = vcombine.low %v10103_v26, %v10113_v31  ;;  %v20770_v39 = vshrl.u32 %v19704_v14, 16  ;;  %v20769_v20 = vshll.u32 %v19704_v14, 16  ;;  %v9948_v31 = vld [vmem:[#allocation2 + $0x188] sm:$0x11] }
 0x7f2   : > { %v19696_v36 = vadd.f32 %v14681_v5, %v19440_v10  ;;  %10683 = vmatprep.mubr.bf16.mxu1 %v14035_v46  ;;  %v10155_v10 = vor.u32 %v10154_v52, %v10150_v11  ;;  %v10127_v0 = vsel %vm16813_vm2, %v10122_v49, %v10126_v61  ;;  %v10160_v16 = vrot.slane %v10158_v29, 5 }
 0x7f3   : > { %v10145_v4 = vor.u32 %v10144_v1, %v10141_v59  ;;  %v14037_v21 = vcombine.high %v10127_v0, %v10137_v43  ;;  %v10174_v26 = vrot.slane %v20768_v25, 5  ;;  %v19724_v59 = vld [vmem:[#allocation2 + $0x1a8] sm:$0xff]  ;;  %v10168_v1 = vrot.slane %v20769_v20, 5 }
 0x7f4   : > { %21071 = vst [vmem:[#allocation31_spill] sm:$0xff] %v19696_v36  ;;  %v14682_v9 = vpop.f32.mrb[232].mxu1  ;;  %v10156_v52 = vrot.slane %v10155_v10, 4  ;;  %v19730_v10 = vld [vmem:[#allocation2 + $0x1a0] sm:$0xff] }
 0x7f5   : > { %v14683_v22 = vpop.f32.mrb[233].mxu1 }
 0x7f6   : > { %v14684_v5 = vadd.f32 %v14683_v22, %v14682_v9  ;;  %v14685_v46 = vpop.f32.mrb[234].mxu1  ;;  %v21073_v9 = vshrl.u32 %v19698_v51, 16  ;;  %v10182_v22 = vshll.u32 %v9948_v31, 16  ;;  %v20773_v31 = vshrl.u32 %v19730_v10, 16 }
 0x7f7   : > { %v14686_v19 = vpop.f32.mrb[235].mxu1 }
 0x7f8   : > { %v19715_v36 = vadd.f32 %v14684_v5, %v19446_v27  ;;  %v14687_v35 = vadd.f32 %v14686_v19, %v14685_v46  ;;  %v10178_v61 = vrot.slane %v21073_v9, 4  ;;  %v10146_v27 = vrot.slane %v10145_v4, 4 }
 0x7f9   : > { %10684 = vmatmul.mubr.bf16.gmra.mrb[84].mxu1 %v14034_v7  ;;  %v10165_v19 = vrot.slane %v20770_v39, 4  ;;  %v10161_v5 = vsel %vm16813_vm2, %v10156_v52, %v10160_v16  ;;  %v20771_v46 = vshll.u32 %v19724_v59, 16  ;;  %v14036_v4 = vcombine.low %v10127_v0, %v10137_v43 }
 0x7fa   : > { %21072 = vst [vmem:[#allocation32_spill] sm:$0xff] %v19715_v36  ;;  %v19722_v49 = vadd.f32 %v14687_v35, %v19452_v44  ;;  %10691 = vmatprep.mubr.bf16.mxu1 %v14037_v21  ;;  %v10179_v44 = vor.u32 %v10178_v61, %v10174_v26  ;;  %v10151_v20 = vsel %vm16813_vm2, %v10146_v27, %v10150_v11  ;;  %v10184_v35 = vrot.slane %v10182_v22, 5  ;;  %v9951_v27 = vld [vmem:[#allocation2 + $0x1b0] sm:$0x11] }
 0x7fb   : > { %v10169_v39 = vor.u32 %v10168_v1, %v10165_v19  ;;  %v14039_v52 = vcombine.high %v10151_v20, %v10161_v5  ;;  %v10198_v0 = vrot.slane %v20771_v46, 5  ;;  %v21075_v43 = vshrl.u32 %v19724_v59, 16 }
 0x7fc   : > { %21074 = vst [vmem:[#allocation60_spill] sm:$0xff] %v19722_v49  ;;  %v14688_v29 = vpop.f32.mrb[236].mxu1  ;;  %v20772_v49 = vshll.u32 %v19730_v10, 16  ;;  %v10180_v61 = vrot.slane %v10179_v44, 4 }
 0x7fd   : > { %v14689_v7 = vpop.f32.mrb[237].mxu1  ;;  %v10170_v19 = vrot.slane %v10169_v39, 4 }
 0x7fe   : > { %v14690_v21 = vadd.f32 %v14689_v7, %v14688_v29  ;;  %v14691_v9 = vpop.f32.mrb[238].mxu1  ;;  %v10202_v29 = vrot.slane %v21075_v43, 4  ;;  %v10185_v7 = vsel %vm16813_vm2, %v10180_v61, %v10184_v35  ;;  %v21077_v35 = vshll.u32 %v18960_v58, 16 }
 0x7ff   : > { %v14692_v25 = vpop.f32.mrb[239].mxu1  ;;  %v10175_v39 = vsel %vm16813_vm2, %v10170_v19, %v10174_v26  ;;  %v9954_v26 = vld [vmem:[#allocation2 + $0x1d8] sm:$0x11] }
 0x800   : > { %v19741_v36 = vadd.f32 %v14690_v21, %v19458_v45  ;;  %v14693_v16 = vadd.f32 %v14692_v25, %v14691_v9  ;;  %v10189_v45 = vrot.slane %v20773_v31, 4  ;;  %v10192_v25 = vrot.slane %v20772_v49, 5  ;;  %v21079_v19 = vld [vmem:[#allocation37_spill] sm:$0xff] }
 0x801   : > { %10692 = vmatmul.mubr.bf16.gmra.mrb[88].mxu1 %v14036_v4  ;;  %v10203_v44 = vor.u32 %v10202_v29, %v10198_v0  ;;  %v10206_v4 = vshll.u32 %v9951_v27, 16  ;;  %v14041_v49 = vcombine.high %v10175_v39, %v10185_v7  ;;  %v10222_v61 = vrot.slane %v21077_v35, 5 }
 0x802   : > { %v19748_v11 = vadd.f32 %v14693_v16, %v19464_v56  ;;  %10699 = vmatprep.mubr.bf16.mxu1 %v14039_v52  ;;  %v14038_v56 = vcombine.low %v10151_v20, %v10161_v5  ;;  %v10193_v52 = vor.u32 %v10192_v25, %v10189_v45  ;;  %v21078_v29 = vshrl.u32 %v18960_v58, 16 }
 0x803   : > { %v10204_v31 = vrot.slane %v10203_v44, 4  ;;  %v21081_v25 = vshll.u32 %v21079_v19, 16  ;;  %v10230_v58 = vshll.u32 %v9954_v26, 16 }
 0x804   : > { %21076 = vst [vmem:[#allocation29_spill] sm:$0xff] %v19748_v11  ;;  %v14694_v1 = vpop.f32.mrb[240].mxu1  ;;  %v10208_v11 = vrot.slane %v10206_v4, 5  ;;  %v10226_v27 = vrot.slane %v21078_v29, 4  ;;  %v10194_v5 = vrot.slane %v10193_v52, 4 }
 0x805   : > { %v14695_v22 = vpop.f32.mrb[241].mxu1 }
 0x806   : > { %v14696_v21 = vadd.f32 %v14695_v22, %v14694_v1  ;;  %v14697_v9 = vpop.f32.mrb[242].mxu1  ;;  %v10216_v1 = vrot.slane %v21081_v25, 5  ;;  %v10209_v4 = vsel %vm16813_vm2, %v10204_v31, %v10208_v11  ;;  %v21082_v31 = vshll.u32 %v18974_v50, 16 }
 0x807   : > { %v14698_v16 = vpop.f32.mrb[243].mxu1 }
 0x808   : > { %v19759_v43 = vadd.f32 %v14696_v21, %v19470_v62  ;;  %v14699_v46 = vadd.f32 %v14698_v16, %v14697_v9  ;;  %v21080_v62 = vshrl.u32 %v21079_v19, 16  ;;  %v10227_v21 = vor.u32 %v10226_v27, %v10222_v61 }
 0x809   : > { %10700 = vmatmul.mubr.bf16.gmra.mrb[92].mxu1 %v14038_v56  ;;  %v10246_v11 = vrot.slane %v21082_v31, 5  ;;  %v21083_v27 = vshrl.u32 %v18974_v50, 16 }
 0x80a   : > { %v19766_v20 = vadd.f32 %v14699_v46, %v19476_v57  ;;  %10707 = vmatprep.mubr.bf16.mxu1 %v14041_v49  ;;  %v10213_v45 = vrot.slane %v21080_v62, 4  ;;  %v14040_v57 = vcombine.low %v10175_v39, %v10185_v7  ;;  %v10199_v49 = vsel %vm16813_vm2, %v10194_v5, %v10198_v0  ;;  %v9957_v0 = vld [vmem:[#allocation2 + $0x200] sm:$0x11] }
 0x80b   : > { %v14043_v29 = vcombine.high %v10199_v49, %v10209_v4  ;;  %v10228_v19 = vrot.slane %v10227_v21, 4  ;;  %v10232_v62 = vrot.slane %v10230_v58, 5  ;;  %v10250_v26 = vrot.slane %v21083_v27, 4 }
 0x80c   : > { %v14700_v22 = vpop.f32.mrb[244].mxu1  ;;  %v10217_v16 = vor.u32 %v10216_v1, %v10213_v45  ;;  %v21085_v45 = vshll.u32 %v18962_v54, 16  ;;  %v10254_v50 = vshll.u32 %v9957_v0, 16  ;;  %v21087_v27 = vshrl.u32 %v18985_v17, 16 }
 0x80d   : > { %v14701_v44 = vpop.f32.mrb[245].mxu1  ;;  %v10251_v21 = vor.u32 %v10250_v26, %v10246_v11 }
 0x80e   : > { %v14702_v9 = vadd.f32 %v14701_v44, %v14700_v22  ;;  %v14703_v56 = vpop.f32.mrb[246].mxu1  ;;  %v10218_v39 = vrot.slane %v10217_v16, 4  ;;  %v10240_v25 = vrot.slane %v21085_v45, 5  ;;  %v10233_v44 = vsel %vm16813_vm2, %v10228_v19, %v10232_v62 }
 0x80f   : > { %v14704_v46 = vpop.f32.mrb[247].mxu1  ;;  %v10256_v31 = vrot.slane %v10254_v50, 5  ;;  %v21086_v19 = vshll.u32 %v18985_v17, 16  ;;  %v10274_v26 = vrot.slane %v21087_v27, 4  ;;  %v21092_v27 = vld [vmem:[#allocation38_spill] sm:$0xff] }
 0x810   : > { %v19777_v52 = vadd.f32 %v14702_v9, %v19482_v33  ;;  %v14705_v35 = vadd.f32 %v14704_v46, %v14703_v56  ;;  %v21084_v33 = vshrl.u32 %v18962_v54, 16 }
 0x811   : > { %10708 = vmatmul.mubr.bf16.gmra.mrb[96].mxu1 %v14040_v57  ;;  %v10223_v57 = vsel %vm16813_vm2, %v10218_v39, %v10222_v61  ;;  %v10270_v62 = vrot.slane %v21086_v19, 5  ;;  %v9960_v61 = vld [vmem:[#allocation2 + $0x228] sm:$0x11]  ;;  %v21089_v39 = vshll.u32 %v18983_v18, 16 }
 0x812   : > { %v19784_v7 = vadd.f32 %v14705_v35, %v19489_v37  ;;  %10715 = vmatprep.mubr.bf16.mxu1 %v14043_v29  ;;  %v10237_v5 = vrot.slane %v21084_v33, 4  ;;  %v14042_v37 = vcombine.low %v10199_v49, %v10209_v4  ;;  %v14045_v35 = vcombine.high %v10223_v57, %v10233_v44 }
 0x813   : > { %v10252_v29 = vrot.slane %v10251_v21, 4  ;;  %v10264_v33 = vrot.slane %v21089_v39, 5  ;;  %v10278_v17 = vshll.u32 %v9960_v61, 16  ;;  %v21094_v61 = vshll.u32 %v21092_v27, 16 }
 0x814   : > { %v14706_v1 = vpop.f32.mrb[248].mxu1  ;;  %v10241_v46 = vor.u32 %v10240_v25, %v10237_v5 }
 0x815   : > { %v14707_v22 = vpop.f32.mrb[249].mxu1  ;;  %v10257_v25 = vsel %vm16813_vm2, %v10252_v29, %v10256_v31  ;;  %v21091_v31 = vshrl.u32 %v18997_v60, 16 }
 0x816   : > { %v14708_v58 = vadd.f32 %v14707_v22, %v14706_v1  ;;  %v14709_v9 = vpop.f32.mrb[250].mxu1  ;;  %v10242_v49 = vrot.slane %v10241_v46, 4  ;;  %v10275_v1 = vor.u32 %v10274_v26, %v10270_v62 }
 0x817   : > { %v14710_v56 = vpop.f32.mrb[251].mxu1  ;;  %v10298_v19 = vrot.slane %v21091_v31, 4 }
 0x818   : > { %v19795_v16 = vadd.f32 %v14708_v58, %v19493_v8  ;;  %v14711_v54 = vadd.f32 %v14710_v56, %v14709_v9  ;;  %v21088_v8 = vshrl.u32 %v18983_v18, 16  ;;  %v10247_v58 = vsel %vm16813_vm2, %v10242_v49, %v10246_v11  ;;  %v9963_v11 = vld [vmem:[#allocation2 + $0x250] sm:$0x11] }
 0x819   : > { %10716 = vmatmul.mubr.bf16.gmra.mrb[100].mxu1 %v14042_v37  ;;  %v14047_v56 = vcombine.high %v10247_v58, %v10257_v25  ;;  %v10276_v46 = vrot.slane %v10275_v1, 4  ;;  %v10288_v49 = vrot.slane %v21094_v61, 5 }
 0x81a   : > { %v19802_v4 = vadd.f32 %v14711_v54, %v19496_v55  ;;  %10723 = vmatprep.mubr.bf16.mxu1 %v14045_v35  ;;  %v10261_v0 = vrot.slane %v21088_v8, 4  ;;  %v14044_v55 = vcombine.low %v10223_v57, %v10233_v44  ;;  %v10280_v54 = vrot.slane %v10278_v17, 5 }
 0x81b   : > { %v21090_v35 = vshll.u32 %v18997_v60, 16  ;;  %v10302_v60 = vshll.u32 %v9963_v11, 16 }
 0x81c   : > { %v14712_v5 = vpop.f32.mrb[252].mxu1  ;;  %v10265_v9 = vor.u32 %v10264_v33, %v10261_v0  ;;  %v10281_v39 = vsel %vm16813_vm2, %v10276_v46, %v10280_v54 }
 0x81d   : > { %v14713_v45 = vpop.f32.mrb[253].mxu1  ;;  %v10294_v29 = vrot.slane %v21090_v35, 5 }
 0x81e   : > { %v14714_v22 = vadd.f32 %v14713_v45, %v14712_v5  ;;  %v14715_v21 = vpop.f32.mrb[254].mxu1  ;;  %v10266_v57 = vrot.slane %v10265_v9, 4 }
 0x81f   : > { %v14716_v50 = vpop.f32.mrb[255].mxu1  ;;  %v10299_v33 = vor.u32 %v10298_v19, %v10294_v29  ;;  %v21098_v19 = vld [vmem:[#allocation13_spill] sm:$0xff] }
 0x820   : > { %v19813_v37 = vadd.f32 %v14714_v22, %v19499_v13  ;;  %v14717_v18 = vadd.f32 %v14716_v50, %v14715_v21  ;;  %v21093_v13 = vshrl.u32 %v21092_v27, 16  ;;  %v10271_v17 = vsel %vm16813_vm2, %v10266_v57, %v10270_v62 }
 0x821   : > { %10724 = vmatmul.mubr.bf16.gmra.mrb[104].mxu1 %v14044_v55  ;;  %v14049_v55 = vcombine.high %v10271_v17, %v10281_v39  ;;  %v10300_v9 = vrot.slane %v10299_v33, 4  ;;  %v21099_v11 = vshrl.u32 %v21098_v19, 16 }
 0x822   : > { %v19820_v44 = vadd.f32 %v14717_v18, %v19502_v6  ;;  %10731 = vmatprep.mubr.bf16.mxu1 %v14047_v56  ;;  %v10285_v26 = vrot.slane %v21093_v13, 4  ;;  %v14046_v6 = vcombine.low %v10247_v58, %v10257_v25  ;;  %v10304_v18 = vrot.slane %v10302_v60, 5  ;;  %v21095_v56 = vld [vmem:[#allocation41_spill] sm:$0xff] }
 0x823   : > { %v21096_v46 = vshll.u32 %v21095_v56, 16  ;;  %v21097_v35 = vshrl.u32 %v21095_v56, 16  ;;  %v9966_v25 = vld [vmem:[#allocation2 + $0x278] sm:$0x11]  ;;  %v10309_v57 = vrot.slane %v21099_v11, 4  ;;  %v14048_v60 = vcombine.low %v10271_v17, %v10281_v39  ;;  %v21101_v56 = vld [vmem:[#allocation71_spill] sm:$0xff] }
 0x824   : > { %v14734_v8 = vpop.f32.mrb[0].mxu1  ;;  %v10289_v22 = vor.u32 %v10288_v49, %v10285_v26  ;;  %v10305_v61 = vsel %vm16813_vm2, %v10300_v9, %v10304_v18  ;;  %v21102_v9 = vshll.u32 %v21101_v56, 16  ;;  %v9969_v39 = vld [vmem:[#allocation2 + $0x2a0] sm:$0x11]  ;;  %v21104_v17 = vld [vmem:[#allocation15_spill] sm:$0xff] }
 0x825   : > { %v14735_v0 = vpop.f32.mrb[1].mxu1  ;;  %v10318_v54 = vrot.slane %v21096_v46, 5  ;;  %v10322_v31 = vrot.slane %v21097_v35, 4  ;;  %v21103_v46 = vshrl.u32 %v21101_v56, 16 }
 0x826   : > { %v14736_v5 = vadd.f32 %v14735_v0, %v14734_v8  ;;  %v14737_v45 = vpop.f32.mrb[2].mxu1  ;;  %v10290_v62 = vrot.slane %v10289_v22, 4  ;;  %v10326_v8 = vshll.u32 %v9966_v25, 16  ;;  %v10342_v18 = vrot.slane %v21102_v9, 5  ;;  %v21105_v25 = vld [vmem:[#allocation42_spill] sm:$0xff] }
 0x827   : > { %v14738_v1 = vpop.f32.mrb[3].mxu1  ;;  %v10323_v49 = vor.u32 %v10322_v31, %v10318_v54  ;;  %v10346_v35 = vrot.slane %v21103_v46, 4 }
 0x828   : > { %v14739_v21 = vadd.f32 %v14738_v1, %v14737_v45  ;;  %v19831_v50 = vadd.f32 %v14736_v5, %v19505_v47  ;;  %v21100_v47 = vshll.u32 %v21098_v19, 16 }
 0x829   : > { %10732 = vmatmul.mubr.bf16.gmra.mrb[108].mxu1 %v14046_v6 }
 0x82a   : > { %10739 = vmatprep.mubr.bf16.mxu1 %v14049_v55  ;;  %v19838_v58 = vadd.f32 %v14739_v21, %v19508_v30  ;;  %v10312_v27 = vrot.slane %v21100_v47, 5  ;;  %v10295_v30 = vsel %vm16813_vm2, %v10290_v62, %v10294_v29  ;;  %v10324_v21 = vrot.slane %v10323_v49, 4 }
 0x82b   : > { %v14051_v1 = vcombine.high %v10295_v30, %v10305_v61  ;;  %v10328_v55 = vrot.slane %v10326_v8, 5  ;;  %v21106_v62 = vshrl.u32 %v21105_v25, 16 }
 0x82c   : > { %v14740_v13 = vpop.f32.mrb[4].mxu1  ;;  %v10313_v45 = vor.u32 %v10312_v27, %v10309_v57 }
 0x82d   : > { %v14741_v26 = vpop.f32.mrb[5].mxu1  ;;  %v10333_v19 = vrot.slane %v21106_v62, 4  ;;  %v10329_v27 = vsel %vm16813_vm2, %v10324_v21, %v10328_v55  ;;  %v21109_v55 = vld [vmem:[#allocation43_spill] sm:$0xff] }
 0x82e   : > { %v14742_v0 = vadd.f32 %v14741_v26, %v14740_v13  ;;  %v14743_v33 = vpop.f32.mrb[6].mxu1  ;;  %v10314_v29 = vrot.slane %v10313_v45, 4  ;;  %v10347_v13 = vor.u32 %v10346_v35, %v10342_v18  ;;  %v10350_v26 = vshll.u32 %v9969_v39, 16  ;;  %v16413_v39 = vld [vmem:[#allocation2 + $0x60] sm:$0xff] }
 0x82f   : > { %v14744_v5 = vpop.f32.mrb[7].mxu1 }
 0x830   : > { %v14745_v6 = vadd.f32 %v14744_v5, %v14743_v33  ;;  %v19849_v22 = vadd.f32 %v14742_v0, %v19511_v12  ;;  %v21107_v12 = vshll.u32 %v21105_v25, 16  ;;  %v14050_v0 = vcombine.low %v10295_v30, %v10305_v61  ;;  %v10805_v30 = vld [vmem:[#allocation2 + $0x58] sm:$0x88] }
 0x831   : > { %10740 = vmatmul.mubr.bf16.gmra.mrb[112].mxu1 %v14048_v60  ;;  %v10319_v60 = vsel %vm16813_vm2, %v10314_v29, %v10318_v54  ;;  %v10348_v9 = vrot.slane %v10347_v13, 4  ;;  %v10352_v46 = vrot.slane %v10350_v26, 5  ;;  %v10859_v25 = vshrl.u32 %v16413_v39, 16 }
 0x832   : > { %10747 = vmatprep.mubr.bf16.mxu1 %v14051_v1  ;;  %v19856_v31 = vadd.f32 %v14745_v6, %v21104_v17  ;;  %v10336_v11 = vrot.slane %v21107_v12, 5  ;;  %v14053_v6 = vcombine.high %v10319_v60, %v10329_v27  ;;  %v21108_v1 = vld [vmem:[#allocation16_spill] sm:$0xff]  ;;  %v16412_v17 = vld [vmem:[#allocation2 + $0x68] sm:$0xff] }
 0x833   : > { %v10868_v21 = vshrl.u32 %v16412_v17, 16  ;;  %v10353_v62 = vsel %vm16813_vm2, %v10348_v9, %v10352_v46  ;;  %v10808_v46 = vld [vmem:[#allocation2 + $0x80] sm:$0x88] }
 0x834   : > { %v14746_v57 = vpop.f32.mrb[8].mxu1  ;;  %v10337_v5 = vor.u32 %v10336_v11, %v10333_v19 }
 0x835   : > { %v14747_v47 = vpop.f32.mrb[9].mxu1  ;;  %v10870_v19 = vrot.slane %v10868_v21, 7 }
 0x836   : > { %v14748_v49 = vadd.f32 %v14747_v47, %v14746_v57  ;;  %v14749_v8 = vpop.f32.mrb[10].mxu1  ;;  %v10338_v61 = vrot.slane %v10337_v5, 4  ;;  %v10854_v57 = vshrl.u32 %v10805_v30, 16  ;;  %v14052_v47 = vcombine.low %v10319_v60, %v10329_v27 }
 0x837   : > { %v14750_v33 = vpop.f32.mrb[11].mxu1 }
 0x838   : > { %v14751_v45 = vadd.f32 %v14750_v33, %v14749_v8  ;;  %v19867_v56 = vadd.f32 %v14748_v49, %v21108_v1  ;;  %v10343_v26 = vsel %vm16813_vm2, %v10338_v61, %v10342_v18  ;;  %v10861_v49 = vrot.slane %v10859_v25, 7 }
 0x839   : > { %10748 = vmatmul.mubr.bf16.gmra.mrb[116].mxu1 %v14050_v0  ;;  %v10871_v8 = vshll.u32 %v16412_v17, 16  ;;  %v14055_v33 = vcombine.high %v10343_v26, %v10353_v62  ;;  %v14072_v9 = vrot.slane %v10854_v57, 11  ;;  %v21111_v61 = vshrl.u32 %v19531_v40, 16 }
 0x83a   : > { %10755 = vmatprep.mubr.bf16.mxu1 %v14053_v6  ;;  %v19870_v35 = vadd.f32 %v14751_v45, %v21109_v55  ;;  %v10862_v45 = vshll.u32 %v16413_v39, 16  ;;  %v10866_v60 = vrot.slane %v10861_v49, 4  ;;  %v10876_v39 = vshrl.u32 %v10808_v46, 16 }
 0x83b   : > { %v10873_v6 = vor.u32 %v10871_v8, %v10870_v19  ;;  %v21112_v19 = vld [vmem:[#allocation17_spill] sm:$0xff]  ;;  %v21115_v8 = vshll.u32 %v19531_v40, 16 }
 0x83c   : > { %v14752_v54 = vpop.f32.mrb[12].mxu1  ;;  %v10864_v27 = vor.u32 %v10862_v45, %v10861_v49 }
 0x83d   : > { %v14753_v29 = vpop.f32.mrb[13].mxu1  ;;  %v10874_v17 = vsel %vm18073_vm8, %v10866_v60, %v10873_v6  ;;  %v10811_v60 = vld [vmem:[#allocation2 + $0xa8] sm:$0x88] }
 0x83e   : > { %v14754_v12 = vadd.f32 %v14753_v29, %v14752_v54  ;;  %v14755_v11 = vpop.f32.mrb[14].mxu1  ;;  %v14054_v54 = vcombine.low %v10343_v26, %v10353_v62  ;;  %v14073_v62 = vrot.slane %v10876_v39, 11  ;;  %v21117_v26 = vshll.u32 %v21112_v19, 16 }
 0x83f   : > { %v14756_v13 = vpop.f32.mrb[15].mxu1 }
 0x840   : > { %v14757_v0 = vadd.f32 %v14756_v13, %v14755_v11  ;;  %v19877_v5 = vadd.f32 %v14754_v12, %v19523_v63  ;;  %v10892_v63 = vrot.slane %v21111_v61, 7  ;;  %v21113_v12 = vshrl.u32 %v21112_v19, 16  ;;  %v21114_v13 = vld [vmem:[#allocation12_spill] sm:$0xff] }
 0x841   : > { %10756 = vmatmul.mubr.bf16.gmra.mrb[120].mxu1 %v14052_v47  ;;  %v21119_v19 = vshrl.u32 %v19562_v34, 16 }
 0x842   : > { %10763 = vmatprep.mubr.bf16.mxu1 %v14055_v33  ;;  %v19880_v1 = vadd.f32 %v14757_v0, %v19526_v41  ;;  %v10865_v41 = vsel %vm18073_vm8, %v14072_v9, %v10864_v27  ;;  %v10883_v11 = vrot.slane %v21113_v12, 7  ;;  %v10895_v0 = vor.u32 %v10892_v63, %v21115_v8  ;;  %v21116_v33 = vld [vmem:[#allocation18_spill] sm:$0xff] }
 0x843   : > { %v14089_v47 = vcombine.high %v10865_v41, %v10874_v17  ;;  %v10905_v12 = vrot.slane %v21119_v19, 7 }
 0x844   : > { %v14758_v21 = vpop.f32.mrb[16].mxu1  ;;  %v10886_v6 = vor.u32 %v10883_v11, %v21117_v26  ;;  %v10888_v9 = vrot.slane %v10883_v11, 4  ;;  %v16271_v11 = vld [vmem:[#allocation6 + $0x3c8] sm:$0xff]  }
 0x845   : > { %v14759_v18 = vpop.f32.mrb[17].mxu1 }
 0x846   : > { %v14760_v30 = vadd.f32 %v14759_v18, %v14758_v21  ;;  %v14761_v25 = vpop.f32.mrb[18].mxu1  ;;  %v10896_v21 = vsel %vm18073_vm8, %v10888_v9, %v10895_v0  ;;  %v21118_v18 = vshrl.u32 %v19556_v53, 16  ;;  %v10887_v39 = vsel %vm18073_vm8, %v14073_v62, %v10886_v6 }
 0x847   : > { %v14762_v29 = vpop.f32.mrb[19].mxu1  ;;  %v21121_v0 = vshll.u32 %v19556_v53, 16  ;;  %v21123_v6 = vshll.u32 %v19562_v34, 16 }
 0x848   : > { %v14763_v57 = vadd.f32 %v14762_v29, %v14761_v25  ;;  %v19891_v49 = vadd.f32 %v14760_v30, %v21114_v13  ;;  %v10914_v61 = vrot.slane %v21118_v18, 7  ;;  %v16269_v30 = vld [vmem:[#allocation6 + $0x380] sm:$0xff]   ;;  %v14088_v25 = vcombine.low %v10865_v41, %v10874_v17  ;;  %v21120_v13 = vld [vmem:[#allocation19_spill] sm:$0xff]  ;;  %v16273_v17 = vld [vmem:[#allocation6 + $0x388] sm:$0xff]  }
 0x849   : > { %10764 = vmatmul.mubr.bf16.gmra.mrb[124].mxu1 %v14054_v54  ;;  %v10898_v29 = vshrl.u32 %v10811_v60, 16  ;;  %v21122_v41 = vld [vmem:[#allocation22_spill] sm:$0xff]  ;;  %v10908_v9 = vor.u32 %v10905_v12, %v21123_v6  ;;  %v10814_v18 = vld [vmem:[#allocation2 + $0xd0] sm:$0x88] }
 0x84a   : > { %11494 = vmatprep.mubr.bf16.mxu1 %v14089_v47  ;;  %v19896_v45 = vadd.f32 %v14763_v57, %v21116_v33  ;;  %v14091_v47 = vcombine.high %v10887_v39, %v10896_v21  ;;  %v10917_v33 = vor.u32 %v10914_v61, %v21121_v0  ;;  %v16275_v60 = vld [vmem:[#allocation6 + $0x3d0] sm:$0xff]   ;;  %v21124_v61 = vshrl.u32 %v19584_v2, 16 }
 0x84b   : > { %v14074_v62 = vrot.slane %v10898_v29, 11  ;;  %v14090_v29 = vcombine.low %v10887_v39, %v10896_v21  ;;  %v16281_v21 = vld [vmem:[#allocation6 + $0x398] sm:$0xff]   ;;  %v21128_v39 = vld [vmem:[#allocation20_spill] sm:$0xff] }
 0x84c   : > { %v14764_v27 = vpop.f32.mrb[20].mxu1 }
 0x84d   : > { %v14765_v46 = vpop.f32.mrb[21].mxu1  ;;  %v10909_v34 = vsel %vm18073_vm8, %v14074_v62, %v10908_v9 }
 0x84e   : > { %v14766_v40 = vadd.f32 %v14765_v46, %v14764_v27  ;;  %v14767_v63 = vpop.f32.mrb[22].mxu1  ;;  %v10910_v27 = vrot.slane %v10905_v12, 4  ;;  %v10920_v12 = vshrl.u32 %v10814_v18, 16  ;;  %v16283_v18 = vld [vmem:[#allocation6 + $0x3e0] sm:$0xff]  }
 0x84f   : > { %v14768_v54 = vpop.f32.mrb[23].mxu1 }
 0x850   : > { %v14769_v57 = vadd.f32 %v14768_v54, %v14767_v63  ;;  %v19909_v8 = vadd.f32 %v14766_v40, %v21120_v13  ;;  %v10918_v53 = vsel %vm18073_vm8, %v10910_v27, %v10917_v33  ;;  %v10936_v63 = vrot.slane %v21124_v61, 7  ;;  %v16277_v54 = vld [vmem:[#allocation6 + $0x390] sm:$0xff]   ;;  %v21126_v33 = vld [vmem:[#allocation23_spill] sm:$0xff]  ;;  %v10817_v61 = vld [vmem:[#allocation2 + $0xf8] sm:$0x88] }
 0x851   : > { %11495 = vmatmul.mubr.bf16.vlgmr.msra.gmra.mrb[128].mxu1 %v14088_v25  ;;  %v14093_v0 = vcombine.high %v10909_v34, %v10918_v53  ;;  %v14075_v9 = vrot.slane %v10920_v12, 11  ;;  %v21129_v27 = vshll.u32 %v19590_v42, 16  ;;  %v14092_v12 = vcombine.low %v10909_v34, %v10918_v53  ;;  %v16289_v53 = vld [vmem:[#allocation6 + $0x3a8] sm:$0xff]  }
 0x852   : > { %11502 = vmatprep.mubr.bf16.mxu1 %v14091_v47  ;;  %15055 = vmatpush3.bf16.msra.mxu1 %v16269_v30  ;;  %v19914_v26 = vadd.f32 %v14769_v57, %v21122_v41  ;;  %v16279_v47 = vld [vmem:[#allocation6 + $0x3d8] sm:$0xff]   ;;  %v21134_v34 = vld [vmem:[#allocation25_spill] sm:$0xff] }
 0x853   : > { %15056 = vmatprep.subr.bf16.mxu1 %v16271_v11  ;;  %v21125_v11 = vshrl.u32 %v19590_v42, 16 }
 0x854   : > { %v14770_v46 = vpop.f32.mrb[24].mxu1 }
 0x855   : > { %v14771_v40 = vpop.f32.mrb[25].mxu1  ;;  %v10927_v57 = vrot.slane %v21125_v11, 7 }
 0x856   : > { %v14772_v30 = vadd.f32 %v14771_v40, %v14770_v46  ;;  %v14773_v25 = vpop.f32.mrb[26].mxu1  ;;  %15057 = vmatpush3.bf16.msra.mxu1 %v16273_v17  ;;  %v21127_v17 = vshll.u32 %v19584_v2, 16 }
 0x857   : > { %v14774_v19 = vpop.f32.mrb[27].mxu1  ;;  %15058 = vmatprep.subr.bf16.mxu1 %v16275_v60  ;;  %v10930_v60 = vor.u32 %v10927_v57, %v21129_v27  ;;  %v10932_v46 = vrot.slane %v10927_v57, 4  ;;  %v10942_v57 = vshrl.u32 %v10817_v61, 16  ;;  %v16291_v61 = vld [vmem:[#allocation6 + $0x3f0] sm:$0xff]  }
 0x858   : > { %v14775_v13 = vadd.f32 %v14774_v19, %v14773_v25  ;;  %v19927_v41 = vadd.f32 %v14772_v30, %v21126_v33  ;;  %v10939_v6 = vor.u32 %v10936_v63, %v21127_v17  ;;  %v21130_v63 = vshrl.u32 %v19613_v3, 16  ;;  %v16285_v19 = vld [vmem:[#allocation6 + $0x3a0] sm:$0xff]  }
 0x859   : > { %11503 = vmatmul.mubr.bf16.gmra.mrb[132].mxu1 %v14090_v29  ;;  %v10931_v42 = vsel %vm18073_vm8, %v14075_v9, %v10930_v60  ;;  %v14076_v60 = vrot.slane %v10942_v57, 11 }
 0x85a   : > { %11510 = vmatprep.mubr.bf16.mxu1 %v14093_v0  ;;  %15059 = vmatpush3.bf16.msra.mxu1 %v16277_v54  ;;  %v19932_v62 = vadd.f32 %v14775_v13, %v21128_v39  ;;  %v10940_v2 = vsel %vm18073_vm8, %v10932_v46, %v10939_v6  ;;  %v10958_v25 = vrot.slane %v21130_v63, 7  ;;  %v16287_v0 = vld [vmem:[#allocation6 + $0x3e8] sm:$0xff]   ;;  %v21135_v46 = vshll.u32 %v19619_v28, 16  ;;  %v10820_v63 = vld [vmem:[#allocation2 + $0x120] sm:$0x88] }
 0x85b   : > { %15060 = vmatprep.subr.bf16.mxu1 %v16279_v47  ;;  %v21131_v47 = vshrl.u32 %v19619_v28, 16  ;;  %v14095_v17 = vcombine.high %v10931_v42, %v10940_v2  ;;  %v21132_v6 = vld [vmem:[#allocation21_spill] sm:$0xff]  ;;  %v14094_v57 = vcombine.low %v10931_v42, %v10940_v2  ;;  %v16296_v2 = vld [vmem:[#allocation6 + $0x3b8] sm:$0xff]   ;;  %v21140_v42 = vld [vmem:[#allocation24_spill] sm:$0xff] }
 0x85c   : > { %v14776_v40 = vpop.f32.mrb[28].mxu1 }
 0x85d   : > { %v14777_v30 = vpop.f32.mrb[29].mxu1  ;;  %v10949_v13 = vrot.slane %v21131_v47, 7 }
 0x85e   : > { %v14778_v54 = vadd.f32 %v14777_v30, %v14776_v40  ;;  %v14779_v29 = vpop.f32.mrb[30].mxu1  ;;  %15061 = vmatpush3.bf16.msra.mxu1 %v16281_v21  ;;  %v21133_v21 = vshll.u32 %v19613_v3, 16 }
 0x85f   : > { %v14780_v11 = vpop.f32.mrb[31].mxu1  ;;  %15062 = vmatprep.subr.bf16.mxu1 %v16283_v18  ;;  %v10952_v18 = vor.u32 %v10949_v13, %v21135_v46  ;;  %v10954_v40 = vrot.slane %v10949_v13, 4  ;;  %v10964_v13 = vshrl.u32 %v10820_v63, 16  ;;  %v16298_v63 = vld [vmem:[#allocation6 + $0x440] sm:$0xff]  }
 0x860   : > { %v14781_v33 = vadd.f32 %v14780_v11, %v14779_v29  ;;  %v19945_v39 = vadd.f32 %v14778_v54, %v21132_v6  ;;  %v10961_v27 = vor.u32 %v10958_v25, %v21133_v21  ;;  %v21136_v25 = vshrl.u32 %v19643_v38, 16  ;;  %v16293_v11 = vld [vmem:[#allocation6 + $0x3b0] sm:$0xff]  }
 0x861   : > { %11511 = vmatmul.mubr.bf16.gmra.mrb[136].mxu1 %v14092_v12  ;;  %v10953_v28 = vsel %vm18073_vm8, %v14076_v60, %v10952_v18  ;;  %v14077_v18 = vrot.slane %v10964_v13, 11 }
 0x862   : > { %11518 = vmatprep.mubr.bf16.mxu1 %v14095_v17  ;;  %15063 = vmatpush3.bf16.msra.mxu1 %v16285_v19  ;;  %v19950_v9 = vadd.f32 %v14781_v33, %v21134_v34  ;;  %v10962_v3 = vsel %vm18073_vm8, %v10954_v40, %v10961_v27  ;;  %v10980_v29 = vrot.slane %v21136_v25, 7  ;;  %v16295_v17 = vld [vmem:[#allocation6 + $0x3f8] sm:$0xff]   ;;  %v21138_v27 = vld [vmem:[#allocation28_spill] sm:$0xff]  ;;  %v21141_v40 = vshll.u32 %v19649_v48, 16 }
 0x863   : > { %15064 = vmatprep.subr.bf16.mxu1 %v16287_v0  ;;  %v21137_v0 = vshrl.u32 %v19649_v48, 16  ;;  %v14097_v21 = vcombine.high %v10953_v28, %v10962_v3  ;;  %v10823_v25 = vld [vmem:[#allocation2 + $0x148] sm:$0x88] }
 0x864   : > { %v14782_v30 = vpop.f32.mrb[32].mxu1 }
 0x865   : > { %v14783_v54 = vpop.f32.mrb[33].mxu1  ;;  %v10971_v33 = vrot.slane %v21137_v0, 7  ;;  %v10986_v0 = vshrl.u32 %v10823_v25, 16 }
 0x866   : > { %v14784_v19 = vadd.f32 %v14783_v54, %v14782_v30  ;;  %v14785_v12 = vpop.f32.mrb[34].mxu1  ;;  %15065 = vmatpush3.bf16.msra.mxu1 %v16289_v53  ;;  %v21139_v53 = vshll.u32 %v19643_v38, 16 }
 0x867   : > { %v14786_v47 = vpop.f32.mrb[35].mxu1  ;;  %15066 = vmatprep.subr.bf16.mxu1 %v16291_v61  ;;  %v10974_v61 = vor.u32 %v10971_v33, %v21141_v40  ;;  %v10976_v30 = vrot.slane %v10971_v33, 4  ;;  %v21143_v33 = vshrl.u32 %v19677_v24, 16 }
 0x868   : > { %v14787_v6 = vadd.f32 %v14786_v47, %v14785_v12  ;;  %v19963_v34 = vadd.f32 %v14784_v19, %v21138_v27  ;;  %v10983_v46 = vor.u32 %v10980_v29, %v21139_v53  ;;  %v21142_v29 = vshrl.u32 %v19671_v15, 16 }
 0x869   : > { %11519 = vmatmul.mubr.bf16.gmra.mrb[140].mxu1 %v14094_v57  ;;  %v14096_v47 = vcombine.low %v10953_v28, %v10962_v3  ;;  %v10975_v48 = vsel %vm18073_vm8, %v14077_v18, %v10974_v61  ;;  %v21144_v53 = vshll.u32 %v19671_v15, 16  ;;  %v21145_v3 = vld [vmem:[#allocation31_spill] sm:$0xff] }
 0x86a   : > { %11526 = vmatprep.mubr.bf16.mxu1 %v14097_v21  ;;  %15067 = vmatpush3.bf16.msra.mxu1 %v16293_v11  ;;  %v19968_v60 = vadd.f32 %v14787_v6, %v21140_v42  ;;  %v10984_v38 = vsel %vm18073_vm8, %v10976_v30, %v10983_v46  ;;  %v11002_v12 = vrot.slane %v21142_v29, 7  ;;  %v21146_v42 = vshll.u32 %v19677_v24, 16  ;;  %v10826_v30 = vld [vmem:[#allocation2 + $0x170] sm:$0x88] }
 0x86b   : > { %15068 = vmatprep.subr.bf16.mxu1 %v16295_v17  ;;  %v10993_v17 = vrot.slane %v21143_v33, 7  ;;  %v14099_v21 = vcombine.high %v10975_v48, %v10984_v38  ;;  %v14098_v29 = vcombine.low %v10975_v48, %v10984_v38  ;;  %v21148_v24 = vshrl.u32 %v19704_v14, 16  ;;  %v21149_v33 = vld [vmem:[#allocation32_spill] sm:$0xff] }
 0x86c   : > { %v14788_v54 = vpop.f32.mrb[36].mxu1  ;;  %v11005_v46 = vor.u32 %v11002_v12, %v21144_v53  ;;  %v21151_v53 = vld [vmem:[#allocation60_spill] sm:$0xff] }
 0x86d   : > { %v14789_v19 = vpop.f32.mrb[37].mxu1  ;;  %v10996_v18 = vor.u32 %v10993_v17, %v21146_v42  ;;  %v10998_v40 = vrot.slane %v10993_v17, 4 }
 0x86e   : > { %v14790_v11 = vadd.f32 %v14789_v19, %v14788_v54  ;;  %v14791_v57 = vpop.f32.mrb[38].mxu1  ;;  %15069 = vmatpush3.bf16.msra.mxu1 %v16296_v2  ;;  %v14078_v2 = vrot.slane %v10986_v0, 11  ;;  %v21147_v54 = vshrl.u32 %v19698_v51, 16 }
 0x86f   : > { %v14792_v13 = vpop.f32.mrb[39].mxu1  ;;  %15166 = vmatprep.subr.bf16.mxu1 %v16298_v63 }
 0x870   : > { %v14793_v6 = vadd.f32 %v14792_v13, %v14791_v57  ;;  %v19981_v27 = vadd.f32 %v14790_v11, %v19689_v32  ;;  %v11006_v32 = vsel %vm18073_vm8, %v10998_v40, %v11005_v46  ;;  %v11024_v25 = vrot.slane %v21147_v54, 7 }
 0x871   : > { %11527 = vmatmul.mubr.bf16.gmra.mrb[144].mxu1 %v14096_v47  ;;  %v10997_v11 = vsel %vm18073_vm8, %v14078_v2, %v10996_v18  ;;  %v11008_v57 = vshrl.u32 %v10826_v30, 16  ;;  %v11015_v47 = vrot.slane %v21148_v24, 7  ;;  %v21152_v46 = vshll.u32 %v19704_v14, 16  ;;  %v10829_v18 = vld [vmem:[#allocation2 + $0x198] sm:$0x88] }
 0x872   : > { %11534 = vmatprep.mubr.bf16.mxu1 %v14099_v21  ;;  %v19986_v28 = vadd.f32 %v14793_v6, %v21145_v3  ;;  %v14101_v0 = vcombine.high %v10997_v11, %v11006_v32  ;;  %v21150_v6 = vshll.u32 %v19698_v51, 16  ;;  %v21153_v30 = vshrl.u32 %v19724_v59, 16 }
 0x873   : > { %v14079_v48 = vrot.slane %v11008_v57, 11  ;;  %v11018_v3 = vor.u32 %v11015_v47, %v21152_v46  ;;  %v11020_v2 = vrot.slane %v11015_v47, 4  ;;  %v21154_v14 = vshrl.u32 %v19730_v10, 16 }
 0x874   : > { %v14794_v61 = vpop.f32.mrb[40].mxu1  ;;  %v11027_v21 = vor.u32 %v11024_v25, %v21150_v6  ;;  %v14100_v25 = vcombine.low %v10997_v11, %v11006_v32  ;;  %v21157_v6 = vshll.u32 %v19730_v10, 16 }
 0x875   : > { %v14795_v63 = vpop.f32.mrb[41].mxu1 }
 0x876   : > { %v14796_v15 = vadd.f32 %v14795_v63, %v14794_v61  ;;  %v14797_v19 = vpop.f32.mrb[42].mxu1  ;;  %v11028_v61 = vsel %vm18073_vm8, %v11020_v2, %v11027_v21  ;;  %v11046_v63 = vrot.slane %v21153_v30, 7 }
 0x877   : > { %v14798_v12 = vpop.f32.mrb[43].mxu1 }
 0x878   : > { %v14799_v13 = vadd.f32 %v14798_v12, %v14797_v19  ;;  %v19999_v17 = vadd.f32 %v14796_v15, %v21149_v33  ;;  %v11019_v19 = vsel %vm18073_vm8, %v14079_v48, %v11018_v3  ;;  %v11037_v12 = vrot.slane %v21154_v14, 7  ;;  %v21156_v33 = vld [vmem:[#allocation29_spill] sm:$0xff] }
 0x879   : > { %11535 = vmatmul.mubr.bf16.gmra.mrb[148].mxu1 %v14098_v29  ;;  %v11030_v29 = vshrl.u32 %v10829_v18, 16  ;;  %v14103_v24 = vcombine.high %v11019_v19, %v11028_v61 }
 0x87a   : > { %11542 = vmatprep.mubr.bf16.mxu1 %v14101_v0  ;;  %v20004_v38 = vadd.f32 %v14799_v13, %v21151_v53  ;;  %v21155_v13 = vshll.u32 %v19724_v59, 16  ;;  %v11040_v21 = vor.u32 %v11037_v12, %v21157_v6  ;;  %v11042_v53 = vrot.slane %v11037_v12, 4  ;;  %v21158_v12 = vld [vmem:[#allocation69_spill] sm:$0xff] }
 0x87b   : > { %v14080_v11 = vrot.slane %v11030_v29, 11 }
 0x87c   : > { %v14800_v42 = vpop.f32.mrb[44].mxu1  ;;  %v11049_v0 = vor.u32 %v11046_v63, %v21155_v13 }
 0x87d   : > { %v14801_v40 = vpop.f32.mrb[45].mxu1  ;;  %v11041_v59 = vsel %vm18073_vm8, %v14080_v11, %v11040_v21 }
 0x87e   : > { %v14802_v51 = vadd.f32 %v14801_v40, %v14800_v42  ;;  %v14803_v54 = vpop.f32.mrb[46].mxu1  ;;  %v11050_v3 = vsel %vm18073_vm8, %v11042_v53, %v11049_v0  ;;  %v14102_v42 = vcombine.low %v11019_v19, %v11028_v61  ;;  %v21162_v53 = vld [vmem:[#allocation72_spill] sm:$0xff] }
 0x87f   : > { %v14804_v15 = vpop.f32.mrb[47].mxu1  ;;  %v14105_v30 = vcombine.high %v11041_v59, %v11050_v3  ;;  %v14104_v29 = vcombine.low %v11041_v59, %v11050_v3 }
 0x880   : > { %v14805_v57 = vadd.f32 %v14804_v15, %v14803_v54  ;;  %v20017_v47 = vadd.f32 %v14802_v51, %v19741_v36 }
 0x881   : > { %11543 = vmatmul.mubr.bf16.gmra.mrb[152].mxu1 %v14100_v25 }
 0x882   : > { %11550 = vmatprep.mubr.bf16.mxu1 %v14103_v24  ;;  %v20022_v32 = vadd.f32 %v14805_v57, %v21156_v33  ;;  %v21159_v57 = vld [vmem:[#allocation70_spill] sm:$0xff] }
 0x884   : > { %v14806_v48 = vpop.f32.mrb[48].mxu1 }
 0x885   : > { %v14807_v46 = vpop.f32.mrb[49].mxu1 }
 0x886   : > { %v14808_v36 = vadd.f32 %v14807_v46, %v14806_v48  ;;  %v14809_v2 = vpop.f32.mrb[50].mxu1  ;;  %v21163_v48 = vld [vmem:[#allocation73_spill] sm:$0xff] }
 0x887   : > { %v14810_v18 = vpop.f32.mrb[51].mxu1  ;;  %v21164_v46 = vcombine.high %v21162_v53, %v21163_v48 }
 0x888   : > { %v14811_v40 = vadd.f32 %v14810_v18, %v14809_v2  ;;  %v20031_v63 = vadd.f32 %v14808_v36, %v19759_v43  ;;  %v21160_v43 = vcombine.high %v21158_v12, %v21159_v57 }
 0x889   : > { %11551 = vmatmul.mubr.bf16.gmra.mrb[156].mxu1 %v14102_v42 }
 0x88a   : > { %11558 = vmatprep.mubr.bf16.mxu1 %v14105_v30  ;;  %v20034_v10 = vadd.f32 %v14811_v40, %v19766_v20  ;;  %v21165_v40 = vcombine.low %v21162_v53, %v21163_v48  ;;  %v21166_v30 = vld [vmem:[#allocation74_spill] sm:$0xff] }
 0x88b   : > { %v20081_v53 = vld [vmem:[#allocation2] sm:$0xff] }
 0x88c   : > { %v14812_v51 = vpop.f32.mrb[52].mxu1 }
 0x88d   : > { %v14813_v54 = vpop.f32.mrb[53].mxu1 }
 0x88e   : > { %v14814_v25 = vadd.f32 %v14813_v54, %v14812_v51  ;;  %v14815_v15 = vpop.f32.mrb[54].mxu1  ;;  %v21167_v51 = vld [vmem:[#allocation75_spill] sm:$0xff] }
 0x88f   : > { %v14816_v61 = vpop.f32.mrb[55].mxu1  ;;  %v21168_v54 = vcombine.high %v21166_v30, %v21167_v51 }
 0x890   : > { %v14817_v19 = vadd.f32 %v14816_v61, %v14815_v15  ;;  %v20037_v14 = vadd.f32 %v14814_v25, %v19777_v52  ;;  %v21161_v52 = vcombine.low %v21158_v12, %v21159_v57  ;;  %v21169_v57 = vcombine.low %v21166_v30, %v21167_v51 }
 0x891   : > { %11559 = vmatmul.mubr.bf16.gmra.mrb[160].mxu1 %v14104_v29  ;;  %v11192_v30 = vshll.u32 %v20081_v53, 16 }
 0x892   : > { %11566 = vmatprep.mubr.bf16.mxu1 %v21160_v43  ;;  %v20043_v24 = vadd.f32 %v14817_v19, %v19784_v7 }
 0x894   : > { %v14818_v20 = vpop.f32.mrb[56].mxu1 }
 0x895   : > { %v14819_v13 = vpop.f32.mrb[57].mxu1 }
 0x896   : > { %v14820_v0 = vadd.f32 %v14819_v13, %v14818_v20  ;;  %v14821_v33 = vpop.f32.mrb[58].mxu1  ;;  %v21170_v20 = vld [vmem:[#allocation76_spill] sm:$0xff]  ;;  %v21171_v13 = vld [vmem:[#allocation77_spill] sm:$0xff] }
 0x897   : > { %v14822_v11 = vpop.f32.mrb[59].mxu1 }
 0x898   : > { %v14823_v6 = vadd.f32 %v14822_v11, %v14821_v33  ;;  %v20046_v21 = vadd.f32 %v14820_v0, %v19795_v16 }
 0x899   : > { %11567 = vmatmul.mubr.bf16.gmra.mrb[164].mxu1 %v21161_v52 }
 0x89a   : > { %11574 = vmatprep.mubr.bf16.mxu1 %v21164_v46  ;;  %v20055_v7 = vadd.f32 %v14823_v6, %v19802_v4 }
 0x89c   : > { %v14824_v3 = vpop.f32.mrb[60].mxu1 }
 0x89d   : > { %v14825_v36 = vpop.f32.mrb[61].mxu1 }
 0x89e   : > { %v14826_v2 = vadd.f32 %v14825_v36, %v14824_v3  ;;  %v14827_v42 = vpop.f32.mrb[62].mxu1  ;;  %v10850_v3 = vld [vmem:[#allocation2 + $0x2b0] sm:$0x88] }
 0x89f   : > { %v14828_v18 = vpop.f32.mrb[63].mxu1 }
 0x8a0   : > { %v14829_v59 = vadd.f32 %v14828_v18, %v14827_v42  ;;  %v20058_v16 = vadd.f32 %v14826_v2, %v19813_v37  ;;  %v21174_v2 = vld [vmem:[#allocation78_spill] sm:$0xff]  ;;  %v21175_v42 = vld [vmem:[#allocation79_spill] sm:$0xff] }
 0x8a1   : > { %11575 = vmatmul.mubr.bf16.gmra.mrb[168].mxu1 %v21165_v40  ;;  %v21176_v18 = vcombine.high %v21174_v2, %v21175_v42 }
 0x8a2   : > { %11582 = vmatprep.mubr.bf16.mxu1 %v21168_v54  ;;  %v20067_v4 = vadd.f32 %v14829_v59, %v19820_v44  ;;  %v21172_v44 = vcombine.high %v21170_v20, %v21171_v13  ;;  %v11184_v59 = vshrl.u32 %v10850_v3, 16 }
 0x8a4   : > { %v14846_v25 = vpop.f32.mrb[64].mxu1 }
 0x8a5   : > { %v14847_v15 = vpop.f32.mrb[65].mxu1 }
 0x8a6   : > { %v14848_v29 = vadd.f32 %v14847_v15, %v14846_v25  ;;  %v14849_v61 = vpop.f32.mrb[66].mxu1 }
 0x8a7   : > { %v14850_v19 = vpop.f32.mrb[67].mxu1 }
 0x8a8   : > { %v20070_v12 = vadd.f32 %v14848_v29, %v19831_v50  ;;  %v14851_v37 = vadd.f32 %v14850_v19, %v14849_v61  ;;  %v11189_v50 = vshrl.u32 %v20081_v53, 16  ;;  %v14087_v29 = vrot.slane %v11184_v59, 11 }
 0x8a9   : > { %11583 = vmatmul.mubr.bf16.gmra.mrb[172].mxu1 %v21169_v57  ;;  %v21177_v57 = vcombine.low %v21174_v2, %v21175_v42 }
 0x8aa   : > { %v20076_v43 = vadd.f32 %v14851_v37, %v19838_v58  ;;  %11590 = vmatprep.mubr.bf16.mxu1 %v21172_v44  ;;  %v21173_v58 = vcombine.low %v21170_v20, %v21171_v13  ;;  %v11191_v40 = vrot.slane %v11189_v50, 7  ;;  %v21178_v13 = vld [vmem:[#allocation80_spill] sm:$0xff]  ;;  %v21179_v44 = vld [vmem:[#allocation81_spill] sm:$0xff] }
 0x8ab   : > { %v21181_v2 = vcombine.low %v21178_v13, %v21179_v44 }
 0x8ac   : > { %v14852_v0 = vpop.f32.mrb[68].mxu1  ;;  %v11194_v61 = vor.u32 %v11192_v30, %v11191_v40  ;;  %v11196_v19 = vrot.slane %v11191_v40, 4 }
 0x8ad   : > { %v14853_v33 = vpop.f32.mrb[69].mxu1 }
 0x8ae   : > { %v14854_v11 = vadd.f32 %v14853_v33, %v14852_v0  ;;  %v14855_v6 = vpop.f32.mrb[70].mxu1  ;;  %v21180_v0 = vcombine.high %v21178_v13, %v21179_v44  ;;  %v11195_v33 = vsel %vm18073_vm8, %v14087_v29, %v11194_v61  ;;  %v16302_v44 = vld [vmem:[#allocation6 + $0x448] sm:$0xff]  }
 0x8af   : > { %v14856_v52 = vpop.f32.mrb[71].mxu1 }
 0x8b0   : > { %v20085_v48 = vadd.f32 %v14854_v11, %v19849_v22  ;;  %v14857_v46 = vadd.f32 %v14856_v52, %v14855_v6  ;;  %v11204_v11 = vsel %vm18073_vm8, %v11196_v19, %v11194_v61 }
 0x8b1   : > { %11591 = vmatmul.mubr.bf16.gmra.mrb[176].mxu1 %v21173_v58  ;;  %v14118_v59 = vcombine.low %v11195_v33, %v11204_v11 }
 0x8b2   : > { %v20091_v36 = vadd.f32 %v14857_v46, %v19856_v31  ;;  %11598 = vmatprep.mubr.bf16.mxu1 %v21176_v18  ;;  %v14119_v46 = vcombine.high %v11195_v33, %v11204_v11  ;;  %v16415_v33 = vld [vmem:[#allocation2 + $0x90] sm:$0xff]  ;;  %v16416_v11 = vld [vmem:[#allocation2 + $0x88] sm:$0xff] }
 0x8b4   : > { %v14858_v51 = vpop.f32.mrb[72].mxu1 }
 0x8b5   : > { %v14859_v22 = vpop.f32.mrb[73].mxu1 }
 0x8b6   : > { %v14860_v54 = vadd.f32 %v14859_v22, %v14858_v51  ;;  %v14861_v25 = vpop.f32.mrb[74].mxu1 }
 0x8b7   : > { %v14862_v15 = vpop.f32.mrb[75].mxu1 }
 0x8b8   : > { %v20098_v37 = vadd.f32 %v14860_v54, %v19867_v56  ;;  %v14863_v31 = vadd.f32 %v14862_v15, %v14861_v25  ;;  %v21182_v25 = vld [vmem:[#allocation30_spill] sm:$0xff]  ;;  %v21183_v15 = vld [vmem:[#allocation27_spill] sm:$0xff] }
 0x8b9   : > { %11599 = vmatmul.mubr.bf16.gmra.mrb[180].mxu1 %v21177_v57  ;;  %v21184_v29 = vcombine.high %v21182_v25, %v21183_v15  ;;  %v16300_v57 = vld [vmem:[#allocation6 + $0x400] sm:$0xff]  }
 0x8ba   : > { %v20104_v20 = vadd.f32 %v14863_v31, %v19870_v35  ;;  %11606 = vmatprep.mubr.bf16.mxu1 %v21180_v0 }
 0x8bc   : > { %v14864_v56 = vpop.f32.mrb[76].mxu1 }
 0x8bd   : > { %v14865_v6 = vpop.f32.mrb[77].mxu1 }
 0x8be   : > { %v14866_v52 = vadd.f32 %v14865_v6, %v14864_v56  ;;  %v14867_v50 = vpop.f32.mrb[78].mxu1  ;;  %v14139_v56 = vcombine.high %v16416_v11, %v16415_v33 }
 0x8bf   : > { %v14868_v3 = vpop.f32.mrb[79].mxu1 }
 0x8c0   : > { %v20114_v58 = vadd.f32 %v14866_v52, %v19877_v5  ;;  %v14869_v35 = vadd.f32 %v14868_v3, %v14867_v50  ;;  %v16304_v52 = vld [vmem:[#allocation6 + $0x408] sm:$0xff]   ;;  %v16306_v50 = vld [vmem:[#allocation6 + $0x450] sm:$0xff]  }
 0x8c1   : > { %11607 = vmatmul.mubr.bf16.gmra.mrb[184].mxu1 %v21181_v2  ;;  %v16308_v2 = vld [vmem:[#allocation6 + $0x410] sm:$0xff]  }
 0x8c2   : > { %v20120_v42 = vadd.f32 %v14869_v35, %v19880_v1  ;;  %11614 = vmatprep.mubr.bf16.mxu1 %v14119_v46 }
 0x8c4   : > { %v14870_v55 = vpop.f32.mrb[80].mxu1 }
 0x8c5   : > { %v14871_v18 = vpop.f32.mrb[81].mxu1 }
 0x8c6   : > { %v14872_v40 = vadd.f32 %v14871_v18, %v14870_v55  ;;  %v14873_v30 = vpop.f32.mrb[82].mxu1  ;;  %v14138_v55 = vcombine.low %v16416_v11, %v16415_v33  ;;  %v16419_v33 = vld [vmem:[#allocation2 + $0xe0] sm:$0xff]  ;;  %v16420_v11 = vld [vmem:[#allocation2 + $0xd8] sm:$0xff] }
 0x8c7   : > { %v14874_v51 = vpop.f32.mrb[83].mxu1 }
 0x8c8   : > { %v20123_v22 = vadd.f32 %v14872_v40, %v19891_v49  ;;  %v14875_v5 = vadd.f32 %v14874_v51, %v14873_v30  ;;  %v16417_v30 = vld [vmem:[#allocation2 + $0xb8] sm:$0xff]  ;;  %v16418_v51 = vld [vmem:[#allocation2 + $0xb0] sm:$0xff] }
 0x8c9   : > { %11615 = vmatmul.mubr.bf16.gmra.mrb[188].mxu1 %v14118_v59  ;;  %v16310_v59 = vld [vmem:[#allocation6 + $0x458] sm:$0xff]  }
 0x8ca   : > { %v20126_v54 = vadd.f32 %v14875_v5, %v19896_v45  ;;  %11976 = vmatprep.mubr.bf16.mxu1 %v21184_v29  ;;  %v21185_v45 = vcombine.low %v21182_v25, %v21183_v15  ;;  %v14141_v5 = vcombine.high %v16418_v51, %v16417_v30  ;;  %v16312_v15 = vld [vmem:[#allocation6 + $0x418] sm:$0xff]   ;;  %v16314_v29 = vld [vmem:[#allocation6 + $0x460] sm:$0xff]  }
 0x8cc   : > { %v14876_v1 = vpop.f32.mrb[84].mxu1 }
 0x8cd   : > { %v14877_v61 = vpop.f32.mrb[85].mxu1 }
 0x8ce   : > { %v14878_v19 = vadd.f32 %v14877_v61, %v14876_v1  ;;  %v14879_v31 = vpop.f32.mrb[86].mxu1 }
 0x8cf   : > { %v14880_v13 = vpop.f32.mrb[87].mxu1 }
 0x8d0   : > { %v20132_v0 = vadd.f32 %v14878_v19, %v19909_v8  ;;  %v14881_v49 = vadd.f32 %v14880_v13, %v14879_v31 }
 0x8d1   : > { %11977 = vmatmul.mubr.bf16.vlgmr.msra.gmra.mrb[192].mxu1 %v21185_v45 }
 0x8d2   : > { %v20138_v6 = vadd.f32 %v14881_v49, %v19914_v26  ;;  %11984 = vmatprep.mubr.bf16.mxu1 %v14139_v56  ;;  %15167 = vmatpush3.bf16.msra.mxu1 %v16300_v57  ;;  %v14140_v57 = vcombine.low %v16418_v51, %v16417_v30  ;;  %v14143_v56 = vcombine.high %v16420_v11, %v16419_v33  ;;  %v16422_v30 = vld [vmem:[#allocation2 + $0x100] sm:$0xff] }
 0x8d3   : > { %15168 = vmatprep.subr.bf16.mxu1 %v16302_v44  ;;  %v16318_v44 = vld [vmem:[#allocation6 + $0x468] sm:$0xff]  }
 0x8d4   : > { %v14882_v46 = vpop.f32.mrb[88].mxu1 }
 0x8d5   : > { %v14883_v3 = vpop.f32.mrb[89].mxu1 }
 0x8d6   : > { %v14884_v8 = vadd.f32 %v14883_v3, %v14882_v46  ;;  %v14885_v35 = vpop.f32.mrb[90].mxu1  ;;  %15169 = vmatpush3.bf16.msra.mxu1 %v16304_v52  ;;  %v16320_v52 = vld [vmem:[#allocation6 + $0x428] sm:$0xff]  }
 0x8d7   : > { %v14886_v18 = vpop.f32.mrb[91].mxu1  ;;  %15170 = vmatprep.subr.bf16.mxu1 %v16306_v50  ;;  %v16322_v50 = vld [vmem:[#allocation6 + $0x470] sm:$0xff]  }
 0x8d8   : > { %v20141_v40 = vadd.f32 %v14884_v8, %v19927_v41  ;;  %v14887_v26 = vadd.f32 %v14886_v18, %v14885_v35  ;;  %v16316_v41 = vld [vmem:[#allocation6 + $0x420] sm:$0xff]   ;;  %v16326_v18 = vld [vmem:[#allocation6 + $0x478] sm:$0xff]  }
 0x8d9   : > { %11985 = vmatmul.mubr.bf16.gmra.mrb[196].mxu1 %v14138_v55 }
 0x8da   : > { %v20144_v25 = vadd.f32 %v14887_v26, %v19932_v62  ;;  %11992 = vmatprep.mubr.bf16.mxu1 %v14141_v5  ;;  %15171 = vmatpush3.bf16.msra.mxu1 %v16308_v2  ;;  %v14142_v2 = vcombine.low %v16420_v11, %v16419_v33  ;;  %v16421_v26 = vld [vmem:[#allocation2 + $0x108] sm:$0xff] }
 0x8db   : > { %15172 = vmatprep.subr.bf16.mxu1 %v16310_v59  ;;  %v14145_v51 = vcombine.high %v16422_v30, %v16421_v26 }
 0x8dc   : > { %v14888_v1 = vpop.f32.mrb[92].mxu1 }
 0x8dd   : > { %v14889_v61 = vpop.f32.mrb[93].mxu1 }
 0x8de   : > { %v14890_v19 = vadd.f32 %v14889_v61, %v14888_v1  ;;  %v14891_v31 = vpop.f32.mrb[94].mxu1  ;;  %15173 = vmatpush3.bf16.msra.mxu1 %v16312_v15  ;;  %v16327_v15 = vld [vmem:[#allocation6 + $0x438] sm:$0xff]  }
 0x8df   : > { %v14892_v13 = vpop.f32.mrb[95].mxu1  ;;  %15174 = vmatprep.subr.bf16.mxu1 %v16314_v29 }
 0x8e0   : > { %v20147_v49 = vadd.f32 %v14890_v19, %v19945_v39  ;;  %v14893_v62 = vadd.f32 %v14892_v13, %v14891_v31  ;;  %v16324_v39 = vld [vmem:[#allocation6 + $0x430] sm:$0xff]   ;;  %v14144_v31 = vcombine.low %v16422_v30, %v16421_v26  ;;  %v16423_v13 = vld [vmem:[#allocation2 + $0x130] sm:$0xff] }
 0x8e1   : > { %11993 = vmatmul.mubr.bf16.gmra.mrb[200].mxu1 %v14140_v57 }
 0x8e2   : > { %v20150_v45 = vadd.f32 %v14893_v62, %v19950_v9  ;;  %12000 = vmatprep.mubr.bf16.mxu1 %v14143_v56  ;;  %15175 = vmatpush3.bf16.msra.mxu1 %v16316_v41 }
 0x8e3   : > { %15176 = vmatprep.subr.bf16.mxu1 %v16318_v44  ;;  %v16424_v44 = vld [vmem:[#allocation2 + $0x128] sm:$0xff] }
 0x8e4   : > { %v14894_v46 = vpop.f32.mrb[96].mxu1  ;;  %v14147_v62 = vcombine.high %v16424_v44, %v16423_v13 }
 0x8e5   : > { %v14895_v3 = vpop.f32.mrb[97].mxu1 }
 0x8e6   : > { %v14896_v8 = vadd.f32 %v14895_v3, %v14894_v46  ;;  %v14897_v35 = vpop.f32.mrb[98].mxu1  ;;  %15177 = vmatpush3.bf16.msra.mxu1 %v16320_v52 }
 0x8e7   : > { %v14898_v55 = vpop.f32.mrb[99].mxu1  ;;  %15178 = vmatprep.subr.bf16.mxu1 %v16322_v50  ;;  %v14146_v50 = vcombine.low %v16424_v44, %v16423_v13 }
 0x8e8   : > { %v20153_v59 = vadd.f32 %v14896_v8, %v19963_v34  ;;  %v14899_v9 = vadd.f32 %v14898_v55, %v14897_v35  ;;  %v16425_v8 = vld [vmem:[#allocation2 + $0x158] sm:$0xff]  ;;  %v16426_v35 = vld [vmem:[#allocation2 + $0x150] sm:$0xff] }
 0x8e9   : > { %12001 = vmatmul.mubr.bf16.gmra.mrb[204].mxu1 %v14142_v2  ;;  %v14148_v26 = vcombine.low %v16426_v35, %v16425_v8 }
 0x8ea   : > { %v20156_v5 = vadd.f32 %v14899_v9, %v19968_v60  ;;  %12008 = vmatprep.mubr.bf16.mxu1 %v14145_v51  ;;  %15179 = vmatpush3.bf16.msra.mxu1 %v16324_v39  ;;  %v14149_v39 = vcombine.high %v16426_v35, %v16425_v8 }
 0x8eb   : > { %15180 = vmatprep.subr.bf16.mxu1 %v16326_v18 }
 0x8ec   : > { %v14900_v29 = vpop.f32.mrb[100].mxu1 }
 0x8ed   : > { %v14901_v1 = vpop.f32.mrb[101].mxu1 }
 0x8ee   : > { %v14902_v61 = vadd.f32 %v14901_v1, %v14900_v29  ;;  %v14903_v19 = vpop.f32.mrb[102].mxu1  ;;  %15181 = vmatpush3.bf16.msra.mxu1 %v16327_v15  ;;  %v16427_v15 = vld [vmem:[#allocation2 + $0x180] sm:$0xff]  ;;  %v16428_v29 = vld [vmem:[#allocation2 + $0x178] sm:$0xff] }
 0x8ef   : > { %v14904_v34 = vpop.f32.mrb[103].mxu1  ;;  %v14151_v1 = vcombine.high %v16428_v29, %v16427_v15 }
 0x8f0   : > { %v20159_v41 = vadd.f32 %v14902_v61, %v19981_v27  ;;  %v14905_v57 = vadd.f32 %v14904_v34, %v14903_v19 }
 0x8f1   : > { %12009 = vmatmul.mubr.bf16.gmra.mrb[208].mxu1 %v14144_v31 }
 0x8f2   : > { %v20162_v60 = vadd.f32 %v14905_v57, %v19986_v28  ;;  %12016 = vmatprep.mubr.bf16.mxu1 %v14147_v62  ;;  %v14150_v57 = vcombine.low %v16428_v29, %v16427_v15  ;;  %v16429_v62 = vld [vmem:[#allocation2 + $0x1a8] sm:$0xff] }
 0x8f4   : > { %v14906_v33 = vpop.f32.mrb[104].mxu1 }
 0x8f5   : > { %v14907_v11 = vpop.f32.mrb[105].mxu1 }
 0x8f6   : > { %v14908_v56 = vadd.f32 %v14907_v11, %v14906_v33  ;;  %v14909_v52 = vpop.f32.mrb[106].mxu1  ;;  %v16430_v33 = vld [vmem:[#allocation2 + $0x1a0] sm:$0xff] }
 0x8f7   : > { %v14910_v46 = vpop.f32.mrb[107].mxu1  ;;  %v14153_v11 = vcombine.high %v16430_v33, %v16429_v62 }
 0x8f8   : > { %v20165_v3 = vadd.f32 %v14908_v56, %v19999_v17  ;;  %v14911_v27 = vadd.f32 %v14910_v46, %v14909_v52 }
 0x8f9   : > { %12017 = vmatmul.mubr.bf16.gmra.mrb[212].mxu1 %v14146_v50 }
 0x8fa   : > { %v20168_v2 = vadd.f32 %v14911_v27, %v20004_v38  ;;  %12024 = vmatprep.mubr.bf16.mxu1 %v14149_v39  ;;  %v14152_v27 = vcombine.low %v16430_v33, %v16429_v62  ;;  %v16431_v39 = vld [vmem:[#allocation2 + $0x1c8] sm:$0xff] }
 0x8fc   : > { %v14912_v28 = vpop.f32.mrb[108].mxu1 }
 0x8fd   : > { %v14913_v55 = vpop.f32.mrb[109].mxu1 }
 0x8fe   : > { %v14914_v18 = vadd.f32 %v14913_v55, %v14912_v28  ;;  %v14915_v9 = vpop.f32.mrb[110].mxu1  ;;  %v16432_v28 = vld [vmem:[#allocation2 + $0x1d0] sm:$0xff] }
 0x8ff   : > { %v14916_v30 = vpop.f32.mrb[111].mxu1  ;;  %v14155_v55 = vcombine.high %v16431_v39, %v16432_v28 }
 0x900   : > { %v20171_v51 = vadd.f32 %v14914_v18, %v20017_v47  ;;  %v14917_v17 = vadd.f32 %v14916_v30, %v14915_v9 }
 0x901   : > { %12025 = vmatmul.mubr.bf16.gmra.mrb[216].mxu1 %v14148_v26 }
 0x902   : > { %v20174_v61 = vadd.f32 %v14917_v17, %v20022_v32  ;;  %12032 = vmatprep.mubr.bf16.mxu1 %v14151_v1  ;;  %v14154_v17 = vcombine.low %v16431_v39, %v16432_v28  ;;  %v16433_v1 = vld [vmem:[#allocation2 + $0x1f0] sm:$0xff] }
 0x904   : > { %v14918_v38 = vpop.f32.mrb[112].mxu1 }
 0x905   : > { %v14919_v19 = vpop.f32.mrb[113].mxu1 }
 0x906   : > { %v14920_v31 = vadd.f32 %v14919_v19, %v14918_v38  ;;  %v14921_v34 = vpop.f32.mrb[114].mxu1  ;;  %v16434_v38 = vld [vmem:[#allocation2 + $0x1f8] sm:$0xff] }
 0x907   : > { %v14922_v13 = vpop.f32.mrb[115].mxu1  ;;  %v14157_v19 = vcombine.high %v16433_v1, %v16434_v38 }
 0x908   : > { %v20177_v44 = vadd.f32 %v14920_v31, %v20031_v63  ;;  %v14923_v47 = vadd.f32 %v14922_v13, %v14921_v34 }
 0x909   : > { %12033 = vmatmul.mubr.bf16.gmra.mrb[220].mxu1 %v14150_v57 }
 0x90a   : > { %v20180_v56 = vadd.f32 %v14923_v47, %v20034_v10  ;;  %12040 = vmatprep.mubr.bf16.mxu1 %v14153_v11  ;;  %v14156_v47 = vcombine.low %v16433_v1, %v16434_v38  ;;  %v16435_v11 = vld [vmem:[#allocation2 + $0x218] sm:$0xff] }
 0x90c   : > { %v14924_v32 = vpop.f32.mrb[116].mxu1 }
 0x90d   : > { %v14925_v52 = vpop.f32.mrb[117].mxu1 }
 0x90e   : > { %v14926_v50 = vadd.f32 %v14925_v52, %v14924_v32  ;;  %v14927_v46 = vpop.f32.mrb[118].mxu1  ;;  %v16436_v32 = vld [vmem:[#allocation2 + $0x220] sm:$0xff] }
 0x90f   : > { %v14928_v8 = vpop.f32.mrb[119].mxu1  ;;  %v14159_v52 = vcombine.high %v16435_v11, %v16436_v32 }
 0x910   : > { %v20183_v35 = vadd.f32 %v14926_v50, %v20037_v14  ;;  %v14929_v63 = vadd.f32 %v14928_v8, %v14927_v46 }
 0x911   : > { %12041 = vmatmul.mubr.bf16.gmra.mrb[224].mxu1 %v14152_v27 }
 0x912   : > { %v20186_v18 = vadd.f32 %v14929_v63, %v20043_v24  ;;  %12048 = vmatprep.mubr.bf16.mxu1 %v14155_v55  ;;  %v14158_v63 = vcombine.low %v16435_v11, %v16436_v32  ;;  %v16437_v55 = vld [vmem:[#allocation2 + $0x240] sm:$0xff] }
 0x914   : > { %v14930_v10 = vpop.f32.mrb[120].mxu1 }
 0x915   : > { %v14931_v9 = vpop.f32.mrb[121].mxu1 }
 0x916   : > { %v14932_v26 = vadd.f32 %v14931_v9, %v14930_v10  ;;  %v14933_v30 = vpop.f32.mrb[122].mxu1  ;;  %v16438_v10 = vld [vmem:[#allocation2 + $0x248] sm:$0xff] }
 0x917   : > { %v14934_v15 = vpop.f32.mrb[123].mxu1  ;;  %v14161_v9 = vcombine.high %v16437_v55, %v16438_v10 }
 0x918   : > { %v20189_v29 = vadd.f32 %v14932_v26, %v20046_v21  ;;  %v14935_v14 = vadd.f32 %v14934_v15, %v14933_v30 }
 0x919   : > { %12049 = vmatmul.mubr.bf16.gmra.mrb[228].mxu1 %v14154_v17 }
 0x91a   : > { %v20192_v31 = vadd.f32 %v14935_v14, %v20055_v7  ;;  %12056 = vmatprep.mubr.bf16.mxu1 %v14157_v19  ;;  %v14160_v14 = vcombine.low %v16437_v55, %v16438_v10  ;;  %v16439_v19 = vld [vmem:[#allocation2 + $0x268] sm:$0xff] }
 0x91c   : > { %v14936_v24 = vpop.f32.mrb[124].mxu1 }
 0x91d   : > { %v14937_v34 = vpop.f32.mrb[125].mxu1 }
 0x91e   : > { %v14938_v57 = vadd.f32 %v14937_v34, %v14936_v24  ;;  %v14939_v13 = vpop.f32.mrb[126].mxu1  ;;  %v16440_v24 = vld [vmem:[#allocation2 + $0x270] sm:$0xff] }
 0x91f   : > { %v14940_v62 = vpop.f32.mrb[127].mxu1  ;;  %v14163_v34 = vcombine.high %v16439_v19, %v16440_v24 }
 0x920   : > { %v20195_v33 = vadd.f32 %v14938_v57, %v20058_v16  ;;  %v14941_v21 = vadd.f32 %v14940_v62, %v14939_v13  ;;  %v12138_v57 = vld [vmem:[#allocation2 + $0x68] sm:$0xff] }
 0x921   : > { %12057 = vmatmul.mubr.bf16.gmra.mrb[232].mxu1 %v14156_v47  ;;  %v12195_v62 = vshll.u32 %v12138_v57, 16 }
 0x922   : > { %v20198_v50 = vadd.f32 %v14941_v21, %v20067_v4  ;;  %12064 = vmatprep.mubr.bf16.mxu1 %v14159_v52  ;;  %v12199_v21 = vshrl.u32 %v12138_v57, 16 }
 0x923   : > { %v12197_v55 = vrot.slane %v12195_v62, 5 }
 0x924   : > { %v14958_v7 = vpop.f32.mrb[128].mxu1  ;;  %v12201_v10 = vrot.slane %v12199_v21, 4  ;;  %v14167_v21 = vcombine.high %v20081_v53, %v20081_v53 }
 0x925   : > { %v14959_v46 = vpop.f32.mrb[129].mxu1 }
 0x926   : > { %v14960_v27 = vadd.f32 %v14959_v46, %v14958_v7  ;;  %v14961_v8 = vpop.f32.mrb[130].mxu1  ;;  %v14162_v46 = vcombine.low %v16439_v19, %v16440_v24  ;;  %v12202_v24 = vor.u32 %v12201_v10, %v12197_v55 }
 0x927   : > { %v14962_v39 = vpop.f32.mrb[131].mxu1 }
 0x928   : > { %v20201_v28 = vadd.f32 %v14960_v27, %v20070_v12  ;;  %v14963_v16 = vadd.f32 %v14962_v39, %v14961_v8  ;;  %v16441_v8 = vld [vmem:[#allocation2 + $0x290] sm:$0xff] }
 0x929   : > { %12065 = vmatmul.mubr.bf16.gmra.mrb[236].mxu1 %v14158_v63  ;;  %v16442_v63 = vld [vmem:[#allocation2 + $0x298] sm:$0xff] }
 0x92a   : > { %v20204_v26 = vadd.f32 %v14963_v16, %v20076_v43  ;;  %12072 = vmatprep.mubr.bf16.mxu1 %v14161_v9  ;;  %v12137_v43 = vld [vmem:[#allocation2 + $0x60] sm:$0xff]  ;;  %v14165_v39 = vcombine.high %v16441_v8, %v16442_v63  ;;  %v12141_v9 = vld [vmem:[#allocation2 + $0x90] sm:$0xff] }
 0x92b   : > { %v12186_v7 = vshrl.u32 %v12137_v43, 16 }
 0x92c   : > { %v14964_v4 = vpop.f32.mrb[132].mxu1 }
 0x92d   : > { %v14965_v30 = vpop.f32.mrb[133].mxu1 }
 0x92e   : > { %v14966_v17 = vadd.f32 %v14965_v30, %v14964_v4  ;;  %v14967_v15 = vpop.f32.mrb[134].mxu1  ;;  %v12139_v4 = vld [vmem:[#allocation2 + $0x70] sm:$0x11] }
 0x92f   : > { %v14968_v1 = vpop.f32.mrb[135].mxu1 }
 0x930   : > { %v20207_v38 = vadd.f32 %v14966_v17, %v20085_v48  ;;  %v14969_v12 = vadd.f32 %v14968_v1, %v14967_v15  ;;  %v12189_v48 = vshll.u32 %v12137_v43, 16  ;;  %v12188_v17 = vrot.slane %v12186_v7, 4 }
 0x931   : > { %12073 = vmatmul.mubr.bf16.gmra.mrb[240].mxu1 %v14160_v14  ;;  %v12140_v14 = vld [vmem:[#allocation2 + $0x88] sm:$0xff]  ;;  %v12219_v1 = vshll.u32 %v12141_v9, 16 }
 0x932   : > { %v20210_v13 = vadd.f32 %v14969_v12, %v20091_v36  ;;  %12080 = vmatprep.mubr.bf16.mxu1 %v14163_v34  ;;  %v12191_v15 = vrot.slane %v12189_v48, 5  ;;  %v12223_v12 = vshrl.u32 %v12141_v9, 16  ;;  %v12205_v34 = vshll.u32 %v12139_v4, 16  ;;  %v12144_v4 = vld [vmem:[#allocation2 + $0xb8] sm:$0xff] }
 0x933   : > { %v12210_v57 = vshrl.u32 %v12140_v14, 16  ;;  %v12213_v43 = vshll.u32 %v12140_v14, 16 }
 0x934   : > { %v14970_v47 = vpop.f32.mrb[136].mxu1  ;;  %v12225_v7 = vrot.slane %v12223_v12, 4  ;;  %v12243_v12 = vshll.u32 %v12144_v4, 16 }
 0x935   : > { %v14971_v11 = vpop.f32.mrb[137].mxu1  ;;  %v12212_v10 = vrot.slane %v12210_v57, 4  ;;  %v12215_v9 = vrot.slane %v12213_v43, 5 }
 0x936   : > { %v14972_v32 = vadd.f32 %v14971_v11, %v14970_v47  ;;  %v14973_v52 = vpop.f32.mrb[138].mxu1  ;;  %v12192_v11 = vor.u32 %v12191_v15, %v12188_v17  ;;  %v12143_v15 = vld [vmem:[#allocation2 + $0xb0] sm:$0xff] }
 0x937   : > { %v14974_v27 = vpop.f32.mrb[139].mxu1 }
 0x938   : > { %v20213_v16 = vadd.f32 %v14972_v32, %v20098_v37  ;;  %v14975_v36 = vadd.f32 %v14974_v27, %v14973_v52  ;;  %v12221_v52 = vrot.slane %v12219_v1, 5  ;;  %v12203_v27 = vrot.slane %v12202_v24, 4 }
 0x939   : > { %12081 = vmatmul.mubr.bf16.gmra.mrb[244].mxu1 %v14162_v46  ;;  %v12193_v17 = vrot.slane %v12192_v11, 4  ;;  %v14166_v24 = vcombine.low %v20081_v53, %v20081_v53  ;;  %v12145_v53 = vld [vmem:[#allocation2 + $0xc0] sm:$0x11] }
 0x93a   : > { %v20216_v30 = vadd.f32 %v14975_v36, %v20104_v20  ;;  %12088 = vmatprep.mubr.bf16.mxu1 %v14165_v39  ;;  %v14164_v20 = vcombine.low %v16441_v8, %v16442_v63  ;;  %v12207_v39 = vrot.slane %v12205_v34, 5  ;;  %v12142_v36 = vld [vmem:[#allocation2 + $0x98] sm:$0x11]  ;;  %v12226_v8 = vor.u32 %v12225_v7, %v12221_v52 }
 0x93b   : > { %v12229_v63 = vshll.u32 %v12142_v36, 16 }
 0x93c   : > { %v14976_v19 = vpop.f32.mrb[140].mxu1 }
 0x93d   : > { %v14977_v37 = vpop.f32.mrb[141].mxu1 }
 0x93e   : > { %v14978_v47 = vadd.f32 %v14977_v37, %v14976_v19  ;;  %v14979_v62 = vpop.f32.mrb[142].mxu1  ;;  %v12247_v19 = vshrl.u32 %v12144_v4, 16  ;;  %v12216_v37 = vor.u32 %v12215_v9, %v12212_v10  ;;  %v12147_v4 = vld [vmem:[#allocation2 + $0xe0] sm:$0xff] }
 0x93f   : > { %v14980_v32 = vpop.f32.mrb[143].mxu1 }
 0x940   : > { %v20221_v48 = vadd.f32 %v14978_v47, %v20114_v58  ;;  %v14981_v46 = vadd.f32 %v14980_v32, %v14979_v62  ;;  %v12208_v58 = vsel %vm16813_vm2, %v12203_v27, %v12207_v39  ;;  %v12234_v47 = vshrl.u32 %v12143_v15, 16 }
 0x941   : > { %12089 = vmatmul.mubr.bf16.gmra.mrb[248].mxu1 %v14164_v20  ;;  %v12237_v62 = vshll.u32 %v12143_v15, 16  ;;  %v12227_v20 = vrot.slane %v12226_v8, 4  ;;  %v12231_v32 = vrot.slane %v12229_v63, 5  ;;  %v12245_v27 = vrot.slane %v12243_v12, 5  ;;  %v12146_v15 = vld [vmem:[#allocation2 + $0xd8] sm:$0xff] }
 0x942   : > { %v20224_v14 = vadd.f32 %v14981_v46, %v20120_v42  ;;  %12096 = vmatprep.mubr.bf16.mxu1 %v14167_v21  ;;  %v12198_v42 = vsel %vm16813_vm2, %v12193_v17, %v12197_v55  ;;  %v12249_v39 = vrot.slane %v12247_v19, 4  ;;  %v12217_v10 = vrot.slane %v12216_v37, 4 }
 0x943   : > { %v14185_v11 = vcombine.high %v12198_v42, %v12208_v58  ;;  %v12236_v55 = vrot.slane %v12234_v47, 4  ;;  %v12239_v9 = vrot.slane %v12237_v62, 5  ;;  %v12232_v8 = vsel %vm16813_vm2, %v12227_v20, %v12231_v32 }
 0x944   : > { %v14982_v1 = vpop.f32.mrb[144].mxu1  ;;  %v12250_v63 = vor.u32 %v12249_v39, %v12245_v27  ;;  %v12267_v12 = vshll.u32 %v12147_v4, 16  ;;  %v12271_v19 = vshrl.u32 %v12147_v4, 16  ;;  %v14184_v37 = vcombine.low %v12198_v42, %v12208_v58  ;;  %v12150_v4 = vld [vmem:[#allocation2 + $0x108] sm:$0xff]  ;;  %v12149_v42 = vld [vmem:[#allocation2 + $0x100] sm:$0xff] }
 0x945   : > { %v14983_v34 = vpop.f32.mrb[145].mxu1  ;;  %v12258_v62 = vshrl.u32 %v12146_v15, 16  ;;  %v12148_v58 = vld [vmem:[#allocation2 + $0xe8] sm:$0x11] }
 0x946   : > { %v14984_v57 = vadd.f32 %v14983_v34, %v14982_v1  ;;  %v14985_v43 = vpop.f32.mrb[146].mxu1  ;;  %v12251_v32 = vrot.slane %v12250_v63, 4  ;;  %v12269_v39 = vrot.slane %v12267_v12, 5  ;;  %v12295_v63 = vshrl.u32 %v12150_v4, 16 }
 0x947   : > { %v14986_v21 = vpop.f32.mrb[147].mxu1  ;;  %v12277_v12 = vshll.u32 %v12148_v58, 16 }
 0x948   : > { %v20233_v7 = vadd.f32 %v14984_v57, %v20123_v22  ;;  %v14987_v46 = vadd.f32 %v14986_v21, %v14985_v43  ;;  %v12253_v22 = vshll.u32 %v12145_v53, 16  ;;  %v12240_v57 = vor.u32 %v12239_v9, %v12236_v55 }
 0x949   : > { %12097 = vmatmul.mubr.bf16.gmra.mrb[252].mxu1 %v14166_v24  ;;  %v12261_v21 = vshll.u32 %v12146_v15, 16  ;;  %v12273_v53 = vrot.slane %v12271_v19, 4  ;;  %v12291_v15 = vshll.u32 %v12150_v4, 16  ;;  %v12282_v19 = vshrl.u32 %v12149_v42, 16 }
 0x94a   : > { %v20236_v36 = vadd.f32 %v14987_v46, %v20126_v54  ;;  %12858 = vmatprep.mubr.bf16.mxu1 %v14185_v11  ;;  %v12222_v54 = vsel %vm16813_vm2, %v12217_v10, %v12221_v52  ;;  %v12255_v46 = vrot.slane %v12253_v22, 5  ;;  %v12241_v52 = vrot.slane %v12240_v57, 4 }
 0x94b   : > { %v14187_v47 = vcombine.high %v12222_v54, %v12232_v8  ;;  %v12260_v10 = vrot.slane %v12258_v62, 4  ;;  %v12263_v55 = vrot.slane %v12261_v21, 5  ;;  %v12297_v4 = vrot.slane %v12295_v63, 4 }
 0x94c   : > { %v14988_v17 = vpop.f32.mrb[148].mxu1  ;;  %v12246_v57 = vsel %vm16813_vm2, %v12241_v52, %v12245_v27 }
 0x94d   : > { %v14989_v1 = vpop.f32.mrb[149].mxu1  ;;  %v12264_v62 = vor.u32 %v12263_v55, %v12260_v10 }
 0x94e   : > { %v14990_v24 = vadd.f32 %v14989_v1, %v14988_v17  ;;  %v14991_v34 = vpop.f32.mrb[150].mxu1  ;;  %v12274_v1 = vor.u32 %v12273_v53, %v12269_v39  ;;  %v12153_v53 = vld [vmem:[#allocation2 + $0x130] sm:$0xff] }
 0x94f   : > { %v14992_v43 = vpop.f32.mrb[151].mxu1  ;;  %v12265_v27 = vrot.slane %v12264_v62, 4  ;;  %v12315_v52 = vshll.u32 %v12153_v53, 16 }
 0x950   : > { %v20243_v11 = vadd.f32 %v14990_v24, %v20132_v0  ;;  %v14993_v20 = vadd.f32 %v14992_v43, %v14991_v34  ;;  %v12256_v0 = vsel %vm16813_vm2, %v12251_v32, %v12255_v46  ;;  %v12285_v24 = vshll.u32 %v12149_v42, 16  ;;  %v12151_v32 = vld [vmem:[#allocation2 + $0x110] sm:$0x11] }
 0x951   : > { %12859 = vmatmul.mubr.bf16.vlgmr.msra.gmra.mrb[0].mxu1 %v14184_v37  ;;  %v14186_v37 = vcombine.low %v12222_v54, %v12232_v8  ;;  %v12293_v46 = vrot.slane %v12291_v15, 5  ;;  %v12275_v58 = vrot.slane %v12274_v1, 4  ;;  %v12279_v42 = vrot.slane %v12277_v12, 5  ;;  %v12152_v54 = vld [vmem:[#allocation2 + $0x128] sm:$0xff] }
 0x952   : > { %v20246_v17 = vadd.f32 %v14993_v20, %v20138_v6  ;;  %12866 = vmatprep.mubr.bf16.mxu1 %v14187_v47  ;;  %v14189_v47 = vcombine.high %v12246_v57, %v12256_v0  ;;  %v12301_v8 = vshll.u32 %v12151_v32, 16  ;;  %v14188_v1 = vcombine.low %v12246_v57, %v12256_v0  ;;  %v12156_v57 = vld [vmem:[#allocation2 + $0x158] sm:$0xff] }
 0x953   : > { %v12298_v55 = vor.u32 %v12297_v4, %v12293_v46  ;;  %v12280_v15 = vsel %vm16813_vm2, %v12275_v58, %v12279_v42  ;;  %v12154_v58 = vld [vmem:[#allocation2 + $0x138] sm:$0x11] }
 0x954   : > { %21186 = vst [vmem:[#allocation26_spill] sm:$0xff] %v20246_v17  ;;  %v14994_v9 = vpop.f32.mrb[152].mxu1 }
 0x955   : > { %v14995_v22 = vpop.f32.mrb[153].mxu1 }
 0x956   : > { %v14996_v34 = vadd.f32 %v14995_v22, %v14994_v9  ;;  %v14997_v6 = vpop.f32.mrb[154].mxu1  ;;  %v12284_v9 = vrot.slane %v12282_v19, 4  ;;  %v12287_v22 = vrot.slane %v12285_v24, 5  ;;  %v12306_v24 = vshrl.u32 %v12152_v54, 16 }
 0x957   : > { %v14998_v43 = vpop.f32.mrb[155].mxu1 }
 0x958   : > { %v20253_v21 = vadd.f32 %v14996_v34, %v20141_v40  ;;  %v14999_v20 = vadd.f32 %v14998_v43, %v14997_v6  ;;  %v12319_v40 = vshrl.u32 %v12153_v53, 16  ;;  %v12288_v63 = vor.u32 %v12287_v22, %v12284_v9 }
 0x959   : > { %12867 = vmatmul.mubr.bf16.gmra.mrb[4].mxu1 %v14186_v37  ;;  %v12309_v6 = vshll.u32 %v12152_v54, 16  ;;  %v12270_v37 = vsel %vm16813_vm2, %v12265_v27, %v12269_v39  ;;  %v12303_v43 = vrot.slane %v12301_v8, 5  ;;  %v12299_v53 = vrot.slane %v12298_v55, 4  ;;  %v12155_v8 = vld [vmem:[#allocation2 + $0x150] sm:$0xff] }
 0x95a   : > { %v20256_v17 = vadd.f32 %v14999_v20, %v20144_v25  ;;  %12874 = vmatprep.mubr.bf16.mxu1 %v14189_v47  ;;  %v12317_v47 = vrot.slane %v12315_v52, 5  ;;  %v12321_v62 = vrot.slane %v12319_v40, 4  ;;  %v14191_v4 = vcombine.high %v12270_v37, %v12280_v15 }
 0x95b   : > { %v12289_v0 = vrot.slane %v12288_v63, 4  ;;  %v12308_v9 = vrot.slane %v12306_v24, 4  ;;  %v12311_v22 = vrot.slane %v12309_v6, 5  ;;  %v12325_v27 = vshll.u32 %v12154_v58, 16  ;;  %v12157_v58 = vld [vmem:[#allocation2 + $0x160] sm:$0x11] }
 0x95c   : > { %v15000_v10 = vpop.f32.mrb[156].mxu1  ;;  %v12322_v39 = vor.u32 %v12321_v62, %v12317_v47  ;;  %v12339_v52 = vshll.u32 %v12156_v57, 16  ;;  %v12343_v40 = vshrl.u32 %v12156_v57, 16 }
 0x95d   : > { %v15001_v34 = vpop.f32.mrb[157].mxu1  ;;  %v12294_v55 = vsel %vm16813_vm2, %v12289_v0, %v12293_v46  ;;  %v12327_v62 = vrot.slane %v12325_v27, 5  ;;  %v12158_v27 = vld [vmem:[#allocation2 + $0x178] sm:$0xff] }
 0x95e   : > { %v15002_v12 = vadd.f32 %v15001_v34, %v15000_v10  ;;  %v15003_v19 = vpop.f32.mrb[158].mxu1 }
 0x95f   : > { %v15004_v25 = vpop.f32.mrb[159].mxu1 }
 0x960   : > { %v20263_v20 = vadd.f32 %v15002_v12, %v20147_v49  ;;  %v15005_v32 = vadd.f32 %v15004_v25, %v15003_v19  ;;  %v12304_v49 = vsel %vm16813_vm2, %v12299_v53, %v12303_v43  ;;  %v12333_v12 = vshll.u32 %v12155_v8, 16 }
 0x961   : > { %12875 = vmatmul.mubr.bf16.gmra.mrb[8].mxu1 %v14188_v1  ;;  %v12330_v1 = vshrl.u32 %v12155_v8, 16  ;;  %v14190_v19 = vcombine.low %v12270_v37, %v12280_v15  ;;  %v14193_v6 = vcombine.high %v12294_v55, %v12304_v49  ;;  %v12323_v25 = vrot.slane %v12322_v39, 4  ;;  %v12159_v15 = vld [vmem:[#allocation2 + $0x180] sm:$0xff] }
 0x962   : > { %v20266_v42 = vadd.f32 %v15005_v32, %v20150_v45  ;;  %12882 = vmatprep.mubr.bf16.mxu1 %v14191_v4  ;;  %v12312_v45 = vor.u32 %v12311_v22, %v12308_v9  ;;  %v12341_v4 = vrot.slane %v12339_v52, 5  ;;  %v12345_v53 = vrot.slane %v12343_v40, 4 }
 0x963   : > { %v12332_v57 = vrot.slane %v12330_v1, 4  ;;  %v12335_v9 = vrot.slane %v12333_v12, 5  ;;  %v12328_v22 = vsel %vm16813_vm2, %v12323_v25, %v12327_v62  ;;  %v12367_v52 = vshrl.u32 %v12159_v15, 16 }
 0x964   : > { %v15006_v54 = vpop.f32.mrb[160].mxu1  ;;  %v12313_v0 = vrot.slane %v12312_v45, 4  ;;  %v12346_v39 = vor.u32 %v12345_v53, %v12341_v4  ;;  %v12354_v12 = vshrl.u32 %v12158_v27, 16 }
 0x965   : > { %v15007_v10 = vpop.f32.mrb[161].mxu1  ;;  %v12369_v53 = vrot.slane %v12367_v52, 4 }
 0x966   : > { %v15008_v34 = vadd.f32 %v15007_v10, %v15006_v54  ;;  %v15009_v63 = vpop.f32.mrb[162].mxu1  ;;  %v12363_v54 = vshll.u32 %v12159_v15, 16  ;;  %v12347_v25 = vrot.slane %v12346_v39, 4 }
 0x967   : > { %v15010_v24 = vpop.f32.mrb[163].mxu1 }
 0x968   : > { %v20273_v32 = vadd.f32 %v15008_v34, %v20153_v59  ;;  %v15011_v43 = vadd.f32 %v15010_v24, %v15009_v63  ;;  %v12349_v59 = vshll.u32 %v12157_v58, 16  ;;  %v12336_v34 = vor.u32 %v12335_v9, %v12332_v57  ;;  %v12162_v58 = vld [vmem:[#allocation2 + $0x1a8] sm:$0xff]  ;;  %v12161_v57 = vld [vmem:[#allocation2 + $0x1a0] sm:$0xff] }
 0x969   : > { %12883 = vmatmul.mubr.bf16.gmra.mrb[12].mxu1 %v14190_v19  ;;  %v14192_v63 = vcombine.low %v12294_v55, %v12304_v49  ;;  %v12357_v19 = vshll.u32 %v12158_v27, 16  ;;  %v12160_v49 = vld [vmem:[#allocation2 + $0x188] sm:$0x11]  ;;  %v12356_v55 = vrot.slane %v12354_v12, 4  ;;  %v12391_v39 = vshrl.u32 %v12162_v58, 16 }
 0x96a   : > { %v20276_v46 = vadd.f32 %v15011_v43, %v20156_v5  ;;  %12890 = vmatprep.mubr.bf16.mxu1 %v14193_v6  ;;  %v12318_v5 = vsel %vm16813_vm2, %v12313_v0, %v12317_v47  ;;  %v12351_v62 = vrot.slane %v12349_v59, 5  ;;  %v12365_v43 = vrot.slane %v12363_v54, 5 }
 0x96b   : > { %v14195_v1 = vcombine.high %v12318_v5, %v12328_v22  ;;  %v12337_v47 = vrot.slane %v12336_v34, 4  ;;  %v12359_v0 = vrot.slane %v12357_v19, 5  ;;  %v14194_v34 = vcombine.low %v12318_v5, %v12328_v22  ;;  %v12165_v22 = vld [vmem:[#allocation2 + $0x1d0] sm:$0xff] }
 0x96c   : > { %v15012_v37 = vpop.f32.mrb[164].mxu1  ;;  %v12370_v27 = vor.u32 %v12369_v53, %v12365_v43 }
 0x96d   : > { %v15013_v8 = vpop.f32.mrb[165].mxu1 }
 0x96e   : > { %v15014_v40 = vadd.f32 %v15013_v8, %v15012_v37  ;;  %v15015_v10 = vpop.f32.mrb[166].mxu1  ;;  %v12387_v37 = vshll.u32 %v12162_v58, 16  ;;  %v12373_v8 = vshll.u32 %v12160_v49, 16  ;;  %v12371_v53 = vrot.slane %v12370_v27, 4 }
 0x96f   : > { %v15016_v45 = vpop.f32.mrb[167].mxu1 }
 0x970   : > { %v20283_v24 = vadd.f32 %v15014_v40, %v20159_v41  ;;  %v15017_v6 = vadd.f32 %v15016_v45, %v15015_v10  ;;  %v12352_v41 = vsel %vm16813_vm2, %v12347_v25, %v12351_v62  ;;  %v12378_v40 = vshrl.u32 %v12161_v57, 16 }
 0x971   : > { %12891 = vmatmul.mubr.bf16.gmra.mrb[16].mxu1 %v14192_v63  ;;  %v12381_v10 = vshll.u32 %v12161_v57, 16  ;;  %v12389_v25 = vrot.slane %v12387_v37, 5  ;;  %v12393_v62 = vrot.slane %v12391_v39, 4  ;;  %v12375_v58 = vrot.slane %v12373_v8, 5 }
 0x972   : > { %v20286_v15 = vadd.f32 %v15017_v6, %v20162_v60  ;;  %12898 = vmatprep.mubr.bf16.mxu1 %v14195_v1  ;;  %v12342_v60 = vsel %vm16813_vm2, %v12337_v47, %v12341_v4  ;;  %v12360_v1 = vor.u32 %v12359_v0, %v12356_v55  ;;  %v12163_v6 = vld [vmem:[#allocation2 + $0x1b0] sm:$0x11]  ;;  %v12380_v4 = vrot.slane %v12378_v40, 4  ;;  %v12164_v55 = vld [vmem:[#allocation2 + $0x1c8] sm:$0xff] }
 0x973   : > { %v14197_v45 = vcombine.high %v12342_v60, %v12352_v41  ;;  %v12383_v47 = vrot.slane %v12381_v10, 5  ;;  %v12397_v57 = vshll.u32 %v12163_v6, 16  ;;  %v12376_v37 = vsel %vm16813_vm2, %v12371_v53, %v12375_v58  ;;  %v12168_v58 = vld [vmem:[#allocation2 + $0x1f8] sm:$0xff] }
 0x974   : > { %v15018_v9 = vpop.f32.mrb[168].mxu1  ;;  %v12361_v5 = vrot.slane %v12360_v1, 4  ;;  %v12411_v39 = vshll.u32 %v12165_v22, 16 }
 0x975   : > { %v15019_v59 = vpop.f32.mrb[169].mxu1 }
 0x976   : > { %v15020_v54 = vadd.f32 %v15019_v59, %v15018_v9  ;;  %v15021_v52 = vpop.f32.mrb[170].mxu1  ;;  %v12415_v59 = vshrl.u32 %v12165_v22, 16  ;;  %v12366_v10 = vsel %vm16813_vm2, %v12361_v5, %v12365_v43  ;;  %v12167_v5 = vld [vmem:[#allocation2 + $0x1f0] sm:$0xff] }
 0x977   : > { %v15022_v63 = vpop.f32.mrb[171].mxu1 }
 0x978   : > { %v20293_v12 = vadd.f32 %v15020_v54, %v20165_v3  ;;  %v15023_v19 = vadd.f32 %v15022_v63, %v15021_v52  ;;  %v12394_v3 = vor.u32 %v12393_v62, %v12389_v25  ;;  %v12384_v54 = vor.u32 %v12383_v47, %v12380_v4 }
 0x979   : > { %12899 = vmatmul.mubr.bf16.gmra.mrb[20].mxu1 %v14194_v34  ;;  %v12405_v52 = vshll.u32 %v12164_v55, 16  ;;  %v14196_v34 = vcombine.low %v12342_v60, %v12352_v41  ;;  %v12399_v63 = vrot.slane %v12397_v57, 5  ;;  %v12413_v62 = vrot.slane %v12411_v39, 5  ;;  %v12166_v60 = vld [vmem:[#allocation2 + $0x1d8] sm:$0x11] }
 0x97a   : > { %v20296_v49 = vadd.f32 %v15023_v19, %v20168_v2  ;;  %12906 = vmatprep.mubr.bf16.mxu1 %v14197_v45  ;;  %v12402_v2 = vshrl.u32 %v12164_v55, 16  ;;  %v14199_v19 = vcombine.high %v12366_v10, %v12376_v37  ;;  %v12395_v6 = vrot.slane %v12394_v3, 4 }
 0x97b   : > { %v12417_v53 = vrot.slane %v12415_v59, 4  ;;  %v12385_v41 = vrot.slane %v12384_v54, 4  ;;  %v12407_v22 = vrot.slane %v12405_v52, 5  ;;  %v12435_v57 = vshll.u32 %v12168_v58, 16 }
 0x97c   : > { %v15024_v0 = vpop.f32.mrb[172].mxu1  ;;  %v12404_v47 = vrot.slane %v12402_v2, 4  ;;  %v12439_v55 = vshrl.u32 %v12168_v58, 16  ;;  %v12426_v52 = vshrl.u32 %v12167_v5, 16 }
 0x97d   : > { %v15025_v9 = vpop.f32.mrb[173].mxu1  ;;  %v12418_v3 = vor.u32 %v12417_v53, %v12413_v62 }
 0x97e   : > { %v15026_v27 = vadd.f32 %v15025_v9, %v15024_v0  ;;  %v15027_v8 = vpop.f32.mrb[174].mxu1  ;;  %v12421_v9 = vshll.u32 %v12166_v60, 16 }
 0x97f   : > { %v15028_v40 = vpop.f32.mrb[175].mxu1  ;;  %v12419_v53 = vrot.slane %v12418_v3, 4 }
 0x980   : > { %v20303_v45 = vadd.f32 %v15026_v27, %v20171_v51  ;;  %v15029_v1 = vadd.f32 %v15028_v40, %v15027_v8  ;;  %v12400_v51 = vsel %vm16813_vm2, %v12395_v6, %v12399_v63  ;;  %v12408_v27 = vor.u32 %v12407_v22, %v12404_v47 }
 0x981   : > { %12907 = vmatmul.mubr.bf16.gmra.mrb[24].mxu1 %v14196_v34  ;;  %v14198_v8 = vcombine.low %v12366_v10, %v12376_v37  ;;  %v12429_v34 = vshll.u32 %v12167_v5, 16  ;;  %v12441_v6 = vrot.slane %v12439_v55, 4  ;;  %v12423_v58 = vrot.slane %v12421_v9, 5  ;;  %v12171_v37 = vld [vmem:[#allocation2 + $0x220] sm:$0xff] }
 0x982   : > { %v20306_v4 = vadd.f32 %v15029_v1, %v20174_v61  ;;  %12914 = vmatprep.mubr.bf16.mxu1 %v14199_v19  ;;  %v12390_v61 = vsel %vm16813_vm2, %v12385_v41, %v12389_v25  ;;  %v12169_v1 = vld [vmem:[#allocation2 + $0x200] sm:$0x11]  ;;  %v12437_v19 = vrot.slane %v12435_v57, 5  ;;  %v12409_v25 = vrot.slane %v12408_v27, 4 }
 0x983   : > { %v14201_v2 = vcombine.high %v12390_v61, %v12400_v51  ;;  %v12428_v10 = vrot.slane %v12426_v52, 4  ;;  %v12431_v41 = vrot.slane %v12429_v34, 5  ;;  %v12445_v47 = vshll.u32 %v12169_v1, 16 }
 0x984   : > { %v15030_v43 = vpop.f32.mrb[176].mxu1  ;;  %v12424_v57 = vsel %vm16813_vm2, %v12419_v53, %v12423_v58  ;;  %v12459_v55 = vshll.u32 %v12171_v37, 16  ;;  %v14200_v3 = vcombine.low %v12390_v61, %v12400_v51  ;;  %v12172_v61 = vld [vmem:[#allocation2 + $0x228] sm:$0x11] }
 0x985   : > { %v15031_v0 = vpop.f32.mrb[177].mxu1  ;;  %v12432_v27 = vor.u32 %v12431_v41, %v12428_v10  ;;  %v12173_v41 = vld [vmem:[#allocation2 + $0x240] sm:$0xff] }
 0x986   : > { %v15032_v39 = vadd.f32 %v15031_v0, %v15030_v43  ;;  %v15033_v59 = vpop.f32.mrb[178].mxu1  ;;  %v12442_v43 = vor.u32 %v12441_v6, %v12437_v19  ;;  %v12463_v0 = vshrl.u32 %v12171_v37, 16  ;;  %v12461_v6 = vrot.slane %v12459_v55, 5 }
 0x987   : > { %v15034_v54 = vpop.f32.mrb[179].mxu1  ;;  %v12433_v58 = vrot.slane %v12432_v27, 4  ;;  %v12477_v27 = vshll.u32 %v12173_v41, 16 }
 0x988   : > { %v20313_v40 = vadd.f32 %v15032_v39, %v20177_v44  ;;  %v15035_v63 = vadd.f32 %v15034_v54, %v15033_v59  ;;  %v12170_v44 = vld [vmem:[#allocation2 + $0x218] sm:$0xff]  ;;  %v12443_v1 = vrot.slane %v12442_v43, 4  ;;  %v12465_v53 = vrot.slane %v12463_v0, 4 }
 0x989   : > { %12915 = vmatmul.mubr.bf16.gmra.mrb[28].mxu1 %v14198_v8  ;;  %v12447_v8 = vrot.slane %v12445_v47, 5  ;;  %v12450_v54 = vshrl.u32 %v12170_v44, 16  ;;  %v12469_v43 = vshll.u32 %v12172_v61, 16  ;;  %v12177_v61 = vld [vmem:[#allocation2 + $0x270] sm:$0xff] }
 0x98a   : > { %v20316_v60 = vadd.f32 %v15035_v63, %v20180_v56  ;;  %12922 = vmatprep.mubr.bf16.mxu1 %v14201_v2  ;;  %v12414_v56 = vsel %vm16813_vm2, %v12409_v25, %v12413_v62  ;;  %v12453_v2 = vshll.u32 %v12170_v44, 16  ;;  %v12174_v62 = vld [vmem:[#allocation2 + $0x248] sm:$0xff] }
 0x98b   : > { %v14203_v63 = vcombine.high %v12414_v56, %v12424_v57  ;;  %v12452_v25 = vrot.slane %v12450_v54, 4  ;;  %v12483_v44 = vshll.u32 %v12174_v62, 16  ;;  %v14202_v55 = vcombine.low %v12414_v56, %v12424_v57 }
 0x98c   : > { %v15036_v22 = vpop.f32.mrb[180].mxu1  ;;  %v12455_v37 = vrot.slane %v12453_v2, 5 }
 0x98d   : > { %v15037_v5 = vpop.f32.mrb[181].mxu1 }
 0x98e   : > { %v15038_v9 = vadd.f32 %v15037_v5, %v15036_v22  ;;  %v15039_v39 = vpop.f32.mrb[182].mxu1  ;;  %v12466_v22 = vor.u32 %v12465_v53, %v12461_v6  ;;  %v12487_v5 = vshrl.u32 %v12174_v62, 16  ;;  %v12485_v53 = vrot.slane %v12483_v44, 5 }
 0x98f   : > { %v15040_v59 = vpop.f32.mrb[183].mxu1 }
 0x990   : > { %v20323_v52 = vadd.f32 %v15038_v9, %v20183_v35  ;;  %v15041_v34 = vadd.f32 %v15040_v59, %v15039_v39  ;;  %v12448_v35 = vsel %vm16813_vm2, %v12443_v1, %v12447_v8  ;;  %v12438_v9 = vsel %vm16813_vm2, %v12433_v58, %v12437_v19  ;;  %v12175_v1 = vld [vmem:[#allocation2 + $0x250] sm:$0x11] }
 0x991   : > { %12923 = vmatmul.mubr.bf16.gmra.mrb[32].mxu1 %v14200_v3  ;;  %v12456_v39 = vor.u32 %v12455_v37, %v12452_v25  ;;  %v12474_v59 = vshrl.u32 %v12173_v41, 16  ;;  %v14205_v2 = vcombine.high %v12438_v9, %v12448_v35  ;;  %v12489_v57 = vrot.slane %v12487_v5, 4  ;;  %v12176_v25 = vld [vmem:[#allocation2 + $0x268] sm:$0xff] }
 0x992   : > { %v20326_v51 = vadd.f32 %v15041_v34, %v20186_v18  ;;  %12930 = vmatprep.mubr.bf16.mxu1 %v14203_v63  ;;  %v12467_v34 = vrot.slane %v12466_v22, 4  ;;  %v12471_v63 = vrot.slane %v12469_v43, 5  ;;  %v12479_v58 = vrot.slane %v12477_v27, 5 }
 0x993   : > { %v12457_v19 = vrot.slane %v12456_v39, 4  ;;  %v12476_v62 = vrot.slane %v12474_v59, 4  ;;  %v12507_v22 = vshll.u32 %v12177_v61, 16  ;;  %v12511_v43 = vshrl.u32 %v12177_v61, 16 }
 0x994   : > { %v15042_v10 = vpop.f32.mrb[184].mxu1  ;;  %v12472_v41 = vsel %vm16813_vm2, %v12467_v34, %v12471_v63  ;;  %v12178_v63 = vld [vmem:[#allocation2 + $0x278] sm:$0x11] }
 0x995   : > { %v15043_v47 = vpop.f32.mrb[185].mxu1  ;;  %v12480_v39 = vor.u32 %v12479_v58, %v12476_v62  ;;  %v12517_v62 = vshll.u32 %v12178_v63, 16 }
 0x996   : > { %v15044_v0 = vadd.f32 %v15043_v47, %v15042_v10  ;;  %v15045_v18 = vpop.f32.mrb[186].mxu1  ;;  %v12490_v47 = vor.u32 %v12489_v57, %v12485_v53  ;;  %v12513_v57 = vrot.slane %v12511_v43, 4 }
 0x997   : > { %v15046_v3 = vpop.f32.mrb[187].mxu1 }
 0x998   : > { %v20333_v54 = vadd.f32 %v15044_v0, %v20189_v29  ;;  %v15047_v8 = vadd.f32 %v15046_v3, %v15045_v18  ;;  %v12493_v29 = vshll.u32 %v12175_v1, 16  ;;  %v14204_v0 = vcombine.low %v12438_v9, %v12448_v35 }
 0x999   : > { %12931 = vmatmul.mubr.bf16.gmra.mrb[36].mxu1 %v14202_v55  ;;  %v12498_v55 = vshrl.u32 %v12176_v25, 16  ;;  %v12462_v3 = vsel %vm16813_vm2, %v12457_v19, %v12461_v6  ;;  %v12509_v1 = vrot.slane %v12507_v22, 5  ;;  %v12481_v6 = vrot.slane %v12480_v39, 4 }
 0x99a   : > { %v20336_v56 = vadd.f32 %v15047_v8, %v20192_v31  ;;  %12938 = vmatprep.mubr.bf16.mxu1 %v14205_v2  ;;  %v12501_v31 = vshll.u32 %v12176_v25, 16  ;;  %v14207_v8 = vcombine.high %v12462_v3, %v12472_v41  ;;  %v12491_v2 = vrot.slane %v12490_v47, 4  ;;  %v12180_v25 = vld [vmem:[#allocation2 + $0x298] sm:$0xff] }
 0x99b   : > { %v12495_v34 = vrot.slane %v12493_v29, 5  ;;  %v12500_v35 = vrot.slane %v12498_v55, 4  ;;  %v12531_v29 = vshll.u32 %v12180_v25, 16  ;;  %v12535_v47 = vshrl.u32 %v12180_v25, 16 }
 0x99c   : > { %v15048_v37 = vpop.f32.mrb[188].mxu1  ;;  %v12503_v9 = vrot.slane %v12501_v31, 5  ;;  %v12486_v55 = vsel %vm16813_vm2, %v12481_v6, %v12485_v53 }
 0x99d   : > { %v15049_v10 = vpop.f32.mrb[189].mxu1  ;;  %v12537_v63 = vrot.slane %v12535_v47, 4 }
 0x99e   : > { %v15050_v44 = vadd.f32 %v15049_v10, %v15048_v37  ;;  %v15051_v5 = vpop.f32.mrb[190].mxu1  ;;  %v12496_v37 = vsel %vm16813_vm2, %v12491_v2, %v12495_v34  ;;  %v12514_v10 = vor.u32 %v12513_v57, %v12509_v1  ;;  %v12519_v2 = vrot.slane %v12517_v62, 5 }
 0x99f   : > { %v15052_v18 = vpop.f32.mrb[191].mxu1  ;;  %v12533_v34 = vrot.slane %v12531_v29, 5 }
 0x9a0   : > { %v20343_v59 = vadd.f32 %v15050_v44, %v20195_v33  ;;  %v15053_v27 = vadd.f32 %v15052_v18, %v15051_v5  ;;  %v12179_v33 = vld [vmem:[#allocation2 + $0x290] sm:$0xff]  ;;  %v12504_v44 = vor.u32 %v12503_v9, %v12500_v35  ;;  %v16443_v9 = vld [vmem:[#allocation2] sm:$0xff] }
 0x9a1   : > { %12939 = vmatmul.mubr.bf16.gmra.mrb[40].mxu1 %v14204_v0  ;;  %v12522_v31 = vshrl.u32 %v12179_v33, 16  ;;  %v12525_v0 = vshll.u32 %v12179_v33, 16  ;;  %v12546_v25 = vshrl.u32 %v16443_v9, 16  ;;  %v12549_v6 = vshll.u32 %v16443_v9, 16 }
 0x9a2   : > { %v20346_v61 = vadd.f32 %v15053_v27, %v20198_v50  ;;  %12946 = vmatprep.mubr.bf16.mxu1 %v14207_v8  ;;  %v14206_v50 = vcombine.low %v12462_v3, %v12472_v41  ;;  %v14209_v27 = vcombine.high %v12486_v55, %v12496_v37  ;;  %v12515_v8 = vrot.slane %v12514_v10, 4  ;;  %v12181_v3 = vld [vmem:[#allocation2 + $0x2a0] sm:$0x11] }
 0x9a3   : > { %v12505_v41 = vrot.slane %v12504_v44, 4  ;;  %v12524_v35 = vrot.slane %v12522_v31, 4  ;;  %v12527_v53 = vrot.slane %v12525_v0, 5  ;;  %v12541_v62 = vshll.u32 %v12181_v3, 16 }
 0x9a4   : > { %v15070_v19 = vpop.f32.mrb[192].mxu1  ;;  %v12520_v33 = vsel %vm16813_vm2, %v12515_v8, %v12519_v2  ;;  %v14208_v10 = vcombine.low %v12486_v55, %v12496_v37  ;;  %v12548_v44 = vrot.slane %v12546_v25, 4 }
 0x9a5   : > { %v15071_v58 = vpop.f32.mrb[193].mxu1  ;;  %v12543_v8 = vrot.slane %v12541_v62, 5 }
 0x9a6   : > { %v15072_v22 = vadd.f32 %v15071_v58, %v15070_v19  ;;  %v15073_v43 = vpop.f32.mrb[194].mxu1  ;;  %v12538_v58 = vor.u32 %v12537_v63, %v12533_v34 }
 0x9a7   : > { %v15074_v5 = vpop.f32.mrb[195].mxu1 }
 0x9a8   : > { %v20353_v18 = vadd.f32 %v15072_v22, %v20201_v28  ;;  %v15075_v39 = vadd.f32 %v15074_v5, %v15073_v43  ;;  %v12510_v22 = vsel %vm16813_vm2, %v12505_v41, %v12509_v1  ;;  %v12528_v43 = vor.u32 %v12527_v53, %v12524_v35 }
 0x9a9   : > { %12947 = vmatmul.mubr.bf16.gmra.mrb[44].mxu1 %v14206_v50  ;;  %v12551_v50 = vrot.slane %v12549_v6, 5  ;;  %v14211_v0 = vcombine.high %v12510_v22, %v12520_v33 }
 0x9aa   : > { %v20356_v57 = vadd.f32 %v15075_v39, %v20204_v26  ;;  %12954 = vmatprep.mubr.bf16.mxu1 %v14209_v27  ;;  %v12184_v39 = vld [vmem:[#allocation2 + $0x2c8] sm:$0x11]  ;;  %v12539_v27 = vrot.slane %v12538_v58, 4  ;;  %v12529_v55 = vrot.slane %v12528_v43, 4 }
 0x9ab   : > { %v12552_v2 = vor.u32 %v12551_v50, %v12548_v44  ;;  %v12565_v63 = vshll.u32 %v12184_v39, 16 }
 0x9ac   : > { %v15076_v28 = vpop.f32.mrb[196].mxu1  ;;  %v12544_v3 = vsel %vm16813_vm2, %v12539_v27, %v12543_v8  ;;  %v12534_v25 = vsel %vm16813_vm2, %v12529_v55, %v12533_v34 }
 0x9ad   : > { %v15077_v19 = vpop.f32.mrb[197].mxu1  ;;  %v12553_v6 = vrot.slane %v12552_v2, 4  ;;  %v14213_v58 = vcombine.high %v12534_v25, %v12544_v3 }
 0x9ae   : > { %v15078_v29 = vadd.f32 %v15077_v19, %v15076_v28  ;;  %v15079_v47 = vpop.f32.mrb[198].mxu1  ;;  %v12567_v28 = vrot.slane %v12565_v63, 5 }
 0x9af   : > { %v15080_v26 = vpop.f32.mrb[199].mxu1 }
 0x9b0   : > { %v20363_v5 = vadd.f32 %v15078_v29, %v20207_v38  ;;  %v15081_v31 = vadd.f32 %v15080_v26, %v15079_v47  ;;  %v14210_v38 = vcombine.low %v12510_v22, %v12520_v33  ;;  %v12558_v33 = vsel %vm16813_vm2, %v12553_v6, %v12551_v50 }
 0x9b1   : > { %12955 = vmatmul.mubr.bf16.gmra.mrb[48].mxu1 %v14208_v10  ;;  %v12568_v10 = vsel %vm16813_vm2, %v12553_v6, %v12567_v28 }
 0x9b2   : > { %v20366_v37 = vadd.f32 %v15081_v31, %v20210_v13  ;;  %12962 = vmatprep.mubr.bf16.mxu1 %v14211_v0  ;;  %v14215_v22 = vcombine.high %v12558_v33, %v12568_v10  ;;  %v14214_v23 = vcombine.low %v12558_v33, %v12568_v10 }
 0x9b4   : > { %v15082_v1 = vpop.f32.mrb[200].mxu1 }
 0x9b5   : > { %v15083_v41 = vpop.f32.mrb[201].mxu1 }
 0x9b6   : > { %v15084_v35 = vadd.f32 %v15083_v41, %v15082_v1  ;;  %v15085_v53 = vpop.f32.mrb[202].mxu1 }
 0x9b7   : > { %v15086_v9 = vpop.f32.mrb[203].mxu1 }
 0x9b8   : > { %v20373_v13 = vadd.f32 %v15084_v35, %v20213_v16  ;;  %v15087_v19 = vadd.f32 %v15086_v9, %v15085_v53  ;;  %v14212_v16 = vcombine.low %v12534_v25, %v12544_v3  ;;  %v21187_v53 = vld [vmem:[#allocation26_spill] sm:$0xff] }
 0x9b9   : > { %12963 = vmatmul.mubr.bf16.gmra.mrb[52].mxu1 %v14210_v38 }
 0x9ba   : > { %v20376_v62 = vadd.f32 %v15087_v19, %v20216_v30  ;;  %12970 = vmatprep.mubr.bf16.mxu1 %v14213_v58 }
 0x9bc   : > { %v15088_v29 = vpop.f32.mrb[204].mxu1 }
 0x9bd   : > { %v15089_v34 = vpop.f32.mrb[205].mxu1 }
 0x9be   : > { %v15090_v47 = vadd.f32 %v15089_v34, %v15088_v29  ;;  %v15091_v26 = vpop.f32.mrb[206].mxu1 }
 0x9bf   : > { %v15092_v43 = vpop.f32.mrb[207].mxu1 }
 0x9c0   : > { %v20383_v44 = vadd.f32 %v15090_v47, %v20221_v48  ;;  %v15093_v31 = vadd.f32 %v15092_v43, %v15091_v26 }
 0x9c1   : > { %12971 = vmatmul.mubr.bf16.gmra.mrb[56].mxu1 %v14212_v16 }
 0x9c2   : > { %v20386_v30 = vadd.f32 %v15093_v31, %v20224_v14  ;;  %12978 = vmatprep.mubr.bf16.mxu1 %v14215_v22 }
 0x9c4   : > { %v15094_v50 = vpop.f32.mrb[208].mxu1 }
 0x9c5   : > { %v15095_v0 = vpop.f32.mrb[209].mxu1 }
 0x9c6   : > { %v15096_v39 = vadd.f32 %v15095_v0, %v15094_v50  ;;  %v15097_v27 = vpop.f32.mrb[210].mxu1 }
 0x9c7   : > { %v15098_v8 = vpop.f32.mrb[211].mxu1 }
 0x9c8   : > { %v20389_v55 = vadd.f32 %v15096_v39, %v20233_v7  ;;  %v15099_v2 = vadd.f32 %v15098_v8, %v15097_v27 }
 0x9c9   : > { %12979 = vmatmul.mubr.bf16.gmra.mrb[60].mxu1 %v14214_v23 }
 0x9ca   : > { %v20392_v48 = vadd.f32 %v15099_v2, %v20236_v36 }
 0x9cc   : > { %v15100_v63 = vpop.f32.mrb[212].mxu1 }
 0x9cd   : > { %v15101_v1 = vpop.f32.mrb[213].mxu1 }
 0x9ce   : > { %v15102_v41 = vadd.f32 %v15101_v1, %v15100_v63  ;;  %v15103_v14 = vpop.f32.mrb[214].mxu1 }
 0x9cf   : > { %v15104_v3 = vpop.f32.mrb[215].mxu1 }
 0x9d0   : > { %v20395_v38 = vadd.f32 %v15102_v41, %v20243_v11  ;;  %v15105_v35 = vadd.f32 %v15104_v3, %v15103_v14 }
 0x9d2   : > { %v20398_v9 = vadd.f32 %v15105_v35, %v21187_v53 }
 0x9d4   : > { %v15106_v25 = vpop.f32.mrb[216].mxu1 }
 0x9d5   : > { %v15107_v7 = vpop.f32.mrb[217].mxu1 }
 0x9d6   : > { %v15108_v6 = vadd.f32 %v15107_v7, %v15106_v25  ;;  %v15109_v28 = vpop.f32.mrb[218].mxu1 }
 0x9d7   : > { %v15110_v19 = vpop.f32.mrb[219].mxu1 }
 0x9d8   : > { %v20401_v36 = vadd.f32 %v15108_v6, %v20253_v21  ;;  %v15111_v58 = vadd.f32 %v15110_v19, %v15109_v28 }
 0x9da   : > { %v20404_v33 = vadd.f32 %v15111_v58, %v20256_v17 }
 0x9dc   : > { %v15112_v10 = vpop.f32.mrb[220].mxu1 }
 0x9dd   : > { %v15113_v29 = vpop.f32.mrb[221].mxu1 }
 0x9de   : > { %v15114_v11 = vadd.f32 %v15113_v29, %v15112_v10  ;;  %v15115_v34 = vpop.f32.mrb[222].mxu1 }
 0x9df   : > { %v15116_v47 = vpop.f32.mrb[223].mxu1 }
 0x9e0   : > { %v20407_v26 = vadd.f32 %v15114_v11, %v20263_v20  ;;  %v15117_v22 = vadd.f32 %v15116_v47, %v15115_v34 }
 0x9e2   : > { %v20410_v16 = vadd.f32 %v15117_v22, %v20266_v42 }
 0x9e4   : > { %v15118_v43 = vpop.f32.mrb[224].mxu1 }
 0x9e5   : > { %v15119_v31 = vpop.f32.mrb[225].mxu1 }
 0x9e6   : > { %v15120_v21 = vadd.f32 %v15119_v31, %v15118_v43  ;;  %v15121_v50 = vpop.f32.mrb[226].mxu1 }
 0x9e7   : > { %v15122_v0 = vpop.f32.mrb[227].mxu1 }
 0x9e8   : > { %v20413_v17 = vadd.f32 %v15120_v21, %v20273_v32  ;;  %v15123_v23 = vadd.f32 %v15122_v0, %v15121_v50 }
 0x9ea   : > { %v20416_v39 = vadd.f32 %v15123_v23, %v20276_v46 }
 0x9ec   : > { %v15124_v27 = vpop.f32.mrb[228].mxu1 }
 0x9ed   : > { %v15125_v8 = vpop.f32.mrb[229].mxu1 }
 0x9ee   : > { %v15126_v20 = vadd.f32 %v15125_v8, %v15124_v27  ;;  %v15127_v2 = vpop.f32.mrb[230].mxu1 }
 0x9ef   : > { %v15128_v63 = vpop.f32.mrb[231].mxu1 }
 0x9f0   : > { %v20419_v42 = vadd.f32 %v15126_v20, %v20283_v24  ;;  %v15129_v1 = vadd.f32 %v15128_v63, %v15127_v2 }
 0x9f2   : > { %v20422_v41 = vadd.f32 %v15129_v1, %v20286_v15 }
 0x9f4   : > { %v15130_v14 = vpop.f32.mrb[232].mxu1 }
 0x9f5   : > { %v15131_v3 = vpop.f32.mrb[233].mxu1 }
 0x9f6   : > { %v15132_v32 = vadd.f32 %v15131_v3, %v15130_v14  ;;  %v15133_v35 = vpop.f32.mrb[234].mxu1 }
 0x9f7   : > { %v15134_v53 = vpop.f32.mrb[235].mxu1 }
 0x9f8   : > { %v20425_v46 = vadd.f32 %v15132_v32, %v20293_v12  ;;  %v15135_v25 = vadd.f32 %v15134_v53, %v15133_v35 }
 0x9fa   : > { %v20428_v7 = vadd.f32 %v15135_v25, %v20296_v49 }
 0x9fc   : > { %v15136_v6 = vpop.f32.mrb[236].mxu1 }
 0x9fd   : > { %v15137_v28 = vpop.f32.mrb[237].mxu1 }
 0x9fe   : > { %v15138_v24 = vadd.f32 %v15137_v28, %v15136_v6  ;;  %v15139_v19 = vpop.f32.mrb[238].mxu1 }
 0x9ff   : > { %v15140_v58 = vpop.f32.mrb[239].mxu1 }
 0xa00   : > { %v20431_v15 = vadd.f32 %v15138_v24, %v20303_v45  ;;  %v15141_v10 = vadd.f32 %v15140_v58, %v15139_v19 }
 0xa02   : > { %v20434_v29 = vadd.f32 %v15141_v10, %v20306_v4 }
 0xa04   : > { %v15142_v11 = vpop.f32.mrb[240].mxu1 }
 0xa05   : > { %v15143_v34 = vpop.f32.mrb[241].mxu1 }
 0xa06   : > { %v15144_v12 = vadd.f32 %v15143_v34, %v15142_v11  ;;  %v15145_v47 = vpop.f32.mrb[242].mxu1 }
 0xa07   : > { %v15146_v22 = vpop.f32.mrb[243].mxu1 }
 0xa08   : > { %v20437_v49 = vadd.f32 %v15144_v12, %v20313_v40  ;;  %v15147_v43 = vadd.f32 %v15146_v22, %v15145_v47 }
 0xa0a   : > { %v20440_v31 = vadd.f32 %v15147_v43, %v20316_v60 }
 0xa0c   : > { %v15148_v21 = vpop.f32.mrb[244].mxu1 }
 0xa0d   : > { %v15149_v50 = vpop.f32.mrb[245].mxu1 }
 0xa0e   : > { %v15150_v45 = vadd.f32 %v15149_v50, %v15148_v21  ;;  %v15151_v0 = vpop.f32.mrb[246].mxu1 }
 0xa0f   : > { %v15152_v23 = vpop.f32.mrb[247].mxu1 }
 0xa10   : > { %v20443_v4 = vadd.f32 %v15150_v45, %v20323_v52  ;;  %v15153_v27 = vadd.f32 %v15152_v23, %v15151_v0 }
 0xa12   : > { %v20446_v8 = vadd.f32 %v15153_v27, %v20326_v51 }
 0xa14   : > { %v15154_v20 = vpop.f32.mrb[248].mxu1 }
 0xa15   : > { %v15155_v40 = vpop.f32.mrb[249].mxu1 }
 0xa16   : > { %v15156_v2 = vadd.f32 %v15155_v40, %v15154_v20  ;;  %v15157_v63 = vpop.f32.mrb[250].mxu1 }
 0xa17   : > { %v15158_v60 = vpop.f32.mrb[251].mxu1 }
 0xa18   : > { %v20449_v1 = vadd.f32 %v15156_v2, %v20333_v54  ;;  %v15159_v14 = vadd.f32 %v15158_v60, %v15157_v63 }
 0xa1a   : > { %v20452_v3 = vadd.f32 %v15159_v14, %v20336_v56 }
 0xa1c   : > { %v15160_v52 = vpop.f32.mrb[252].mxu1 }
 0xa1d   : > { %v15161_v32 = vpop.f32.mrb[253].mxu1 }
 0xa1e   : > { %v15162_v35 = vadd.f32 %v15161_v32, %v15160_v52  ;;  %v15163_v53 = vpop.f32.mrb[254].mxu1 }
 0xa1f   : > { %v15164_v51 = vpop.f32.mrb[255].mxu1 }
 0xa20   : > { %v20455_v25 = vadd.f32 %v15162_v35, %v20343_v59  ;;  %v15165_v6 = vadd.f32 %v15164_v51, %v15163_v53 }
 0xa22   : > { %v20458_v28 = vadd.f32 %v15165_v6, %v20346_v61 }
 0xa24   : > { %v15182_v24 = vpop.f32.mrb[0].mxu1 }
 0xa25   : > { %v15183_v54 = vpop.f32.mrb[1].mxu1 }
 0xa26   : > { %v15184_v19 = vadd.f32 %v15183_v54, %v15182_v24  ;;  %v15185_v56 = vpop.f32.mrb[2].mxu1 }
 0xa27   : > { %v15186_v58 = vpop.f32.mrb[3].mxu1 }
 0xa28   : > { %v12987_v10 = vadd.f32 %v15184_v19, %v20353_v18  ;;  %v15187_v11 = vadd.f32 %v15186_v58, %v15185_v56 }
 0xa2a   : > { %v13019_v34 = vmax.f32 %v12987_v10, 0.0  ;;  %v12988_v12 = vadd.f32 %v15187_v11, %v20356_v57 }
 0xa2c   : > { %13051 = vst [vmem:[%s20465_s25] sm:$0xff] %v13019_v34  ;;  %v13020_v59 = vmax.f32 %v12988_v12, 0.0  ;;  %v15188_v61 = vpop.f32.mrb[4].mxu1 }
 0xa2d   : > { %v15189_v47 = vpop.f32.mrb[5].mxu1 }
 0xa2e   : > { %13052 = vst [vmem:[%s20465_s25 + $0x8] sm:$0xff] %v13020_v59  ;;  %v15190_v22 = vadd.f32 %v15189_v47, %v15188_v61  ;;  %v15191_v43 = vpop.f32.mrb[6].mxu1 }
 0xa2f   : > { %v15192_v21 = vpop.f32.mrb[7].mxu1 }
 0xa30   : > { %v12989_v18 = vadd.f32 %v15190_v22, %v20363_v5  ;;  %v15193_v50 = vadd.f32 %v15192_v21, %v15191_v43 }
 0xa32   : > { %v13021_v45 = vmax.f32 %v12989_v18, 0.0  ;;  %v12990_v57 = vadd.f32 %v15193_v50, %v20366_v37 }
 0xa34   : > { %13053 = vst [vmem:[%s20465_s25 + $0x10] sm:$0xff] %v13021_v45  ;;  %v13022_v0 = vmax.f32 %v12990_v57, 0.0  ;;  %v15194_v23 = vpop.f32.mrb[8].mxu1 }
 0xa35   : > { %v15195_v27 = vpop.f32.mrb[9].mxu1 }
 0xa36   : > { %13054 = vst [vmem:[%s20465_s25 + $0x18] sm:$0xff] %v13022_v0  ;;  %v15196_v20 = vadd.f32 %v15195_v27, %v15194_v23  ;;  %v15197_v40 = vpop.f32.mrb[10].mxu1 }
 0xa37   : > { %v15198_v2 = vpop.f32.mrb[11].mxu1 }
 0xa38   : > { %v12991_v63 = vadd.f32 %v15196_v20, %v20373_v13  ;;  %v15199_v60 = vadd.f32 %v15198_v2, %v15197_v40 }
 0xa3a   : > { %v13023_v14 = vmax.f32 %v12991_v63, 0.0  ;;  %v12992_v5 = vadd.f32 %v15199_v60, %v20376_v62 }
 0xa3c   : > { %13055 = vst [vmem:[%s20465_s25 + $0x20] sm:$0xff] %v13023_v14  ;;  %v13024_v52 = vmax.f32 %v12992_v5, 0.0  ;;  %v15200_v37 = vpop.f32.mrb[12].mxu1 }
 0xa3d   : > { %v15201_v32 = vpop.f32.mrb[13].mxu1 }
 0xa3e   : > { %13056 = vst [vmem:[%s20465_s25 + $0x28] sm:$0xff] %v13024_v52  ;;  %v15202_v35 = vadd.f32 %v15201_v32, %v15200_v37  ;;  %v15203_v53 = vpop.f32.mrb[14].mxu1 }
 0xa3f   : > { %v15204_v51 = vpop.f32.mrb[15].mxu1 }
 0xa40   : > { %v12993_v6 = vadd.f32 %v15202_v35, %v20383_v44  ;;  %v15205_v24 = vadd.f32 %v15204_v51, %v15203_v53 }
 0xa42   : > { %v13025_v54 = vmax.f32 %v12993_v6, 0.0  ;;  %v12994_v13 = vadd.f32 %v15205_v24, %v20386_v30 }
 0xa44   : > { %13057 = vst [vmem:[%s20465_s25 + $0x30] sm:$0xff] %v13025_v54  ;;  %v13026_v19 = vmax.f32 %v12994_v13, 0.0  ;;  %v15206_v62 = vpop.f32.mrb[16].mxu1 }
 0xa45   : > { %v15207_v56 = vpop.f32.mrb[17].mxu1 }
 0xa46   : > { %13058 = vst [vmem:[%s20465_s25 + $0x38] sm:$0xff] %v13026_v19  ;;  %v15208_v58 = vadd.f32 %v15207_v56, %v15206_v62  ;;  %v15209_v10 = vpop.f32.mrb[18].mxu1 }
 0xa47   : > { %v15210_v11 = vpop.f32.mrb[19].mxu1 }
 0xa48   : > { %v12995_v34 = vadd.f32 %v15208_v58, %v20389_v55  ;;  %v15211_v12 = vadd.f32 %v15210_v11, %v15209_v10 }
 0xa4a   : > { %v13027_v59 = vmax.f32 %v12995_v34, 0.0  ;;  %v12996_v44 = vadd.f32 %v15211_v12, %v20392_v48 }
 0xa4c   : > { %13059 = vst [vmem:[%s20465_s25 + $0x40] sm:$0xff] %v13027_v59  ;;  %v13028_v61 = vmax.f32 %v12996_v44, 0.0  ;;  %v15212_v30 = vpop.f32.mrb[20].mxu1 }
 0xa4d   : > { %v15213_v47 = vpop.f32.mrb[21].mxu1 }
 0xa4e   : > { %13060 = vst [vmem:[%s20465_s25 + $0x48] sm:$0xff] %v13028_v61  ;;  %v15214_v22 = vadd.f32 %v15213_v47, %v15212_v30  ;;  %v15215_v43 = vpop.f32.mrb[22].mxu1 }
 0xa4f   : > { %v15216_v21 = vpop.f32.mrb[23].mxu1 }
 0xa50   : > { %v12997_v18 = vadd.f32 %v15214_v22, %v20395_v38  ;;  %v15217_v50 = vadd.f32 %v15216_v21, %v15215_v43 }
 0xa52   : > { %v13029_v45 = vmax.f32 %v12997_v18, 0.0  ;;  %v12998_v55 = vadd.f32 %v15217_v50, %v20398_v9 }
 0xa54   : > { %13061 = vst [vmem:[%s20465_s25 + $0x50] sm:$0xff] %v13029_v45  ;;  %v13030_v57 = vmax.f32 %v12998_v55, 0.0  ;;  %v15218_v48 = vpop.f32.mrb[24].mxu1 }
 0xa55   : > { %v15219_v0 = vpop.f32.mrb[25].mxu1 }
 0xa56   : > { %13062 = vst [vmem:[%s20465_s25 + $0x58] sm:$0xff] %v13030_v57  ;;  %v15220_v23 = vadd.f32 %v15219_v0, %v15218_v48  ;;  %v15221_v27 = vpop.f32.mrb[26].mxu1 }
 0xa57   : > { %v15222_v20 = vpop.f32.mrb[27].mxu1 }
 0xa58   : > { %v12999_v40 = vadd.f32 %v15220_v23, %v20401_v36  ;;  %v15223_v2 = vadd.f32 %v15222_v20, %v15221_v27 }
 0xa5a   : > { %v13031_v63 = vmax.f32 %v12999_v40, 0.0  ;;  %v13000_v38 = vadd.f32 %v15223_v2, %v20404_v33 }
 0xa5c   : > { %13063 = vst [vmem:[%s20465_s25 + $0x60] sm:$0xff] %v13031_v63  ;;  %v13032_v60 = vmax.f32 %v13000_v38, 0.0  ;;  %v15224_v9 = vpop.f32.mrb[28].mxu1 }
 0xa5d   : > { %v15225_v14 = vpop.f32.mrb[29].mxu1 }
 0xa5e   : > { %13064 = vst [vmem:[%s20465_s25 + $0x68] sm:$0xff] %v13032_v60  ;;  %v15226_v5 = vadd.f32 %v15225_v14, %v15224_v9  ;;  %v15227_v52 = vpop.f32.mrb[30].mxu1 }
 0xa5f   : > { %v15228_v37 = vpop.f32.mrb[31].mxu1 }
 0xa60   : > { %v13001_v32 = vadd.f32 %v15226_v5, %v20407_v26  ;;  %v15229_v35 = vadd.f32 %v15228_v37, %v15227_v52 }
 0xa62   : > { %v13033_v53 = vmax.f32 %v13001_v32, 0.0  ;;  %v13002_v36 = vadd.f32 %v15229_v35, %v20410_v16 }
 0xa64   : > { %13065 = vst [vmem:[%s20465_s25 + $0x70] sm:$0xff] %v13033_v53  ;;  %v13034_v51 = vmax.f32 %v13002_v36, 0.0  ;;  %v15230_v33 = vpop.f32.mrb[32].mxu1 }
 0xa65   : > { %v15231_v6 = vpop.f32.mrb[33].mxu1 }
 0xa66   : > { %13066 = vst [vmem:[%s20465_s25 + $0x78] sm:$0xff] %v13034_v51  ;;  %v15232_v24 = vadd.f32 %v15231_v6, %v15230_v33  ;;  %v15233_v54 = vpop.f32.mrb[34].mxu1 }
 0xa67   : > { %v15234_v13 = vpop.f32.mrb[35].mxu1 }
 0xa68   : > { %v13003_v19 = vadd.f32 %v15232_v24, %v20413_v17  ;;  %v15235_v62 = vadd.f32 %v15234_v13, %v15233_v54 }
 0xa6a   : > { %v13035_v56 = vmax.f32 %v13003_v19, 0.0  ;;  %v13004_v26 = vadd.f32 %v15235_v62, %v20416_v39 }
 0xa6c   : > { %13067 = vst [vmem:[%s20465_s25 + $0x80] sm:$0xff] %v13035_v56  ;;  %v13036_v58 = vmax.f32 %v13004_v26, 0.0  ;;  %v15236_v16 = vpop.f32.mrb[36].mxu1 }
 0xa6d   : > { %v15237_v10 = vpop.f32.mrb[37].mxu1 }
 0xa6e   : > { %13068 = vst [vmem:[%s20465_s25 + $0x88] sm:$0xff] %v13036_v58  ;;  %v15238_v11 = vadd.f32 %v15237_v10, %v15236_v16  ;;  %v15239_v34 = vpop.f32.mrb[38].mxu1 }
 0xa6f   : > { %v15240_v12 = vpop.f32.mrb[39].mxu1 }
 0xa70   : > { %v13005_v59 = vadd.f32 %v15238_v11, %v20419_v42  ;;  %v15241_v44 = vadd.f32 %v15240_v12, %v15239_v34 }
 0xa72   : > { %v13037_v61 = vmax.f32 %v13005_v59, 0.0  ;;  %v13006_v17 = vadd.f32 %v15241_v44, %v20422_v41 }
 0xa74   : > { %13069 = vst [vmem:[%s20465_s25 + $0x90] sm:$0xff] %v13037_v61  ;;  %v13038_v30 = vmax.f32 %v13006_v17, 0.0  ;;  %v15242_v39 = vpop.f32.mrb[40].mxu1 }
 0xa75   : > { %v15243_v47 = vpop.f32.mrb[41].mxu1 }
 0xa76   : > { %13070 = vst [vmem:[%s20465_s25 + $0x98] sm:$0xff] %v13038_v30  ;;  %v15244_v22 = vadd.f32 %v15243_v47, %v15242_v39  ;;  %v15245_v43 = vpop.f32.mrb[42].mxu1 }
 0xa77   : > { %v15246_v21 = vpop.f32.mrb[43].mxu1 }
 0xa78   : > { %v13007_v18 = vadd.f32 %v15244_v22, %v20425_v46  ;;  %v15247_v50 = vadd.f32 %v15246_v21, %v15245_v43 }
 0xa7a   : > { %v13039_v45 = vmax.f32 %v13007_v18, 0.0  ;;  %v13008_v42 = vadd.f32 %v15247_v50, %v20428_v7 }
 0xa7c   : > { %13071 = vst [vmem:[%s20465_s25 + $0xa0] sm:$0xff] %v13039_v45  ;;  %v13040_v55 = vmax.f32 %v13008_v42, 0.0  ;;  %v15248_v41 = vpop.f32.mrb[44].mxu1 }
 0xa7d   : > { %v15249_v57 = vpop.f32.mrb[45].mxu1 }
 0xa7e   : > { %13072 = vst [vmem:[%s20465_s25 + $0xa8] sm:$0xff] %v13040_v55  ;;  %v15250_v48 = vadd.f32 %v15249_v57, %v15248_v41  ;;  %v15251_v0 = vpop.f32.mrb[46].mxu1 }
 0xa7f   : > { %v15252_v23 = vpop.f32.mrb[47].mxu1 }
 0xa80   : > { %v13009_v27 = vadd.f32 %v15250_v48, %v20431_v15  ;;  %v15253_v20 = vadd.f32 %v15252_v23, %v15251_v0 }
 0xa82   : > { %v13041_v40 = vmax.f32 %v13009_v27, 0.0  ;;  %v13010_v46 = vadd.f32 %v15253_v20, %v20434_v29 }
 0xa84   : > { %13073 = vst [vmem:[%s20465_s25 + $0xb0] sm:$0xff] %v13041_v40  ;;  %v13042_v2 = vmax.f32 %v13010_v46, 0.0  ;;  %v15254_v7 = vpop.f32.mrb[48].mxu1 }
 0xa85   : > { %v15255_v63 = vpop.f32.mrb[49].mxu1 }
 0xa86   : > { %13074 = vst [vmem:[%s20465_s25 + $0xb8] sm:$0xff] %v13042_v2  ;;  %v15256_v38 = vadd.f32 %v15255_v63, %v15254_v7  ;;  %v15257_v60 = vpop.f32.mrb[50].mxu1 }
 0xa87   : > { %v15258_v9 = vpop.f32.mrb[51].mxu1 }
 0xa88   : > { %v13011_v14 = vadd.f32 %v15256_v38, %v20437_v49  ;;  %v15259_v5 = vadd.f32 %v15258_v9, %v15257_v60 }
 0xa8a   : > { %v13043_v52 = vmax.f32 %v13011_v14, 0.0  ;;  %v13012_v15 = vadd.f32 %v15259_v5, %v20440_v31 }
 0xa8c   : > { %13075 = vst [vmem:[%s20465_s25 + $0xc0] sm:$0xff] %v13043_v52  ;;  %v13044_v37 = vmax.f32 %v13012_v15, 0.0  ;;  %v15260_v29 = vpop.f32.mrb[52].mxu1 }
 0xa8d   : > { %v15261_v32 = vpop.f32.mrb[53].mxu1 }
 0xa8e   : > { %13076 = vst [vmem:[%s20465_s25 + $0xc8] sm:$0xff] %v13044_v37  ;;  %v15262_v35 = vadd.f32 %v15261_v32, %v15260_v29  ;;  %v15263_v53 = vpop.f32.mrb[54].mxu1 }
 0xa8f   : > { %v15264_v36 = vpop.f32.mrb[55].mxu1 }
 0xa90   : > { %v13013_v51 = vadd.f32 %v15262_v35, %v20443_v4  ;;  %v15265_v33 = vadd.f32 %v15264_v36, %v15263_v53 }
 0xa92   : > { %v13045_v6 = vmax.f32 %v13013_v51, 0.0  ;;  %v13014_v49 = vadd.f32 %v15265_v33, %v20446_v8 }
 0xa94   : > { %13077 = vst [vmem:[%s20465_s25 + $0xd0] sm:$0xff] %v13045_v6  ;;  %v13046_v24 = vmax.f32 %v13014_v49, 0.0  ;;  %v15266_v31 = vpop.f32.mrb[56].mxu1 }
 0xa95   : > { %v15267_v54 = vpop.f32.mrb[57].mxu1 }
 0xa96   : > { %13078 = vst [vmem:[%s20465_s25 + $0xd8] sm:$0xff] %v13046_v24  ;;  %v15268_v13 = vadd.f32 %v15267_v54, %v15266_v31  ;;  %v15269_v19 = vpop.f32.mrb[58].mxu1 }
 0xa97   : > { %v15270_v62 = vpop.f32.mrb[59].mxu1 }
 0xa98   : > { %v13015_v56 = vadd.f32 %v15268_v13, %v20449_v1  ;;  %v15271_v26 = vadd.f32 %v15270_v62, %v15269_v19 }
 0xa9a   : > { %v13047_v4 = vmax.f32 %v13015_v56, 0.0  ;;  %v13016_v58 = vadd.f32 %v15271_v26, %v20452_v3 }
 0xa9c   : > { %13079 = vst [vmem:[%s20465_s25 + $0xe0] sm:$0xff] %v13047_v4  ;;  %v13048_v8 = vmax.f32 %v13016_v58, 0.0  ;;  %v15272_v16 = vpop.f32.mrb[60].mxu1 }
 0xa9d   : > { %v15273_v10 = vpop.f32.mrb[61].mxu1 }
 0xa9e   : > { %13080 = vst [vmem:[%s20465_s25 + $0xe8] sm:$0xff] %v13048_v8  ;;  %v15274_v11 = vadd.f32 %v15273_v10, %v15272_v16  ;;  %v15275_v34 = vpop.f32.mrb[62].mxu1 }
 0xa9f   : > { %v15276_v12 = vpop.f32.mrb[63].mxu1 }
 0xaa0   : > { %v13017_v59 = vadd.f32 %v15274_v11, %v20455_v25  ;;  %v15277_v44 = vadd.f32 %v15276_v12, %v15275_v34 }
 0xaa2   : > { %v13049_v1 = vmax.f32 %v13017_v59, 0.0  ;;  %v13018_v3 = vadd.f32 %v15277_v44, %v20458_v28 }
 0xaa4   : > { %13081 = vst [vmem:[%s20465_s25 + $0xf0] sm:$0xff] %v13049_v1  ;;  %v13050_v61 = vmax.f32 %v13018_v3, 0.0 }
 0xaa6   : > { %13082 = vst [vmem:[%s20465_s25 + $0xf8] sm:$0xff] %v13050_v61 }
 0xaa7   : > { %16543 = shalt.err (!%p16540_p11)
}
 0xaa8   : > { %s16544_s14 = scalar_lea.hbm %s20532_s10, 4096  ;;  %s16548_s17 = scalar_lea.hbm %s20586_s5, 8192 }
 0xaa9   : > { %p16545_p13 = scmp.ne.s32.totalorder %s20532_s10, %s16544_s14  ;;  %p16549_p6 = scmp.lt.u32.totalorder %s20532_s10, %s20586_s5 }
 0xaaa   : > { %p16550_p9 = scmp.lt.u32.totalorder %s16548_s17, %s16544_s14  ;;  %p16552_p10 = scmp.lt.u32.totalorder %s16544_s14, %s20532_s10 }
 0xaab   : > { %p16546_p0 = pnand %p16545_p13, %p21188_p1 }
 0xaac   : > { %p16551_p12 = por %p16550_p9, %p16549_p6 }
 0xaad   : > { %p16547_p5 = pneg %p16546_p0 }
 0xaae   : > { %p16553_p2 = por %p16552_p10, %p16551_p12 }
 0xab0   : > { %p16554_p3 = pnand %p16553_p2, %p16547_p5 }
 0xab2   : > { %16557 = shalt.err (!%p16554_p3)
}
 0xab3   : > { %s16610_s25 = smov 128   ;;  %s16611_s26 = smov 8  }
 0xab4   : > { %15799 = dma.vmem_to_hbm [thread:$0]  (%p21188_p1), %s20534_s6, 4096, %s20532_s10, %s20540_s9, %s16610_s25, %s16610_s25, %s16611_s26  }
 0xab5 PF: > { %p15816_p4 = scmp.ge.s32.totalorder %s16600_s21, 2  ;;  %s13112_s30 = sand.u32 1, %s16588_s18  }
 0xab6   : > { %p21189_p7 = scmp.ne.s32.totalorder %s20775_s29, 0  ;;  %s13113_s8 = scalar_lea.sflag [#allocation5], %s13112_s30 }
 0xab8   : > { %p15809_p8 = pnand %p15816_p4, %p21189_p7 }
 0xaba   : > { %16583 = dma.done.wait (!%p15809_p8), %s13113_s8, 4096  }
 0xabb   : > { %16585 = vsyncadd (!%p15809_p8), %s13113_s8, 4294963200  ;;  %p17_p11 = scmp.ge.s32.totalorder %s16667_s24, 4   ;;  %s21190_s18 = smov %s16592_s19 }
 0xabc   : > { %s21191_s19 = smov %s16596_s20  ;;  %s21192_s20 = smov %s16678_s27 }
 0xabd   : > { %s21193_s21 = smov %s16667_s24  ;;  %19 = sbr.rel (!%p17_p11) target bundleno = 5 (0x5), region = 105 }
 0xac4   :  { %13118 = vsyncpa [#allocation4], 1 }
 0xac5   :  { %13120 = vsyncpa [#allocation4 + $0x1], 1 }
 0xac6   :  { %13121 = vsyncpa [#allocation7], 1 }
 0xac7   :  { %13122 = vsyncpa [#allocation5], 1 }
 0xac8   :  { %13124 = vsyncpa [#allocation5 + $0x1], 1 }

</bundles_post_ra>
